<compile_context>
chip_gen: v6e
topology: v6e:2x2x1
jax: 0.10.0
libtpu: 0.0.40
codegen_flags: <defaults>
</compile_context>

<pallas_src>
import functools

import jax
import jax.numpy as jnp
from jax.experimental import pallas as pl
from jax.experimental.pallas import tpu as pltpu


KSIZE = 7            # every conv is expressed as a (possibly zero-padded) 7x7
PAD = KSIZE // 2     # = 3


# ---------------------------------------------------------------------------
# Fused kernel
# ---------------------------------------------------------------------------
def _make_fused_kernel(C, H, W):
    HW = H * W
    C5 = 5 * C
    f32 = jnp.float32

    def kernel(x_ref, w_h_ref, b_h_ref, w1_ref, bn_scale_ref, bn_shift_ref,
               w2_ref, w_ab_ref, b_ab_ref, out_a_ref, out_b_ref,
               col_h_ref, col_ab_ref):
        # x_ref      : (1, C, HW)    input image, channels-first, flat spatial
        # w_h_ref    : (4C, 49*C)    4 head convs packed into one 7x7 matmul
        # b_h_ref    : (4C, 1)
        # w1_ref     : (d, C)        SK mlp conv1 (no bias)
        # bn_*_ref   : (d, 1)        folded eval-mode BatchNorm scale / shift
        # w2_ref     : (4C, d)       SK mlp conv2 (no bias)
        # w_ab_ref   : (6, 49*5C)    convs a|b packed into one 7x7 matmul
        # b_ab_ref   : (6, 1)
        # out_a_ref  : (1, 3, HW)    conv a output
        # out_b_ref  : (1, 3, HW)    conv b output
        # col_h_ref  : (49*C, HW)    VMEM scratch: im2col of zero-padded x
        # col_ab_ref : (49*5C, HW)   VMEM scratch: im2col of reflect-padded cat

        # column index (position inside an image row); masks hoisted & reused
        col = jax.lax.broadcasted_iota(jnp.int32, (1, HW), 1) % W
        wmask = {dw: jnp.logical_and(col + dw >= 0, col + dw < W)
                 for dw in range(-PAD, PAD + 1) if dw != 0}
        eq_cache = {}

        def col_eq(j):
            if j not in eq_cache:
                eq_cache[j] = col == j
            return eq_cache[j]

        # ------------------------------------------------------------------
        # Stage 1: the four head convs (zero padding) as ONE matmul
        # ------------------------------------------------------------------
        x = x_ref[0].astype(f32)                               # (C, HW)
        lane_apron = jnp.zeros((C, PAD), f32)
        xz = jnp.concatenate([lane_apron, x, lane_apron], axis=1)  # (C, HW+6)
        row_zeros = jnp.zeros((C, PAD * W), f32)

        for dw in range(-PAD, PAD + 1):
            # width-shifted image, invalid (wrapped) columns zeroed once
            xw = xz[:, PAD + dw:PAD + dw + HW]                 # (C, HW)
            if dw != 0:
                xw = jnp.where(wmask[dw], xw, 0.0)
            # zero rows above/below -> 7 vertical taps are static slices
            xwp = jnp.concatenate([row_zeros, xw, row_zeros], axis=1)
            kw = dw + PAD
            for kh in range(KSIZE):
                t = kh * KSIZE + kw
                col_h_ref[t * C:(t + 1) * C, :] = xwp[:, kh * W:kh * W + HW]

        heads = jnp.dot(w_h_ref[...], col_h_ref[...],
                        preferred_element_type=f32) + b_h_ref[...]   # (4C, HW)

        # ------------------------------------------------------------------
        # Stage 2: SKFusion over the 4 branches
        # ------------------------------------------------------------------
        xs = [heads[h * C:(h + 1) * C, :] for h in range(4)]  # 4 x (C, HW)
        feats_sum = xs[0] + xs[1] + xs[2] + xs[3]              # (C, HW)
        pooled = jnp.mean(feats_sum, axis=1, keepdims=True)    # (C, 1)

        d = w1_ref.shape[0]
        # tiny MLP unrolled as scalar-broadcast FMAs (C, d are small)
        z = jnp.zeros((d, 1), f32)
        for c in range(C):
            z = z + w1_ref[:, c:c + 1] * pooled[c:c + 1, :]
        z = z * bn_scale_ref[...] + bn_shift_ref[...]          # BatchNorm (eval)
        z = jnp.maximum(z, 0.0)                                # ReLU
        logits = jnp.zeros((4 * C, 1), f32)
        for k in range(d):
            logits = logits + w2_ref[:, k:k + 1] * z[k:k + 1, :]

        # per-channel softmax over the 4 branches
        ls = [logits[h * C:(h + 1) * C, :] for h in range(4)]  # 4 x (C, 1)
        m = jnp.maximum(jnp.maximum(ls[0], ls[1]), jnp.maximum(ls[2], ls[3]))
        es = [jnp.exp(l - m) for l in ls]
        denom = es[0] + es[1] + es[2] + es[3]
        inv = 1.0 / denom
        sk = (es[0] * xs[0] + es[1] * xs[1]
              + es[2] * xs[2] + es[3] * xs[3]) * inv           # (C, HW)

        # ------------------------------------------------------------------
        # Stage 3: convs a and b (reflect padding) as ONE matmul on cat
        # ------------------------------------------------------------------
        cat = jnp.concatenate([heads, sk], axis=0)             # (5C, HW)
        apron5 = jnp.zeros((C5, PAD), f32)
        catz = jnp.concatenate([apron5, cat, apron5], axis=1)  # (5C, HW + 6)

        # base[o][:, p] == cat[:, p + o]   (zero outside the flat image)
        base = {o: catz[:, PAD + o:PAD + o + HW]
                for o in range(-PAD, PAD + 1)}

        for dw in range(-PAD, PAD + 1):
            # width reflection: sh[:, i*W + j] == cat[:, i*W + reflW(j + dw)]
            sh = base[dw]
            if dw > 0:
                for j in range(W - dw, W):
                    src = 2 * (W - 1) - j - dw                 # reflected col
                    sh = jnp.where(col_eq(j), base[src - j], sh)
            elif dw < 0:
                for j in range(0, -dw):
                    src = -(j + dw)                            # reflected col
                    sh = jnp.where(col_eq(j), base[src - j], sh)

            # height-reflect extension: row order [3,2,1, 0..H-1, H-2,H-3,H-4]
            row = lambda r: sh[:, r * W:(r + 1) * W]
            she = jnp.concatenate(
                [row(3), row(2), row(1), sh,
                 row(H - 2), row(H - 3), row(H - 4)], axis=1)  # (5C, (H+6)*W)

            kw = dw + PAD
            for kh in range(KSIZE):
                t = kh * KSIZE + kw
                col_ab_ref[t * C5:(t + 1) * C5, :] = she[:, kh * W:kh * W + HW]

        out_ab = jnp.dot(w_ab_ref[...], col_ab_ref[...],
                         preferred_element_type=f32) + b_ab_ref[...]  # (6, HW)
        out_a_ref[0] = out_ab[:3, :].astype(out_a_ref.dtype)
        out_b_ref[0] = out_ab[3:, :].astype(out_b_ref.dtype)

    return kernel


# ---------------------------------------------------------------------------
# Weight packing (PyTorch OIHW -> im2col-matmul layout)
# ---------------------------------------------------------------------------
def _pack_head_weights(ws):
    """ws: 4 head conv weights (C, C, k, k) OIHW -> (4C, 49*C)."""
    C = ws[0].shape[0]
    blocks = []
    for w in ws:
        k = w.shape[-1]
        off = (KSIZE - k) // 2
        w7 = jnp.zeros((C, C, KSIZE, KSIZE), w.dtype)
        w7 = w7.at[:, :, off:off + k, off:off + k].set(w)
        # rows: cout ; cols: (kh, kw, cin) flattened — matches im2col rows
        blocks.append(jnp.transpose(w7, (0, 2, 3, 1)).reshape(C, KSIZE * KSIZE * C))
    return jnp.concatenate(blocks, axis=0)


def _pack_ab_weights(wa, wb):
    """wa/wb: (3, 5C, 7, 7) OIHW -> (6, 49*5C)."""
    def flat(w):
        o, ci = w.shape[0], w.shape[1]
        return jnp.transpose(w, (0, 2, 3, 1)).reshape(o, KSIZE * KSIZE * ci)
    return jnp.concatenate([flat(wa), flat(wb)], axis=0)


def _pack_params(p, bn_eps=1e-5):
    w_heads = _pack_head_weights([p["w_h1"], p["w_h2"], p["w_h3"], p["w_h4"]])
    b_heads = jnp.concatenate(
        [p["b_h1"], p["b_h2"], p["b_h3"], p["b_h4"]]).reshape(-1, 1)
    w_ab = _pack_ab_weights(p["w_a"], p["w_b"])
    b_ab = jnp.concatenate([p["b_a"], p["b_b"]]).reshape(-1, 1)
    # eval-mode BatchNorm folded into scale / shift
    scale = p["sk_gamma"] / jnp.sqrt(p["sk_var"] + bn_eps)
    shift = p["sk_beta"] - p["sk_mean"] * scale
    f32 = jnp.float32
    return (w_heads.astype(f32), b_heads.astype(f32),
            p["sk_w1"].astype(f32),
            scale.reshape(-1, 1).astype(f32), shift.reshape(-1, 1).astype(f32),
            p["sk_w2"].astype(f32),
            w_ab.astype(f32), b_ab.astype(f32))


def _full_spec(arr):
    ndim = arr.ndim
    return pl.BlockSpec(arr.shape, lambda b, _n=ndim: (0,) * _n)


# ---------------------------------------------------------------------------
# mscheadv4 forward
# ---------------------------------------------------------------------------
def mscheadv4_forward(x, params):
    """x: (B, C, H, W) NCHW (same as the PyTorch module). Returns (a, b)."""
    B, C, H, W = x.shape
    assert H >= 4 and W >= 4, "reflect padding of 3 requires H, W >= 4"
    HW = H * W
    (w_heads, b_heads, sk_w1, bn_scale, bn_shift,
     sk_w2, w_ab, b_ab) = _pack_params(params)

    x_flat = x.reshape(B, C, HW)   # free reshape: collapse spatial onto lanes

    out_a, out_b = pl.pallas_call(
        _make_fused_kernel(C, H, W),
        out_shape=(jax.ShapeDtypeStruct((B, 3, HW), x.dtype),
                   jax.ShapeDtypeStruct((B, 3, HW), x.dtype)),
        grid=(B,),
        in_specs=[
            pl.BlockSpec((1, C, HW), lambda b: (b, 0, 0)),
            _full_spec(w_heads), _full_spec(b_heads), _full_spec(sk_w1),
            _full_spec(bn_scale), _full_spec(bn_shift), _full_spec(sk_w2),
            _full_spec(w_ab), _full_spec(b_ab),
        ],
        out_specs=(pl.BlockSpec((1, 3, HW), lambda b: (b, 0, 0)),
                   pl.BlockSpec((1, 3, HW), lambda b: (b, 0, 0))),
        scratch_shapes=[
            pltpu.VMEM((KSIZE * KSIZE * C, HW), jnp.float32),        # heads im2col
            pltpu.VMEM((KSIZE * KSIZE * 5 * C, HW), jnp.float32),    # a/b im2col
        ],
        compiler_params=pltpu.CompilerParams(
            dimension_semantics=("parallel",)),   # v7x: shard batch over 2 TCs
    )(x_flat, w_heads, b_heads, sk_w1, bn_scale, bn_shift, sk_w2, w_ab, b_ab)

    return out_a.reshape(B, 3, H, W), out_b.reshape(B, 3, H, W)


# ---------------------------------------------------------------------------
# Deterministic synthetic parameters matching mscheadv4(in_channels=C)
# ---------------------------------------------------------------------------
def init_params(key, C):
    d = max(C // 4, 8)
    keys = jax.random.split(key, 14)

    def nrm(k, shape, scale=0.05):
        return (scale * jax.random.normal(k, shape)).astype(jnp.float32)

    return {
        # heads: Conv2d(C, C, k) with bias, OIHW weights
        "w_h1": nrm(keys[0], (C, C, 1, 1)), "b_h1": nrm(keys[1], (C,)),
        "w_h2": nrm(keys[2], (C, C, 3, 3)), "b_h2": nrm(keys[3], (C,)),
        "w_h3": nrm(keys[4], (C, C, 5, 5)), "b_h3": nrm(keys[5], (C,)),
        "w_h4": nrm(keys[6], (C, C, 7, 7)), "b_h4": nrm(keys[7], (C,)),
        # a, b: Conv2d(5C, 3, 7, padding_mode='reflect') with bias
        "w_a": nrm(keys[8], (3, 5 * C, 7, 7)), "b_a": nrm(keys[9], (3,)),
        "w_b": nrm(keys[10], (3, 5 * C, 7, 7)), "b_b": nrm(keys[11], (3,)),
        # SKFusion mlp: Conv2d(C, d, 1, bias=False), BN(d), ReLU,
        #               Conv2d(d, 4C, 1, bias=False)
        "sk_w1": nrm(keys[12], (d, C)),
        "sk_w2": nrm(keys[13], (4 * C, d)),
        "sk_gamma": jnp.ones((d,), jnp.float32),
        "sk_beta": jnp.zeros((d,), jnp.float32),
        "sk_mean": jnp.zeros((d,), jnp.float32),
        "sk_var": jnp.ones((d,), jnp.float32),
    }


if __name__ == "__main__":
    B, C, H, W = 2, 4, 16, 16
    key = jax.random.PRNGKey(0)
    kx, kp = jax.random.split(key)

    x = jax.random.normal(kx, (B, C, H, W), dtype=jnp.float32)   # NCHW
    params = init_params(kp, C)

    fwd = jax.jit(functools.partial(mscheadv4_forward, params=params))
    out_a, out_b = fwd(x)
    jax.block_until_ready((out_a, out_b))

    assert out_a.shape == (B, 3, H, W) and out_b.shape == (B, 3, H, W)
    assert jnp.all(jnp.isfinite(out_a)) and jnp.all(jnp.isfinite(out_b))
    print("KERNEL_OK")
</pallas_src>

<mosaic_0001>
module attributes {stable_mosaic.version = 11 : i64} {
  func.func @kernel(%arg0: i32, %arg1: memref<1x4x256xf32, #tpu.memory_space<vmem>>, %arg2: memref<16x196xf32, #tpu.memory_space<vmem>>, %arg3: memref<16x1xf32, #tpu.memory_space<vmem>>, %arg4: memref<8x4xf32, #tpu.memory_space<vmem>>, %arg5: memref<8x1xf32, #tpu.memory_space<vmem>>, %arg6: memref<8x1xf32, #tpu.memory_space<vmem>>, %arg7: memref<16x8xf32, #tpu.memory_space<vmem>>, %arg8: memref<6x980xf32, #tpu.memory_space<vmem>>, %arg9: memref<6x1xf32, #tpu.memory_space<vmem>>, %arg10: memref<1x3x256xf32, #tpu.memory_space<vmem>>, %arg11: memref<1x3x256xf32, #tpu.memory_space<vmem>>, %arg12: memref<196x256xf32, #tpu.memory_space<vmem>>, %arg13: memref<980x256xf32, #tpu.memory_space<vmem>>) attributes {dimension_semantics = [#tpu.dimension_semantics<parallel>], iteration_bounds = array<i64: 2>, scalar_prefetch = 0 : i64, scratch_operands = 2 : i64, tpu.core_type = #tpu.core_type<tc>, window_params = [{transform_indices = @transform_0, window_bounds = array<i64: 1, 4, 256>}, {pipeline_mode = #tpu.pipeline_mode<synchronous>, transform_indices = @transform_1, window_bounds = array<i64: 16, 196>}, {pipeline_mode = #tpu.pipeline_mode<synchronous>, transform_indices = @transform_2, window_bounds = array<i64: 16, 1>}, {pipeline_mode = #tpu.pipeline_mode<synchronous>, transform_indices = @transform_3, window_bounds = array<i64: 8, 4>}, {pipeline_mode = #tpu.pipeline_mode<synchronous>, transform_indices = @transform_4, window_bounds = array<i64: 8, 1>}, {pipeline_mode = #tpu.pipeline_mode<synchronous>, transform_indices = @transform_5, window_bounds = array<i64: 8, 1>}, {pipeline_mode = #tpu.pipeline_mode<synchronous>, transform_indices = @transform_6, window_bounds = array<i64: 16, 8>}, {pipeline_mode = #tpu.pipeline_mode<synchronous>, transform_indices = @transform_7, window_bounds = array<i64: 6, 980>}, {pipeline_mode = #tpu.pipeline_mode<synchronous>, transform_indices = @transform_8, window_bounds = array<i64: 6, 1>}, {transform_indices = @transform_9, window_bounds = array<i64: 1, 3, 256>}, {transform_indices = @transform_10, window_bounds = array<i64: 1, 3, 256>}]} {
    %0 = tpu.iota {dimensions = array<i32: 1>} : vector<1x256xi32>
    %c16_i32 = arith.constant 16 : i32
    %c0_i32 = arith.constant 0 : i32
    %1 = arith.cmpi eq, %c16_i32, %c0_i32 : i32
    %c1_i32 = arith.constant 1 : i32
    %2 = arith.select %1, %c1_i32, %c16_i32 : i32
    %3 = vector.broadcast %2 : i32 to vector<1x256xi32>
    %4 = arith.remsi %0, %3 : vector<1x256xi32>
    %c0_i32_0 = arith.constant 0 : i32
    %5 = vector.broadcast %c0_i32_0 : i32 to vector<1x256xi32>
    %6 = arith.cmpi ne, %4, %5 : vector<1x256xi32>
    %c0_i32_1 = arith.constant 0 : i32
    %7 = vector.broadcast %c0_i32_1 : i32 to vector<1x256xi32>
    %8 = arith.cmpi slt, %4, %7 : vector<1x256xi32>
    %c0_i32_2 = arith.constant 0 : i32
    %9 = arith.cmpi slt, %2, %c0_i32_2 : i32
    %10 = vector.broadcast %9 : i1 to vector<1x256xi1>
    %11 = vector.broadcast %10 : vector<1x256xi1> to vector<1x256xi1>
    %12 = arith.xori %8, %11 : vector<1x256xi1>
    %13 = arith.andi %12, %6 : vector<1x256xi1>
    %14 = vector.broadcast %2 : i32 to vector<1x256xi32>
    %15 = arith.addi %4, %14 : vector<1x256xi32>
    %16 = arith.select %13, %15, %4 : vector<1x256xi1>, vector<1x256xi32>
    %c-3_i32 = arith.constant -3 : i32
    %17 = vector.broadcast %c-3_i32 : i32 to vector<1x256xi32>
    %18 = arith.addi %16, %17 : vector<1x256xi32>
    %c0_i32_3 = arith.constant 0 : i32
    %19 = vector.broadcast %c0_i32_3 : i32 to vector<1x256xi32>
    %20 = arith.cmpi sge, %18, %19 : vector<1x256xi32>
    %c-3_i32_4 = arith.constant -3 : i32
    %21 = vector.broadcast %c-3_i32_4 : i32 to vector<1x256xi32>
    %22 = arith.addi %16, %21 : vector<1x256xi32>
    %c16_i32_5 = arith.constant 16 : i32
    %23 = vector.broadcast %c16_i32_5 : i32 to vector<1x256xi32>
    %24 = arith.cmpi slt, %22, %23 : vector<1x256xi32>
    %25 = arith.andi %20, %24 : vector<1x256xi1>
    %c-2_i32 = arith.constant -2 : i32
    %26 = vector.broadcast %c-2_i32 : i32 to vector<1x256xi32>
    %27 = arith.addi %16, %26 : vector<1x256xi32>
    %c0_i32_6 = arith.constant 0 : i32
    %28 = vector.broadcast %c0_i32_6 : i32 to vector<1x256xi32>
    %29 = arith.cmpi sge, %27, %28 : vector<1x256xi32>
    %c-2_i32_7 = arith.constant -2 : i32
    %30 = vector.broadcast %c-2_i32_7 : i32 to vector<1x256xi32>
    %31 = arith.addi %16, %30 : vector<1x256xi32>
    %c16_i32_8 = arith.constant 16 : i32
    %32 = vector.broadcast %c16_i32_8 : i32 to vector<1x256xi32>
    %33 = arith.cmpi slt, %31, %32 : vector<1x256xi32>
    %34 = arith.andi %29, %33 : vector<1x256xi1>
    %c-1_i32 = arith.constant -1 : i32
    %35 = vector.broadcast %c-1_i32 : i32 to vector<1x256xi32>
    %36 = arith.addi %16, %35 : vector<1x256xi32>
    %c0_i32_9 = arith.constant 0 : i32
    %37 = vector.broadcast %c0_i32_9 : i32 to vector<1x256xi32>
    %38 = arith.cmpi sge, %36, %37 : vector<1x256xi32>
    %c-1_i32_10 = arith.constant -1 : i32
    %39 = vector.broadcast %c-1_i32_10 : i32 to vector<1x256xi32>
    %40 = arith.addi %16, %39 : vector<1x256xi32>
    %c16_i32_11 = arith.constant 16 : i32
    %41 = vector.broadcast %c16_i32_11 : i32 to vector<1x256xi32>
    %42 = arith.cmpi slt, %40, %41 : vector<1x256xi32>
    %43 = arith.andi %38, %42 : vector<1x256xi1>
    %c1_i32_12 = arith.constant 1 : i32
    %44 = vector.broadcast %c1_i32_12 : i32 to vector<1x256xi32>
    %45 = arith.addi %16, %44 : vector<1x256xi32>
    %c0_i32_13 = arith.constant 0 : i32
    %46 = vector.broadcast %c0_i32_13 : i32 to vector<1x256xi32>
    %47 = arith.cmpi sge, %45, %46 : vector<1x256xi32>
    %c1_i32_14 = arith.constant 1 : i32
    %48 = vector.broadcast %c1_i32_14 : i32 to vector<1x256xi32>
    %49 = arith.addi %16, %48 : vector<1x256xi32>
    %c16_i32_15 = arith.constant 16 : i32
    %50 = vector.broadcast %c16_i32_15 : i32 to vector<1x256xi32>
    %51 = arith.cmpi slt, %49, %50 : vector<1x256xi32>
    %52 = arith.andi %47, %51 : vector<1x256xi1>
    %c2_i32 = arith.constant 2 : i32
    %53 = vector.broadcast %c2_i32 : i32 to vector<1x256xi32>
    %54 = arith.addi %16, %53 : vector<1x256xi32>
    %c0_i32_16 = arith.constant 0 : i32
    %55 = vector.broadcast %c0_i32_16 : i32 to vector<1x256xi32>
    %56 = arith.cmpi sge, %54, %55 : vector<1x256xi32>
    %c2_i32_17 = arith.constant 2 : i32
    %57 = vector.broadcast %c2_i32_17 : i32 to vector<1x256xi32>
    %58 = arith.addi %16, %57 : vector<1x256xi32>
    %c16_i32_18 = arith.constant 16 : i32
    %59 = vector.broadcast %c16_i32_18 : i32 to vector<1x256xi32>
    %60 = arith.cmpi slt, %58, %59 : vector<1x256xi32>
    %61 = arith.andi %56, %60 : vector<1x256xi1>
    %c3_i32 = arith.constant 3 : i32
    %62 = vector.broadcast %c3_i32 : i32 to vector<1x256xi32>
    %63 = arith.addi %16, %62 : vector<1x256xi32>
    %c0_i32_19 = arith.constant 0 : i32
    %64 = vector.broadcast %c0_i32_19 : i32 to vector<1x256xi32>
    %65 = arith.cmpi sge, %63, %64 : vector<1x256xi32>
    %c3_i32_20 = arith.constant 3 : i32
    %66 = vector.broadcast %c3_i32_20 : i32 to vector<1x256xi32>
    %67 = arith.addi %16, %66 : vector<1x256xi32>
    %c16_i32_21 = arith.constant 16 : i32
    %68 = vector.broadcast %c16_i32_21 : i32 to vector<1x256xi32>
    %69 = arith.cmpi slt, %67, %68 : vector<1x256xi32>
    %70 = arith.andi %65, %69 : vector<1x256xi1>
    %c0 = arith.constant 0 : index
    %c0_22 = arith.constant 0 : index
    %c0_23 = arith.constant 0 : index
    %71 = vector.load %arg1[%c0, %c0_22, %c0_23] : memref<1x4x256xf32, #tpu.memory_space<vmem>>, vector<1x4x256xf32>
    %72 = vector.shape_cast %71 : vector<1x4x256xf32> to vector<4x256xf32>
    %cst = arith.constant 0.000000e+00 : f32
    %73 = vector.broadcast %cst : f32 to vector<4x3xf32>
    %74 = tpu.concatenate %73, %72, %73 in 1 : vector<4x3xf32>, vector<4x256xf32>, vector<4x3xf32> -> vector<4x262xf32>
    %cst_24 = arith.constant 0.000000e+00 : f32
    %75 = vector.broadcast %cst_24 : f32 to vector<4x48xf32>
    %76 = vector.extract_strided_slice %74 {offsets = [0, 0], sizes = [4, 256], strides = [1, 1]} : vector<4x262xf32> to vector<4x256xf32>
    %cst_25 = arith.constant 0.000000e+00 : f32
    %77 = vector.shape_cast %25 : vector<1x256xi1> to vector<1x256xi1>
    %78 = vector.broadcast %77 : vector<1x256xi1> to vector<4x256xi1>
    %79 = vector.broadcast %cst_25 : f32 to vector<4x256xf32>
    %80 = arith.select %78, %76, %79 : vector<4x256xi1>, vector<4x256xf32>
    %81 = tpu.concatenate %75, %80, %75 in 1 : vector<4x48xf32>, vector<4x256xf32>, vector<4x48xf32> -> vector<4x352xf32>
    %82 = vector.extract_strided_slice %81 {offsets = [0, 0], sizes = [4, 256], strides = [1, 1]} : vector<4x352xf32> to vector<4x256xf32>
    %c0_26 = arith.constant 0 : index
    %c0_27 = arith.constant 0 : index
    %83 = vector.load %arg12[%c0_26, %c0_27] : memref<196x256xf32, #tpu.memory_space<vmem>>, vector<4x256xf32>
    tpu.vector_store %arg12[%c0_26, %c0_27], %82 {strides = array<i32>} : memref<196x256xf32, #tpu.memory_space<vmem>>, vector<4x256xf32>,
    %84 = vector.extract_strided_slice %81 {offsets = [0, 16], sizes = [4, 256], strides = [1, 1]} : vector<4x352xf32> to vector<4x256xf32>
    %c28 = arith.constant 28 : index
    %c0_28 = arith.constant 0 : index
    %85 = vector.load %arg12[%c28, %c0_28] : memref<196x256xf32, #tpu.memory_space<vmem>>, vector<4x256xf32>
    tpu.vector_store %arg12[%c28, %c0_28], %84 {strides = array<i32>} : memref<196x256xf32, #tpu.memory_space<vmem>>, vector<4x256xf32>,
    %86 = vector.extract_strided_slice %81 {offsets = [0, 32], sizes = [4, 256], strides = [1, 1]} : vector<4x352xf32> to vector<4x256xf32>
    %c56 = arith.constant 56 : index
    %c0_29 = arith.constant 0 : index
    %87 = vector.load %arg12[%c56, %c0_29] : memref<196x256xf32, #tpu.memory_space<vmem>>, vector<4x256xf32>
    tpu.vector_store %arg12[%c56, %c0_29], %86 {strides = array<i32>} : memref<196x256xf32, #tpu.memory_space<vmem>>, vector<4x256xf32>,
    %88 = vector.extract_strided_slice %81 {offsets = [0, 48], sizes = [4, 256], strides = [1, 1]} : vector<4x352xf32> to vector<4x256xf32>
    %c84 = arith.constant 84 : index
    %c0_30 = arith.constant 0 : index
    %89 = vector.load %arg12[%c84, %c0_30] : memref<196x256xf32, #tpu.memory_space<vmem>>, vector<4x256xf32>
    tpu.vector_store %arg12[%c84, %c0_30], %88 {strides = array<i32>} : memref<196x256xf32, #tpu.memory_space<vmem>>, vector<4x256xf32>,
    %90 = vector.extract_strided_slice %81 {offsets = [0, 64], sizes = [4, 256], strides = [1, 1]} : vector<4x352xf32> to vector<4x256xf32>
    %c112 = arith.constant 112 : index
    %c0_31 = arith.constant 0 : index
    %91 = vector.load %arg12[%c112, %c0_31] : memref<196x256xf32, #tpu.memory_space<vmem>>, vector<4x256xf32>
    tpu.vector_store %arg12[%c112, %c0_31], %90 {strides = array<i32>} : memref<196x256xf32, #tpu.memory_space<vmem>>, vector<4x256xf32>,
    %92 = vector.extract_strided_slice %81 {offsets = [0, 80], sizes = [4, 256], strides = [1, 1]} : vector<4x352xf32> to vector<4x256xf32>
    %c140 = arith.constant 140 : index
    %c0_32 = arith.constant 0 : index
    %93 = vector.load %arg12[%c140, %c0_32] : memref<196x256xf32, #tpu.memory_space<vmem>>, vector<4x256xf32>
    tpu.vector_store %arg12[%c140, %c0_32], %92 {strides = array<i32>} : memref<196x256xf32, #tpu.memory_space<vmem>>, vector<4x256xf32>,
    %94 = vector.extract_strided_slice %81 {offsets = [0, 96], sizes = [4, 256], strides = [1, 1]} : vector<4x352xf32> to vector<4x256xf32>
    %c168 = arith.constant 168 : index
    %c0_33 = arith.constant 0 : index
    %95 = vector.load %arg12[%c168, %c0_33] : memref<196x256xf32, #tpu.memory_space<vmem>>, vector<4x256xf32>
    tpu.vector_store %arg12[%c168, %c0_33], %94 {strides = array<i32>} : memref<196x256xf32, #tpu.memory_space<vmem>>, vector<4x256xf32>,
    %96 = vector.extract_strided_slice %74 {offsets = [0, 1], sizes = [4, 256], strides = [1, 1]} : vector<4x262xf32> to vector<4x256xf32>
    %cst_34 = arith.constant 0.000000e+00 : f32
    %97 = vector.shape_cast %34 : vector<1x256xi1> to vector<1x256xi1>
    %98 = vector.broadcast %97 : vector<1x256xi1> to vector<4x256xi1>
    %99 = vector.broadcast %cst_34 : f32 to vector<4x256xf32>
    %100 = arith.select %98, %96, %99 : vector<4x256xi1>, vector<4x256xf32>
    %101 = tpu.concatenate %75, %100, %75 in 1 : vector<4x48xf32>, vector<4x256xf32>, vector<4x48xf32> -> vector<4x352xf32>
    %102 = vector.extract_strided_slice %101 {offsets = [0, 0], sizes = [4, 256], strides = [1, 1]} : vector<4x352xf32> to vector<4x256xf32>
    %c4 = arith.constant 4 : index
    %c0_35 = arith.constant 0 : index
    %103 = vector.load %arg12[%c4, %c0_35] : memref<196x256xf32, #tpu.memory_space<vmem>>, vector<4x256xf32>
    tpu.vector_store %arg12[%c4, %c0_35], %102 {strides = array<i32>} : memref<196x256xf32, #tpu.memory_space<vmem>>, vector<4x256xf32>,
    %104 = vector.extract_strided_slice %101 {offsets = [0, 16], sizes = [4, 256], strides = [1, 1]} : vector<4x352xf32> to vector<4x256xf32>
    %c32 = arith.constant 32 : index
    %c0_36 = arith.constant 0 : index
    %105 = vector.load %arg12[%c32, %c0_36] : memref<196x256xf32, #tpu.memory_space<vmem>>, vector<4x256xf32>
    tpu.vector_store %arg12[%c32, %c0_36], %104 {strides = array<i32>} : memref<196x256xf32, #tpu.memory_space<vmem>>, vector<4x256xf32>,
    %106 = vector.extract_strided_slice %101 {offsets = [0, 32], sizes = [4, 256], strides = [1, 1]} : vector<4x352xf32> to vector<4x256xf32>
    %c60 = arith.constant 60 : index
    %c0_37 = arith.constant 0 : index
    %107 = vector.load %arg12[%c60, %c0_37] : memref<196x256xf32, #tpu.memory_space<vmem>>, vector<4x256xf32>
    tpu.vector_store %arg12[%c60, %c0_37], %106 {strides = array<i32>} : memref<196x256xf32, #tpu.memory_space<vmem>>, vector<4x256xf32>,
    %108 = vector.extract_strided_slice %101 {offsets = [0, 48], sizes = [4, 256], strides = [1, 1]} : vector<4x352xf32> to vector<4x256xf32>
    %c88 = arith.constant 88 : index
    %c0_38 = arith.constant 0 : index
    %109 = vector.load %arg12[%c88, %c0_38] : memref<196x256xf32, #tpu.memory_space<vmem>>, vector<4x256xf32>
    tpu.vector_store %arg12[%c88, %c0_38], %108 {strides = array<i32>} : memref<196x256xf32, #tpu.memory_space<vmem>>, vector<4x256xf32>,
    %110 = vector.extract_strided_slice %101 {offsets = [0, 64], sizes = [4, 256], strides = [1, 1]} : vector<4x352xf32> to vector<4x256xf32>
    %c116 = arith.constant 116 : index
    %c0_39 = arith.constant 0 : index
    %111 = vector.load %arg12[%c116, %c0_39] : memref<196x256xf32, #tpu.memory_space<vmem>>, vector<4x256xf32>
    tpu.vector_store %arg12[%c116, %c0_39], %110 {strides = array<i32>} : memref<196x256xf32, #tpu.memory_space<vmem>>, vector<4x256xf32>,
    %112 = vector.extract_strided_slice %101 {offsets = [0, 80], sizes = [4, 256], strides = [1, 1]} : vector<4x352xf32> to vector<4x256xf32>
    %c144 = arith.constant 144 : index
    %c0_40 = arith.constant 0 : index
    %113 = vector.load %arg12[%c144, %c0_40] : memref<196x256xf32, #tpu.memory_space<vmem>>, vector<4x256xf32>
    tpu.vector_store %arg12[%c144, %c0_40], %112 {strides = array<i32>} : memref<196x256xf32, #tpu.memory_space<vmem>>, vector<4x256xf32>,
    %114 = vector.extract_strided_slice %101 {offsets = [0, 96], sizes = [4, 256], strides = [1, 1]} : vector<4x352xf32> to vector<4x256xf32>
    %c172 = arith.constant 172 : index
    %c0_41 = arith.constant 0 : index
    %115 = vector.load %arg12[%c172, %c0_41] : memref<196x256xf32, #tpu.memory_space<vmem>>, vector<4x256xf32>
    tpu.vector_store %arg12[%c172, %c0_41], %114 {strides = array<i32>} : memref<196x256xf32, #tpu.memory_space<vmem>>, vector<4x256xf32>,
    %116 = vector.extract_strided_slice %74 {offsets = [0, 2], sizes = [4, 256], strides = [1, 1]} : vector<4x262xf32> to vector<4x256xf32>
    %cst_42 = arith.constant 0.000000e+00 : f32
    %117 = vector.shape_cast %43 : vector<1x256xi1> to vector<1x256xi1>
    %118 = vector.broadcast %117 : vector<1x256xi1> to vector<4x256xi1>
    %119 = vector.broadcast %cst_42 : f32 to vector<4x256xf32>
    %120 = arith.select %118, %116, %119 : vector<4x256xi1>, vector<4x256xf32>
    %121 = tpu.concatenate %75, %120, %75 in 1 : vector<4x48xf32>, vector<4x256xf32>, vector<4x48xf32> -> vector<4x352xf32>
    %122 = vector.extract_strided_slice %121 {offsets = [0, 0], sizes = [4, 256], strides = [1, 1]} : vector<4x352xf32> to vector<4x256xf32>
    %c8 = arith.constant 8 : index
    %c0_43 = arith.constant 0 : index
    %123 = vector.load %arg12[%c8, %c0_43] : memref<196x256xf32, #tpu.memory_space<vmem>>, vector<4x256xf32>
    tpu.vector_store %arg12[%c8, %c0_43], %122 {strides = array<i32>} : memref<196x256xf32, #tpu.memory_space<vmem>>, vector<4x256xf32>,
    %124 = vector.extract_strided_slice %121 {offsets = [0, 16], sizes = [4, 256], strides = [1, 1]} : vector<4x352xf32> to vector<4x256xf32>
    %c36 = arith.constant 36 : index
    %c0_44 = arith.constant 0 : index
    %125 = vector.load %arg12[%c36, %c0_44] : memref<196x256xf32, #tpu.memory_space<vmem>>, vector<4x256xf32>
    tpu.vector_store %arg12[%c36, %c0_44], %124 {strides = array<i32>} : memref<196x256xf32, #tpu.memory_space<vmem>>, vector<4x256xf32>,
    %126 = vector.extract_strided_slice %121 {offsets = [0, 32], sizes = [4, 256], strides = [1, 1]} : vector<4x352xf32> to vector<4x256xf32>
    %c64 = arith.constant 64 : index
    %c0_45 = arith.constant 0 : index
    %127 = vector.load %arg12[%c64, %c0_45] : memref<196x256xf32, #tpu.memory_space<vmem>>, vector<4x256xf32>
    tpu.vector_store %arg12[%c64, %c0_45], %126 {strides = array<i32>} : memref<196x256xf32, #tpu.memory_space<vmem>>, vector<4x256xf32>,
    %128 = vector.extract_strided_slice %121 {offsets = [0, 48], sizes = [4, 256], strides = [1, 1]} : vector<4x352xf32> to vector<4x256xf32>
    %c92 = arith.constant 92 : index
    %c0_46 = arith.constant 0 : index
    %129 = vector.load %arg12[%c92, %c0_46] : memref<196x256xf32, #tpu.memory_space<vmem>>, vector<4x256xf32>
    tpu.vector_store %arg12[%c92, %c0_46], %128 {strides = array<i32>} : memref<196x256xf32, #tpu.memory_space<vmem>>, vector<4x256xf32>,
    %130 = vector.extract_strided_slice %121 {offsets = [0, 64], sizes = [4, 256], strides = [1, 1]} : vector<4x352xf32> to vector<4x256xf32>
    %c120 = arith.constant 120 : index
    %c0_47 = arith.constant 0 : index
    %131 = vector.load %arg12[%c120, %c0_47] : memref<196x256xf32, #tpu.memory_space<vmem>>, vector<4x256xf32>
    tpu.vector_store %arg12[%c120, %c0_47], %130 {strides = array<i32>} : memref<196x256xf32, #tpu.memory_space<vmem>>, vector<4x256xf32>,
    %132 = vector.extract_strided_slice %121 {offsets = [0, 80], sizes = [4, 256], strides = [1, 1]} : vector<4x352xf32> to vector<4x256xf32>
    %c148 = arith.constant 148 : index
    %c0_48 = arith.constant 0 : index
    %133 = vector.load %arg12[%c148, %c0_48] : memref<196x256xf32, #tpu.memory_space<vmem>>, vector<4x256xf32>
    tpu.vector_store %arg12[%c148, %c0_48], %132 {strides = array<i32>} : memref<196x256xf32, #tpu.memory_space<vmem>>, vector<4x256xf32>,
    %134 = vector.extract_strided_slice %121 {offsets = [0, 96], sizes = [4, 256], strides = [1, 1]} : vector<4x352xf32> to vector<4x256xf32>
    %c176 = arith.constant 176 : index
    %c0_49 = arith.constant 0 : index
    %135 = vector.load %arg12[%c176, %c0_49] : memref<196x256xf32, #tpu.memory_space<vmem>>, vector<4x256xf32>
    tpu.vector_store %arg12[%c176, %c0_49], %134 {strides = array<i32>} : memref<196x256xf32, #tpu.memory_space<vmem>>, vector<4x256xf32>,
    %136 = vector.extract_strided_slice %74 {offsets = [0, 3], sizes = [4, 256], strides = [1, 1]} : vector<4x262xf32> to vector<4x256xf32>
    %137 = tpu.concatenate %75, %136, %75 in 1 : vector<4x48xf32>, vector<4x256xf32>, vector<4x48xf32> -> vector<4x352xf32>
    %138 = vector.extract_strided_slice %137 {offsets = [0, 0], sizes = [4, 256], strides = [1, 1]} : vector<4x352xf32> to vector<4x256xf32>
    %c12 = arith.constant 12 : index
    %c0_50 = arith.constant 0 : index
    %139 = vector.load %arg12[%c12, %c0_50] : memref<196x256xf32, #tpu.memory_space<vmem>>, vector<4x256xf32>
    tpu.vector_store %arg12[%c12, %c0_50], %138 {strides = array<i32>} : memref<196x256xf32, #tpu.memory_space<vmem>>, vector<4x256xf32>,
    %140 = vector.extract_strided_slice %137 {offsets = [0, 16], sizes = [4, 256], strides = [1, 1]} : vector<4x352xf32> to vector<4x256xf32>
    %c40 = arith.constant 40 : index
    %c0_51 = arith.constant 0 : index
    %141 = vector.load %arg12[%c40, %c0_51] : memref<196x256xf32, #tpu.memory_space<vmem>>, vector<4x256xf32>
    tpu.vector_store %arg12[%c40, %c0_51], %140 {strides = array<i32>} : memref<196x256xf32, #tpu.memory_space<vmem>>, vector<4x256xf32>,
    %142 = vector.extract_strided_slice %137 {offsets = [0, 32], sizes = [4, 256], strides = [1, 1]} : vector<4x352xf32> to vector<4x256xf32>
    %c68 = arith.constant 68 : index
    %c0_52 = arith.constant 0 : index
    %143 = vector.load %arg12[%c68, %c0_52] : memref<196x256xf32, #tpu.memory_space<vmem>>, vector<4x256xf32>
    tpu.vector_store %arg12[%c68, %c0_52], %142 {strides = array<i32>} : memref<196x256xf32, #tpu.memory_space<vmem>>, vector<4x256xf32>,
    %144 = vector.extract_strided_slice %137 {offsets = [0, 48], sizes = [4, 256], strides = [1, 1]} : vector<4x352xf32> to vector<4x256xf32>
    %c96 = arith.constant 96 : index
    %c0_53 = arith.constant 0 : index
    %145 = vector.load %arg12[%c96, %c0_53] : memref<196x256xf32, #tpu.memory_space<vmem>>, vector<4x256xf32>
    tpu.vector_store %arg12[%c96, %c0_53], %144 {strides = array<i32>} : memref<196x256xf32, #tpu.memory_space<vmem>>, vector<4x256xf32>,
    %146 = vector.extract_strided_slice %137 {offsets = [0, 64], sizes = [4, 256], strides = [1, 1]} : vector<4x352xf32> to vector<4x256xf32>
    %c124 = arith.constant 124 : index
    %c0_54 = arith.constant 0 : index
    %147 = vector.load %arg12[%c124, %c0_54] : memref<196x256xf32, #tpu.memory_space<vmem>>, vector<4x256xf32>
    tpu.vector_store %arg12[%c124, %c0_54], %146 {strides = array<i32>} : memref<196x256xf32, #tpu.memory_space<vmem>>, vector<4x256xf32>,
    %148 = vector.extract_strided_slice %137 {offsets = [0, 80], sizes = [4, 256], strides = [1, 1]} : vector<4x352xf32> to vector<4x256xf32>
    %c152 = arith.constant 152 : index
    %c0_55 = arith.constant 0 : index
    %149 = vector.load %arg12[%c152, %c0_55] : memref<196x256xf32, #tpu.memory_space<vmem>>, vector<4x256xf32>
    tpu.vector_store %arg12[%c152, %c0_55], %148 {strides = array<i32>} : memref<196x256xf32, #tpu.memory_space<vmem>>, vector<4x256xf32>,
    %150 = vector.extract_strided_slice %137 {offsets = [0, 96], sizes = [4, 256], strides = [1, 1]} : vector<4x352xf32> to vector<4x256xf32>
    %c180 = arith.constant 180 : index
    %c0_56 = arith.constant 0 : index
    %151 = vector.load %arg12[%c180, %c0_56] : memref<196x256xf32, #tpu.memory_space<vmem>>, vector<4x256xf32>
    tpu.vector_store %arg12[%c180, %c0_56], %150 {strides = array<i32>} : memref<196x256xf32, #tpu.memory_space<vmem>>, vector<4x256xf32>,
    %152 = vector.extract_strided_slice %74 {offsets = [0, 4], sizes = [4, 256], strides = [1, 1]} : vector<4x262xf32> to vector<4x256xf32>
    %cst_57 = arith.constant 0.000000e+00 : f32
    %153 = vector.shape_cast %52 : vector<1x256xi1> to vector<1x256xi1>
    %154 = vector.broadcast %153 : vector<1x256xi1> to vector<4x256xi1>
    %155 = vector.broadcast %cst_57 : f32 to vector<4x256xf32>
    %156 = arith.select %154, %152, %155 : vector<4x256xi1>, vector<4x256xf32>
    %157 = tpu.concatenate %75, %156, %75 in 1 : vector<4x48xf32>, vector<4x256xf32>, vector<4x48xf32> -> vector<4x352xf32>
    %158 = vector.extract_strided_slice %157 {offsets = [0, 0], sizes = [4, 256], strides = [1, 1]} : vector<4x352xf32> to vector<4x256xf32>
    %c16 = arith.constant 16 : index
    %c0_58 = arith.constant 0 : index
    %159 = vector.load %arg12[%c16, %c0_58] : memref<196x256xf32, #tpu.memory_space<vmem>>, vector<4x256xf32>
    tpu.vector_store %arg12[%c16, %c0_58], %158 {strides = array<i32>} : memref<196x256xf32, #tpu.memory_space<vmem>>, vector<4x256xf32>,
    %160 = vector.extract_strided_slice %157 {offsets = [0, 16], sizes = [4, 256], strides = [1, 1]} : vector<4x352xf32> to vector<4x256xf32>
    %c44 = arith.constant 44 : index
    %c0_59 = arith.constant 0 : index
    %161 = vector.load %arg12[%c44, %c0_59] : memref<196x256xf32, #tpu.memory_space<vmem>>, vector<4x256xf32>
    tpu.vector_store %arg12[%c44, %c0_59], %160 {strides = array<i32>} : memref<196x256xf32, #tpu.memory_space<vmem>>, vector<4x256xf32>,
    %162 = vector.extract_strided_slice %157 {offsets = [0, 32], sizes = [4, 256], strides = [1, 1]} : vector<4x352xf32> to vector<4x256xf32>
    %c72 = arith.constant 72 : index
    %c0_60 = arith.constant 0 : index
    %163 = vector.load %arg12[%c72, %c0_60] : memref<196x256xf32, #tpu.memory_space<vmem>>, vector<4x256xf32>
    tpu.vector_store %arg12[%c72, %c0_60], %162 {strides = array<i32>} : memref<196x256xf32, #tpu.memory_space<vmem>>, vector<4x256xf32>,
    %164 = vector.extract_strided_slice %157 {offsets = [0, 48], sizes = [4, 256], strides = [1, 1]} : vector<4x352xf32> to vector<4x256xf32>
    %c100 = arith.constant 100 : index
    %c0_61 = arith.constant 0 : index
    %165 = vector.load %arg12[%c100, %c0_61] : memref<196x256xf32, #tpu.memory_space<vmem>>, vector<4x256xf32>
    tpu.vector_store %arg12[%c100, %c0_61], %164 {strides = array<i32>} : memref<196x256xf32, #tpu.memory_space<vmem>>, vector<4x256xf32>,
    %166 = vector.extract_strided_slice %157 {offsets = [0, 64], sizes = [4, 256], strides = [1, 1]} : vector<4x352xf32> to vector<4x256xf32>
    %c128 = arith.constant 128 : index
    %c0_62 = arith.constant 0 : index
    %167 = vector.load %arg12[%c128, %c0_62] : memref<196x256xf32, #tpu.memory_space<vmem>>, vector<4x256xf32>
    tpu.vector_store %arg12[%c128, %c0_62], %166 {strides = array<i32>} : memref<196x256xf32, #tpu.memory_space<vmem>>, vector<4x256xf32>,
    %168 = vector.extract_strided_slice %157 {offsets = [0, 80], sizes = [4, 256], strides = [1, 1]} : vector<4x352xf32> to vector<4x256xf32>
    %c156 = arith.constant 156 : index
    %c0_63 = arith.constant 0 : index
    %169 = vector.load %arg12[%c156, %c0_63] : memref<196x256xf32, #tpu.memory_space<vmem>>, vector<4x256xf32>
    tpu.vector_store %arg12[%c156, %c0_63], %168 {strides = array<i32>} : memref<196x256xf32, #tpu.memory_space<vmem>>, vector<4x256xf32>,
    %170 = vector.extract_strided_slice %157 {offsets = [0, 96], sizes = [4, 256], strides = [1, 1]} : vector<4x352xf32> to vector<4x256xf32>
    %c184 = arith.constant 184 : index
    %c0_64 = arith.constant 0 : index
    %171 = vector.load %arg12[%c184, %c0_64] : memref<196x256xf32, #tpu.memory_space<vmem>>, vector<4x256xf32>
    tpu.vector_store %arg12[%c184, %c0_64], %170 {strides = array<i32>} : memref<196x256xf32, #tpu.memory_space<vmem>>, vector<4x256xf32>,
    %172 = vector.extract_strided_slice %74 {offsets = [0, 5], sizes = [4, 256], strides = [1, 1]} : vector<4x262xf32> to vector<4x256xf32>
    %cst_65 = arith.constant 0.000000e+00 : f32
    %173 = vector.shape_cast %61 : vector<1x256xi1> to vector<1x256xi1>
    %174 = vector.broadcast %173 : vector<1x256xi1> to vector<4x256xi1>
    %175 = vector.broadcast %cst_65 : f32 to vector<4x256xf32>
    %176 = arith.select %174, %172, %175 : vector<4x256xi1>, vector<4x256xf32>
    %177 = tpu.concatenate %75, %176, %75 in 1 : vector<4x48xf32>, vector<4x256xf32>, vector<4x48xf32> -> vector<4x352xf32>
    %178 = vector.extract_strided_slice %177 {offsets = [0, 0], sizes = [4, 256], strides = [1, 1]} : vector<4x352xf32> to vector<4x256xf32>
    %c20 = arith.constant 20 : index
    %c0_66 = arith.constant 0 : index
    %179 = vector.load %arg12[%c20, %c0_66] : memref<196x256xf32, #tpu.memory_space<vmem>>, vector<4x256xf32>
    tpu.vector_store %arg12[%c20, %c0_66], %178 {strides = array<i32>} : memref<196x256xf32, #tpu.memory_space<vmem>>, vector<4x256xf32>,
    %180 = vector.extract_strided_slice %177 {offsets = [0, 16], sizes = [4, 256], strides = [1, 1]} : vector<4x352xf32> to vector<4x256xf32>
    %c48 = arith.constant 48 : index
    %c0_67 = arith.constant 0 : index
    %181 = vector.load %arg12[%c48, %c0_67] : memref<196x256xf32, #tpu.memory_space<vmem>>, vector<4x256xf32>
    tpu.vector_store %arg12[%c48, %c0_67], %180 {strides = array<i32>} : memref<196x256xf32, #tpu.memory_space<vmem>>, vector<4x256xf32>,
    %182 = vector.extract_strided_slice %177 {offsets = [0, 32], sizes = [4, 256], strides = [1, 1]} : vector<4x352xf32> to vector<4x256xf32>
    %c76 = arith.constant 76 : index
    %c0_68 = arith.constant 0 : index
    %183 = vector.load %arg12[%c76, %c0_68] : memref<196x256xf32, #tpu.memory_space<vmem>>, vector<4x256xf32>
    tpu.vector_store %arg12[%c76, %c0_68], %182 {strides = array<i32>} : memref<196x256xf32, #tpu.memory_space<vmem>>, vector<4x256xf32>,
    %184 = vector.extract_strided_slice %177 {offsets = [0, 48], sizes = [4, 256], strides = [1, 1]} : vector<4x352xf32> to vector<4x256xf32>
    %c104 = arith.constant 104 : index
    %c0_69 = arith.constant 0 : index
    %185 = vector.load %arg12[%c104, %c0_69] : memref<196x256xf32, #tpu.memory_space<vmem>>, vector<4x256xf32>
    tpu.vector_store %arg12[%c104, %c0_69], %184 {strides = array<i32>} : memref<196x256xf32, #tpu.memory_space<vmem>>, vector<4x256xf32>,
    %186 = vector.extract_strided_slice %177 {offsets = [0, 64], sizes = [4, 256], strides = [1, 1]} : vector<4x352xf32> to vector<4x256xf32>
    %c132 = arith.constant 132 : index
    %c0_70 = arith.constant 0 : index
    %187 = vector.load %arg12[%c132, %c0_70] : memref<196x256xf32, #tpu.memory_space<vmem>>, vector<4x256xf32>
    tpu.vector_store %arg12[%c132, %c0_70], %186 {strides = array<i32>} : memref<196x256xf32, #tpu.memory_space<vmem>>, vector<4x256xf32>,
    %188 = vector.extract_strided_slice %177 {offsets = [0, 80], sizes = [4, 256], strides = [1, 1]} : vector<4x352xf32> to vector<4x256xf32>
    %c160 = arith.constant 160 : index
    %c0_71 = arith.constant 0 : index
    %189 = vector.load %arg12[%c160, %c0_71] : memref<196x256xf32, #tpu.memory_space<vmem>>, vector<4x256xf32>
    tpu.vector_store %arg12[%c160, %c0_71], %188 {strides = array<i32>} : memref<196x256xf32, #tpu.memory_space<vmem>>, vector<4x256xf32>,
    %190 = vector.extract_strided_slice %177 {offsets = [0, 96], sizes = [4, 256], strides = [1, 1]} : vector<4x352xf32> to vector<4x256xf32>
    %c188 = arith.constant 188 : index
    %c0_72 = arith.constant 0 : index
    %191 = vector.load %arg12[%c188, %c0_72] : memref<196x256xf32, #tpu.memory_space<vmem>>, vector<4x256xf32>
    tpu.vector_store %arg12[%c188, %c0_72], %190 {strides = array<i32>} : memref<196x256xf32, #tpu.memory_space<vmem>>, vector<4x256xf32>,
    %192 = vector.extract_strided_slice %74 {offsets = [0, 6], sizes = [4, 256], strides = [1, 1]} : vector<4x262xf32> to vector<4x256xf32>
    %cst_73 = arith.constant 0.000000e+00 : f32
    %193 = vector.shape_cast %70 : vector<1x256xi1> to vector<1x256xi1>
    %194 = vector.broadcast %193 : vector<1x256xi1> to vector<4x256xi1>
    %195 = vector.broadcast %cst_73 : f32 to vector<4x256xf32>
    %196 = arith.select %194, %192, %195 : vector<4x256xi1>, vector<4x256xf32>
    %197 = tpu.concatenate %75, %196, %75 in 1 : vector<4x48xf32>, vector<4x256xf32>, vector<4x48xf32> -> vector<4x352xf32>
    %198 = vector.extract_strided_slice %197 {offsets = [0, 0], sizes = [4, 256], strides = [1, 1]} : vector<4x352xf32> to vector<4x256xf32>
    %c24 = arith.constant 24 : index
    %c0_74 = arith.constant 0 : index
    %199 = vector.load %arg12[%c24, %c0_74] : memref<196x256xf32, #tpu.memory_space<vmem>>, vector<4x256xf32>
    tpu.vector_store %arg12[%c24, %c0_74], %198 {strides = array<i32>} : memref<196x256xf32, #tpu.memory_space<vmem>>, vector<4x256xf32>,
    %200 = vector.extract_strided_slice %197 {offsets = [0, 16], sizes = [4, 256], strides = [1, 1]} : vector<4x352xf32> to vector<4x256xf32>
    %c52 = arith.constant 52 : index
    %c0_75 = arith.constant 0 : index
    %201 = vector.load %arg12[%c52, %c0_75] : memref<196x256xf32, #tpu.memory_space<vmem>>, vector<4x256xf32>
    tpu.vector_store %arg12[%c52, %c0_75], %200 {strides = array<i32>} : memref<196x256xf32, #tpu.memory_space<vmem>>, vector<4x256xf32>,
    %202 = vector.extract_strided_slice %197 {offsets = [0, 32], sizes = [4, 256], strides = [1, 1]} : vector<4x352xf32> to vector<4x256xf32>
    %c80 = arith.constant 80 : index
    %c0_76 = arith.constant 0 : index
    %203 = vector.load %arg12[%c80, %c0_76] : memref<196x256xf32, #tpu.memory_space<vmem>>, vector<4x256xf32>
    tpu.vector_store %arg12[%c80, %c0_76], %202 {strides = array<i32>} : memref<196x256xf32, #tpu.memory_space<vmem>>, vector<4x256xf32>,
    %204 = vector.extract_strided_slice %197 {offsets = [0, 48], sizes = [4, 256], strides = [1, 1]} : vector<4x352xf32> to vector<4x256xf32>
    %c108 = arith.constant 108 : index
    %c0_77 = arith.constant 0 : index
    %205 = vector.load %arg12[%c108, %c0_77] : memref<196x256xf32, #tpu.memory_space<vmem>>, vector<4x256xf32>
    tpu.vector_store %arg12[%c108, %c0_77], %204 {strides = array<i32>} : memref<196x256xf32, #tpu.memory_space<vmem>>, vector<4x256xf32>,
    %206 = vector.extract_strided_slice %197 {offsets = [0, 64], sizes = [4, 256], strides = [1, 1]} : vector<4x352xf32> to vector<4x256xf32>
    %c136 = arith.constant 136 : index
    %c0_78 = arith.constant 0 : index
    %207 = vector.load %arg12[%c136, %c0_78] : memref<196x256xf32, #tpu.memory_space<vmem>>, vector<4x256xf32>
    tpu.vector_store %arg12[%c136, %c0_78], %206 {strides = array<i32>} : memref<196x256xf32, #tpu.memory_space<vmem>>, vector<4x256xf32>,
    %208 = vector.extract_strided_slice %197 {offsets = [0, 80], sizes = [4, 256], strides = [1, 1]} : vector<4x352xf32> to vector<4x256xf32>
    %c164 = arith.constant 164 : index
    %c0_79 = arith.constant 0 : index
    %209 = vector.load %arg12[%c164, %c0_79] : memref<196x256xf32, #tpu.memory_space<vmem>>, vector<4x256xf32>
    tpu.vector_store %arg12[%c164, %c0_79], %208 {strides = array<i32>} : memref<196x256xf32, #tpu.memory_space<vmem>>, vector<4x256xf32>,
    %210 = vector.extract_strided_slice %197 {offsets = [0, 96], sizes = [4, 256], strides = [1, 1]} : vector<4x352xf32> to vector<4x256xf32>
    %c192 = arith.constant 192 : index
    %c0_80 = arith.constant 0 : index
    %211 = vector.load %arg12[%c192, %c0_80] : memref<196x256xf32, #tpu.memory_space<vmem>>, vector<4x256xf32>
    tpu.vector_store %arg12[%c192, %c0_80], %210 {strides = array<i32>} : memref<196x256xf32, #tpu.memory_space<vmem>>, vector<4x256xf32>,
    %c0_81 = arith.constant 0 : index
    %c0_82 = arith.constant 0 : index
    %212 = vector.load %arg2[%c0_81, %c0_82] : memref<16x196xf32, #tpu.memory_space<vmem>>, vector<16x196xf32>
    %c0_83 = arith.constant 0 : index
    %c0_84 = arith.constant 0 : index
    %213 = vector.load %arg12[%c0_83, %c0_84] : memref<196x256xf32, #tpu.memory_space<vmem>>, vector<196x256xf32>
    %cst_85 = arith.constant dense<0.000000e+00> : vector<16x256xf32>
    %214 = tpu.matmul %212, %213, %cst_85 {dimension_numbers = #tpu.dot_dimension_numbers<[1], [0], [0], [1], [0, 0, 1, 1], [], []>} : vector<16x196xf32>, vector<196x256xf32>, vector<16x256xf32> -> vector<16x256xf32>
    %c0_86 = arith.constant 0 : index
    %c0_87 = arith.constant 0 : index
    %215 = vector.load %arg3[%c0_86, %c0_87] : memref<16x1xf32, #tpu.memory_space<vmem>>, vector<16x1xf32>
    %216 = vector.broadcast %215 : vector<16x1xf32> to vector<16x256xf32>
    %217 = arith.addf %214, %216 : vector<16x256xf32>
    %218 = vector.extract_strided_slice %217 {offsets = [0, 0], sizes = [4, 256], strides = [1, 1]} : vector<16x256xf32> to vector<4x256xf32>
    %219 = vector.extract_strided_slice %217 {offsets = [4, 0], sizes = [4, 256], strides = [1, 1]} : vector<16x256xf32> to vector<4x256xf32>
    %220 = vector.extract_strided_slice %217 {offsets = [8, 0], sizes = [4, 256], strides = [1, 1]} : vector<16x256xf32> to vector<4x256xf32>
    %221 = vector.extract_strided_slice %217 {offsets = [12, 0], sizes = [4, 256], strides = [1, 1]} : vector<16x256xf32> to vector<4x256xf32>
    %222 = arith.addf %218, %219 : vector<4x256xf32>
    %223 = arith.addf %222, %220 : vector<4x256xf32>
    %224 = arith.addf %223, %221 : vector<4x256xf32>
    %cst_88 = arith.constant dense<0.000000e+00> : vector<4xf32>
    %225 = vector.multi_reduction <add>, %224, %cst_88 [1] : vector<4x256xf32> to vector<4xf32>
    %226 = vector.shape_cast %225 : vector<4xf32> to vector<4x1xf32>
    %cst_89 = arith.constant 2.560000e+02 : f32
    %227 = vector.broadcast %cst_89 : f32 to vector<4x1xf32>
    %228 = arith.divf %226, %227 : vector<4x1xf32>
    %cst_90 = arith.constant 0.000000e+00 : f32
    %229 = vector.broadcast %cst_90 : f32 to vector<8x1xf32>
    %c0_91 = arith.constant 0 : index
    %c0_92 = arith.constant 0 : index
    %230 = vector.load %arg4[%c0_91, %c0_92] : memref<8x4xf32, #tpu.memory_space<vmem>>, vector<8x1xf32>
    %231 = vector.extract_strided_slice %228 {offsets = [0, 0], sizes = [1, 1], strides = [1, 1]} : vector<4x1xf32> to vector<1x1xf32>
    %232 = vector.broadcast %231 : vector<1x1xf32> to vector<8x1xf32>
    %233 = arith.mulf %230, %232 : vector<8x1xf32>
    %234 = arith.addf %229, %233 : vector<8x1xf32>
    %c0_93 = arith.constant 0 : index
    %c1 = arith.constant 1 : index
    %235 = vector.load %arg4[%c0_93, %c1] : memref<8x4xf32, #tpu.memory_space<vmem>>, vector<8x1xf32>
    %236 = vector.extract_strided_slice %228 {offsets = [1, 0], sizes = [1, 1], strides = [1, 1]} : vector<4x1xf32> to vector<1x1xf32>
    %237 = vector.broadcast %236 : vector<1x1xf32> to vector<8x1xf32>
    %238 = arith.mulf %235, %237 : vector<8x1xf32>
    %239 = arith.addf %234, %238 : vector<8x1xf32>
    %c0_94 = arith.constant 0 : index
    %c2 = arith.constant 2 : index
    %240 = vector.load %arg4[%c0_94, %c2] : memref<8x4xf32, #tpu.memory_space<vmem>>, vector<8x1xf32>
    %241 = vector.extract_strided_slice %228 {offsets = [2, 0], sizes = [1, 1], strides = [1, 1]} : vector<4x1xf32> to vector<1x1xf32>
    %242 = vector.broadcast %241 : vector<1x1xf32> to vector<8x1xf32>
    %243 = arith.mulf %240, %242 : vector<8x1xf32>
    %244 = arith.addf %239, %243 : vector<8x1xf32>
    %c0_95 = arith.constant 0 : index
    %c3 = arith.constant 3 : index
    %245 = vector.load %arg4[%c0_95, %c3] : memref<8x4xf32, #tpu.memory_space<vmem>>, vector<8x1xf32>
    %246 = vector.extract_strided_slice %228 {offsets = [3, 0], sizes = [1, 1], strides = [1, 1]} : vector<4x1xf32> to vector<1x1xf32>
    %247 = vector.broadcast %246 : vector<1x1xf32> to vector<8x1xf32>
    %248 = arith.mulf %245, %247 : vector<8x1xf32>
    %249 = arith.addf %244, %248 : vector<8x1xf32>
    %c0_96 = arith.constant 0 : index
    %c0_97 = arith.constant 0 : index
    %250 = vector.load %arg5[%c0_96, %c0_97] : memref<8x1xf32, #tpu.memory_space<vmem>>, vector<8x1xf32>
    %251 = arith.mulf %249, %250 : vector<8x1xf32>
    %c0_98 = arith.constant 0 : index
    %c0_99 = arith.constant 0 : index
    %252 = vector.load %arg6[%c0_98, %c0_99] : memref<8x1xf32, #tpu.memory_space<vmem>>, vector<8x1xf32>
    %253 = arith.addf %251, %252 : vector<8x1xf32>
    %cst_100 = arith.constant 0.000000e+00 : f32
    %254 = vector.broadcast %cst_100 : f32 to vector<8x1xf32>
    %255 = arith.maximumf %253, %254 : vector<8x1xf32>
    %cst_101 = arith.constant 0.000000e+00 : f32
    %256 = vector.broadcast %cst_101 : f32 to vector<16x1xf32>
    %c0_102 = arith.constant 0 : index
    %c0_103 = arith.constant 0 : index
    %257 = vector.load %arg7[%c0_102, %c0_103] : memref<16x8xf32, #tpu.memory_space<vmem>>, vector<16x1xf32>
    %258 = vector.extract_strided_slice %255 {offsets = [0, 0], sizes = [1, 1], strides = [1, 1]} : vector<8x1xf32> to vector<1x1xf32>
    %259 = vector.broadcast %258 : vector<1x1xf32> to vector<16x1xf32>
    %260 = arith.mulf %257, %259 : vector<16x1xf32>
    %261 = arith.addf %256, %260 : vector<16x1xf32>
    %c0_104 = arith.constant 0 : index
    %c1_105 = arith.constant 1 : index
    %262 = vector.load %arg7[%c0_104, %c1_105] : memref<16x8xf32, #tpu.memory_space<vmem>>, vector<16x1xf32>
    %263 = vector.extract_strided_slice %255 {offsets = [1, 0], sizes = [1, 1], strides = [1, 1]} : vector<8x1xf32> to vector<1x1xf32>
    %264 = vector.broadcast %263 : vector<1x1xf32> to vector<16x1xf32>
    %265 = arith.mulf %262, %264 : vector<16x1xf32>
    %266 = arith.addf %261, %265 : vector<16x1xf32>
    %c0_106 = arith.constant 0 : index
    %c2_107 = arith.constant 2 : index
    %267 = vector.load %arg7[%c0_106, %c2_107] : memref<16x8xf32, #tpu.memory_space<vmem>>, vector<16x1xf32>
    %268 = vector.extract_strided_slice %255 {offsets = [2, 0], sizes = [1, 1], strides = [1, 1]} : vector<8x1xf32> to vector<1x1xf32>
    %269 = vector.broadcast %268 : vector<1x1xf32> to vector<16x1xf32>
    %270 = arith.mulf %267, %269 : vector<16x1xf32>
    %271 = arith.addf %266, %270 : vector<16x1xf32>
    %c0_108 = arith.constant 0 : index
    %c3_109 = arith.constant 3 : index
    %272 = vector.load %arg7[%c0_108, %c3_109] : memref<16x8xf32, #tpu.memory_space<vmem>>, vector<16x1xf32>
    %273 = vector.extract_strided_slice %255 {offsets = [3, 0], sizes = [1, 1], strides = [1, 1]} : vector<8x1xf32> to vector<1x1xf32>
    %274 = vector.broadcast %273 : vector<1x1xf32> to vector<16x1xf32>
    %275 = arith.mulf %272, %274 : vector<16x1xf32>
    %276 = arith.addf %271, %275 : vector<16x1xf32>
    %c0_110 = arith.constant 0 : index
    %c4_111 = arith.constant 4 : index
    %277 = vector.load %arg7[%c0_110, %c4_111] : memref<16x8xf32, #tpu.memory_space<vmem>>, vector<16x1xf32>
    %278 = vector.extract_strided_slice %255 {offsets = [4, 0], sizes = [1, 1], strides = [1, 1]} : vector<8x1xf32> to vector<1x1xf32>
    %279 = vector.broadcast %278 : vector<1x1xf32> to vector<16x1xf32>
    %280 = arith.mulf %277, %279 : vector<16x1xf32>
    %281 = arith.addf %276, %280 : vector<16x1xf32>
    %c0_112 = arith.constant 0 : index
    %c5 = arith.constant 5 : index
    %282 = vector.load %arg7[%c0_112, %c5] : memref<16x8xf32, #tpu.memory_space<vmem>>, vector<16x1xf32>
    %283 = vector.extract_strided_slice %255 {offsets = [5, 0], sizes = [1, 1], strides = [1, 1]} : vector<8x1xf32> to vector<1x1xf32>
    %284 = vector.broadcast %283 : vector<1x1xf32> to vector<16x1xf32>
    %285 = arith.mulf %282, %284 : vector<16x1xf32>
    %286 = arith.addf %281, %285 : vector<16x1xf32>
    %c0_113 = arith.constant 0 : index
    %c6 = arith.constant 6 : index
    %287 = vector.load %arg7[%c0_113, %c6] : memref<16x8xf32, #tpu.memory_space<vmem>>, vector<16x1xf32>
    %288 = vector.extract_strided_slice %255 {offsets = [6, 0], sizes = [1, 1], strides = [1, 1]} : vector<8x1xf32> to vector<1x1xf32>
    %289 = vector.broadcast %288 : vector<1x1xf32> to vector<16x1xf32>
    %290 = arith.mulf %287, %289 : vector<16x1xf32>
    %291 = arith.addf %286, %290 : vector<16x1xf32>
    %c0_114 = arith.constant 0 : index
    %c7 = arith.constant 7 : index
    %292 = vector.load %arg7[%c0_114, %c7] : memref<16x8xf32, #tpu.memory_space<vmem>>, vector<16x1xf32>
    %293 = vector.extract_strided_slice %255 {offsets = [7, 0], sizes = [1, 1], strides = [1, 1]} : vector<8x1xf32> to vector<1x1xf32>
    %294 = vector.broadcast %293 : vector<1x1xf32> to vector<16x1xf32>
    %295 = arith.mulf %292, %294 : vector<16x1xf32>
    %296 = arith.addf %291, %295 : vector<16x1xf32>
    %297 = vector.extract_strided_slice %296 {offsets = [0, 0], sizes = [4, 1], strides = [1, 1]} : vector<16x1xf32> to vector<4x1xf32>
    %298 = vector.extract_strided_slice %296 {offsets = [4, 0], sizes = [4, 1], strides = [1, 1]} : vector<16x1xf32> to vector<4x1xf32>
    %299 = vector.extract_strided_slice %296 {offsets = [8, 0], sizes = [4, 1], strides = [1, 1]} : vector<16x1xf32> to vector<4x1xf32>
    %300 = vector.extract_strided_slice %296 {offsets = [12, 0], sizes = [4, 1], strides = [1, 1]} : vector<16x1xf32> to vector<4x1xf32>
    %301 = arith.maximumf %297, %298 : vector<4x1xf32>
    %302 = arith.maximumf %299, %300 : vector<4x1xf32>
    %303 = arith.maximumf %301, %302 : vector<4x1xf32>
    %304 = arith.subf %297, %303 : vector<4x1xf32>
    %305 = math.exp %304 : vector<4x1xf32>
    %306 = arith.subf %298, %303 : vector<4x1xf32>
    %307 = math.exp %306 : vector<4x1xf32>
    %308 = arith.subf %299, %303 : vector<4x1xf32>
    %309 = math.exp %308 : vector<4x1xf32>
    %310 = arith.subf %300, %303 : vector<4x1xf32>
    %311 = math.exp %310 : vector<4x1xf32>
    %312 = arith.addf %305, %307 : vector<4x1xf32>
    %313 = arith.addf %312, %309 : vector<4x1xf32>
    %314 = arith.addf %313, %311 : vector<4x1xf32>
    %cst_115 = arith.constant 1.000000e+00 : f32
    %315 = vector.broadcast %cst_115 : f32 to vector<4x1xf32>
    %316 = arith.divf %315, %314 : vector<4x1xf32>
    %317 = vector.broadcast %305 : vector<4x1xf32> to vector<4x256xf32>
    %318 = arith.mulf %317, %218 : vector<4x256xf32>
    %319 = vector.broadcast %307 : vector<4x1xf32> to vector<4x256xf32>
    %320 = arith.mulf %319, %219 : vector<4x256xf32>
    %321 = arith.addf %318, %320 : vector<4x256xf32>
    %322 = vector.broadcast %309 : vector<4x1xf32> to vector<4x256xf32>
    %323 = arith.mulf %322, %220 : vector<4x256xf32>
    %324 = arith.addf %321, %323 : vector<4x256xf32>
    %325 = vector.broadcast %311 : vector<4x1xf32> to vector<4x256xf32>
    %326 = arith.mulf %325, %221 : vector<4x256xf32>
    %327 = arith.addf %324, %326 : vector<4x256xf32>
    %328 = vector.broadcast %316 : vector<4x1xf32> to vector<4x256xf32>
    %329 = arith.mulf %327, %328 : vector<4x256xf32>
    %330 = tpu.concatenate %217, %329 in 0 : vector<16x256xf32>, vector<4x256xf32> -> vector<20x256xf32>
    %cst_116 = arith.constant 0.000000e+00 : f32
    %331 = vector.broadcast %cst_116 : f32 to vector<20x3xf32>
    %332 = tpu.concatenate %331, %330, %331 in 1 : vector<20x3xf32>, vector<20x256xf32>, vector<20x3xf32> -> vector<20x262xf32>
    %333 = vector.extract_strided_slice %332 {offsets = [0, 0], sizes = [20, 256], strides = [1, 1]} : vector<20x262xf32> to vector<20x256xf32>
    %334 = vector.extract_strided_slice %332 {offsets = [0, 1], sizes = [20, 256], strides = [1, 1]} : vector<20x262xf32> to vector<20x256xf32>
    %335 = vector.extract_strided_slice %332 {offsets = [0, 2], sizes = [20, 256], strides = [1, 1]} : vector<20x262xf32> to vector<20x256xf32>
    %336 = vector.extract_strided_slice %332 {offsets = [0, 3], sizes = [20, 256], strides = [1, 1]} : vector<20x262xf32> to vector<20x256xf32>
    %337 = vector.extract_strided_slice %332 {offsets = [0, 4], sizes = [20, 256], strides = [1, 1]} : vector<20x262xf32> to vector<20x256xf32>
    %338 = vector.extract_strided_slice %332 {offsets = [0, 5], sizes = [20, 256], strides = [1, 1]} : vector<20x262xf32> to vector<20x256xf32>
    %339 = vector.extract_strided_slice %332 {offsets = [0, 6], sizes = [20, 256], strides = [1, 1]} : vector<20x262xf32> to vector<20x256xf32>
    %c0_i32_117 = arith.constant 0 : i32
    %340 = vector.broadcast %c0_i32_117 : i32 to vector<1x256xi32>
    %341 = arith.cmpi eq, %16, %340 : vector<1x256xi32>
    %342 = vector.shape_cast %341 : vector<1x256xi1> to vector<1x256xi1>
    %343 = vector.broadcast %342 : vector<1x256xi1> to vector<20x256xi1>
    %344 = arith.select %343, %339, %333 : vector<20x256xi1>, vector<20x256xf32>
    %c1_i32_118 = arith.constant 1 : i32
    %345 = vector.broadcast %c1_i32_118 : i32 to vector<1x256xi32>
    %346 = arith.cmpi eq, %16, %345 : vector<1x256xi32>
    %347 = vector.shape_cast %346 : vector<1x256xi1> to vector<1x256xi1>
    %348 = vector.broadcast %347 : vector<1x256xi1> to vector<20x256xi1>
    %349 = arith.select %348, %337, %344 : vector<20x256xi1>, vector<20x256xf32>
    %c2_i32_119 = arith.constant 2 : i32
    %350 = vector.broadcast %c2_i32_119 : i32 to vector<1x256xi32>
    %351 = arith.cmpi eq, %16, %350 : vector<1x256xi32>
    %352 = vector.shape_cast %351 : vector<1x256xi1> to vector<1x256xi1>
    %353 = vector.broadcast %352 : vector<1x256xi1> to vector<20x256xi1>
    %354 = arith.select %353, %335, %349 : vector<20x256xi1>, vector<20x256xf32>
    %355 = vector.extract_strided_slice %354 {offsets = [0, 48], sizes = [20, 16], strides = [1, 1]} : vector<20x256xf32> to vector<20x16xf32>
    %356 = vector.extract_strided_slice %354 {offsets = [0, 32], sizes = [20, 16], strides = [1, 1]} : vector<20x256xf32> to vector<20x16xf32>
    %357 = vector.extract_strided_slice %354 {offsets = [0, 16], sizes = [20, 16], strides = [1, 1]} : vector<20x256xf32> to vector<20x16xf32>
    %358 = vector.extract_strided_slice %354 {offsets = [0, 224], sizes = [20, 16], strides = [1, 1]} : vector<20x256xf32> to vector<20x16xf32>
    %359 = vector.extract_strided_slice %354 {offsets = [0, 208], sizes = [20, 16], strides = [1, 1]} : vector<20x256xf32> to vector<20x16xf32>
    %360 = vector.extract_strided_slice %354 {offsets = [0, 192], sizes = [20, 16], strides = [1, 1]} : vector<20x256xf32> to vector<20x16xf32>
    %361 = tpu.concatenate %355, %356, %357, %354, %358, %359, %360 in 1 : vector<20x16xf32>, vector<20x16xf32>, vector<20x16xf32>, vector<20x256xf32>, vector<20x16xf32>, vector<20x16xf32>, vector<20x16xf32> -> vector<20x352xf32>
    %362 = vector.extract_strided_slice %361 {offsets = [0, 0], sizes = [20, 256], strides = [1, 1]} : vector<20x352xf32> to vector<20x256xf32>
    %c0_120 = arith.constant 0 : index
    %c0_121 = arith.constant 0 : index
    %363 = vector.load %arg13[%c0_120, %c0_121] : memref<980x256xf32, #tpu.memory_space<vmem>>, vector<20x256xf32>
    tpu.vector_store %arg13[%c0_120, %c0_121], %362 {strides = array<i32>} : memref<980x256xf32, #tpu.memory_space<vmem>>, vector<20x256xf32>,
    %364 = vector.extract_strided_slice %361 {offsets = [0, 16], sizes = [20, 256], strides = [1, 1]} : vector<20x352xf32> to vector<20x256xf32>
    %c140_122 = arith.constant 140 : index
    %c0_123 = arith.constant 0 : index
    %365 = vector.load %arg13[%c140_122, %c0_123] : memref<980x256xf32, #tpu.memory_space<vmem>>, vector<20x256xf32>
    tpu.vector_store %arg13[%c140_122, %c0_123], %364 {strides = array<i32>} : memref<980x256xf32, #tpu.memory_space<vmem>>, vector<20x256xf32>,
    %366 = vector.extract_strided_slice %361 {offsets = [0, 32], sizes = [20, 256], strides = [1, 1]} : vector<20x352xf32> to vector<20x256xf32>
    %c280 = arith.constant 280 : index
    %c0_124 = arith.constant 0 : index
    %367 = vector.load %arg13[%c280, %c0_124] : memref<980x256xf32, #tpu.memory_space<vmem>>, vector<20x256xf32>
    tpu.vector_store %arg13[%c280, %c0_124], %366 {strides = array<i32>} : memref<980x256xf32, #tpu.memory_space<vmem>>, vector<20x256xf32>,
    %368 = vector.extract_strided_slice %361 {offsets = [0, 48], sizes = [20, 256], strides = [1, 1]} : vector<20x352xf32> to vector<20x256xf32>
    %c420 = arith.constant 420 : index
    %c0_125 = arith.constant 0 : index
    %369 = vector.load %arg13[%c420, %c0_125] : memref<980x256xf32, #tpu.memory_space<vmem>>, vector<20x256xf32>
    tpu.vector_store %arg13[%c420, %c0_125], %368 {strides = array<i32>} : memref<980x256xf32, #tpu.memory_space<vmem>>, vector<20x256xf32>,
    %370 = vector.extract_strided_slice %361 {offsets = [0, 64], sizes = [20, 256], strides = [1, 1]} : vector<20x352xf32> to vector<20x256xf32>
    %c560 = arith.constant 560 : index
    %c0_126 = arith.constant 0 : index
    %371 = vector.load %arg13[%c560, %c0_126] : memref<980x256xf32, #tpu.memory_space<vmem>>, vector<20x256xf32>
    tpu.vector_store %arg13[%c560, %c0_126], %370 {strides = array<i32>} : memref<980x256xf32, #tpu.memory_space<vmem>>, vector<20x256xf32>,
    %372 = vector.extract_strided_slice %361 {offsets = [0, 80], sizes = [20, 256], strides = [1, 1]} : vector<20x352xf32> to vector<20x256xf32>
    %c700 = arith.constant 700 : index
    %c0_127 = arith.constant 0 : index
    %373 = vector.load %arg13[%c700, %c0_127] : memref<980x256xf32, #tpu.memory_space<vmem>>, vector<20x256xf32>
    tpu.vector_store %arg13[%c700, %c0_127], %372 {strides = array<i32>} : memref<980x256xf32, #tpu.memory_space<vmem>>, vector<20x256xf32>,
    %374 = vector.extract_strided_slice %361 {offsets = [0, 96], sizes = [20, 256], strides = [1, 1]} : vector<20x352xf32> to vector<20x256xf32>
    %c840 = arith.constant 840 : index
    %c0_128 = arith.constant 0 : index
    %375 = vector.load %arg13[%c840, %c0_128] : memref<980x256xf32, #tpu.memory_space<vmem>>, vector<20x256xf32>
    tpu.vector_store %arg13[%c840, %c0_128], %374 {strides = array<i32>} : memref<980x256xf32, #tpu.memory_space<vmem>>, vector<20x256xf32>,
    %376 = vector.shape_cast %341 : vector<1x256xi1> to vector<1x256xi1>
    %377 = vector.broadcast %376 : vector<1x256xi1> to vector<20x256xi1>
    %378 = arith.select %377, %338, %334 : vector<20x256xi1>, vector<20x256xf32>
    %379 = vector.shape_cast %346 : vector<1x256xi1> to vector<1x256xi1>
    %380 = vector.broadcast %379 : vector<1x256xi1> to vector<20x256xi1>
    %381 = arith.select %380, %336, %378 : vector<20x256xi1>, vector<20x256xf32>
    %382 = vector.extract_strided_slice %381 {offsets = [0, 48], sizes = [20, 16], strides = [1, 1]} : vector<20x256xf32> to vector<20x16xf32>
    %383 = vector.extract_strided_slice %381 {offsets = [0, 32], sizes = [20, 16], strides = [1, 1]} : vector<20x256xf32> to vector<20x16xf32>
    %384 = vector.extract_strided_slice %381 {offsets = [0, 16], sizes = [20, 16], strides = [1, 1]} : vector<20x256xf32> to vector<20x16xf32>
    %385 = vector.extract_strided_slice %381 {offsets = [0, 224], sizes = [20, 16], strides = [1, 1]} : vector<20x256xf32> to vector<20x16xf32>
    %386 = vector.extract_strided_slice %381 {offsets = [0, 208], sizes = [20, 16], strides = [1, 1]} : vector<20x256xf32> to vector<20x16xf32>
    %387 = vector.extract_strided_slice %381 {offsets = [0, 192], sizes = [20, 16], strides = [1, 1]} : vector<20x256xf32> to vector<20x16xf32>
    %388 = tpu.concatenate %382, %383, %384, %381, %385, %386, %387 in 1 : vector<20x16xf32>, vector<20x16xf32>, vector<20x16xf32>, vector<20x256xf32>, vector<20x16xf32>, vector<20x16xf32>, vector<20x16xf32> -> vector<20x352xf32>
    %389 = vector.extract_strided_slice %388 {offsets = [0, 0], sizes = [20, 256], strides = [1, 1]} : vector<20x352xf32> to vector<20x256xf32>
    %c20_129 = arith.constant 20 : index
    %c0_130 = arith.constant 0 : index
    %390 = vector.load %arg13[%c20_129, %c0_130] : memref<980x256xf32, #tpu.memory_space<vmem>>, vector<20x256xf32>
    tpu.vector_store %arg13[%c20_129, %c0_130], %389 {strides = array<i32>} : memref<980x256xf32, #tpu.memory_space<vmem>>, vector<20x256xf32>,
    %391 = vector.extract_strided_slice %388 {offsets = [0, 16], sizes = [20, 256], strides = [1, 1]} : vector<20x352xf32> to vector<20x256xf32>
    %c160_131 = arith.constant 160 : index
    %c0_132 = arith.constant 0 : index
    %392 = vector.load %arg13[%c160_131, %c0_132] : memref<980x256xf32, #tpu.memory_space<vmem>>, vector<20x256xf32>
    tpu.vector_store %arg13[%c160_131, %c0_132], %391 {strides = array<i32>} : memref<980x256xf32, #tpu.memory_space<vmem>>, vector<20x256xf32>,
    %393 = vector.extract_strided_slice %388 {offsets = [0, 32], sizes = [20, 256], strides = [1, 1]} : vector<20x352xf32> to vector<20x256xf32>
    %c300 = arith.constant 300 : index
    %c0_133 = arith.constant 0 : index
    %394 = vector.load %arg13[%c300, %c0_133] : memref<980x256xf32, #tpu.memory_space<vmem>>, vector<20x256xf32>
    tpu.vector_store %arg13[%c300, %c0_133], %393 {strides = array<i32>} : memref<980x256xf32, #tpu.memory_space<vmem>>, vector<20x256xf32>,
    %395 = vector.extract_strided_slice %388 {offsets = [0, 48], sizes = [20, 256], strides = [1, 1]} : vector<20x352xf32> to vector<20x256xf32>
    %c440 = arith.constant 440 : index
    %c0_134 = arith.constant 0 : index
    %396 = vector.load %arg13[%c440, %c0_134] : memref<980x256xf32, #tpu.memory_space<vmem>>, vector<20x256xf32>
    tpu.vector_store %arg13[%c440, %c0_134], %395 {strides = array<i32>} : memref<980x256xf32, #tpu.memory_space<vmem>>, vector<20x256xf32>,
    %397 = vector.extract_strided_slice %388 {offsets = [0, 64], sizes = [20, 256], strides = [1, 1]} : vector<20x352xf32> to vector<20x256xf32>
    %c580 = arith.constant 580 : index
    %c0_135 = arith.constant 0 : index
    %398 = vector.load %arg13[%c580, %c0_135] : memref<980x256xf32, #tpu.memory_space<vmem>>, vector<20x256xf32>
    tpu.vector_store %arg13[%c580, %c0_135], %397 {strides = array<i32>} : memref<980x256xf32, #tpu.memory_space<vmem>>, vector<20x256xf32>,
    %399 = vector.extract_strided_slice %388 {offsets = [0, 80], sizes = [20, 256], strides = [1, 1]} : vector<20x352xf32> to vector<20x256xf32>
    %c720 = arith.constant 720 : index
    %c0_136 = arith.constant 0 : index
    %400 = vector.load %arg13[%c720, %c0_136] : memref<980x256xf32, #tpu.memory_space<vmem>>, vector<20x256xf32>
    tpu.vector_store %arg13[%c720, %c0_136], %399 {strides = array<i32>} : memref<980x256xf32, #tpu.memory_space<vmem>>, vector<20x256xf32>,
    %401 = vector.extract_strided_slice %388 {offsets = [0, 96], sizes = [20, 256], strides = [1, 1]} : vector<20x352xf32> to vector<20x256xf32>
    %c860 = arith.constant 860 : index
    %c0_137 = arith.constant 0 : index
    %402 = vector.load %arg13[%c860, %c0_137] : memref<980x256xf32, #tpu.memory_space<vmem>>, vector<20x256xf32>
    tpu.vector_store %arg13[%c860, %c0_137], %401 {strides = array<i32>} : memref<980x256xf32, #tpu.memory_space<vmem>>, vector<20x256xf32>,
    %403 = vector.shape_cast %341 : vector<1x256xi1> to vector<1x256xi1>
    %404 = vector.broadcast %403 : vector<1x256xi1> to vector<20x256xi1>
    %405 = arith.select %404, %337, %335 : vector<20x256xi1>, vector<20x256xf32>
    %406 = vector.extract_strided_slice %405 {offsets = [0, 48], sizes = [20, 16], strides = [1, 1]} : vector<20x256xf32> to vector<20x16xf32>
    %407 = vector.extract_strided_slice %405 {offsets = [0, 32], sizes = [20, 16], strides = [1, 1]} : vector<20x256xf32> to vector<20x16xf32>
    %408 = vector.extract_strided_slice %405 {offsets = [0, 16], sizes = [20, 16], strides = [1, 1]} : vector<20x256xf32> to vector<20x16xf32>
    %409 = vector.extract_strided_slice %405 {offsets = [0, 224], sizes = [20, 16], strides = [1, 1]} : vector<20x256xf32> to vector<20x16xf32>
    %410 = vector.extract_strided_slice %405 {offsets = [0, 208], sizes = [20, 16], strides = [1, 1]} : vector<20x256xf32> to vector<20x16xf32>
    %411 = vector.extract_strided_slice %405 {offsets = [0, 192], sizes = [20, 16], strides = [1, 1]} : vector<20x256xf32> to vector<20x16xf32>
    %412 = tpu.concatenate %406, %407, %408, %405, %409, %410, %411 in 1 : vector<20x16xf32>, vector<20x16xf32>, vector<20x16xf32>, vector<20x256xf32>, vector<20x16xf32>, vector<20x16xf32>, vector<20x16xf32> -> vector<20x352xf32>
    %413 = vector.extract_strided_slice %412 {offsets = [0, 0], sizes = [20, 256], strides = [1, 1]} : vector<20x352xf32> to vector<20x256xf32>
    %c40_138 = arith.constant 40 : index
    %c0_139 = arith.constant 0 : index
    %414 = vector.load %arg13[%c40_138, %c0_139] : memref<980x256xf32, #tpu.memory_space<vmem>>, vector<20x256xf32>
    tpu.vector_store %arg13[%c40_138, %c0_139], %413 {strides = array<i32>} : memref<980x256xf32, #tpu.memory_space<vmem>>, vector<20x256xf32>,
    %415 = vector.extract_strided_slice %412 {offsets = [0, 16], sizes = [20, 256], strides = [1, 1]} : vector<20x352xf32> to vector<20x256xf32>
    %c180_140 = arith.constant 180 : index
    %c0_141 = arith.constant 0 : index
    %416 = vector.load %arg13[%c180_140, %c0_141] : memref<980x256xf32, #tpu.memory_space<vmem>>, vector<20x256xf32>
    tpu.vector_store %arg13[%c180_140, %c0_141], %415 {strides = array<i32>} : memref<980x256xf32, #tpu.memory_space<vmem>>, vector<20x256xf32>,
    %417 = vector.extract_strided_slice %412 {offsets = [0, 32], sizes = [20, 256], strides = [1, 1]} : vector<20x352xf32> to vector<20x256xf32>
    %c320 = arith.constant 320 : index
    %c0_142 = arith.constant 0 : index
    %418 = vector.load %arg13[%c320, %c0_142] : memref<980x256xf32, #tpu.memory_space<vmem>>, vector<20x256xf32>
    tpu.vector_store %arg13[%c320, %c0_142], %417 {strides = array<i32>} : memref<980x256xf32, #tpu.memory_space<vmem>>, vector<20x256xf32>,
    %419 = vector.extract_strided_slice %412 {offsets = [0, 48], sizes = [20, 256], strides = [1, 1]} : vector<20x352xf32> to vector<20x256xf32>
    %c460 = arith.constant 460 : index
    %c0_143 = arith.constant 0 : index
    %420 = vector.load %arg13[%c460, %c0_143] : memref<980x256xf32, #tpu.memory_space<vmem>>, vector<20x256xf32>
    tpu.vector_store %arg13[%c460, %c0_143], %419 {strides = array<i32>} : memref<980x256xf32, #tpu.memory_space<vmem>>, vector<20x256xf32>,
    %421 = vector.extract_strided_slice %412 {offsets = [0, 64], sizes = [20, 256], strides = [1, 1]} : vector<20x352xf32> to vector<20x256xf32>
    %c600 = arith.constant 600 : index
    %c0_144 = arith.constant 0 : index
    %422 = vector.load %arg13[%c600, %c0_144] : memref<980x256xf32, #tpu.memory_space<vmem>>, vector<20x256xf32>
    tpu.vector_store %arg13[%c600, %c0_144], %421 {strides = array<i32>} : memref<980x256xf32, #tpu.memory_space<vmem>>, vector<20x256xf32>,
    %423 = vector.extract_strided_slice %412 {offsets = [0, 80], sizes = [20, 256], strides = [1, 1]} : vector<20x352xf32> to vector<20x256xf32>
    %c740 = arith.constant 740 : index
    %c0_145 = arith.constant 0 : index
    %424 = vector.load %arg13[%c740, %c0_145] : memref<980x256xf32, #tpu.memory_space<vmem>>, vector<20x256xf32>
    tpu.vector_store %arg13[%c740, %c0_145], %423 {strides = array<i32>} : memref<980x256xf32, #tpu.memory_space<vmem>>, vector<20x256xf32>,
    %425 = vector.extract_strided_slice %412 {offsets = [0, 96], sizes = [20, 256], strides = [1, 1]} : vector<20x352xf32> to vector<20x256xf32>
    %c880 = arith.constant 880 : index
    %c0_146 = arith.constant 0 : index
    %426 = vector.load %arg13[%c880, %c0_146] : memref<980x256xf32, #tpu.memory_space<vmem>>, vector<20x256xf32>
    tpu.vector_store %arg13[%c880, %c0_146], %425 {strides = array<i32>} : memref<980x256xf32, #tpu.memory_space<vmem>>, vector<20x256xf32>,
    %427 = vector.extract_strided_slice %336 {offsets = [0, 48], sizes = [20, 16], strides = [1, 1]} : vector<20x256xf32> to vector<20x16xf32>
    %428 = vector.extract_strided_slice %336 {offsets = [0, 32], sizes = [20, 16], strides = [1, 1]} : vector<20x256xf32> to vector<20x16xf32>
    %429 = vector.extract_strided_slice %336 {offsets = [0, 16], sizes = [20, 16], strides = [1, 1]} : vector<20x256xf32> to vector<20x16xf32>
    %430 = vector.extract_strided_slice %336 {offsets = [0, 224], sizes = [20, 16], strides = [1, 1]} : vector<20x256xf32> to vector<20x16xf32>
    %431 = vector.extract_strided_slice %336 {offsets = [0, 208], sizes = [20, 16], strides = [1, 1]} : vector<20x256xf32> to vector<20x16xf32>
    %432 = vector.extract_strided_slice %336 {offsets = [0, 192], sizes = [20, 16], strides = [1, 1]} : vector<20x256xf32> to vector<20x16xf32>
    %433 = tpu.concatenate %427, %428, %429, %336, %430, %431, %432 in 1 : vector<20x16xf32>, vector<20x16xf32>, vector<20x16xf32>, vector<20x256xf32>, vector<20x16xf32>, vector<20x16xf32>, vector<20x16xf32> -> vector<20x352xf32>
    %434 = vector.extract_strided_slice %433 {offsets = [0, 0], sizes = [20, 256], strides = [1, 1]} : vector<20x352xf32> to vector<20x256xf32>
    %c60_147 = arith.constant 60 : index
    %c0_148 = arith.constant 0 : index
    %435 = vector.load %arg13[%c60_147, %c0_148] : memref<980x256xf32, #tpu.memory_space<vmem>>, vector<20x256xf32>
    tpu.vector_store %arg13[%c60_147, %c0_148], %434 {strides = array<i32>} : memref<980x256xf32, #tpu.memory_space<vmem>>, vector<20x256xf32>,
    %436 = vector.extract_strided_slice %433 {offsets = [0, 16], sizes = [20, 256], strides = [1, 1]} : vector<20x352xf32> to vector<20x256xf32>
    %c200 = arith.constant 200 : index
    %c0_149 = arith.constant 0 : index
    %437 = vector.load %arg13[%c200, %c0_149] : memref<980x256xf32, #tpu.memory_space<vmem>>, vector<20x256xf32>
    tpu.vector_store %arg13[%c200, %c0_149], %436 {strides = array<i32>} : memref<980x256xf32, #tpu.memory_space<vmem>>, vector<20x256xf32>,
    %438 = vector.extract_strided_slice %433 {offsets = [0, 32], sizes = [20, 256], strides = [1, 1]} : vector<20x352xf32> to vector<20x256xf32>
    %c340 = arith.constant 340 : index
    %c0_150 = arith.constant 0 : index
    %439 = vector.load %arg13[%c340, %c0_150] : memref<980x256xf32, #tpu.memory_space<vmem>>, vector<20x256xf32>
    tpu.vector_store %arg13[%c340, %c0_150], %438 {strides = array<i32>} : memref<980x256xf32, #tpu.memory_space<vmem>>, vector<20x256xf32>,
    %440 = vector.extract_strided_slice %433 {offsets = [0, 48], sizes = [20, 256], strides = [1, 1]} : vector<20x352xf32> to vector<20x256xf32>
    %c480 = arith.constant 480 : index
    %c0_151 = arith.constant 0 : index
    %441 = vector.load %arg13[%c480, %c0_151] : memref<980x256xf32, #tpu.memory_space<vmem>>, vector<20x256xf32>
    tpu.vector_store %arg13[%c480, %c0_151], %440 {strides = array<i32>} : memref<980x256xf32, #tpu.memory_space<vmem>>, vector<20x256xf32>,
    %442 = vector.extract_strided_slice %433 {offsets = [0, 64], sizes = [20, 256], strides = [1, 1]} : vector<20x352xf32> to vector<20x256xf32>
    %c620 = arith.constant 620 : index
    %c0_152 = arith.constant 0 : index
    %443 = vector.load %arg13[%c620, %c0_152] : memref<980x256xf32, #tpu.memory_space<vmem>>, vector<20x256xf32>
    tpu.vector_store %arg13[%c620, %c0_152], %442 {strides = array<i32>} : memref<980x256xf32, #tpu.memory_space<vmem>>, vector<20x256xf32>,
    %444 = vector.extract_strided_slice %433 {offsets = [0, 80], sizes = [20, 256], strides = [1, 1]} : vector<20x352xf32> to vector<20x256xf32>
    %c760 = arith.constant 760 : index
    %c0_153 = arith.constant 0 : index
    %445 = vector.load %arg13[%c760, %c0_153] : memref<980x256xf32, #tpu.memory_space<vmem>>, vector<20x256xf32>
    tpu.vector_store %arg13[%c760, %c0_153], %444 {strides = array<i32>} : memref<980x256xf32, #tpu.memory_space<vmem>>, vector<20x256xf32>,
    %446 = vector.extract_strided_slice %433 {offsets = [0, 96], sizes = [20, 256], strides = [1, 1]} : vector<20x352xf32> to vector<20x256xf32>
    %c900 = arith.constant 900 : index
    %c0_154 = arith.constant 0 : index
    %447 = vector.load %arg13[%c900, %c0_154] : memref<980x256xf32, #tpu.memory_space<vmem>>, vector<20x256xf32>
    tpu.vector_store %arg13[%c900, %c0_154], %446 {strides = array<i32>} : memref<980x256xf32, #tpu.memory_space<vmem>>, vector<20x256xf32>,
    %c15_i32 = arith.constant 15 : i32
    %448 = vector.broadcast %c15_i32 : i32 to vector<1x256xi32>
    %449 = arith.cmpi eq, %16, %448 : vector<1x256xi32>
    %450 = vector.shape_cast %449 : vector<1x256xi1> to vector<1x256xi1>
    %451 = vector.broadcast %450 : vector<1x256xi1> to vector<20x256xi1>
    %452 = arith.select %451, %335, %337 : vector<20x256xi1>, vector<20x256xf32>
    %453 = vector.extract_strided_slice %452 {offsets = [0, 48], sizes = [20, 16], strides = [1, 1]} : vector<20x256xf32> to vector<20x16xf32>
    %454 = vector.extract_strided_slice %452 {offsets = [0, 32], sizes = [20, 16], strides = [1, 1]} : vector<20x256xf32> to vector<20x16xf32>
    %455 = vector.extract_strided_slice %452 {offsets = [0, 16], sizes = [20, 16], strides = [1, 1]} : vector<20x256xf32> to vector<20x16xf32>
    %456 = vector.extract_strided_slice %452 {offsets = [0, 224], sizes = [20, 16], strides = [1, 1]} : vector<20x256xf32> to vector<20x16xf32>
    %457 = vector.extract_strided_slice %452 {offsets = [0, 208], sizes = [20, 16], strides = [1, 1]} : vector<20x256xf32> to vector<20x16xf32>
    %458 = vector.extract_strided_slice %452 {offsets = [0, 192], sizes = [20, 16], strides = [1, 1]} : vector<20x256xf32> to vector<20x16xf32>
    %459 = tpu.concatenate %453, %454, %455, %452, %456, %457, %458 in 1 : vector<20x16xf32>, vector<20x16xf32>, vector<20x16xf32>, vector<20x256xf32>, vector<20x16xf32>, vector<20x16xf32>, vector<20x16xf32> -> vector<20x352xf32>
    %460 = vector.extract_strided_slice %459 {offsets = [0, 0], sizes = [20, 256], strides = [1, 1]} : vector<20x352xf32> to vector<20x256xf32>
    %c80_155 = arith.constant 80 : index
    %c0_156 = arith.constant 0 : index
    %461 = vector.load %arg13[%c80_155, %c0_156] : memref<980x256xf32, #tpu.memory_space<vmem>>, vector<20x256xf32>
    tpu.vector_store %arg13[%c80_155, %c0_156], %460 {strides = array<i32>} : memref<980x256xf32, #tpu.memory_space<vmem>>, vector<20x256xf32>,
    %462 = vector.extract_strided_slice %459 {offsets = [0, 16], sizes = [20, 256], strides = [1, 1]} : vector<20x352xf32> to vector<20x256xf32>
    %c220 = arith.constant 220 : index
    %c0_157 = arith.constant 0 : index
    %463 = vector.load %arg13[%c220, %c0_157] : memref<980x256xf32, #tpu.memory_space<vmem>>, vector<20x256xf32>
    tpu.vector_store %arg13[%c220, %c0_157], %462 {strides = array<i32>} : memref<980x256xf32, #tpu.memory_space<vmem>>, vector<20x256xf32>,
    %464 = vector.extract_strided_slice %459 {offsets = [0, 32], sizes = [20, 256], strides = [1, 1]} : vector<20x352xf32> to vector<20x256xf32>
    %c360 = arith.constant 360 : index
    %c0_158 = arith.constant 0 : index
    %465 = vector.load %arg13[%c360, %c0_158] : memref<980x256xf32, #tpu.memory_space<vmem>>, vector<20x256xf32>
    tpu.vector_store %arg13[%c360, %c0_158], %464 {strides = array<i32>} : memref<980x256xf32, #tpu.memory_space<vmem>>, vector<20x256xf32>,
    %466 = vector.extract_strided_slice %459 {offsets = [0, 48], sizes = [20, 256], strides = [1, 1]} : vector<20x352xf32> to vector<20x256xf32>
    %c500 = arith.constant 500 : index
    %c0_159 = arith.constant 0 : index
    %467 = vector.load %arg13[%c500, %c0_159] : memref<980x256xf32, #tpu.memory_space<vmem>>, vector<20x256xf32>
    tpu.vector_store %arg13[%c500, %c0_159], %466 {strides = array<i32>} : memref<980x256xf32, #tpu.memory_space<vmem>>, vector<20x256xf32>,
    %468 = vector.extract_strided_slice %459 {offsets = [0, 64], sizes = [20, 256], strides = [1, 1]} : vector<20x352xf32> to vector<20x256xf32>
    %c640 = arith.constant 640 : index
    %c0_160 = arith.constant 0 : index
    %469 = vector.load %arg13[%c640, %c0_160] : memref<980x256xf32, #tpu.memory_space<vmem>>, vector<20x256xf32>
    tpu.vector_store %arg13[%c640, %c0_160], %468 {strides = array<i32>} : memref<980x256xf32, #tpu.memory_space<vmem>>, vector<20x256xf32>,
    %470 = vector.extract_strided_slice %459 {offsets = [0, 80], sizes = [20, 256], strides = [1, 1]} : vector<20x352xf32> to vector<20x256xf32>
    %c780 = arith.constant 780 : index
    %c0_161 = arith.constant 0 : index
    %471 = vector.load %arg13[%c780, %c0_161] : memref<980x256xf32, #tpu.memory_space<vmem>>, vector<20x256xf32>
    tpu.vector_store %arg13[%c780, %c0_161], %470 {strides = array<i32>} : memref<980x256xf32, #tpu.memory_space<vmem>>, vector<20x256xf32>,
    %472 = vector.extract_strided_slice %459 {offsets = [0, 96], sizes = [20, 256], strides = [1, 1]} : vector<20x352xf32> to vector<20x256xf32>
    %c920 = arith.constant 920 : index
    %c0_162 = arith.constant 0 : index
    %473 = vector.load %arg13[%c920, %c0_162] : memref<980x256xf32, #tpu.memory_space<vmem>>, vector<20x256xf32>
    tpu.vector_store %arg13[%c920, %c0_162], %472 {strides = array<i32>} : memref<980x256xf32, #tpu.memory_space<vmem>>, vector<20x256xf32>,
    %c14_i32 = arith.constant 14 : i32
    %474 = vector.broadcast %c14_i32 : i32 to vector<1x256xi32>
    %475 = arith.cmpi eq, %16, %474 : vector<1x256xi32>
    %476 = vector.shape_cast %475 : vector<1x256xi1> to vector<1x256xi1>
    %477 = vector.broadcast %476 : vector<1x256xi1> to vector<20x256xi1>
    %478 = arith.select %477, %336, %338 : vector<20x256xi1>, vector<20x256xf32>
    %479 = vector.shape_cast %449 : vector<1x256xi1> to vector<1x256xi1>
    %480 = vector.broadcast %479 : vector<1x256xi1> to vector<20x256xi1>
    %481 = arith.select %480, %334, %478 : vector<20x256xi1>, vector<20x256xf32>
    %482 = vector.extract_strided_slice %481 {offsets = [0, 48], sizes = [20, 16], strides = [1, 1]} : vector<20x256xf32> to vector<20x16xf32>
    %483 = vector.extract_strided_slice %481 {offsets = [0, 32], sizes = [20, 16], strides = [1, 1]} : vector<20x256xf32> to vector<20x16xf32>
    %484 = vector.extract_strided_slice %481 {offsets = [0, 16], sizes = [20, 16], strides = [1, 1]} : vector<20x256xf32> to vector<20x16xf32>
    %485 = vector.extract_strided_slice %481 {offsets = [0, 224], sizes = [20, 16], strides = [1, 1]} : vector<20x256xf32> to vector<20x16xf32>
    %486 = vector.extract_strided_slice %481 {offsets = [0, 208], sizes = [20, 16], strides = [1, 1]} : vector<20x256xf32> to vector<20x16xf32>
    %487 = vector.extract_strided_slice %481 {offsets = [0, 192], sizes = [20, 16], strides = [1, 1]} : vector<20x256xf32> to vector<20x16xf32>
    %488 = tpu.concatenate %482, %483, %484, %481, %485, %486, %487 in 1 : vector<20x16xf32>, vector<20x16xf32>, vector<20x16xf32>, vector<20x256xf32>, vector<20x16xf32>, vector<20x16xf32>, vector<20x16xf32> -> vector<20x352xf32>
    %489 = vector.extract_strided_slice %488 {offsets = [0, 0], sizes = [20, 256], strides = [1, 1]} : vector<20x352xf32> to vector<20x256xf32>
    %c100_163 = arith.constant 100 : index
    %c0_164 = arith.constant 0 : index
    %490 = vector.load %arg13[%c100_163, %c0_164] : memref<980x256xf32, #tpu.memory_space<vmem>>, vector<20x256xf32>
    tpu.vector_store %arg13[%c100_163, %c0_164], %489 {strides = array<i32>} : memref<980x256xf32, #tpu.memory_space<vmem>>, vector<20x256xf32>,
    %491 = vector.extract_strided_slice %488 {offsets = [0, 16], sizes = [20, 256], strides = [1, 1]} : vector<20x352xf32> to vector<20x256xf32>
    %c240 = arith.constant 240 : index
    %c0_165 = arith.constant 0 : index
    %492 = vector.load %arg13[%c240, %c0_165] : memref<980x256xf32, #tpu.memory_space<vmem>>, vector<20x256xf32>
    tpu.vector_store %arg13[%c240, %c0_165], %491 {strides = array<i32>} : memref<980x256xf32, #tpu.memory_space<vmem>>, vector<20x256xf32>,
    %493 = vector.extract_strided_slice %488 {offsets = [0, 32], sizes = [20, 256], strides = [1, 1]} : vector<20x352xf32> to vector<20x256xf32>
    %c380 = arith.constant 380 : index
    %c0_166 = arith.constant 0 : index
    %494 = vector.load %arg13[%c380, %c0_166] : memref<980x256xf32, #tpu.memory_space<vmem>>, vector<20x256xf32>
    tpu.vector_store %arg13[%c380, %c0_166], %493 {strides = array<i32>} : memref<980x256xf32, #tpu.memory_space<vmem>>, vector<20x256xf32>,
    %495 = vector.extract_strided_slice %488 {offsets = [0, 48], sizes = [20, 256], strides = [1, 1]} : vector<20x352xf32> to vector<20x256xf32>
    %c520 = arith.constant 520 : index
    %c0_167 = arith.constant 0 : index
    %496 = vector.load %arg13[%c520, %c0_167] : memref<980x256xf32, #tpu.memory_space<vmem>>, vector<20x256xf32>
    tpu.vector_store %arg13[%c520, %c0_167], %495 {strides = array<i32>} : memref<980x256xf32, #tpu.memory_space<vmem>>, vector<20x256xf32>,
    %497 = vector.extract_strided_slice %488 {offsets = [0, 64], sizes = [20, 256], strides = [1, 1]} : vector<20x352xf32> to vector<20x256xf32>
    %c660 = arith.constant 660 : index
    %c0_168 = arith.constant 0 : index
    %498 = vector.load %arg13[%c660, %c0_168] : memref<980x256xf32, #tpu.memory_space<vmem>>, vector<20x256xf32>
    tpu.vector_store %arg13[%c660, %c0_168], %497 {strides = array<i32>} : memref<980x256xf32, #tpu.memory_space<vmem>>, vector<20x256xf32>,
    %499 = vector.extract_strided_slice %488 {offsets = [0, 80], sizes = [20, 256], strides = [1, 1]} : vector<20x352xf32> to vector<20x256xf32>
    %c800 = arith.constant 800 : index
    %c0_169 = arith.constant 0 : index
    %500 = vector.load %arg13[%c800, %c0_169] : memref<980x256xf32, #tpu.memory_space<vmem>>, vector<20x256xf32>
    tpu.vector_store %arg13[%c800, %c0_169], %499 {strides = array<i32>} : memref<980x256xf32, #tpu.memory_space<vmem>>, vector<20x256xf32>,
    %501 = vector.extract_strided_slice %488 {offsets = [0, 96], sizes = [20, 256], strides = [1, 1]} : vector<20x352xf32> to vector<20x256xf32>
    %c940 = arith.constant 940 : index
    %c0_170 = arith.constant 0 : index
    %502 = vector.load %arg13[%c940, %c0_170] : memref<980x256xf32, #tpu.memory_space<vmem>>, vector<20x256xf32>
    tpu.vector_store %arg13[%c940, %c0_170], %501 {strides = array<i32>} : memref<980x256xf32, #tpu.memory_space<vmem>>, vector<20x256xf32>,
    %c13_i32 = arith.constant 13 : i32
    %503 = vector.broadcast %c13_i32 : i32 to vector<1x256xi32>
    %504 = arith.cmpi eq, %16, %503 : vector<1x256xi32>
    %505 = vector.shape_cast %504 : vector<1x256xi1> to vector<1x256xi1>
    %506 = vector.broadcast %505 : vector<1x256xi1> to vector<20x256xi1>
    %507 = arith.select %506, %337, %339 : vector<20x256xi1>, vector<20x256xf32>
    %508 = vector.shape_cast %475 : vector<1x256xi1> to vector<1x256xi1>
    %509 = vector.broadcast %508 : vector<1x256xi1> to vector<20x256xi1>
    %510 = arith.select %509, %335, %507 : vector<20x256xi1>, vector<20x256xf32>
    %511 = vector.shape_cast %449 : vector<1x256xi1> to vector<1x256xi1>
    %512 = vector.broadcast %511 : vector<1x256xi1> to vector<20x256xi1>
    %513 = arith.select %512, %333, %510 : vector<20x256xi1>, vector<20x256xf32>
    %514 = vector.extract_strided_slice %513 {offsets = [0, 48], sizes = [20, 16], strides = [1, 1]} : vector<20x256xf32> to vector<20x16xf32>
    %515 = vector.extract_strided_slice %513 {offsets = [0, 32], sizes = [20, 16], strides = [1, 1]} : vector<20x256xf32> to vector<20x16xf32>
    %516 = vector.extract_strided_slice %513 {offsets = [0, 16], sizes = [20, 16], strides = [1, 1]} : vector<20x256xf32> to vector<20x16xf32>
    %517 = vector.extract_strided_slice %513 {offsets = [0, 224], sizes = [20, 16], strides = [1, 1]} : vector<20x256xf32> to vector<20x16xf32>
    %518 = vector.extract_strided_slice %513 {offsets = [0, 208], sizes = [20, 16], strides = [1, 1]} : vector<20x256xf32> to vector<20x16xf32>
    %519 = vector.extract_strided_slice %513 {offsets = [0, 192], sizes = [20, 16], strides = [1, 1]} : vector<20x256xf32> to vector<20x16xf32>
    %520 = tpu.concatenate %514, %515, %516, %513, %517, %518, %519 in 1 : vector<20x16xf32>, vector<20x16xf32>, vector<20x16xf32>, vector<20x256xf32>, vector<20x16xf32>, vector<20x16xf32>, vector<20x16xf32> -> vector<20x352xf32>
    %521 = vector.extract_strided_slice %520 {offsets = [0, 0], sizes = [20, 256], strides = [1, 1]} : vector<20x352xf32> to vector<20x256xf32>
    %c120_171 = arith.constant 120 : index
    %c0_172 = arith.constant 0 : index
    %522 = vector.load %arg13[%c120_171, %c0_172] : memref<980x256xf32, #tpu.memory_space<vmem>>, vector<20x256xf32>
    tpu.vector_store %arg13[%c120_171, %c0_172], %521 {strides = array<i32>} : memref<980x256xf32, #tpu.memory_space<vmem>>, vector<20x256xf32>,
    %523 = vector.extract_strided_slice %520 {offsets = [0, 16], sizes = [20, 256], strides = [1, 1]} : vector<20x352xf32> to vector<20x256xf32>
    %c260 = arith.constant 260 : index
    %c0_173 = arith.constant 0 : index
    %524 = vector.load %arg13[%c260, %c0_173] : memref<980x256xf32, #tpu.memory_space<vmem>>, vector<20x256xf32>
    tpu.vector_store %arg13[%c260, %c0_173], %523 {strides = array<i32>} : memref<980x256xf32, #tpu.memory_space<vmem>>, vector<20x256xf32>,
    %525 = vector.extract_strided_slice %520 {offsets = [0, 32], sizes = [20, 256], strides = [1, 1]} : vector<20x352xf32> to vector<20x256xf32>
    %c400 = arith.constant 400 : index
    %c0_174 = arith.constant 0 : index
    %526 = vector.load %arg13[%c400, %c0_174] : memref<980x256xf32, #tpu.memory_space<vmem>>, vector<20x256xf32>
    tpu.vector_store %arg13[%c400, %c0_174], %525 {strides = array<i32>} : memref<980x256xf32, #tpu.memory_space<vmem>>, vector<20x256xf32>,
    %527 = vector.extract_strided_slice %520 {offsets = [0, 48], sizes = [20, 256], strides = [1, 1]} : vector<20x352xf32> to vector<20x256xf32>
    %c540 = arith.constant 540 : index
    %c0_175 = arith.constant 0 : index
    %528 = vector.load %arg13[%c540, %c0_175] : memref<980x256xf32, #tpu.memory_space<vmem>>, vector<20x256xf32>
    tpu.vector_store %arg13[%c540, %c0_175], %527 {strides = array<i32>} : memref<980x256xf32, #tpu.memory_space<vmem>>, vector<20x256xf32>,
    %529 = vector.extract_strided_slice %520 {offsets = [0, 64], sizes = [20, 256], strides = [1, 1]} : vector<20x352xf32> to vector<20x256xf32>
    %c680 = arith.constant 680 : index
    %c0_176 = arith.constant 0 : index
    %530 = vector.load %arg13[%c680, %c0_176] : memref<980x256xf32, #tpu.memory_space<vmem>>, vector<20x256xf32>
    tpu.vector_store %arg13[%c680, %c0_176], %529 {strides = array<i32>} : memref<980x256xf32, #tpu.memory_space<vmem>>, vector<20x256xf32>,
    %531 = vector.extract_strided_slice %520 {offsets = [0, 80], sizes = [20, 256], strides = [1, 1]} : vector<20x352xf32> to vector<20x256xf32>
    %c820 = arith.constant 820 : index
    %c0_177 = arith.constant 0 : index
    %532 = vector.load %arg13[%c820, %c0_177] : memref<980x256xf32, #tpu.memory_space<vmem>>, vector<20x256xf32>
    tpu.vector_store %arg13[%c820, %c0_177], %531 {strides = array<i32>} : memref<980x256xf32, #tpu.memory_space<vmem>>, vector<20x256xf32>,
    %533 = vector.extract_strided_slice %520 {offsets = [0, 96], sizes = [20, 256], strides = [1, 1]} : vector<20x352xf32> to vector<20x256xf32>
    %c960 = arith.constant 960 : index
    %c0_178 = arith.constant 0 : index
    %534 = vector.load %arg13[%c960, %c0_178] : memref<980x256xf32, #tpu.memory_space<vmem>>, vector<20x256xf32>
    tpu.vector_store %arg13[%c960, %c0_178], %533 {strides = array<i32>} : memref<980x256xf32, #tpu.memory_space<vmem>>, vector<20x256xf32>,
    %c0_179 = arith.constant 0 : index
    %c0_180 = arith.constant 0 : index
    %535 = vector.load %arg8[%c0_179, %c0_180] : memref<6x980xf32, #tpu.memory_space<vmem>>, vector<6x980xf32>
    %c0_181 = arith.constant 0 : index
    %c0_182 = arith.constant 0 : index
    %536 = vector.load %arg13[%c0_181, %c0_182] : memref<980x256xf32, #tpu.memory_space<vmem>>, vector<980x256xf32>
    %cst_183 = arith.constant dense<0.000000e+00> : vector<6x256xf32>
    %537 = tpu.matmul %535, %536, %cst_183 {dimension_numbers = #tpu.dot_dimension_numbers<[1], [0], [0], [1], [0, 0, 1, 1], [], []>} : vector<6x980xf32>, vector<980x256xf32>, vector<6x256xf32> -> vector<6x256xf32>
    %c0_184 = arith.constant 0 : index
    %c0_185 = arith.constant 0 : index
    %538 = vector.load %arg9[%c0_184, %c0_185] : memref<6x1xf32, #tpu.memory_space<vmem>>, vector<6x1xf32>
    %539 = vector.broadcast %538 : vector<6x1xf32> to vector<6x256xf32>
    %540 = arith.addf %537, %539 : vector<6x256xf32>
    %541 = vector.extract_strided_slice %540 {offsets = [0, 0], sizes = [3, 256], strides = [1, 1]} : vector<6x256xf32> to vector<3x256xf32>
    %c0_186 = arith.constant 0 : index
    %c0_187 = arith.constant 0 : index
    %c0_188 = arith.constant 0 : index
    %542 = vector.load %arg10[%c0_186, %c0_187, %c0_188] : memref<1x3x256xf32, #tpu.memory_space<vmem>>, vector<1x3x256xf32>
    %543 = vector.shape_cast %542 : vector<1x3x256xf32> to vector<3x256xf32>
    %544 = vector.shape_cast %541 : vector<3x256xf32> to vector<1x3x256xf32>
    tpu.vector_store %arg10[%c0_186, %c0_187, %c0_188], %544 {strides = array<i32>} : memref<1x3x256xf32, #tpu.memory_space<vmem>>, vector<1x3x256xf32>,
    %545 = vector.extract_strided_slice %540 {offsets = [3, 0], sizes = [3, 256], strides = [1, 1]} : vector<6x256xf32> to vector<3x256xf32>
    %c0_189 = arith.constant 0 : index
    %c0_190 = arith.constant 0 : index
    %c0_191 = arith.constant 0 : index
    %546 = vector.load %arg11[%c0_189, %c0_190, %c0_191] : memref<1x3x256xf32, #tpu.memory_space<vmem>>, vector<1x3x256xf32>
    %547 = vector.shape_cast %546 : vector<1x3x256xf32> to vector<3x256xf32>
    %548 = vector.shape_cast %545 : vector<3x256xf32> to vector<1x3x256xf32>
    tpu.vector_store %arg11[%c0_189, %c0_190, %c0_191], %548 {strides = array<i32>} : memref<1x3x256xf32, #tpu.memory_space<vmem>>, vector<1x3x256xf32>,
    return
  }
  func.func @transform_0(%arg0: i32) -> (i32, i32, i32) {
    %c0_i32 = arith.constant 0 : i32
    %c0_i32_0 = arith.constant 0 : i32
    %c0_i32_1 = arith.constant 0 : i32
    return %arg0, %c0_i32, %c0_i32_0 : i32, i32, i32
  }
  func.func @transform_1(%arg0: i32) -> (i32, i32) {
    %c0_i32 = arith.constant 0 : i32
    %c0_i32_0 = arith.constant 0 : i32
    %c0_i32_1 = arith.constant 0 : i32
    return %c0_i32, %c0_i32_0 : i32, i32
  }
  func.func @transform_2(%arg0: i32) -> (i32, i32) {
    %c0_i32 = arith.constant 0 : i32
    %c0_i32_0 = arith.constant 0 : i32
    %c0_i32_1 = arith.constant 0 : i32
    return %c0_i32, %c0_i32_0 : i32, i32
  }
  func.func @transform_3(%arg0: i32) -> (i32, i32) {
    %c0_i32 = arith.constant 0 : i32
    %c0_i32_0 = arith.constant 0 : i32
    %c0_i32_1 = arith.constant 0 : i32
    return %c0_i32, %c0_i32_0 : i32, i32
  }
  func.func @transform_4(%arg0: i32) -> (i32, i32) {
    %c0_i32 = arith.constant 0 : i32
    %c0_i32_0 = arith.constant 0 : i32
    %c0_i32_1 = arith.constant 0 : i32
    return %c0_i32, %c0_i32_0 : i32, i32
  }
  func.func @transform_5(%arg0: i32) -> (i32, i32) {
    %c0_i32 = arith.constant 0 : i32
    %c0_i32_0 = arith.constant 0 : i32
    %c0_i32_1 = arith.constant 0 : i32
    return %c0_i32, %c0_i32_0 : i32, i32
  }
  func.func @transform_6(%arg0: i32) -> (i32, i32) {
    %c0_i32 = arith.constant 0 : i32
    %c0_i32_0 = arith.constant 0 : i32
    %c0_i32_1 = arith.constant 0 : i32
    return %c0_i32, %c0_i32_0 : i32, i32
  }
  func.func @transform_7(%arg0: i32) -> (i32, i32) {
    %c0_i32 = arith.constant 0 : i32
    %c0_i32_0 = arith.constant 0 : i32
    %c0_i32_1 = arith.constant 0 : i32
    return %c0_i32, %c0_i32_0 : i32, i32
  }
  func.func @transform_8(%arg0: i32) -> (i32, i32) {
    %c0_i32 = arith.constant 0 : i32
    %c0_i32_0 = arith.constant 0 : i32
    %c0_i32_1 = arith.constant 0 : i32
    return %c0_i32, %c0_i32_0 : i32, i32
  }
  func.func @transform_9(%arg0: i32) -> (i32, i32, i32) {
    %c0_i32 = arith.constant 0 : i32
    %c0_i32_0 = arith.constant 0 : i32
    %c0_i32_1 = arith.constant 0 : i32
    return %arg0, %c0_i32, %c0_i32_0 : i32, i32, i32
  }
  func.func @transform_10(%arg0: i32) -> (i32, i32, i32) {
    %c0_i32 = arith.constant 0 : i32
    %c0_i32_0 = arith.constant 0 : i32
    %c0_i32_1 = arith.constant 0 : i32
    return %arg0, %c0_i32, %c0_i32_0 : i32, i32, i32
  }
}

</mosaic_0001>

<bundles_post_ra>
// kernel: mscheadv4_forward.1
= control target key start
LH: loop header
LB: loop body
LE: loop exit
PB: predicated region body
PF: predicated region fallthrough
CT: control target
= control target key end

     0   :  { %s5249_s13 = smov 0   ;;  %s8884_s0 = inlined_call_operand.vmem [shape: f32[2,4,256], index: 0, kind: input, shape index: {}]   ;;  %s8885_s1 = inlined_call_operand.vmem [shape: f32[16,196], index: 1, kind: input, shape index: {}]   ;;  %s8886_s2 = inlined_call_operand.vmem [shape: f32[16,1], index: 2, kind: input, shape index: {}]   ;;  %s8887_s3 = inlined_call_operand.vmem [shape: f32[8,4], index: 3, kind: input, shape index: {}]   ;;  %s8888_s4 = inlined_call_operand.vmem [shape: f32[8,1], index: 4, kind: input, shape index: {}]   ;;  %s8889_s5 = inlined_call_operand.vmem [shape: f32[8,1], index: 5, kind: input, shape index: {}]   ;;  %s8890_s6 = inlined_call_operand.vmem [shape: f32[16,8], index: 6, kind: input, shape index: {}]   ;;  %s8891_s7 = inlined_call_operand.vmem [shape: f32[6,980], index: 7, kind: input, shape index: {}]   ;;  %s8892_s8 = inlined_call_operand.vmem [shape: f32[6,1], index: 8, kind: input, shape index: {}]   ;;  %s8893_s9 = inlined_call_operand.vmem [shape: f32[2,3,256], index: 9, kind: output, shape index: {0}]   ;;  %s8894_s10 = inlined_call_operand.vmem [shape: f32[2,3,256], index: 10, kind: output, shape index: {1}]  }
   0x1 LB: > { %s5075_s14 = sadd.s32 4294967295, %s5166_s13   ;;  %p5079_p0 = scmp.ge.s32.totalorder %s5166_s13, 1  ;;  %s5166_s13 = sphi %s5249_s13, %s21_s13  }
   0x2   : > { %p315_p1 = scmp.lt.s32.totalorder %s5166_s13, 3 }
   0x4   : > { %p316_p2 = pnand %p5079_p0, %p315_p1 }
   0x6   : > { %319 = sbr.rel (%p316_p2) target bundleno = 3268 (0xcc4), region = 56 }
   0xb   : > { %p358_p3 = scmp.lt.s32.totalorder %s5075_s14, 1  ;;  %v1258_v0 = vld [vmem:[%s8886_s2 + $0x8] sm:$0xff]  ;;  %v5168_v1 = vmov 0   ;;  %s5169_s21 = smov 3   ;;  %v1257_v4 = vld [vmem:[%s8886_s2] sm:$0xff]  ;;  %v373_v5 = vlaneseq  ;;  %vm8897_vm0 = vcmask 23552  }
   0xc   : > { %5134 = vset.pattern.permute.xlu1 %v5168_v1  ;;  %5133 = vset.pattern.permute.xlu0 %v5168_v1  ;;  %s5170_s24 = smov 126   ;;  %s5171_s25 = smov 127   ;;  %vm8904_vm3 = vcmask 392192   ;;  %vm8976_vm4 = vcmask 367616   ;;  %vm577_vm5 = vcmask 1039360   ;;  %vm686_vm7 = vcmask 1031168  }
   0xd   : > { %s9464_s14 = smov (!%p358_p3, %s5075_s14), 1  ;;  %1266 = vperm.xlu1 %5134, %v1258_v0   ;;  %v374_v6 = vand.u32 127, %v373_v5  ;;  %s5172_s26 = smov 124   ;;  %vm8905_vm9 = vcmask 1014784   ;;  %vm8912_vm12 = vcmask 1006592   ;;  %vm8903_vm15 = vcmask 998400  }
   0xe   : > { %s5260_s17 = sshll.u32 %s9464_s14, 3  ;;  %s8929_s27 = smov 45  }
   0xf   : > { %s362_s20 = scalar_lea.vmem %s8884_s0, %s5260_s17  ;;  %v5275_v9 = vand.u32 15, %v374_v6  ;;  %s5174_s28 = smov 122   ;;  %v375_v15 = vadd.s32 128, %v374_v6 }
  0x10   : > { %v448_v2 = vld [vmem:[%s362_s20] sm:$0xff]  ;;  %s5175_s29 = smov 123   ;;  %s5176_s30 = smov 48  }
  0x11   : > { %451 = vrot.lane.b32.xlu0 %v448_v2, %s5169_s21  ;;  %v450_v3 = vcombine.high %v448_v2, %v448_v2  ;;  %8988 = vst [vmem:[#allocation4_spill] sm:$0xff] %v5275_v9  ;;  %v400_v10 = vadd.s32 4294967293, %v5275_v9  ;;  %v5294_v16 = vand.u32 15, %v375_v15  ;;  %s5177_s11 = smov 112   ;;  %s5178_s12 = smov 80   ;;  %v408_v43 = vadd.s32 4294967294, %v5275_v9 }
  0x12   : > { %s5179_s14 = smov 96   ;;  %s5180_s15 = smov 64   ;;  %v416_v57 = vadd.s32 4294967295, %v5275_v9  ;;  %v432_v60 = vadd.s32 2, %v5275_v9  ;;  %v424_v0 = vadd.s32 1, %v5275_v9  ;;  %v440_v15 = vadd.s32 3, %v5275_v9 }
  0x13   : > { %vm402_vm1 = vcmp.ge.s32.totalorder %v400_v10, 0  ;;  %8989 = vst [vmem:[#allocation5_spill] sm:$0xff] %v5294_v16  ;;  %v401_v17 = vadd.s32 4294967293, %v5294_v16  ;;  %s8895_s16 = smov 32   ;;  %vm410_vm6 = vcmp.ge.s32.totalorder %v408_v43, 0  ;;  %v417_v46 = vadd.s32 4294967295, %v5294_v16 }
  0x14   : > { %v409_v55 = vadd.s32 4294967294, %v5294_v16  ;;  %v425_v56 = vadd.s32 1, %v5294_v16  ;;  %vm418_vm13 = vcmp.ge.s32.totalorder %v416_v57, 0  ;;  %vm436_vm14 = vcmp.lt.s32.totalorder %v432_v60, 16  ;;  %s8935_s20 = smov 77   ;;  %s8933_s22 = smov 109  }
  0x15   : > { %453 = vrot.lane.b32.xlu0 %v450_v3, %s5169_s21  ;;  %vm403_vm2 = vcmp.ge.s32.totalorder %v401_v17, 0  ;;  %vm419_vm8 = vcmp.ge.s32.totalorder %v417_v46, 0  ;;  %v441_v3 = vadd.s32 3, %v5294_v16  ;;  %s8931_s23 = smov 13   ;;  %s5186_s18 = smov 16  }
  0x16   : > { %vm411_vm10 = vcmp.ge.s32.totalorder %v409_v55, 0  ;;  %vm429_vm11 = vcmp.lt.s32.totalorder %v425_v56, 16  ;;  %s9002_s19 = smov 32  }
  0x19   : > { %1261 = vperm.xlu0 %5133, %v1257_v4  }
  0x83   : > { %v452_v7 = vpop.permute.xlu0 %451 }
  0x84   : > { %v460_v8 = vsel %vm8897_vm0, 0.0, %v452_v7 }
  0x85   : > { %680 = vrot.lane.b32.xlu1 %v460_v8, %s5170_s24  ;;  %571 = vrot.lane.b32.xlu0 %v460_v8, %s5171_s25  ;;  %v466_v13 = vsel %vm402_vm1, %v460_v8, 0.0  ;;  %vm428_vm1 = vcmp.lt.s32.totalorder %v424_v0, 16 }
  0x87   : > { %v454_v11 = vpop.permute.xlu0 %453 }
  0x88   : > { %v461_v12 = vsel %vm8897_vm0, %v454_v11, 0.0  ;;  %v456_v14 = vsel %vm8897_vm0, %v452_v7, %v454_v11  ;;  %v5301_v19 = vpop.permute.xlu1 %1266  ;;  %v433_v11 = vadd.s32 2, %v5294_v16 }
  0x89   : > { %882 = vrot.lane.b32.xlu1 %v460_v8, %s5172_s26  ;;  %784 = vrot.lane.b32.xlu0 %v460_v8, %s8929_s27  ;;  %v467_v18 = vsel %vm403_vm2, %v456_v14, 0.0  ;;  %vm445_vm2 = vcmp.lt.s32.totalorder %v441_v3, 16 }
  0x8d   : > { %1099 = vrot.lane.b32.xlu1 %v460_v8, %s5174_s28  ;;  %990 = vrot.lane.b32.xlu0 %v460_v8, %s5175_s29 }
  0x91   : > { %470 = vrot.lane.b32.xlu1 %v466_v13, %s5176_s30  ;;  %575 = vrot.lane.b32.xlu0 %v461_v12, %s5171_s25 }
  0x94   : > { %v5303_v20 = vpop.permute.xlu0 %1261 }
  0x95   : > { %682 = vrot.lane.b32.xlu0 %v456_v14, %s5170_s24  ;;  %573 = vrot.lane.b32.xlu1 %v456_v14, %s5171_s25 }
  0x99   : > { %788 = vrot.lane.b32.xlu0 %v461_v12, %s8929_s27  ;;  %684 = vrot.lane.b32.xlu1 %v461_v12, %s5170_s24 }
  0x9d   : > { %884 = vrot.lane.b32.xlu0 %v456_v14, %s5172_s26  ;;  %786 = vrot.lane.b32.xlu1 %v456_v14, %s8929_s27 }
  0xa1   : > { %994 = vrot.lane.b32.xlu0 %v461_v12, %s5175_s29  ;;  %886 = vrot.lane.b32.xlu1 %v461_v12, %s5172_s26 }
  0xa5   : > { %1101 = vrot.lane.b32.xlu0 %v456_v14, %s5174_s28  ;;  %992 = vrot.lane.b32.xlu1 %v456_v14, %s5175_s29 }
  0xa9   : > { %1103 = vrot.lane.b32.xlu1 %v461_v12, %s5174_s28 }
  0xad   : > { %472 = vrot.lane.b32.xlu1 %v467_v18, %s5176_s30 }
  0xf7   : > { %v5305_v21 = vpop.permute.xlu1 %680  ;;  %v572_v22 = vpop.permute.xlu0 %571 }
  0xfb   : > { %v5307_v23 = vpop.permute.xlu1 %882  ;;  %v785_v24 = vpop.permute.xlu0 %784 }
  0xfc   : > { %v795_v25 = vsel %vm8904_vm3, 0.0, %v785_v24 }
  0xfd   : > { %805 = vrot.lane.b32.xlu1 %v795_v25, %s5177_s11  ;;  %v798_v26 = vrot.slane %v795_v25, 4 }
  0xff   : > { %v5311_v27 = vpop.permute.xlu1 %1099  ;;  %802 = vst [vmem:[#allocation2 + $0x50] sm:$0xf0] %v798_v26  ;;  %v991_v38 = vpop.permute.xlu0 %990 }
 0x101   : > { %830 = vrot.lane.b32.xlu1 %v795_v25, %s5178_s12 }
 0x103   : > { %v471_v28 = vpop.permute.xlu1 %470  ;;  %v576_v42 = vpop.permute.xlu0 %575 }
 0x104   : > { %v479_v29 = vsel %vm8904_vm3, 0.0, %v471_v28 }
 0x105   : > { %481 = vst [vmem:[#allocation2 + $0x80] sm:$0xf] %v479_v29  ;;  %854 = vrot.lane.b32.xlu1 %v795_v25, %s5176_s30  ;;  %v485_v44 = vrot.slane %v479_v29, 4 }
 0x107   : > { %v5316_v30 = vpop.permute.xlu1 %573  ;;  %v683_v47 = vpop.permute.xlu0 %682 }
 0x108   : > { %v578_v45 = vsel %vm577_vm5, %v572_v22, %v5316_v30  ;;  %v579_v59 = vsel %vm577_vm5, %v5316_v30, %v576_v42  ;;  %v687_v1 = vsel %vm686_vm7, %v5305_v21, %v683_v47 }
 0x109   : > { %501 = vrot.lane.b32.xlu1 %v479_v29, %s5179_s14  ;;  %v582_v48 = vsel %vm410_vm6, %v578_v45, 0.0  ;;  %v583_v62 = vsel %vm411_vm10, %v579_v59, 0.0  ;;  %v691_v6 = vsel %vm418_vm13, %v687_v1, 0.0  ;;  %vm437_vm6 = vcmp.lt.s32.totalorder %v433_v11, 16 }
 0x10a   : > { %vm8899_vm10 = vcmask 916480   ;;  %vm8898_vm13 = vcmask 785408  }
 0x10b   : > { %v685_v31 = vpop.permute.xlu1 %684  ;;  %v789_v50 = vpop.permute.xlu0 %788 }
 0x10c   : > { %v688_v49 = vsel %vm686_vm7, %v683_v47, %v685_v31 }
 0x10d   : > { %527 = vrot.lane.b32.xlu1 %v479_v29, %s5180_s15  ;;  %v692_v51 = vsel %vm419_vm8, %v688_v49, 0.0  ;;  %vm444_vm8 = vcmp.lt.s32.totalorder %v440_v15, 16 }
 0x10f   : > { %v787_v32 = vpop.permute.xlu1 %786  ;;  %v885_v54 = vpop.permute.xlu0 %884 }
 0x110   : > { %v791_v33 = vsel %vm8976_vm4, %v785_v24, %v787_v32  ;;  %v792_v52 = vsel %vm8976_vm4, %v787_v32, %v789_v50  ;;  %v889_v10 = vsel %vm8905_vm9, %v5307_v23, %v885_v54 }
 0x111   : > { %552 = vrot.lane.b32.xlu1 %v479_v29, %s8895_s16  ;;  %807 = vrot.lane.b32.xlu0 %v791_v33, %s5177_s11  ;;  %v5323_v34 = vrot.slane %v791_v33, 4  ;;  %v796_v53 = vsel %vm8904_vm3, %v792_v52, 0.0  ;;  %v893_v12 = vsel %vm428_vm1, %v889_v10, 0.0  ;;  %vm558_vm1 = vcmask 261120  }
 0x112   : > { %v817_v24 = vrot.slane %v796_v53, 4 }
 0x113   : > { %v887_v35 = vpop.permute.xlu1 %886  ;;  %803 = vst [vmem:[#allocation2 + $0x18] sm:$0xf0] %v5323_v34  ;;  %v995_v61 = vpop.permute.xlu0 %994 }
 0x114   : > { %v890_v58 = vsel %vm8905_vm9, %v885_v54, %v887_v35 }
 0x115   : > { %818 = vrot.lane.b32.xlu0 %v798_v26, %s5179_s14  ;;  %v894_v63 = vsel %vm429_vm11, %v890_v58, 0.0  ;;  %vm8900_vm11 = vcmask 654336  }
 0x117   : > { %v5327_v36 = vpop.permute.xlu1 %992  ;;  %v1102_v4 = vpop.permute.xlu0 %1101 }
 0x118   : > { %v997_v2 = vsel %vm8912_vm12, %v991_v38, %v5327_v36  ;;  %v998_v14 = vsel %vm8912_vm12, %v5327_v36, %v995_v61  ;;  %v1106_v18 = vsel %vm8903_vm15, %v5311_v27, %v1102_v4 }
 0x119   : > { %832 = vrot.lane.b32.xlu0 %v791_v33, %s5178_s12  ;;  %v1001_v7 = vsel %vm436_vm14, %v997_v2, 0.0  ;;  %v1002_v17 = vsel %vm437_vm6, %v998_v14, 0.0  ;;  %v1110_v21 = vsel %vm444_vm8, %v1106_v18, 0.0  ;;  %vm8901_vm14 = vcmask 523264  }
 0x11a   : > { %vm8902_vm6 = vcmask 1043456   ;;  %vm1911_vm8 = vcmask 130048  }
 0x11b   : > { %v5330_v37 = vpop.permute.xlu1 %1103 }
 0x11c   : > { %v1107_v8 = vsel %vm8903_vm15, %v1102_v4, %v5330_v37 }
 0x11d   : > { %842 = vrot.lane.b32.xlu0 %v798_v26, %s5180_s15  ;;  %v1111_v13 = vsel %vm445_vm2, %v1107_v8, 0.0  ;;  %vm1269_vm2 = vcmask 556032  }
 0x11f   : > { %v473_v39 = vpop.permute.xlu1 %472 }
 0x120   : > { %v5334_v40 = vsel %vm8904_vm3, %v471_v28, %v473_v39  ;;  %v5337_v41 = vsel %vm8904_vm3, %v473_v39, 0.0 }
 0x121   : > { %482 = vst [vmem:[#allocation2 + $0x160] sm:$0xf] %v5334_v40  ;;  %505 = vrot.lane.b32.xlu1 %v5337_v41, %s5179_s14  ;;  %856 = vrot.lane.b32.xlu0 %v791_v33, %s5176_s30  ;;  %v487_v22 = vrot.slane %v5337_v41, 4  ;;  %v486_v23 = vrot.slane %v5334_v40, 4 }
 0x125   : > { %531 = vrot.lane.b32.xlu1 %v5337_v41, %s5180_s15  ;;  %866 = vrot.lane.b32.xlu0 %v798_v26, %s8895_s16 }
 0x129   : > { %556 = vrot.lane.b32.xlu1 %v5337_v41, %s8895_s16  ;;  %488 = vrot.lane.b32.xlu0 %v485_v44, %s5177_s11 }
 0x12d   : > { %586 = vrot.lane.b32.xlu1 %v582_v48, %s5176_s30  ;;  %503 = vrot.lane.b32.xlu0 %v5334_v40, %s5179_s14 }
 0x131   : > { %514 = vrot.lane.b32.xlu0 %v485_v44, %s5178_s12  ;;  %697 = vrot.lane.b32.xlu1 %v692_v51, %s5176_s30 }
 0x135   : > { %529 = vrot.lane.b32.xlu0 %v5334_v40, %s5180_s15  ;;  %809 = vrot.lane.b32.xlu1 %v796_v53, %s5177_s11 }
 0x139   : > { %540 = vrot.lane.b32.xlu0 %v485_v44, %s5176_s30  ;;  %834 = vrot.lane.b32.xlu1 %v796_v53, %s5178_s12 }
 0x13d   : > { %554 = vrot.lane.b32.xlu0 %v5334_v40, %s8895_s16  ;;  %858 = vrot.lane.b32.xlu1 %v796_v53, %s5176_s30 }
 0x141   : > { %588 = vrot.lane.b32.xlu0 %v583_v62, %s5176_s30  ;;  %899 = vrot.lane.b32.xlu1 %v894_v63, %s5176_s30 }
 0x145   : > { %695 = vrot.lane.b32.xlu0 %v691_v6, %s5176_s30  ;;  %1005 = vrot.lane.b32.xlu1 %v1001_v7, %s5176_s30 }
 0x149   : > { %897 = vrot.lane.b32.xlu0 %v893_v12, %s5176_s30  ;;  %1116 = vrot.lane.b32.xlu1 %v1111_v13, %s5176_s30 }
 0x14d   : > { %1007 = vrot.lane.b32.xlu0 %v1002_v17, %s5176_s30  ;;  %820 = vrot.lane.b32.xlu1 %v5323_v34, %s5179_s14 }
 0x151   : > { %844 = vrot.lane.b32.xlu1 %v5323_v34, %s5180_s15  ;;  %1114 = vrot.lane.b32.xlu0 %v1110_v21, %s5176_s30 }
 0x155   : > { %868 = vrot.lane.b32.xlu1 %v5323_v34, %s8895_s16  ;;  %492 = vrot.lane.b32.xlu0 %v487_v22, %s5177_s11 }
 0x159   : > { %490 = vrot.lane.b32.xlu1 %v486_v23, %s5177_s11  ;;  %518 = vrot.lane.b32.xlu0 %v487_v22, %s5178_s12 }
 0x15d   : > { %516 = vrot.lane.b32.xlu1 %v486_v23, %s5178_s12  ;;  %544 = vrot.lane.b32.xlu0 %v487_v22, %s5176_s30 }
 0x161   : > { %542 = vrot.lane.b32.xlu1 %v486_v23, %s5176_s30  ;;  %822 = vrot.lane.b32.xlu0 %v817_v24, %s5179_s14 }
 0x165   : > { %846 = vrot.lane.b32.xlu0 %v817_v24, %s5180_s15 }
 0x169   : > { %870 = vrot.lane.b32.xlu0 %v817_v24, %s8895_s16 }
 0x16f   : > { %v806_v25 = vpop.permute.xlu1 %805 }
 0x173   : > { %v831_v26 = vpop.permute.xlu1 %830 }
 0x177   : > { %v855_v27 = vpop.permute.xlu1 %854 }
 0x17b   : > { %v502_v28 = vpop.permute.xlu1 %501 }
 0x17f   : > { %v528_v32 = vpop.permute.xlu1 %527 }
 0x183   : > { %v808_v29 = vpop.permute.xlu0 %807  ;;  %v553_v35 = vpop.permute.xlu1 %552 }
 0x184   : > { %v811_v30 = vsel %vm8899_vm10, %v806_v25, %v808_v29 }
 0x185   : > { %815 = vst [vmem:[#allocation2 + $0x10] sm:$0xf] %v811_v30 }
 0x187   : > { %v5418_v31 = vpop.permute.xlu0 %818 }
 0x18b   : > { %v833_v33 = vpop.permute.xlu0 %832 }
 0x18c   : > { %v836_v34 = vsel %vm8900_vm11, %v831_v26, %v833_v33 }
 0x18d   : > { %840 = vst [vmem:[#allocation2 + $0xc0] sm:$0xf] %v836_v34 }
 0x18f   : > { %v5421_v36 = vpop.permute.xlu0 %842 }
 0x193   : > { %v506_v37 = vpop.permute.xlu1 %505  ;;  %v857_v38 = vpop.permute.xlu0 %856 }
 0x194   : > { %v860_v39 = vsel %vm8904_vm3, %v855_v27, %v857_v38 }
 0x195   : > { %864 = vst [vmem:[#allocation2 + $0x110] sm:$0xf] %v860_v39 }
 0x197   : > { %v532_v40 = vpop.permute.xlu1 %531  ;;  %v5424_v41 = vpop.permute.xlu0 %866 }
 0x19b   : > { %v557_v42 = vpop.permute.xlu1 %556  ;;  %v5426_v43 = vpop.permute.xlu0 %488 }
 0x19f   : > { %v587_v44 = vpop.permute.xlu1 %586  ;;  %v504_v45 = vpop.permute.xlu0 %503 }
 0x1a0   : > { %v508_v46 = vsel %vm8898_vm13, %v502_v28, %v504_v45  ;;  %v509_v47 = vsel %vm8898_vm13, %v504_v45, %v506_v37  ;;  %v593_v48 = vsel %vm8904_vm3, 0.0, %v587_v44 }
 0x1a1   : > { %512 = vst [vmem:[#allocation2 + $0xd0] sm:$0xf] %v508_v46  ;;  %513 = vst [vmem:[#allocation2 + $0x98] sm:$0xf] %v509_v47  ;;  %603 = vrot.lane.b32.xlu1 %v593_v48, %s5177_s11  ;;  %v5432_v49 = vrot.slane %v593_v48, 4 }
 0x1a3   : > { %v5434_v50 = vpop.permute.xlu1 %697  ;;  %v5436_v51 = vpop.permute.xlu0 %514  ;;  %600 = vst [vmem:[#allocation2 + $0x80] sm:$0xf0] %v5432_v49 }
 0x1a7   : > { %v810_v52 = vpop.permute.xlu1 %809  ;;  %v530_v53 = vpop.permute.xlu0 %529 }
 0x1a8   : > { %v812_v54 = vsel %vm8899_vm10, %v808_v29, %v810_v52  ;;  %v534_v55 = vsel %vm8901_vm14, %v528_v32, %v530_v53  ;;  %v535_v56 = vsel %vm8901_vm14, %v530_v53, %v532_v40 }
 0x1a9   : > { %816 = vst [vmem:[#allocation2 + $0x140] sm:$0xf] %v812_v54  ;;  %538 = vst [vmem:[#allocation2 + $0x138] sm:$0xf] %v534_v55 }
 0x1aa   : > { %539 = vst [vmem:[#allocation2 + $0x20] sm:$0xf] %v535_v56 }
 0x1ab   : > { %v835_v57 = vpop.permute.xlu1 %834  ;;  %v5442_v58 = vpop.permute.xlu0 %540 }
 0x1ac   : > { %v837_v59 = vsel %vm8900_vm11, %v833_v33, %v835_v57 }
 0x1ad   : > { %841 = vst [vmem:[#allocation2 + $0x170] sm:$0xf] %v837_v59 }
 0x1af   : > { %v859_v60 = vpop.permute.xlu1 %858  ;;  %v555_v61 = vpop.permute.xlu0 %554 }
 0x1b0   : > { %v861_v62 = vsel %vm8904_vm3, %v857_v38, %v859_v60  ;;  %v559_v63 = vsel %vm558_vm1, %v553_v35, %v555_v61  ;;  %v560_v0 = vsel %vm558_vm1, %v555_v61, %v557_v42  ;;  %v5530_v38 = vsel %vm8904_vm3, %v5434_v50, 0.0 }
 0x1b1   : > { %865 = vst [vmem:[#allocation2] sm:$0xf] %v861_v62  ;;  %563 = vst [vmem:[#allocation2 + $0x178] sm:$0xf] %v559_v63 }
 0x1b2   : > { %564 = vst [vmem:[#allocation2 + $0x130] sm:$0xf] %v560_v0 }
 0x1b3   : > { %v5448_v1 = vpop.permute.xlu1 %899  ;;  %v589_v2 = vpop.permute.xlu0 %588 }
 0x1b4   : > { %v5451_v3 = vsel %vm8904_vm3, %v589_v2, 0.0  ;;  %v590_v4 = vsel %vm8904_vm3, %v587_v44, %v589_v2  ;;  %v906_v54 = vsel %vm8904_vm3, %v5448_v1, 0.0 }
 0x1b5   : > { %607 = vrot.lane.b32.xlu1 %v5451_v3, %s5177_s11  ;;  %605 = vrot.lane.b32.xlu0 %v590_v4, %s5177_s11  ;;  %v5457_v6 = vrot.slane %v590_v4, 4  ;;  %v615_v55 = vrot.slane %v5451_v3, 4 }
 0x1b7   : > { %v1006_v7 = vpop.permute.xlu1 %1005  ;;  %v696_v8 = vpop.permute.xlu0 %695  ;;  %601 = vst [vmem:[#allocation2 + $0x160] sm:$0xf0] %v5457_v6 }
 0x1b8   : > { %v5462_v10 = vsel %vm8904_vm3, %v696_v8, %v5434_v50  ;;  %v5465_v11 = vsel %vm8904_vm3, 0.0, %v696_v8  ;;  %v5468_v12 = vsel %vm8904_vm3, 0.0, %v1006_v7 }
 0x1b9   : > { %705 = vst [vmem:[#allocation2 + $0x50] sm:$0xf] %v5465_v11  ;;  %706 = vst [vmem:[#allocation2 + $0x18] sm:$0xf] %v5462_v10  ;;  %628 = vrot.lane.b32.xlu1 %v593_v48, %s5178_s12  ;;  %630 = vrot.lane.b32.xlu0 %v590_v4, %s5178_s12  ;;  %v5475_v13 = vrot.slane %v5468_v12, 4  ;;  %v709_v57 = vrot.slane %v5465_v11, 4 }
 0x1ba   : > { %v710_v61 = vrot.slane %v5462_v10, 4 }
 0x1bb   : > { %v5477_v14 = vpop.permute.xlu1 %1116  ;;  %v898_v15 = vpop.permute.xlu0 %897  ;;  %1019 = vst [vmem:[#allocation2 + $0x8] sm:$0xf0] %v5475_v13 }
 0x1bc   : > { %v5482_v17 = vsel %vm8904_vm3, %v898_v15, %v5448_v1  ;;  %v5485_v18 = vsel %vm8904_vm3, 0.0, %v898_v15  ;;  %v5605_v56 = vsel %vm8904_vm3, %v5477_v14, 0.0 }
 0x1bd   : > { %907 = vst [vmem:[#allocation2 + $0x8] sm:$0xf] %v5485_v18  ;;  %908 = vst [vmem:[#allocation2 + $0xf0] sm:$0xf] %v5482_v17  ;;  %632 = vrot.lane.b32.xlu1 %v5451_v3, %s5178_s12  ;;  %654 = vrot.lane.b32.xlu0 %v590_v4, %s5176_s30  ;;  %v911_v2 = vrot.slane %v5485_v18, 4 }
 0x1bf   : > { %v821_v21 = vpop.permute.xlu1 %820  ;;  %v1008_v22 = vpop.permute.xlu0 %1007 }
 0x1c0   : > { %v824_v23 = vsel %vm8898_vm13, %v5418_v31, %v821_v21  ;;  %v5495_v24 = vsel %vm8904_vm3, %v1006_v7, %v1008_v22  ;;  %v5558_v53 = vsel %vm8904_vm3, %v1008_v22, 0.0  ;;  %v913_v7 = vrot.slane %v906_v54, 4 }
 0x1c1   : > { %828 = vst [vmem:[#allocation2 + $0x88] sm:$0xf0] %v824_v23  ;;  %652 = vrot.lane.b32.xlu1 %v593_v48, %s5176_s30  ;;  %726 = vrot.lane.b32.xlu0 %v5462_v10, %s5179_s14  ;;  %v5501_v25 = vrot.slane %v5495_v24, 4 }
 0x1c3   : > { %v845_v26 = vpop.permute.xlu1 %844  ;;  %v1115_v27 = vpop.permute.xlu0 %1114  ;;  %1020 = vst [vmem:[#allocation2 + $0xf0] sm:$0xf0] %v5501_v25 }
 0x1c4   : > { %v848_v28 = vsel %vm8901_vm14, %v5421_v36, %v845_v26  ;;  %v5508_v29 = vsel %vm8904_vm3, %v1115_v27, %v5477_v14  ;;  %v5511_v30 = vsel %vm8904_vm3, 0.0, %v1115_v27 }
 0x1c5   : > { %852 = vst [vmem:[#allocation2 + $0x58] sm:$0xf0] %v848_v28  ;;  %1124 = vst [vmem:[#allocation2 + $0x30] sm:$0xf] %v5511_v30  ;;  %656 = vrot.lane.b32.xlu1 %v5451_v3, %s5176_s30  ;;  %750 = vrot.lane.b32.xlu0 %v5462_v10, %s5180_s15 }
 0x1c6   : > { %1125 = vst [vmem:[#allocation2 + $0xe8] sm:$0xf] %v5508_v29 }
 0x1c7   : > { %v869_v31 = vpop.permute.xlu1 %868  ;;  %v493_v32 = vpop.permute.xlu0 %492 }
 0x1c8   : > { %v872_v33 = vsel %vm558_vm1, %v5424_v41, %v869_v31 }
 0x1c9   : > { %876 = vst [vmem:[#allocation2 + $0x70] sm:$0xf0] %v872_v33  ;;  %724 = vrot.lane.b32.xlu1 %v5465_v11, %s5179_s14  ;;  %774 = vrot.lane.b32.xlu0 %v5462_v10, %s8895_s16 }
 0x1cb   : > { %v491_v34 = vpop.permute.xlu1 %490  ;;  %v519_v35 = vpop.permute.xlu0 %518 }
 0x1cc   : > { %v495_v36 = vsel %vm8899_vm10, %v5426_v43, %v491_v34  ;;  %v496_v37 = vsel %vm8899_vm10, %v491_v34, %v493_v32  ;;  %v1034_v32 = vrot.slane %v5558_v53, 4 }
 0x1cd   : > { %499 = vst [vmem:[#allocation2 + $0x30] sm:$0xf0] %v495_v36  ;;  %500 = vst [vmem:[#allocation2 + $0xe8] sm:$0xf0] %v496_v37  ;;  %728 = vrot.lane.b32.xlu1 %v5530_v38, %s5179_s14  ;;  %928 = vrot.lane.b32.xlu0 %v5482_v17, %s5179_s14 }
 0x1cf   : > { %v517_v39 = vpop.permute.xlu1 %516  ;;  %v545_v40 = vpop.permute.xlu0 %544 }
 0x1d0   : > { %v521_v41 = vsel %vm8900_vm11, %v5436_v51, %v517_v39  ;;  %v522_v42 = vsel %vm8900_vm11, %v517_v39, %v519_v35 }
 0x1d1   : > { %525 = vst [vmem:[#allocation2 + $0xe0] sm:$0xf0] %v521_v41  ;;  %526 = vst [vmem:[#allocation2 + $0x148] sm:$0xf0] %v522_v42  ;;  %748 = vrot.lane.b32.xlu1 %v5465_v11, %s5180_s15  ;;  %952 = vrot.lane.b32.xlu0 %v5482_v17, %s5180_s15  ;;  %v1128_v42 = vrot.slane %v5511_v30, 4 }
 0x1d3   : > { %v543_v43 = vpop.permute.xlu1 %542  ;;  %v823_v44 = vpop.permute.xlu0 %822 }
 0x1d4   : > { %v546_v45 = vsel %vm8904_vm3, %v5442_v58, %v543_v43  ;;  %v547_v46 = vsel %vm8904_vm3, %v543_v43, %v545_v40  ;;  %v825_v47 = vsel %vm8898_vm13, %v821_v21, %v823_v44  ;;  %v711_v58 = vrot.slane %v5530_v38, 4 }
 0x1d5   : > { %550 = vst [vmem:[#allocation2 + $0x120] sm:$0xf0] %v546_v45  ;;  %551 = vst [vmem:[#allocation2 + $0x28] sm:$0xf0] %v547_v46  ;;  %752 = vrot.lane.b32.xlu1 %v5530_v38, %s5180_s15  ;;  %976 = vrot.lane.b32.xlu0 %v5482_v17, %s8895_s16 }
 0x1d6   : > { %829 = vst [vmem:[#allocation2 + $0xd8] sm:$0xf0] %v825_v47 }
 0x1d7   : > { %v847_v48 = vpop.permute.xlu0 %846 }
 0x1d8   : > { %v849_v50 = vsel %vm8901_vm14, %v845_v26, %v847_v48  ;;  %v1130_v48 = vrot.slane %v5605_v56, 4 }
 0x1d9   : > { %853 = vst [vmem:[#allocation2 + $0xc8] sm:$0xf0] %v849_v50  ;;  %772 = vrot.lane.b32.xlu1 %v5465_v11, %s8895_s16  ;;  %1024 = vrot.lane.b32.xlu0 %v5495_v24, %s5177_s11 }
 0x1db   : > { %v871_v51 = vpop.permute.xlu0 %870 }
 0x1dc   : > { %v873_v52 = vsel %vm558_vm1, %v869_v31, %v871_v51 }
 0x1dd   : > { %877 = vst [vmem:[#allocation2 + $0xb8] sm:$0xf0] %v873_v52  ;;  %776 = vrot.lane.b32.xlu1 %v5530_v38, %s8895_s16  ;;  %1026 = vrot.lane.b32.xlu0 %v5558_v53, %s5177_s11 }
 0x1e1   : > { %926 = vrot.lane.b32.xlu1 %v5485_v18, %s5179_s14  ;;  %1047 = vrot.lane.b32.xlu0 %v5468_v12, %s5178_s12 }
 0x1e5   : > { %930 = vrot.lane.b32.xlu1 %v906_v54, %s5179_s14  ;;  %1051 = vrot.lane.b32.xlu0 %v5558_v53, %s5178_s12 }
 0x1e9   : > { %950 = vrot.lane.b32.xlu1 %v5485_v18, %s5180_s15  ;;  %1071 = vrot.lane.b32.xlu0 %v5468_v12, %s5176_s30 }
 0x1ed   : > { %954 = vrot.lane.b32.xlu1 %v906_v54, %s5180_s15  ;;  %1075 = vrot.lane.b32.xlu0 %v5558_v53, %s5176_s30 }
 0x1f1   : > { %974 = vrot.lane.b32.xlu1 %v5485_v18, %s8895_s16  ;;  %1145 = vrot.lane.b32.xlu0 %v5508_v29, %s5179_s14 }
 0x1f5   : > { %978 = vrot.lane.b32.xlu1 %v906_v54, %s8895_s16  ;;  %1169 = vrot.lane.b32.xlu0 %v5508_v29, %s5180_s15 }
 0x1f9   : > { %1022 = vrot.lane.b32.xlu1 %v5468_v12, %s5177_s11  ;;  %1193 = vrot.lane.b32.xlu0 %v5508_v29, %s8895_s16  ;;  %v912_v12 = vrot.slane %v5482_v17, 4 }
 0x1fd   : > { %1049 = vrot.lane.b32.xlu1 %v5495_v24, %s5178_s12  ;;  %616 = vrot.lane.b32.xlu0 %v5432_v49, %s5179_s14 }
 0x201   : > { %1073 = vrot.lane.b32.xlu1 %v5495_v24, %s5176_s30  ;;  %620 = vrot.lane.b32.xlu0 %v615_v55, %s5179_s14 }
 0x205   : > { %1143 = vrot.lane.b32.xlu1 %v5511_v30, %s5179_s14  ;;  %640 = vrot.lane.b32.xlu0 %v5432_v49, %s5180_s15 }
 0x209   : > { %1147 = vrot.lane.b32.xlu1 %v5605_v56, %s5179_s14  ;;  %644 = vrot.lane.b32.xlu0 %v615_v55, %s5180_s15 }
 0x20d   : > { %1167 = vrot.lane.b32.xlu1 %v5511_v30, %s5180_s15  ;;  %664 = vrot.lane.b32.xlu0 %v5432_v49, %s8895_s16 }
 0x211   : > { %1171 = vrot.lane.b32.xlu1 %v5605_v56, %s5180_s15  ;;  %668 = vrot.lane.b32.xlu0 %v615_v55, %s8895_s16 }
 0x213   : > { %v604_v49 = vpop.permute.xlu1 %603 }
 0x215   : > { %1191 = vrot.lane.b32.xlu1 %v5511_v30, %s8895_s16  ;;  %712 = vrot.lane.b32.xlu0 %v709_v57, %s5177_s11 }
 0x219   : > { %1195 = vrot.lane.b32.xlu1 %v5605_v56, %s8895_s16  ;;  %716 = vrot.lane.b32.xlu0 %v711_v58, %s5177_s11 }
 0x21d   : > { %618 = vrot.lane.b32.xlu1 %v5457_v6, %s5179_s14  ;;  %736 = vrot.lane.b32.xlu0 %v709_v57, %s5178_s12 }
 0x221   : > { %642 = vrot.lane.b32.xlu1 %v5457_v6, %s5180_s15  ;;  %740 = vrot.lane.b32.xlu0 %v711_v58, %s5178_s12 }
 0x225   : > { %666 = vrot.lane.b32.xlu1 %v5457_v6, %s8895_s16  ;;  %760 = vrot.lane.b32.xlu0 %v709_v57, %s5176_s30 }
 0x227   : > { %v608_v59 = vpop.permute.xlu1 %607  ;;  %v606_v60 = vpop.permute.xlu0 %605 }
 0x228   : > { %v609_v62 = vsel %vm8899_vm10, %v604_v49, %v606_v60  ;;  %v610_v63 = vsel %vm8899_vm10, %v606_v60, %v608_v59 }
 0x229   : > { %613 = vst [vmem:[#allocation2 + $0x118] sm:$0xf] %v609_v62  ;;  %614 = vst [vmem:[#allocation2 + $0x168] sm:$0xf] %v610_v63  ;;  %714 = vrot.lane.b32.xlu1 %v710_v61, %s5177_s11  ;;  %764 = vrot.lane.b32.xlu0 %v711_v58, %s5176_s30 }
 0x22b   : > { %v629_v0 = vpop.permute.xlu1 %628  ;;  %v631_v1 = vpop.permute.xlu0 %630 }
 0x22c   : > { %v634_v3 = vsel %vm8900_vm11, %v629_v0, %v631_v1 }
 0x22d   : > { %638 = vst [vmem:[#allocation2 + $0x180] sm:$0xf] %v634_v3  ;;  %738 = vrot.lane.b32.xlu1 %v710_v61, %s5178_s12  ;;  %914 = vrot.lane.b32.xlu0 %v911_v2, %s5177_s11 }
 0x22f   : > { %v633_v4 = vpop.permute.xlu1 %632  ;;  %v655_v6 = vpop.permute.xlu0 %654 }
 0x230   : > { %v635_v8 = vsel %vm8900_vm11, %v631_v1, %v633_v4 }
 0x231   : > { %639 = vst [vmem:[#allocation2 + $0x100] sm:$0xf] %v635_v8  ;;  %762 = vrot.lane.b32.xlu1 %v710_v61, %s5176_s30  ;;  %918 = vrot.lane.b32.xlu0 %v913_v7, %s5177_s11 }
 0x233   : > { %v653_v10 = vpop.permute.xlu1 %652  ;;  %v727_v11 = vpop.permute.xlu0 %726 }
 0x234   : > { %v658_v14 = vsel %vm8904_vm3, %v653_v10, %v655_v6 }
 0x235   : > { %662 = vst [vmem:[#allocation2 + $0x108] sm:$0xf] %v658_v14  ;;  %916 = vrot.lane.b32.xlu1 %v912_v12, %s5177_s11  ;;  %938 = vrot.lane.b32.xlu0 %v911_v2, %s5178_s12 }
 0x237   : > { %v657_v15 = vpop.permute.xlu1 %656  ;;  %v751_v18 = vpop.permute.xlu0 %750 }
 0x238   : > { %v659_v21 = vsel %vm8904_vm3, %v655_v6, %v657_v15 }
 0x239   : > { %663 = vst [vmem:[#allocation2 + $0x90] sm:$0xf] %v659_v21  ;;  %940 = vrot.lane.b32.xlu1 %v912_v12, %s5178_s12  ;;  %942 = vrot.lane.b32.xlu0 %v913_v7, %s5178_s12 }
 0x23b   : > { %v725_v22 = vpop.permute.xlu1 %724  ;;  %v775_v23 = vpop.permute.xlu0 %774 }
 0x23c   : > { %v730_v17 = vsel %vm8898_vm13, %v725_v22, %v727_v11 }
 0x23d   : > { %734 = vst [vmem:[#allocation2 + $0x88] sm:$0xf] %v730_v17  ;;  %964 = vrot.lane.b32.xlu1 %v912_v12, %s5176_s30  ;;  %962 = vrot.lane.b32.xlu0 %v911_v2, %s5176_s30 }
 0x23f   : > { %v729_v24 = vpop.permute.xlu1 %728  ;;  %v929_v26 = vpop.permute.xlu0 %928 }
 0x240   : > { %v731_v27 = vsel %vm8898_vm13, %v727_v11, %v729_v24 }
 0x241   : > { %735 = vst [vmem:[#allocation2 + $0xd8] sm:$0xf] %v731_v27  ;;  %1035 = vrot.lane.b32.xlu1 %v5475_v13, %s5179_s14  ;;  %966 = vrot.lane.b32.xlu0 %v913_v7, %s5176_s30 }
 0x243   : > { %v749_v28 = vpop.permute.xlu1 %748  ;;  %v953_v31 = vpop.permute.xlu0 %952 }
 0x244   : > { %v754_v33 = vsel %vm8901_vm14, %v749_v28, %v751_v18 }
 0x245   : > { %758 = vst [vmem:[#allocation2 + $0x58] sm:$0xf] %v754_v33  ;;  %1039 = vrot.lane.b32.xlu1 %v1034_v32, %s5179_s14  ;;  %1037 = vrot.lane.b32.xlu0 %v5501_v25, %s5179_s14 }
 0x247   : > { %v753_v34 = vpop.permute.xlu1 %752  ;;  %v977_v35 = vpop.permute.xlu0 %976 }
 0x248   : > { %v755_v36 = vsel %vm8901_vm14, %v751_v18, %v753_v34 }
 0x249   : > { %759 = vst [vmem:[#allocation2 + $0xc8] sm:$0xf] %v755_v36  ;;  %1059 = vrot.lane.b32.xlu1 %v5475_v13, %s5180_s15  ;;  %1061 = vrot.lane.b32.xlu0 %v5501_v25, %s5180_s15 }
 0x24b   : > { %v773_v37 = vpop.permute.xlu1 %772  ;;  %v1025_v38 = vpop.permute.xlu0 %1024 }
 0x24c   : > { %v778_v39 = vsel %vm558_vm1, %v773_v37, %v775_v23  ;;  %v1237_v46 = vld [vmem:[#allocation2 + $0x58] sm:$0xff] }
 0x24d   : > { %782 = vst [vmem:[#allocation2 + $0x70] sm:$0xf] %v778_v39  ;;  %1063 = vrot.lane.b32.xlu1 %v1034_v32, %s5180_s15  ;;  %1085 = vrot.lane.b32.xlu0 %v5501_v25, %s8895_s16 }
 0x24f   : > { %v777_v40 = vpop.permute.xlu1 %776  ;;  %v1027_v41 = vpop.permute.xlu0 %1026 }
 0x250   : > { %v779_v43 = vsel %vm558_vm1, %v775_v23, %v777_v40  ;;  %v1029_v44 = vsel %vm8899_vm10, %v1025_v38, %v1027_v41  ;;  %v1238_v45 = vld [vmem:[#allocation2 + $0xc8] sm:$0xff] }
 0x251   : > { %783 = vst [vmem:[#allocation2 + $0xb8] sm:$0xf] %v779_v43  ;;  %1033 = vst [vmem:[#allocation2 + $0x40] sm:$0xf] %v1029_v44  ;;  %1083 = vrot.lane.b32.xlu1 %v5475_v13, %s8895_s16  ;;  %1131 = vrot.lane.b32.xlu0 %v1128_v42, %s5177_s11  ;;  %v1129_v13 = vrot.slane %v5508_v29, 4 }
 0x252   : > { %1283 = vmatprep.subr.mxu0 %v1238_v45 }
 0x253   : > { %1284 = vmatpush1.msra.mxu0 %v1237_v46  ;;  %v927_v25 = vpop.permute.xlu1 %926  ;;  %v1048_v47 = vpop.permute.xlu0 %1047 }
 0x254   : > { %v932_v30 = vsel %vm8898_vm13, %v927_v25, %v929_v26 }
 0x255   : > { %936 = vst [vmem:[#allocation2 + $0x128] sm:$0xf] %v932_v30  ;;  %1087 = vrot.lane.b32.xlu1 %v1034_v32, %s8895_s16  ;;  %1135 = vrot.lane.b32.xlu0 %v1130_v48, %s5177_s11  ;;  %s5182_s16 = smov 125  }
 0x257   : > { %v931_v50 = vpop.permute.xlu1 %930  ;;  %v1052_v51 = vpop.permute.xlu0 %1051 }
 0x258   : > { %v933_v52 = vsel %vm8898_vm13, %v929_v26, %v931_v50 }
 0x259   : > { %937 = vst [vmem:[#allocation2 + $0xa0] sm:$0xf] %v933_v52  ;;  %1155 = vrot.lane.b32.xlu0 %v1128_v42, %s5178_s12  ;;  %1133 = vrot.lane.b32.xlu1 %v1129_v13, %s5177_s11 }
 0x25b   : > { %v951_v53 = vpop.permute.xlu1 %950  ;;  %v1072_v54 = vpop.permute.xlu0 %1071 }
 0x25c   : > { %v956_v55 = vsel %vm8901_vm14, %v951_v53, %v953_v31 }
 0x25d   : > { %960 = vst [vmem:[#allocation2 + $0x188] sm:$0xf] %v956_v55  ;;  %1159 = vrot.lane.b32.xlu0 %v1130_v48, %s5178_s12  ;;  %1157 = vrot.lane.b32.xlu1 %v1129_v13, %s5178_s12 }
 0x25f   : > { %v955_v56 = vpop.permute.xlu1 %954  ;;  %v1076_v57 = vpop.permute.xlu0 %1075 }
 0x260   : > { %v957_v29 = vsel %vm8901_vm14, %v953_v31, %v955_v56  ;;  %v1204_v31 = vld [vmem:[%s8885_s1 + $0x8] sm:$0xff] }
 0x261   : > { %961 = vst [vmem:[#allocation2 + $0x38] sm:$0xf] %v957_v29  ;;  %1181 = vrot.lane.b32.xlu1 %v1129_v13, %s5176_s30  ;;  %1179 = vrot.lane.b32.xlu0 %v1128_v42, %s5176_s30 }
 0x262   : > { %5088 = vmatprep.mubr.msk.f32.mxu0 %vm1269_vm2, %v1204_v31 }
 0x263   : > { %v975_v58 = vpop.permute.xlu1 %974  ;;  %v1146_v49 = vpop.permute.xlu0 %1145 }
 0x264   : > { %v980_v59 = vsel %vm558_vm1, %v975_v58, %v977_v35 }
 0x265   : > { %984 = vst [vmem:[#allocation2 + $0x78] sm:$0xf] %v980_v59  ;;  %1183 = vrot.lane.b32.xlu0 %v1130_v48, %s5176_s30 }
 0x267   : > { %v979_v60 = vpop.permute.xlu1 %978  ;;  %v1170_v61 = vpop.permute.xlu0 %1169 }
 0x268   : > { %v981_v62 = vsel %vm558_vm1, %v977_v35, %v979_v60 }
 0x269   : > { %985 = vst [vmem:[#allocation2 + $0x68] sm:$0xf] %v981_v62 }
 0x26b   : > { %v1023_v63 = vpop.permute.xlu1 %1022  ;;  %v1194_v0 = vpop.permute.xlu0 %1193 }
 0x26c   : > { %v1028_v1 = vsel %vm8899_vm10, %v1023_v63, %v1025_v38 }
 0x26d   : > { %1032 = vst [vmem:[#allocation2 + $0xa8] sm:$0xf] %v1028_v1 }
 0x26f   : > { %v1050_v2 = vpop.permute.xlu1 %1049  ;;  %v617_v3 = vpop.permute.xlu0 %616 }
 0x270   : > { %v1053_v4 = vsel %vm8900_vm11, %v1048_v47, %v1050_v2  ;;  %v1054_v6 = vsel %vm8900_vm11, %v1050_v2, %v1052_v51 }
 0x271   : > { %1057 = vst [vmem:[#allocation2 + $0x158] sm:$0xf] %v1053_v4  ;;  %1058 = vst [vmem:[#allocation2 + $0xb0] sm:$0xf] %v1054_v6 }
 0x273   : > { %v1074_v7 = vpop.permute.xlu1 %1073  ;;  %v621_v8 = vpop.permute.xlu0 %620 }
 0x274   : > { %v1077_v10 = vsel %vm8904_vm3, %v1072_v54, %v1074_v7  ;;  %v1078_v11 = vsel %vm8904_vm3, %v1074_v7, %v1076_v57 }
 0x275   : > { %1081 = vst [vmem:[#allocation2 + $0xf8] sm:$0xf] %v1077_v10  ;;  %1082 = vst [vmem:[#allocation2 + $0x150] sm:$0xf] %v1078_v11 }
 0x277   : > { %v1144_v12 = vpop.permute.xlu1 %1143  ;;  %v641_v14 = vpop.permute.xlu0 %640 }
 0x278   : > { %v1149_v15 = vsel %vm8898_vm13, %v1144_v12, %v1146_v49 }
 0x279   : > { %1153 = vst [vmem:[#allocation2 + $0xe0] sm:$0xf] %v1149_v15 }
 0x27b   : > { %v1148_v18 = vpop.permute.xlu1 %1147  ;;  %v645_v21 = vpop.permute.xlu0 %644 }
 0x27c   : > { %v1150_v22 = vsel %vm8898_vm13, %v1146_v49, %v1148_v18 }
 0x27d   : > { %1154 = vst [vmem:[#allocation2 + $0x148] sm:$0xf] %v1150_v22 }
 0x27f   : > { %v1168_v23 = vpop.permute.xlu1 %1167  ;;  %v665_v17 = vpop.permute.xlu0 %664 }
 0x280   : > { %v1173_v24 = vsel %vm8901_vm14, %v1168_v23, %v1170_v61 }
 0x281   : > { %1177 = vst [vmem:[#allocation2 + $0x120] sm:$0xf] %v1173_v24 }
 0x283   : > { %v1172_v26 = vpop.permute.xlu1 %1171  ;;  %v669_v27 = vpop.permute.xlu0 %668 }
 0x284   : > { %v1174_v28 = vsel %vm8901_vm14, %v1170_v61, %v1172_v26 }
 0x285   : > { %1178 = vst [vmem:[#allocation2 + $0x28] sm:$0xf] %v1174_v28 }
 0x287   : > { %v1192_v32 = vpop.permute.xlu1 %1191  ;;  %v713_v33 = vpop.permute.xlu0 %712 }
 0x288   : > { %v1197_v34 = vsel %vm558_vm1, %v1192_v32, %v1194_v0 }
 0x289   : > { %1201 = vst [vmem:[#allocation2 + $0x48] sm:$0xf] %v1197_v34 }
 0x28b   : > { %v1196_v35 = vpop.permute.xlu1 %1195  ;;  %v717_v36 = vpop.permute.xlu0 %716 }
 0x28c   : > { %v1198_v37 = vsel %vm558_vm1, %v1194_v0, %v1196_v35 }
 0x28d   : > { %1202 = vst [vmem:[#allocation2 + $0x60] sm:$0xf] %v1198_v37 }
 0x28f   : > { %v619_v38 = vpop.permute.xlu1 %618  ;;  %v737_v39 = vpop.permute.xlu0 %736 }
 0x290   : > { %v622_v40 = vsel %vm8898_vm13, %v617_v3, %v619_v38  ;;  %v623_v41 = vsel %vm8898_vm13, %v619_v38, %v621_v8 }
 0x291   : > { %626 = vst [vmem:[#allocation2 + $0xd0] sm:$0xf0] %v622_v40  ;;  %627 = vst [vmem:[#allocation2 + $0x98] sm:$0xf0] %v623_v41 }
 0x293   : > { %v643_v42 = vpop.permute.xlu1 %642  ;;  %v741_v43 = vpop.permute.xlu0 %740 }
 0x294   : > { %v646_v44 = vsel %vm8901_vm14, %v641_v14, %v643_v42  ;;  %v647_v45 = vsel %vm8901_vm14, %v643_v42, %v645_v21 }
 0x295   : > { %650 = vst [vmem:[#allocation2 + $0x138] sm:$0xf0] %v646_v44  ;;  %651 = vst [vmem:[#allocation2 + $0x20] sm:$0xf0] %v647_v45 }
 0x297   : > { %v667_v46 = vpop.permute.xlu1 %666  ;;  %v761_v25 = vpop.permute.xlu0 %760 }
 0x298   : > { %v670_v47 = vsel %vm558_vm1, %v665_v17, %v667_v46  ;;  %v671_v48 = vsel %vm558_vm1, %v667_v46, %v669_v27 }
 0x299   : > { %674 = vst [vmem:[#allocation2 + $0x178] sm:$0xf0] %v670_v47  ;;  %675 = vst [vmem:[#allocation2 + $0x130] sm:$0xf0] %v671_v48 }
 0x29b   : > { %v715_v30 = vpop.permute.xlu1 %714  ;;  %v765_v50 = vpop.permute.xlu0 %764 }
 0x29c   : > { %v718_v51 = vsel %vm8899_vm10, %v713_v33, %v715_v30  ;;  %v719_v13 = vsel %vm8899_vm10, %v715_v30, %v717_v36  ;;  %v1236_v52 = vld [vmem:[#allocation2 + $0x20] sm:$0xff]  ;;  %v1235_v53 = vld [vmem:[#allocation2 + $0x138] sm:$0xff] }
 0x29d   : > { %722 = vst [vmem:[#allocation2 + $0x118] sm:$0xf0] %v718_v51  ;;  %723 = vst [vmem:[#allocation2 + $0x168] sm:$0xf0] %v719_v13  ;;  %1285 = vmatprep.subr.mxu0 %v1236_v52  ;;  %v1228_v52 = vld [vmem:[#allocation2 + $0x148] sm:$0xff] }
 0x29e   : > { %1286 = vmatpush1.msra.mxu0 %v1235_v53  ;;  %v1227_v53 = vld [vmem:[#allocation2 + $0xe0] sm:$0xff] }
 0x29f   : > { %v739_v54 = vpop.permute.xlu1 %738  ;;  %v915_v55 = vpop.permute.xlu0 %914 }
 0x2a0   : > { %v742_v56 = vsel %vm8900_vm11, %v737_v39, %v739_v54  ;;  %v743_v57 = vsel %vm8900_vm11, %v739_v54, %v741_v43 }
 0x2a1   : > { %746 = vst [vmem:[#allocation2 + $0x180] sm:$0xf0] %v742_v56  ;;  %747 = vst [vmem:[#allocation2 + $0x100] sm:$0xf0] %v743_v57  ;;  %v1224_v56 = vld [vmem:[#allocation2 + $0xd8] sm:$0xff]  ;;  %v1223_v57 = vld [vmem:[#allocation2 + $0x88] sm:$0xff] }
 0x2a3   : > { %v763_v29 = vpop.permute.xlu1 %762  ;;  %v919_v58 = vpop.permute.xlu0 %918 }
 0x2a4   : > { %v766_v49 = vsel %vm8904_vm3, %v761_v25, %v763_v29  ;;  %v767_v59 = vsel %vm8904_vm3, %v763_v29, %v765_v50  ;;  %v1222_v29 = vld [vmem:[#allocation2 + $0x98] sm:$0xff] }
 0x2a5   : > { %770 = vst [vmem:[#allocation2 + $0x108] sm:$0xf0] %v766_v49  ;;  %771 = vst [vmem:[#allocation2 + $0x90] sm:$0xf0] %v767_v59 }
 0x2a7   : > { %v917_v60 = vpop.permute.xlu1 %916  ;;  %v939_v61 = vpop.permute.xlu0 %938 }
 0x2a8   : > { %v920_v62 = vsel %vm8899_vm10, %v915_v55, %v917_v60  ;;  %v921_v63 = vsel %vm8899_vm10, %v917_v60, %v919_v58  ;;  %v1230_v51 = vld [vmem:[#allocation2 + $0x100] sm:$0xff]  ;;  %v1221_v58 = vld [vmem:[#allocation2 + $0xd0] sm:$0xff] }
 0x2a9   : > { %924 = vst [vmem:[#allocation2 + $0x10] sm:$0xf0] %v920_v62  ;;  %925 = vst [vmem:[#allocation2 + $0x140] sm:$0xf0] %v921_v63  ;;  %v1229_v13 = vld [vmem:[#allocation2 + $0x180] sm:$0xff]  ;;  %v1216_v62 = vld [vmem:[#allocation2 + $0x168] sm:$0xff] }
 0x2aa   : > { %v1215_v63 = vld [vmem:[#allocation2 + $0x118] sm:$0xff] }
 0x2ab   : > { %v941_v0 = vpop.permute.xlu1 %940  ;;  %v943_v1 = vpop.permute.xlu0 %942 }
 0x2ac   : > { %v944_v2 = vsel %vm8900_vm11, %v939_v61, %v941_v0  ;;  %v945_v3 = vsel %vm8900_vm11, %v941_v0, %v943_v1  ;;  %v1214_v0 = vld [vmem:[#allocation2 + $0xe8] sm:$0xff]  ;;  %v1213_v1 = vld [vmem:[#allocation2 + $0x30] sm:$0xff] }
 0x2ad   : > { %948 = vst [vmem:[#allocation2 + $0xc0] sm:$0xf0] %v944_v2  ;;  %949 = vst [vmem:[#allocation2 + $0x170] sm:$0xf0] %v945_v3  ;;  %v1212_v2 = vld [vmem:[#allocation2 + $0xf0] sm:$0xff]  ;;  %v1211_v3 = vld [vmem:[#allocation2 + $0x8] sm:$0xff] }
 0x2af   : > { %v965_v4 = vpop.permute.xlu1 %964  ;;  %v963_v6 = vpop.permute.xlu0 %962 }
 0x2b0   : > { %v968_v7 = vsel %vm8904_vm3, %v963_v6, %v965_v4  ;;  %v1218_v60 = vld [vmem:[#allocation2 + $0x140] sm:$0xff]  ;;  %v1217_v61 = vld [vmem:[#allocation2 + $0x10] sm:$0xff] }
 0x2b1   : > { %972 = vst [vmem:[#allocation2 + $0x110] sm:$0xf0] %v968_v7  ;;  %v1209_v6 = vld [vmem:[#allocation2 + $0x50] sm:$0xff]  ;;  %v1208_v7 = vld [vmem:[#allocation2 + $0x160] sm:$0xff] }
 0x2b3   : > { %v1036_v8 = vpop.permute.xlu1 %1035  ;;  %v967_v10 = vpop.permute.xlu0 %966 }
 0x2b4   : > { %v969_v11 = vsel %vm8904_vm3, %v965_v4, %v967_v10  ;;  %v1232_v30 = vld [vmem:[#allocation2 + $0x170] sm:$0xff]  ;;  %v1231_v50 = vld [vmem:[#allocation2 + $0xc0] sm:$0xff]  ;;  %v1210_v4 = vld [vmem:[#allocation2 + $0x18] sm:$0xff] }
 0x2b5   : > { %973 = vst [vmem:[#allocation2] sm:$0xf0] %v969_v11  ;;  %v1256_v10 = vld [vmem:[#allocation2 + $0x60] sm:$0xf]  ;;  %v1255_v11 = vld [vmem:[#allocation2 + $0x48] sm:$0xf] }
 0x2b7   : > { %v1040_v12 = vpop.permute.xlu1 %1039  ;;  %v1038_v14 = vpop.permute.xlu0 %1037 }
 0x2b8   : > { %v1041_v15 = vsel %vm8898_vm13, %v1036_v8, %v1038_v14  ;;  %v1042_v18 = vsel %vm8898_vm13, %v1038_v14, %v1040_v12  ;;  %v1207_v8 = vld [vmem:[#allocation2 + $0x80] sm:$0xff]  ;;  %vm4049_vm13 = vcmp.eq.s32.totalorder %v5275_v9, 13 }
 0x2b9   : > { %1045 = vst [vmem:[#allocation2 + $0x128] sm:$0xf0] %v1041_v15  ;;  %1046 = vst [vmem:[#allocation2 + $0xa0] sm:$0xf0] %v1042_v18  ;;  %v1252_v15 = vld [vmem:[#allocation2 + $0xb8] sm:$0xff]  ;;  %v1251_v18 = vld [vmem:[#allocation2 + $0x70] sm:$0xff] }
 0x2bb   : > { %v1060_v21 = vpop.permute.xlu1 %1059  ;;  %v1062_v22 = vpop.permute.xlu0 %1061 }
 0x2bc   : > { %v1065_v23 = vsel %vm8901_vm14, %v1060_v21, %v1062_v22  ;;  %v1250_v21 = vld [vmem:[#allocation2 + $0x130] sm:$0xff] }
 0x2bd   : > { %1069 = vst [vmem:[#allocation2 + $0x188] sm:$0xf0] %v1065_v23 }
 0x2bf   : > { %v1064_v17 = vpop.permute.xlu1 %1063  ;;  %v1086_v24 = vpop.permute.xlu0 %1085 }
 0x2c0   : > { %v1066_v26 = vsel %vm8901_vm14, %v1062_v22, %v1064_v17  ;;  %v1226_v54 = vld [vmem:[#allocation2 + $0xa0] sm:$0xff]  ;;  %v1225_v55 = vld [vmem:[#allocation2 + $0x128] sm:$0xff]  ;;  %v1249_v22 = vld [vmem:[#allocation2 + $0x178] sm:$0xff]  ;;  %vm8909_vm14 = vcmp.eq.s32.totalorder %v5275_v9, 1 }
 0x2c1   : > { %1070 = vst [vmem:[#allocation2 + $0x38] sm:$0xf0] %v1066_v26  ;;  %v1245_v26 = vld [vmem:[#allocation2 + $0x110] sm:$0xff] }
 0x2c3   : > { %v1084_v27 = vpop.permute.xlu1 %1083  ;;  %v1132_v28 = vpop.permute.xlu0 %1131 }
 0x2c4   : > { %v1089_v31 = vsel %vm558_vm1, %v1084_v27, %v1086_v24  ;;  %v1244_v27 = vld [vmem:[#allocation2 + $0x90] sm:$0xff] }
 0x2c5   : > { %1093 = vst [vmem:[#allocation2 + $0x78] sm:$0xf0] %v1089_v31  ;;  %v1242_v31 = vld [vmem:[#allocation2 + $0x28] sm:$0xff] }
 0x2c7   : > { %v1088_v32 = vpop.permute.xlu1 %1087  ;;  %v1136_v33 = vpop.permute.xlu0 %1135 }
 0x2c8   : > { %v1090_v34 = vsel %vm558_vm1, %v1086_v24, %v1088_v32  ;;  %v1246_v24 = vld [vmem:[#allocation2] sm:$0xff] }
 0x2c9   : > { %1094 = vst [vmem:[#allocation2 + $0x68] sm:$0xf0] %v1090_v34  ;;  %v1241_v32 = vld [vmem:[#allocation2 + $0x120] sm:$0xff] }
 0x2ca   : > { %v1203_v34 = vld [vmem:[%s8885_s1] sm:$0xff] }
 0x2cb   : > { %v1134_v35 = vpop.permute.xlu1 %1133  ;;  %v1156_v36 = vpop.permute.xlu0 %1155 }
 0x2cc   : > { %v1137_v37 = vsel %vm8899_vm10, %v1132_v28, %v1134_v35  ;;  %v1138_v38 = vsel %vm8899_vm10, %v1134_v35, %v1136_v33  ;;  %v1253_v14 = vld [vmem:[#allocation2 + $0x78] sm:$0xff]  ;;  %v1243_v28 = vld [vmem:[#allocation2 + $0x108] sm:$0xff]  ;;  %vm4050_vm10 = vcmp.eq.s32.totalorder %v5294_v16, 13 }
 0x2cd   : > { %1141 = vst [vmem:[#allocation2 + $0xa8] sm:$0xf0] %v1137_v37  ;;  %1142 = vst [vmem:[#allocation2 + $0x40] sm:$0xf0] %v1138_v38  ;;  %v1240_v33 = vld [vmem:[#allocation2 + $0x38] sm:$0xff]  ;;  %v1239_v35 = vld [vmem:[#allocation2 + $0x188] sm:$0xff] }
 0x2ce   : > { %v1205_v37 = vld [vmem:[%s8885_s1 + $0x10] sm:$0xff] }
 0x2cf   : > { %v1158_v39 = vpop.permute.xlu1 %1157  ;;  %v1160_v40 = vpop.permute.xlu0 %1159 }
 0x2d0   : > { %v1161_v41 = vsel %vm8900_vm11, %v1156_v36, %v1158_v39  ;;  %v1162_v42 = vsel %vm8900_vm11, %v1158_v39, %v1160_v40  ;;  %v1254_v12 = vld [vmem:[#allocation2 + $0x68] sm:$0xff]  ;;  %v1206_v36 = vld [vmem:[%s8885_s1 + $0x18] sm:$0xff]  ;;  %vm3684_vm11 = vcmp.eq.s32.totalorder %v5294_v16, 14 }
 0x2d1   : > { %1165 = vst [vmem:[#allocation2 + $0x158] sm:$0xf0] %v1161_v41  ;;  %1166 = vst [vmem:[#allocation2 + $0xb0] sm:$0xf0] %v1162_v42 }
 0x2d3   : > { %v1182_v43 = vpop.permute.xlu1 %1181  ;;  %v1180_v44 = vpop.permute.xlu0 %1179 }
 0x2d4   : > { %v1185_v45 = vsel %vm8904_vm3, %v1180_v44, %v1182_v43  ;;  %v1220_v49 = vld [vmem:[#allocation2 + $0x40] sm:$0xff]  ;;  %v1219_v59 = vld [vmem:[#allocation2 + $0xa8] sm:$0xff] }
 0x2d5   : > { %1189 = vst [vmem:[#allocation2 + $0xf8] sm:$0xf0] %v1185_v45 }
 0x2d7   : > { %v1184_v46 = vpop.permute.xlu0 %1183 }
 0x2d8   : > { %v1186_v25 = vsel %vm8904_vm3, %v1182_v43, %v1184_v46  ;;  %v1234_v47 = vld [vmem:[#allocation2 + $0xb0] sm:$0xff]  ;;  %v1233_v48 = vld [vmem:[#allocation2 + $0x158] sm:$0xff] }
 0x2d9   : > { %1190 = vst [vmem:[#allocation2 + $0x150] sm:$0xf0] %v1186_v25  ;;  %1287 = vmatprep.subr.mxu0 %v1234_v47 }
 0x2da   : > { %1288 = vmatpush1.msra.mxu0 %v1233_v48 }
 0x2db   : > { %1289 = vmatprep.subr.mxu0 %v1232_v30 }
 0x2dc   : > { %1290 = vmatpush1.msra.mxu0 %v1231_v50  ;;  %v1247_v17 = vld [vmem:[#allocation2 + $0xf8] sm:$0xff] }
 0x2dd   : > { %1291 = vmatprep.subr.mxu0 %v1230_v51 }
 0x2de   : > { %1292 = vmatpush1.msra.mxu0 %v1229_v13 }
 0x2df   : > { %1293 = vmatprep.subr.mxu0 %v1228_v52 }
 0x2e0   : > { %1294 = vmatpush1.msra.mxu0 %v1227_v53  ;;  %v1248_v23 = vld [vmem:[#allocation2 + $0x150] sm:$0xff] }
 0x2e1   : > { %1295 = vmatprep.subr.mxu0 %v1226_v54 }
 0x2e2   : > { %1296 = vmatpush1.msra.mxu0 %v1225_v55 }
 0x2e3   : > { %1297 = vmatprep.subr.mxu0 %v1224_v56 }
 0x2e4   : > { %1298 = vmatpush1.msra.mxu0 %v1223_v57 }
 0x2e5   : > { %1299 = vmatprep.subr.mxu0 %v1222_v29 }
 0x2e6   : > { %1300 = vmatpush1.msra.mxu0 %v1221_v58 }
 0x2e7   : > { %1301 = vmatprep.subr.mxu0 %v1220_v49 }
 0x2e8   : > { %1302 = vmatpush1.msra.mxu0 %v1219_v59 }
 0x2e9   : > { %1303 = vmatprep.subr.mxu0 %v1218_v60  ;;  %v5848_v60 = vshrl.u32 %v373_v5, 7  ;;  %v1385_v5 = vld [vmem:[%s8887_s3] sm:$0xff] }
 0x2ea   : > { %1304 = vmatpush1.msra.mxu0 %v1217_v61 }
 0x2eb   : > { %1305 = vmatprep.subr.mxu0 %v1216_v62  ;;  %8994 = vst [vmem:[#allocation10_spill] sm:$0xff] %v5848_v60  ;;  %v8915_v62 = vsub.s32 0, %v5848_v60 }
 0x2ec   : > { %1306 = vmatpush1.msra.mxu0 %v1215_v63 }
 0x2ed   : > { %1307 = vmatprep.subr.mxu0 %v1214_v0 }
 0x2ee   : > { %1308 = vmatpush1.msra.mxu0 %v1213_v1 }
 0x2ef   : > { %1309 = vmatprep.subr.mxu0 %v1212_v2 }
 0x2f0   : > { %1310 = vmatpush1.msra.mxu0 %v1211_v3 }
 0x2f1   : > { %1311 = vmatprep.subr.mxu0 %v1210_v4 }
 0x2f2   : > { %1312 = vmatpush1.msra.mxu0 %v1209_v6  ;;  %v8918_v6 = vsub.s32 1, %v5848_v60 }
 0x2f3   : > { %1313 = vmatprep.subr.mxu0 %v1208_v7 }
 0x2f4   : > { %1314 = vmatpush1.msra.mxu0 %v1207_v8  ;;  %v8917_v8 = vsub.s32 2, %v5848_v60 }
 0x2f5   : > { %5086 = vmatprep.subr.msk.mxu0 %vm8902_vm6, %v1256_v10 }
 0x2f6   : > { %5087 = vmatpush2.msk.msra.mxu0 %vm8902_vm6, %v1255_v11 }
 0x2f7   : > { %1331 = vmatprep.subr.mxu0 %v1254_v12  ;;  %v8916_v12 = vsub.s32 3, %v5848_v60 }
 0x2f8   : > { %1332 = vmatpush2.msra.mxu0 %v1253_v14 }
 0x2f9   : > { %1333 = vmatprep.subr.mxu0 %v1252_v15 }
 0x2fa   : > { %1334 = vmatpush2.msra.mxu0 %v1251_v18 }
 0x2fb   : > { %1335 = vmatprep.subr.mxu0 %v1250_v21 }
 0x2fc   : > { %1336 = vmatpush2.msra.mxu0 %v1249_v22 }
 0x2fd   : > { %1337 = vmatprep.subr.mxu0 %v1248_v23 }
 0x2fe   : > { %1338 = vmatpush2.msra.mxu0 %v1247_v17 }
 0x2ff   : > { %1339 = vmatprep.subr.mxu0 %v1246_v24 }
 0x300   : > { %1340 = vmatpush2.msra.mxu0 %v1245_v26 }
 0x301   : > { %1341 = vmatprep.subr.mxu0 %v1244_v27 }
 0x302   : > { %1342 = vmatpush2.msra.mxu0 %v1243_v28 }
 0x303   : > { %1343 = vmatprep.subr.mxu0 %v1242_v31 }
 0x304   : > { %1344 = vmatpush2.msra.mxu0 %v1241_v32 }
 0x305   : > { %1345 = vmatprep.subr.mxu0 %v1240_v33 }
 0x306   : > { %1346 = vmatpush2.msra.mxu0 %v1239_v35 }
 0x307   : > { %1348 = vmatmul.mubr.f32.vlgmr.msra.gmra.mxu0 %v1203_v34 }
 0x308   : > { %5089 = vmatprep.mubr.msk.f32.mxu0 %vm1269_vm2, %v1206_v36  ;;  %vm1695_vm2 = vcmp.eq.s32.totalorder %v5275_v9, 0 }
 0x30b   : > { %1354 = vmatmul.mubr.f32.gmra.mxu0 %v1205_v37 }
 0x3c7   : > { %v1349_v38 = vpop.f32.mrf.mxu0 }
 0x3c8   : > { %v5755_v39 = vadd.f32 %v1349_v38, %v5303_v20 }
 0x3c9   : > { %v1351_v40 = vpop.f32.mrf.mxu0 }
 0x3ca   : > { %8990 = vst [vmem:[#allocation6_spill] sm:$0xff] %v5755_v39  ;;  %v5758_v41 = vadd.f32 %v1351_v40, %v5303_v20  ;;  %1665 = vrot.lane.b32.xlu0 %v5755_v39, %s5169_s21  ;;  %v1362_v46 = vrot.slane %v5755_v39, 4 }
 0x3cb   : > { %v1355_v42 = vpop.f32.mrf.mxu0 }
 0x3cc   : > { %8991 = vst [vmem:[#allocation7_spill] sm:$0xff] %v5758_v41  ;;  %v5763_v43 = vadd.f32 %v1355_v42, %v5301_v19  ;;  %1667 = vrot.lane.b32.xlu1 %v5758_v41, %s5169_s21  ;;  %v1363_v20 = vrot.slane %v5758_v41, 4  ;;  %v1366_v47 = vadd.f32 %v1362_v46, %v5755_v39 }
 0x3cd   : > { %v1357_v44 = vpop.f32.mrf.mxu0 }
 0x3ce   : > { %8992 = vst [vmem:[#allocation8_spill] sm:$0xff] %v5763_v43  ;;  %v5768_v45 = vadd.f32 %v1357_v44, %v5301_v19  ;;  %1669 = vrot.lane.b32.xlu0 %v5763_v43, %s5169_s21  ;;  %v1367_v25 = vadd.f32 %v1363_v20, %v5758_v41  ;;  %v1368_v19 = vadd.f32 %v1366_v47, %v5763_v43  ;;  %v1372_v50 = vrot.slane %v5763_v43, 4 }
 0x3d0   : > { %8993 = vst [vmem:[#allocation9_spill] sm:$0xff] %v5768_v45  ;;  %1671 = vrot.lane.b32.xlu1 %v5768_v45, %s5169_s21  ;;  %v1369_v48 = vadd.f32 %v1367_v25, %v5768_v45  ;;  %v1373_v30 = vrot.slane %v5768_v45, 4  ;;  %v1376_v13 = vadd.f32 %v1372_v50, %v1368_v19 }
 0x3d2   : > { %v1377_v51 = vadd.f32 %v1373_v30, %v1369_v48  ;;  %v1378_v53 = vsel %vm8902_vm6, %v1376_v13, 0.0 }
 0x3d4   : > { %v1379_v52 = vsel %vm8902_vm6, %v1377_v51, 0.0  ;;  %vm8911_vm6 = vcmp.eq.s32.totalorder %v5294_v16, 1 }
 0x3d5   : > { %v1380_v54 = vadd.f32 %v1379_v52, %v1378_v53 }
 0x3f4   : > { %1381 = vadd.xlane.f32.xlu1 %v1380_v54 }
 0x43c   : > { %v1666_v55 = vpop.permute.xlu0 %1665 }
 0x43d   : > { %v5785_v56 = vsel %vm8897_vm0, 0.0, %v1666_v55 }
 0x43e   : > { %1707 = vrot.lane.b32.xlu0 %v5785_v56, %s5174_s28  ;;  %1749 = vrot.lane.b32.xlu1 %v5785_v56, %s5172_s26  ;;  %v1668_v57 = vpop.permute.xlu1 %1667 }
 0x43f   : > { %v5808_v29 = vsel %vm8897_vm0, %v1666_v55, %v1668_v57  ;;  %v1692_v58 = vsel %vm8897_vm0, %v1668_v57, 0.0 }
 0x440   : > { %v1670_v49 = vpop.permute.xlu0 %1669 }
 0x441   : > { %v5837_v59 = vsel %vm8897_vm0, 0.0, %v1670_v49 }
 0x442   : > { %1791 = vrot.lane.b32.xlu0 %v5785_v56, %s5170_s24  ;;  %2173 = vrot.lane.b32.xlu1 %v5785_v56, %s5175_s29  ;;  %v1672_v61 = vpop.permute.xlu1 %1671 }
 0x443   : > { %v1693_v3 = vsel %vm8897_vm0, %v1672_v61, 0.0  ;;  %v5875_v4 = vsel %vm8897_vm0, %v1670_v49, %v1672_v61  ;;  %vm1696_vm0 = vcmp.eq.s32.totalorder %v5294_v16, 0 }
 0x446   : > { %2203 = vrot.lane.b32.xlu0 %v5785_v56, %s5171_s25  ;;  %2239 = vrot.lane.b32.xlu1 %v5785_v56, %s5182_s16 }
 0x44a   : > { %2975 = vrot.lane.b32.xlu0 %v5785_v56, %s8935_s20  ;;  %2984 = vrot.lane.b32.xlu1 %v5785_v56, %s8933_s22 }
 0x44e   : > { %2993 = vrot.lane.b32.xlu0 %v5785_v56, %s8931_s23  ;;  %3002 = vrot.lane.b32.xlu1 %v5785_v56, %s8929_s27 }
 0x452   : > { %1711 = vrot.lane.b32.xlu0 %v1692_v58, %s5174_s28  ;;  %1709 = vrot.lane.b32.xlu1 %v5808_v29, %s5174_s28 }
 0x456   : > { %1751 = vrot.lane.b32.xlu0 %v5808_v29, %s5172_s26  ;;  %1753 = vrot.lane.b32.xlu1 %v1692_v58, %s5172_s26 }
 0x45a   : > { %1795 = vrot.lane.b32.xlu0 %v1692_v58, %s5170_s24  ;;  %1793 = vrot.lane.b32.xlu1 %v5808_v29, %s5170_s24 }
 0x45e   : > { %2175 = vrot.lane.b32.xlu0 %v5808_v29, %s5175_s29  ;;  %2177 = vrot.lane.b32.xlu1 %v1692_v58, %s5175_s29 }
 0x462   : > { %2207 = vrot.lane.b32.xlu0 %v1692_v58, %s5171_s25  ;;  %2205 = vrot.lane.b32.xlu1 %v5808_v29, %s5171_s25 }
 0x466   : > { %2241 = vrot.lane.b32.xlu0 %v5808_v29, %s5182_s16  ;;  %2243 = vrot.lane.b32.xlu1 %v1692_v58, %s5182_s16 }
 0x46a   : > { %3004 = vrot.lane.b32.xlu0 %v5808_v29, %s8929_s27  ;;  %3006 = vrot.lane.b32.xlu1 %v1692_v58, %s8929_s27 }
 0x46e   : > { %3032 = vrot.lane.b32.xlu0 %v5808_v29, %s8935_s20  ;;  %3041 = vrot.lane.b32.xlu1 %v5808_v29, %s8933_s22 }
 0x472   : > { %3050 = vrot.lane.b32.xlu0 %v5808_v29, %s8931_s23  ;;  %1713 = vrot.lane.b32.xlu1 %v5837_v59, %s5174_s28 }
 0x476   : > { %1755 = vrot.lane.b32.xlu0 %v5837_v59, %s5172_s26  ;;  %1797 = vrot.lane.b32.xlu1 %v5837_v59, %s5170_s24 }
 0x47a   : > { %2179 = vrot.lane.b32.xlu0 %v5837_v59, %s5175_s29  ;;  %2209 = vrot.lane.b32.xlu1 %v5837_v59, %s5171_s25 }
 0x47d   : > { %v1382_v63 = vpop.xlane.xlu1 %1381 }
 0x47e   : > { %v1384_v0 = vmul.f32 0.00390625, %v1382_v63  ;;  %2245 = vrot.lane.b32.xlu0 %v5837_v59, %s5182_s16  ;;  %2977 = vrot.lane.b32.xlu1 %v5837_v59, %s8935_s20 }
 0x480   : > { %v1389_v1 = vrot.slane %v1384_v0, %v8915_v62  ;;  %v1395_v7 = vrot.slane %v1384_v0, %v8918_v6  ;;  %v1405_v11 = vrot.slane %v1384_v0, %v8917_v8  ;;  %v1415_v15 = vrot.slane %v1384_v0, %v8916_v12 }
 0x482   : > { %2986 = vrot.lane.b32.xlu0 %v5837_v59, %s8933_s22  ;;  %2995 = vrot.lane.b32.xlu1 %v5837_v59, %s8931_s23  ;;  %v5868_v2 = vmul.f32 %v1389_v1, %v1385_v5  ;;  %v1396_v10 = vmul.f32 %v1395_v7, %v1385_v5  ;;  %v1406_v14 = vmul.f32 %v1405_v11, %v1385_v5 }
 0x483   : > { %v1416_v22 = vmul.f32 %v1415_v15, %v1385_v5 }
 0x486   : > { %3008 = vrot.lane.b32.xlu0 %v5837_v59, %s8929_s27  ;;  %1717 = vrot.lane.b32.xlu1 %v1693_v3, %s5174_s28 }
 0x48a   : > { %1715 = vrot.lane.b32.xlu0 %v5875_v4, %s5174_s28  ;;  %1757 = vrot.lane.b32.xlu1 %v5875_v4, %s5172_s26 }
 0x48e   : > { %1759 = vrot.lane.b32.xlu0 %v1693_v3, %s5172_s26  ;;  %1801 = vrot.lane.b32.xlu1 %v1693_v3, %s5170_s24 }
 0x492   : > { %1799 = vrot.lane.b32.xlu0 %v5875_v4, %s5170_s24  ;;  %2181 = vrot.lane.b32.xlu1 %v5875_v4, %s5175_s29 }
 0x496   : > { %2183 = vrot.lane.b32.xlu0 %v1693_v3, %s5175_s29  ;;  %2213 = vrot.lane.b32.xlu1 %v1693_v3, %s5171_s25 }
 0x49a   : > { %2211 = vrot.lane.b32.xlu0 %v5875_v4, %s5171_s25  ;;  %2247 = vrot.lane.b32.xlu1 %v5875_v4, %s5182_s16 }
 0x49e   : > { %2249 = vrot.lane.b32.xlu0 %v1693_v3, %s5182_s16  ;;  %3010 = vrot.lane.b32.xlu1 %v5875_v4, %s8929_s27 }
 0x4a2   : > { %3012 = vrot.lane.b32.xlu0 %v1693_v3, %s8929_s27  ;;  %3034 = vrot.lane.b32.xlu1 %v5875_v4, %s8935_s20  ;;  %s5187_s27 = smov 1   ;;  %s5188_s20 = smov 2  }
 0x4a6   : > { %3043 = vrot.lane.b32.xlu0 %v5875_v4, %s8933_s22  ;;  %3052 = vrot.lane.b32.xlu1 %v5875_v4, %s8931_s23  ;;  %s5189_s22 = smov 4   ;;  %s5190_s23 = smov 6  }
 0x4aa   : > { %1398 = vrot.lane.b32.xlu0 %v1396_v10, %s5171_s25 }
 0x4ae   : > { %1408 = vrot.lane.b32.xlu0 %v1406_v14, %s5170_s24 }
 0x4b0   : > { %v1708_v18 = vpop.permute.xlu0 %1707  ;;  %v1750_v21 = vpop.permute.xlu1 %1749 }
 0x4b2   : > { %1418 = vrot.lane.b32.xlu0 %v1416_v22, %s5182_s16 }
 0x4b4   : > { %v1792_v23 = vpop.permute.xlu0 %1791  ;;  %v5915_v17 = vpop.permute.xlu1 %2173 }
 0x4b8   : > { %v5917_v24 = vpop.permute.xlu0 %2203  ;;  %v5919_v26 = vpop.permute.xlu1 %2239 }
 0x4bc   : > { %v2976_v27 = vpop.permute.xlu0 %2975  ;;  %v2985_v28 = vpop.permute.xlu1 %2984 }
 0x4bd   : > { %v3059_v31 = vsel %vm1911_vm8, %v2976_v27, %v2985_v28 }
 0x4c0   : > { %v2994_v32 = vpop.permute.xlu0 %2993  ;;  %v3003_v33 = vpop.permute.xlu1 %3002 }
 0x4c1   : > { %v3062_v34 = vsel %vm558_vm1, %v3059_v31, %v2994_v32 }
 0x4c2   : > { %v3065_v35 = vsel %vm8904_vm3, %v3062_v34, %v3003_v33  ;;  %vm8907_vm3 = vcmp.eq.s32.totalorder %v5275_v9, 2 }
 0x4c3   : > { %3105 = vrot.lane.b32.xlu1 %v3065_v35, %s5177_s11  ;;  %v5925_v36 = vrot.slane %v3065_v35, 4 }
 0x4c4   : > { %v1712_v37 = vpop.permute.xlu0 %1711  ;;  %v1710_v38 = vpop.permute.xlu1 %1709 }
 0x4c5   : > { %3096 = vst [vmem:[#allocation3 + $0x760] sm:$0xf0] %v5925_v36  ;;  %v1725_v44 = vsel %vm8903_vm15, %v1708_v18, %v1710_v38  ;;  %v1726_v20 = vsel %vm8903_vm15, %v1710_v38, %v1712_v37  ;;  %vm3683_vm15 = vcmp.eq.s32.totalorder %v5275_v9, 14 }
 0x4c6   : > { %v1737_v47 = vsel %vm1695_vm2, %v1725_v44, %v5785_v56  ;;  %v1738_v19 = vsel %vm1696_vm0, %v1726_v20, %v5808_v29 }
 0x4c7   : > { %3182 = vrot.lane.b32.xlu1 %v3065_v35, %s5178_s12 }
 0x4c8   : > { %v1752_v40 = vpop.permute.xlu0 %1751  ;;  %v1754_v42 = vpop.permute.xlu1 %1753 }
 0x4c9   : > { %v1767_v46 = vsel %vm8905_vm9, %v1750_v21, %v1752_v40  ;;  %v1768_v25 = vsel %vm8905_vm9, %v1752_v40, %v1754_v42  ;;  %vm8906_vm9 = vcmp.eq.s32.totalorder %v5294_v16, 2 }
 0x4ca   : > { %v4055_v50 = vsel %vm4049_vm13, %v1767_v46, %v1725_v44  ;;  %v4056_v52 = vsel %vm4050_vm10, %v1768_v25, %v1726_v20  ;;  %v1779_v54 = vsel %vm8909_vm14, %v1767_v46, %v1737_v47  ;;  %v1780_v55 = vsel %vm8911_vm6, %v1768_v25, %v1738_v19 }
 0x4cb   : > { %3254 = vrot.lane.b32.xlu1 %v3065_v35, %s5176_s30 }
 0x4cc   : > { %v1796_v48 = vpop.permute.xlu0 %1795  ;;  %v1794_v30 = vpop.permute.xlu1 %1793 }
 0x4cd   : > { %v1809_v51 = vsel %vm686_vm7, %v1792_v23, %v1794_v30  ;;  %v1810_v13 = vsel %vm686_vm7, %v1794_v30, %v1796_v48 }
 0x4ce   : > { %v2624_v53 = vsel %vm1695_vm2, %v1767_v46, %v1809_v51  ;;  %v5965_v57 = vsel %vm8907_vm3, %v1809_v51, %v1779_v54  ;;  %v5969_v58 = vsel %vm8906_vm9, %v1810_v13, %v1780_v55  ;;  %v5973_v49 = vsel %vm3684_vm11, %v1810_v13, %v4056_v52 }
 0x4cf   : > { %2642 = vrot.lane.b32.xlu1 %v2624_v53, %s5177_s11  ;;  %v5977_v61 = vsel %vm3683_vm15, %v1809_v51, %v4055_v50  ;;  %v2625_v3 = vsel %vm1696_vm0, %v1768_v25, %v1810_v13  ;;  %vm8908_vm9 = vcmp.eq.s32.totalorder %v5275_v9, 15  ;;  %vm3327_vm3 = vcmp.eq.s32.totalorder %v5294_v16, 15 }
 0x4d0   : > { %v2176_v63 = vpop.permute.xlu0 %2175  ;;  %v2178_v0 = vpop.permute.xlu1 %2177  ;;  %v3332_v21 = vsel %vm8908_vm9, %v1809_v51, %v1767_v46  ;;  %v3333_v31 = vsel %vm3327_vm3, %v1810_v13, %v1768_v25  ;;  %vm8910_vm9 = vcmask 1022976  }
 0x4d1   : > { %v2191_v40 = vsel %vm8912_vm12, %v5915_v17, %v2176_v63  ;;  %v2192_v48 = vsel %vm8912_vm12, %v2176_v63, %v2178_v0 }
 0x4d3   : > { %2663 = vrot.lane.b32.xlu1 %v2624_v53, %s5176_s30 }
 0x4d4   : > { %v2208_v5 = vpop.permute.xlu0 %2207  ;;  %v2206_v1 = vpop.permute.xlu1 %2205 }
 0x4d5   : > { %v6019_v37 = vsel %vm577_vm5, %v5917_v24, %v2206_v1  ;;  %v2222_v17 = vsel %vm577_vm5, %v2206_v1, %v2208_v5 }
 0x4d6   : > { %v2233_v20 = vsel %vm1695_vm2, %v2191_v40, %v6019_v37  ;;  %v2234_v51 = vsel %vm1696_vm0, %v2192_v48, %v2222_v17 }
 0x4d7   : > { %2687 = vrot.lane.b32.xlu1 %v2625_v3, %s5178_s12 }
 0x4d8   : > { %v2242_v7 = vpop.permute.xlu0 %2241  ;;  %v2244_v10 = vpop.permute.xlu1 %2243 }
 0x4d9   : > { %v2258_v38 = vsel %vm8910_vm9, %v5919_v26, %v2242_v7  ;;  %v2259_v47 = vsel %vm8910_vm9, %v2242_v7, %v2244_v10  ;;  %vm8997_vm9 = vcmask 1043456  }
 0x4da   : > { %v2270_v24 = vsel %vm8909_vm14, %v2258_v38, %v2233_v20  ;;  %vm8995_vm14 = vcmask 392192   ;;  %v2271_v52 = vsel %vm8911_vm6, %v2259_v47, %v2234_v51  ;;  %vm8999_vm6 = vcmask 1014784  }
 0x4db   : > { %2705 = vrot.lane.b32.xlu1 %v2625_v3, %s5186_s18  ;;  %vm9000_vm12 = vmmov %vm8999_vm6 }
 0x4dc   : > { %v5985_v11 = vpop.permute.xlu0 %3004  ;;  %v5987_v14 = vpop.permute.xlu1 %3006 }
 0x4dd   : > { %v3020_v15 = vsel %vm8976_vm4, %v3003_v33, %v5985_v11 }
 0x4de   : > { %3107 = vrot.lane.b32.xlu0 %v3020_v15, %s5177_s11  ;;  %v5992_v18 = vrot.slane %v3020_v15, 4 }
 0x4df   : > { %3341 = vrot.lane.b32.xlu1 %v3332_v21, %s5178_s12 }
 0x4e0   : > { %3097 = vst [vmem:[#allocation3 + $0x798] sm:$0xf0] %v5992_v18  ;;  %v5998_v22 = vpop.permute.xlu0 %3032  ;;  %v6000_v23 = vpop.permute.xlu1 %3041 }
 0x4e2   : > { %3184 = vrot.lane.b32.xlu0 %v3020_v15, %s5178_s12 }
 0x4e3   : > { %3359 = vrot.lane.b32.xlu1 %v3332_v21, %s5186_s18 }
 0x4e4   : > { %v6005_v27 = vpop.permute.xlu0 %3050  ;;  %v1714_v28 = vpop.permute.xlu1 %1713 }
 0x4e6   : > { %3256 = vrot.lane.b32.xlu0 %v3020_v15, %s5176_s30 }
 0x4e7   : > { %3373 = vrot.lane.b32.xlu1 %v3333_v31, %s5176_s30 }
 0x4e8   : > { %v1756_v32 = vpop.permute.xlu0 %1755  ;;  %v1798_v33 = vpop.permute.xlu1 %1797 }
 0x4ea   : > { %2633 = vrot.lane.b32.xlu0 %v2624_v53, %s5178_s12 }
 0x4eb   : > { %3395 = vrot.lane.b32.xlu1 %v3333_v31, %s5178_s12 }
 0x4ec   : > { %v6013_v34 = vpop.permute.xlu0 %2179  ;;  %v6015_v35 = vpop.permute.xlu1 %2209 }
 0x4ee   : > { %2651 = vrot.lane.b32.xlu0 %v2624_v53, %s5186_s18 }
 0x4ef   : > { %3404 = vrot.lane.b32.xlu1 %v3333_v31, %s5177_s11 }
 0x4f0   : > { %v6027_v42 = vpop.permute.xlu0 %2245  ;;  %v2978_v44 = vpop.permute.xlu1 %2977 }
 0x4f2   : > { %2665 = vrot.lane.b32.xlu0 %v2625_v3, %s5176_s30 }
 0x4f3   : > { %2288 = vrot.lane.b32.xlu1 %v2270_v24, %s5177_s11 }
 0x4f4   : > { %v2987_v26 = vpop.permute.xlu0 %2986  ;;  %v2996_v46 = vpop.permute.xlu1 %2995 }
 0x4f5   : > { %v3060_v25 = vsel %vm1911_vm8, %v2978_v44, %v2987_v26 }
 0x4f6   : > { %2696 = vrot.lane.b32.xlu0 %v2625_v3, %s5177_s11  ;;  %v3063_v30 = vsel %vm558_vm1, %v3060_v25, %v2996_v46  ;;  %v3690_v46 = vsel %vm3684_vm11, %v2259_v47, %v2192_v48 }
 0x4f7   : > { %2309 = vrot.lane.b32.xlu1 %v2270_v24, %s5176_s30 }
 0x4f8   : > { %v3009_v19 = vpop.permute.xlu0 %3008  ;;  %v1718_v50 = vpop.permute.xlu1 %1717 }
 0x4f9   : > { %v6046_v13 = vsel %vm8995_vm14, %v3063_v30, %v3009_v19  ;;  %vm8998_vm14 = vcmask 998400   ;;  %v3696_v30 = vsel %vm3327_vm3, %v2222_v17, %v3690_v46 }
 0x4fa   : > { %8996 = vst [vmem:[#allocation11_spill] sm:$0xff] %v6046_v13  ;;  %3350 = vrot.lane.b32.xlu0 %v3332_v21, %s5177_s11  ;;  %v8914_v53 = vrot.slane %v6046_v13, 4 }
 0x4fb   : > { %2330 = vrot.lane.b32.xlu1 %v2271_v52, %s5178_s12 }
 0x4fc   : > { %v1716_v54 = vpop.permute.xlu0 %1715  ;;  %v1758_v55 = vpop.permute.xlu1 %1757  ;;  %v6057_v63 = vsel %vm8997_vm9, %v5925_v36, %v8914_v53  ;;  %vm9001_vm9 = vmmov %vm8998_vm14 }
 0x4fd   : > { %3098 = vst [vmem:[#allocation3 + $0x538] sm:$0xff] %v6057_v63  ;;  %v6064_v1 = vsel %vm8998_vm14, %v1714_v28, %v1716_v54  ;;  %v6067_v3 = vsel %vm8999_vm6, %v1756_v32, %v1758_v55  ;;  %vm9005_vm6 = vcmask 1043456   ;;  %vm9006_vm14 = vcmask 392192  }
 0x4fe   : > { %3371 = vrot.lane.b32.xlu0 %v3332_v21, %s5176_s30  ;;  %v6077_v21 = vsel %vm9001_vm9, %v1716_v54, %v1718_v50  ;;  %v4057_v32 = vsel %vm4049_vm13, %v6067_v3, %v6064_v1  ;;  %v3689_v50 = vsel %vm3683_vm15, %v2258_v38, %v2191_v40  ;;  %vm9007_vm9 = vcmask 523264  }
 0x4ff   : > { %2348 = vrot.lane.b32.xlu1 %v2271_v52, %s5186_s18 }
 0x500   : > { %v1760_v0 = vpop.permute.xlu0 %1759  ;;  %v1802_v5 = vpop.permute.xlu1 %1801 }
 0x501   : > { %v6070_v7 = vsel %vm9000_vm12, %v1758_v55, %v1760_v0  ;;  %vm9004_vm12 = vcmp.eq.s32.totalorder %v5275_v9, 15  ;;  %v4068_v55 = vsel %vm3327_vm3, %v5808_v29, %v5973_v49 }
 0x502   : > { %3413 = vrot.lane.b32.xlu0 %v3333_v31, %s5186_s18  ;;  %v4058_v44 = vsel %vm4050_vm10, %v6070_v7, %v6077_v21  ;;  %v3695_v47 = vsel %vm9004_vm12, %v6019_v37, %v3689_v50  ;;  %vm9008_vm12 = vcmask 654336  }
 0x503   : > { %3148 = vrot.lane.b32.xlu1 %v5992_v18, %s5179_s14 }
 0x504   : > { %v1800_v10 = vpop.permute.xlu0 %1799  ;;  %v6074_v15 = vpop.permute.xlu1 %2181 }
 0x505   : > { %v6080_v31 = vsel %vm686_vm7, %v1798_v33, %v1800_v10  ;;  %v6083_v28 = vsel %vm686_vm7, %v1800_v10, %v1802_v5 }
 0x506   : > { %2279 = vrot.lane.b32.xlu0 %v2270_v24, %s5178_s12  ;;  %v6099_v33 = vsel %vm3684_vm11, %v6083_v28, %v4058_v44  ;;  %v6104_v20 = vsel %vm3683_vm15, %v6080_v31, %v4057_v32 }
 0x507   : > { %3220 = vrot.lane.b32.xlu1 %v5992_v18, %s5180_s15 }
 0x508   : > { %v6106_v26 = vpop.permute.xlu1 %2213 }
 0x50a   : > { %2297 = vrot.lane.b32.xlu0 %v2270_v24, %s5186_s18 }
 0x50b   : > { %3292 = vrot.lane.b32.xlu1 %v5992_v18, %s9002_s19 }
 0x50c   : > { %v6113_v25 = vpop.permute.xlu1 %2247 }
 0x50e   : > { %2311 = vrot.lane.b32.xlu0 %v2271_v52, %s5176_s30 }
 0x50f   : > { %3755 = vrot.lane.b32.xlu1 %v3696_v30, %s5178_s12 }
 0x510   : > { %v6121_v51 = vpop.permute.xlu1 %3010 }
 0x511   : > { %v6125_v24 = vsel %vm8976_vm4, %v3009_v19, %v6121_v51 }
 0x512   : > { %9003 = vst [vmem:[#allocation12_spill] sm:$0xff] %v6125_v24  ;;  %2339 = vrot.lane.b32.xlu0 %v2271_v52, %s5177_s11  ;;  %v8913_v48 = vrot.slane %v6125_v24, 4 }
 0x513   : > { %3713 = vrot.lane.b32.xlu1 %v3695_v47, %s5177_s11 }
 0x514   : > { %v6137_v38 = vsel %vm9005_vm6, %v5992_v18, %v8913_v48  ;;  %v6150_v18 = vpop.permute.xlu0 %2183  ;;  %v6166_v17 = vpop.permute.xlu1 %3034  ;;  %vm9009_vm6 = vcmp.eq.s32.totalorder %v5275_v9, 15 }
 0x515   : > { %3099 = vst [vmem:[#allocation3 + $0x450] sm:$0xff] %v6137_v38 }
 0x516   : > { %3146 = vrot.lane.b32.xlu0 %v5925_v36, %s5179_s14 }
 0x517   : > { %3722 = vrot.lane.b32.xlu1 %v3695_v47, %s5186_s18 }
 0x518   : > { %v6158_v37 = vpop.permute.xlu0 %2211 }
 0x51a   : > { %3218 = vrot.lane.b32.xlu0 %v5925_v36, %s5180_s15 }
 0x51b   : > { %3773 = vrot.lane.b32.xlu1 %v3696_v30, %s5186_s18 }
 0x51c   : > { %v6176_v54 = vpop.permute.xlu0 %2249 }
 0x51e   : > { %3290 = vrot.lane.b32.xlu0 %v5925_v36, %s9002_s19  ;;  %v3021_v36 = vsel %vm8976_vm4, %v5985_v11, %v5987_v14  ;;  %v6181_v11 = vpop.permute.xlu1 %3052 }
 0x51f   : > { %1830 = vrot.lane.b32.xlu1 %v5965_v57, %s5178_s12  ;;  %v3068_v40 = vsel %vm9006_vm14, %v3021_v36, %v5998_v22  ;;  %vm9010_vm14 = vcmask 916480   ;;  %v2626_v36 = vsel %vm1695_vm2, %v6067_v3, %v6080_v31 }
 0x520   : > { %v3071_v19 = vsel %vm9007_vm9, %v3068_v40, %v6000_v23  ;;  %v6187_v14 = vpop.permute.xlu0 %3012  ;;  %vm9011_vm9 = vmmov %vm9008_vm12 }
 0x521   : > { %v6174_v52 = vsel %vm9008_vm12, %v3071_v19, %v6005_v27  ;;  %vm9012_vm12 = vcmask 392192  }
 0x522   : > { %3736 = vrot.lane.b32.xlu0 %v3696_v30, %s5176_s30  ;;  %v6297_v53 = vrot.slane %v6174_v52, 4 }
 0x523   : > { %1848 = vrot.lane.b32.xlu1 %v5965_v57, %s5186_s18 }
 0x524   : > { %v6193_v27 = vpop.permute.xlu0 %3043 }
 0x526   : > { %3704 = vrot.lane.b32.xlu0 %v3695_v47, %s5178_s12 }
 0x527   : > { %1862 = vrot.lane.b32.xlu1 %v5969_v58, %s5176_s30 }
 0x528   : > { %v6209_v5 = vpop.permute.xlu0 %1398 }
 0x52a   : > { %3764 = vrot.lane.b32.xlu0 %v3696_v30, %s5177_s11 }
 0x52b   : > { %1893 = vrot.lane.b32.xlu1 %v5969_v58, %s5177_s11 }
 0x52c   : > { %v6213_v49 = vpop.permute.xlu0 %1408 }
 0x52e   : > { %3734 = vrot.lane.b32.xlu0 %v3695_v47, %s5176_s30 }
 0x52f   : > { %3109 = vrot.lane.b32.xlu1 %v6174_v52, %s5177_s11 }
 0x532   : > { %1839 = vrot.lane.b32.xlu0 %v5965_v57, %s5177_s11 }
 0x533   : > { %3186 = vrot.lane.b32.xlu1 %v6174_v52, %s5178_s12 }
 0x535   : > { %v3106_v22 = vpop.permute.xlu1 %3105 }
 0x536   : > { %1860 = vrot.lane.b32.xlu0 %v5965_v57, %s5176_s30  ;;  %v4067_v57 = vsel %vm9009_vm6, %v5785_v56, %v5977_v61  ;;  %v6222_v56 = vpop.permute.xlu0 %1418  ;;  %vm9014_vm6 = vmmov %vm9012_vm12 }
 0x537   : > { %3258 = vrot.lane.b32.xlu1 %v6174_v52, %s5176_s30 }
 0x539   : > { %v3183_v23 = vpop.permute.xlu1 %3182 }
 0x53a   : > { %1884 = vrot.lane.b32.xlu0 %v5969_v58, %s5178_s12 }
 0x53b   : > { %4108 = vrot.lane.b32.xlu1 %v4068_v55, %s5176_s30 }
 0x53d   : > { %v3255_v0 = vpop.permute.xlu1 %3254 }
 0x53e   : > { %1902 = vrot.lane.b32.xlu0 %v5969_v58, %s5186_s18 }
 0x53f   : > { %4076 = vrot.lane.b32.xlu1 %v4067_v57, %s5178_s12 }
 0x541   : > { %v2643_v10 = vpop.permute.xlu1 %2642 }
 0x542   : > { %4130 = vrot.lane.b32.xlu0 %v4068_v55, %s5178_s12 }
 0x543   : > { %4139 = vrot.lane.b32.xlu1 %v4068_v55, %s5177_s11 }
 0x545   : > { %v2664_v29 = vpop.permute.xlu1 %2663 }
 0x546   : > { %4085 = vrot.lane.b32.xlu0 %v4067_v57, %s5177_s11 }
 0x547   : > { %4106 = vrot.lane.b32.xlu1 %v4067_v57, %s5176_s30 }
 0x549   : > { %v6217_v58 = vpop.permute.xlu1 %2687 }
 0x54a   : > { %4094 = vrot.lane.b32.xlu0 %v4067_v57, %s5186_s18 }
 0x54b   : > { %3113 = vrot.lane.b32.xlu1 %v6125_v24, %s5177_s11 }
 0x54d   : > { %v6224_v61 = vpop.permute.xlu1 %2705 }
 0x54e   : > { %4148 = vrot.lane.b32.xlu0 %v4068_v55, %s5186_s18 }
 0x54f   : > { %3190 = vrot.lane.b32.xlu1 %v6125_v24, %s5178_s12 }
 0x550   : > { %v6229_v32 = vpop.permute.xlu0 %3107 }
 0x551   : > { %v3123_v44 = vsel %vm9010_vm14, %v3106_v22, %v6229_v32  ;;  %v3342_v46 = vpop.permute.xlu1 %3341  ;;  %vm9015_vm14 = vmmov %vm9014_vm6 }
 0x552   : > { %3135 = vst [vmem:[#allocation3 + $0x6b8] sm:$0xff] %v3123_v44  ;;  %3111 = vrot.lane.b32.xlu0 %v6046_v13, %s5177_s11 }
 0x553   : > { %3262 = vrot.lane.b32.xlu1 %v6125_v24, %s5176_s30 }
 0x554   : > { %v6237_v30 = vpop.permute.xlu0 %3184 }
 0x555   : > { %v3200_v50 = vsel %vm9011_vm9, %v3183_v23, %v6237_v30  ;;  %v3360_v47 = vpop.permute.xlu1 %3359  ;;  %vm9016_vm9 = vcmp.eq.s32.totalorder %v5275_v9, 15 }
 0x556   : > { %3212 = vst [vmem:[#allocation3 + $0x3c0] sm:$0xff] %v3200_v50  ;;  %3188 = vrot.lane.b32.xlu0 %v6046_v13, %s5178_s12 }
 0x557   : > { %2635 = vrot.lane.b32.xlu1 %v2626_v36, %s5178_s12 }
 0x558   : > { %v6248_v40 = vpop.permute.xlu0 %3256 }
 0x559   : > { %v3272_v19 = vsel %vm9012_vm12, %v3255_v0, %v6248_v40  ;;  %v6252_v22 = vpop.permute.xlu1 %3373  ;;  %vm9017_vm12 = vmmov %vm9014_vm6 }
 0x55a   : > { %3284 = vst [vmem:[#allocation3 + $0x428] sm:$0xff] %v3272_v19  ;;  %3260 = vrot.lane.b32.xlu0 %v6046_v13, %s5176_s30  ;;  %v2627_v19 = vsel %vm1696_vm0, %v6070_v7, %v6083_v28 }
 0x55b   : > { %2653 = vrot.lane.b32.xlu1 %v2626_v36, %s5186_s18 }
 0x55c   : > { %v2634_v23 = vpop.permute.xlu0 %2633 }
 0x55d   : > { %v6257_v55 = vpop.permute.xlu1 %3395  ;;  %v2714_v57 = vsel %vm1911_vm8, %v2634_v23, %v2643_v10 }
 0x55e   : > { %2644 = vrot.lane.b32.xlu0 %v2626_v36, %s5177_s11 }
 0x55f   : > { %2667 = vrot.lane.b32.xlu1 %v2626_v36, %s5176_s30 }
 0x560   : > { %v2652_v44 = vpop.permute.xlu0 %2651 }
 0x561   : > { %v2717_v0 = vsel %vm558_vm1, %v2714_v57, %v2652_v44  ;;  %v6263_v50 = vpop.permute.xlu1 %3404  ;;  %v3334_v57 = vsel %vm9016_vm9, %v6080_v31, %v6067_v3  ;;  %vm9019_vm9 = vcmask 1022976  }
 0x562   : > { %9013 = vst [vmem:[#allocation13_spill] sm:$0xff] %v6263_v50  ;;  %v6270_v48 = vsel %vm9014_vm6, %v2717_v0, %v2664_v29  ;;  %2669 = vrot.lane.b32.xlu0 %v2627_v19, %s5176_s30 }
 0x563   : > { %2732 = vst [vmem:[#allocation3 + $0x6d0] sm:$0xff] %v6270_v48  ;;  %2698 = vrot.lane.b32.xlu1 %v2627_v19, %s5177_s11 }
 0x564   : > { %v6275_v10 = vpop.permute.xlu0 %2665 }
 0x565   : > { %v6279_v36 = vsel %vm9015_vm14, %v2664_v29, %v6275_v10  ;;  %v2289_v23 = vpop.permute.xlu1 %2288  ;;  %v3335_v29 = vsel %vm3327_vm3, %v6083_v28, %v6070_v7  ;;  %vm9018_vm14 = vcmask 1006592  }
 0x566   : > { %2733 = vst [vmem:[#allocation3 + $0x338] sm:$0xff] %v6279_v36  ;;  %2689 = vrot.lane.b32.xlu0 %v2627_v19, %s5178_s12  ;;  %v2193_v13 = vsel %vm9018_vm14, %v6013_v34, %v6074_v15  ;;  %vm9022_vm14 = vmmov %vm9019_vm9 }
 0x567   : > { %3352 = vrot.lane.b32.xlu1 %v3334_v57, %s5177_s11  ;;  %v2261_v50 = vsel %vm9022_vm14, %v6113_v25, %v6176_v54  ;;  %vm9027_vm14 = vcmask 785408  }
 0x568   : > { %v6288_v44 = vpop.permute.xlu0 %2696 }
 0x569   : > { %v2310_v0 = vpop.permute.xlu1 %2309 }
 0x56a   : > { %2707 = vrot.lane.b32.xlu0 %v2627_v19, %s5186_s18  ;;  %v2223_v19 = vsel %vm577_vm5, %v6015_v35, %v6158_v37 }
 0x56b   : > { %3377 = vrot.lane.b32.xlu1 %v3335_v29, %s5176_s30 }
 0x56c   : > { %v3351_v62 = vpop.permute.xlu0 %3350 }
 0x56d   : > { %v3422_v12 = vsel %vm1911_vm8, %v3342_v46, %v3351_v62  ;;  %v6300_v8 = vpop.permute.xlu1 %2330 }
 0x56e   : > { %3150 = vrot.lane.b32.xlu0 %v6297_v53, %s5179_s14  ;;  %v3425_v6 = vsel %vm558_vm1, %v3422_v12, %v3360_v47  ;;  %v2260_v12 = vsel %vm9019_vm9, %v6027_v42, %v6113_v25  ;;  %vm9023_vm9 = vcmask 1006592  }
 0x56f   : > { %3397 = vrot.lane.b32.xlu1 %v3335_v29, %s5178_s12 }
 0x570   : > { %v3372_v24 = vpop.permute.xlu0 %3371 }
 0x571   : > { %v6311_v52 = vsel %vm9017_vm12, %v3372_v24, %v6252_v22  ;;  %v6314_v62 = vsel %vm9014_vm6, %v3425_v6, %v3372_v24  ;;  %v6316_v46 = vpop.permute.xlu1 %2348  ;;  %v2235_v6 = vsel %vm1695_vm2, %v2193_v13, %v2223_v19  ;;  %vm9021_vm12 = vcmp.eq.s32.totalorder %v5275_v9, 1 }
 0x572   : > { %3440 = vst [vmem:[#allocation3 + $0x268] sm:$0xff] %v6314_v62  ;;  %3441 = vst [vmem:[#allocation3 + $0x550] sm:$0xff] %v6311_v52  ;;  %3222 = vrot.lane.b32.xlu0 %v6297_v53, %s5180_s15  ;;  %v2272_v34 = vsel %vm9021_vm12, %v2260_v12, %v2235_v6  ;;  %v2224_v6 = vsel %vm577_vm5, %v6158_v37, %v6106_v26 }
 0x573   : > { %3406 = vrot.lane.b32.xlu1 %v3335_v29, %s5177_s11  ;;  %vm9025_vm12 = vmmov %vm9014_vm6 }
 0x574   : > { %v6331_v35 = vpop.permute.xlu0 %3413 }
 0x575   : > { %9020 = vst [vmem:[#allocation14_spill] sm:$0xff] %v6331_v35  ;;  %v6333_v24 = vpop.permute.xlu1 %3148 }
 0x576   : > { %3294 = vrot.lane.b32.xlu0 %v6297_v53, %s9002_s19 }
 0x577   : > { %2281 = vrot.lane.b32.xlu1 %v2272_v34, %s5178_s12 }
 0x578   : > { %v2280_v47 = vpop.permute.xlu0 %2279 }
 0x579   : > { %v6340_v45 = vpop.permute.xlu1 %3220  ;;  %v2357_v42 = vsel %vm1911_vm8, %v2280_v47, %v2289_v23 }
 0x57a   : > { %3343 = vrot.lane.b32.xlu0 %v3334_v57, %s5178_s12 }
 0x57b   : > { %2299 = vrot.lane.b32.xlu1 %v2272_v34, %s5186_s18 }
 0x57c   : > { %v2298_v43 = vpop.permute.xlu0 %2297 }
 0x57d   : > { %v2360_v41 = vsel %vm558_vm1, %v2357_v42, %v2298_v43  ;;  %v6346_v39 = vpop.permute.xlu1 %3292  ;;  %v2194_v43 = vsel %vm9023_vm9, %v6074_v15, %v6150_v18  ;;  %v3691_v42 = vsel %vm3683_vm15, %v2260_v12, %v2193_v13  ;;  %vm9028_vm9 = vcmp.eq.s32.totalorder %v5275_v9, 15 }
 0x57e   : > { %3361 = vrot.lane.b32.xlu0 %v3334_v57, %s5186_s18  ;;  %v6353_v35 = vsel %vm9014_vm6, %v2360_v41, %v2310_v0  ;;  %v2236_v41 = vsel %vm1696_vm0, %v2194_v43, %v2224_v6  ;;  %vm9026_vm6 = vcmp.eq.s32.totalorder %v5294_v16, 1  ;;  %v3692_v18 = vsel %vm3684_vm11, %v2261_v50, %v2194_v43 }
 0x57f   : > { %2313 = vrot.lane.b32.xlu1 %v2272_v34, %s5176_s30  ;;  %v6360_v23 = vrot.slane %v6353_v35, 4  ;;  %v2273_v25 = vsel %vm9026_vm6, %v2261_v50, %v2236_v41  ;;  %vm9030_vm6 = vcmp.eq.s32.totalorder %v5275_v9, 1 }
 0x580   : > { %v6365_v47 = vpop.permute.xlu0 %2311 }
 0x581   : > { %v6367_v26 = vpop.permute.xlu1 %3755  ;;  %v6373_v37 = vsel %vm9025_vm12, %v2310_v0, %v6365_v47  ;;  %2394 = vst [vmem:[#allocation3 + $0x498] sm:$0xf0] %v6360_v23  ;;  %vm9029_vm12 = vcmask 523264  }
 0x582   : > { %9024 = vst [vmem:[#allocation15_spill] sm:$0xff] %v6367_v26  ;;  %3375 = vrot.lane.b32.xlu0 %v3334_v57, %s5176_s30  ;;  %v6380_v15 = vrot.slane %v6373_v37, 4  ;;  %v3698_v57 = vsel %vm3327_vm3, %v2224_v6, %v3692_v18  ;;  %v3697_v26 = vsel %vm9028_vm9, %v2223_v19, %v3691_v42  ;;  %v1739_v19 = vsel %vm1695_vm2, %v6064_v1, %v5837_v59 }
 0x583   : > { %2341 = vrot.lane.b32.xlu1 %v2273_v25, %s5177_s11  ;;  %v1740_v1 = vsel %vm1696_vm0, %v6077_v21, %v5875_v4  ;;  %vm9032_vm9 = vcmp.eq.s32.totalorder %v5294_v16, 1 }
 0x584   : > { %v6385_v54 = vpop.permute.xlu0 %2339  ;;  %2395 = vst [vmem:[#allocation3 + $0x5e0] sm:$0xf0] %v6380_v15 }
 0x585   : > { %v3714_v0 = vpop.permute.xlu1 %3713 }
 0x586   : > { %3415 = vrot.lane.b32.xlu0 %v3335_v29, %s5186_s18 }
 0x587   : > { %3740 = vrot.lane.b32.xlu1 %v3698_v57, %s5176_s30 }
 0x588   : > { %v3147_v41 = vpop.permute.xlu0 %3146 }
 0x589   : > { %v3164_v50 = vsel %vm9027_vm14, %v3147_v41, %v6333_v24  ;;  %v3723_v43 = vpop.permute.xlu1 %3722  ;;  %vm9031_vm14 = vcmp.eq.s32.totalorder %v5275_v9, 2 }
 0x58a   : > { %3176 = vst [vmem:[#allocation3 + $0x250] sm:$0xf0] %v3164_v50  ;;  %2290 = vrot.lane.b32.xlu0 %v2272_v34, %s5177_s11  ;;  %v1781_v50 = vsel %vm9030_vm6, %v6067_v3, %v1739_v19  ;;  %v1782_v3 = vsel %vm9032_vm9, %v6070_v7, %v1740_v1  ;;  %vm9034_vm6 = vcmask 392192   ;;  %vm9038_vm9 = vcmask 916480  }
 0x58b   : > { %3706 = vrot.lane.b32.xlu1 %v3697_v26, %s5178_s12 }
 0x58c   : > { %v3219_v29 = vpop.permute.xlu0 %3218 }
 0x58d   : > { %v3236_v6 = vsel %vm9029_vm12, %v3219_v29, %v6340_v45  ;;  %v6402_v18 = vpop.permute.xlu1 %3773  ;;  %v1823_v29 = vsel %vm9031_vm14, %v6080_v31, %v1781_v50  ;;  %vm9033_vm12 = vcmp.eq.s32.totalorder %v5294_v16, 2  ;;  %vm9036_vm14 = vmmov %vm9034_vm6 }
 0x58e   : > { %3248 = vst [vmem:[#allocation3 + $0x120] sm:$0xf0] %v3236_v6  ;;  %2315 = vrot.lane.b32.xlu0 %v2273_v25, %s5176_s30  ;;  %v1824_v31 = vsel %vm9033_vm12, %v6083_v28, %v1782_v3  ;;  %vm9040_vm12 = vcmask 654336  }
 0x58f   : > { %3766 = vrot.lane.b32.xlu1 %v3698_v57, %s5177_s11 }
 0x590   : > { %v3291_v13 = vpop.permute.xlu0 %3290 }
 0x591   : > { %v3308_v12 = vsel %vm558_vm1, %v3291_v13, %v6346_v39  ;;  %v1831_v34 = vpop.permute.xlu1 %1830 }
 0x592   : > { %3320 = vst [vmem:[#allocation3 + $0x298] sm:$0xf0] %v3308_v12  ;;  %2332 = vrot.lane.b32.xlu0 %v2273_v25, %s5178_s12 }
 0x593   : > { %3738 = vrot.lane.b32.xlu1 %v3697_v26, %s5176_s30 }
 0x594   : > { %v6414_v42 = vpop.permute.xlu0 %3736 }
 0x595   : > { %v1849_v41 = vpop.permute.xlu1 %1848 }
 0x596   : > { %2350 = vrot.lane.b32.xlu0 %v2273_v25, %s5186_s18 }
 0x597   : > { %1841 = vrot.lane.b32.xlu1 %v1823_v29, %s5177_s11 }
 0x598   : > { %v3705_v6 = vpop.permute.xlu0 %3704 }
 0x599   : > { %v6428_v13 = vpop.permute.xlu1 %1862  ;;  %v3782_v12 = vsel %vm1911_vm8, %v3705_v6, %v3714_v0 }
 0x59a   : > { %3757 = vrot.lane.b32.xlu0 %v3698_v57, %s5178_s12  ;;  %v3785_v7 = vsel %vm558_vm1, %v3782_v12, %v3723_v43 }
 0x59b   : > { %1866 = vrot.lane.b32.xlu1 %v1824_v31, %s5176_s30 }
 0x59c   : > { %v6438_v25 = vpop.permute.xlu0 %3764 }
 0x59d   : > { %v6441_v21 = vpop.permute.xlu1 %1893 }
 0x59e   : > { %3715 = vrot.lane.b32.xlu0 %v3697_v26, %s5177_s11 }
 0x59f   : > { %1886 = vrot.lane.b32.xlu1 %v1824_v31, %s5178_s12 }
 0x5a0   : > { %v3735_v19 = vpop.permute.xlu0 %3734 }
 0x5a1   : > { %v3110_v50 = vpop.permute.xlu1 %3109  ;;  %v6448_v1 = vsel %vm9034_vm6, %v3735_v19, %v6414_v42  ;;  %v6451_v28 = vsel %vm9036_vm14, %v3785_v7, %v3735_v19  ;;  %vm9041_vm14 = vmmov %vm9034_vm6 }
 0x5a2   : > { %9035 = vst [vmem:[#allocation16_spill] sm:$0xff] %v6448_v1  ;;  %9037 = vst [vmem:[#allocation17_spill] sm:$0xff] %v6451_v28  ;;  %v3124_v0 = vsel %vm9038_vm9, %v6229_v32, %v3110_v50  ;;  %3724 = vrot.lane.b32.xlu0 %v3697_v26, %s5186_s18  ;;  %v6457_v6 = vrot.slane %v6448_v1, 4  ;;  %v6460_v3 = vrot.slane %v6451_v28, 4 }
 0x5a3   : > { %3136 = vst [vmem:[#allocation3 + $0x788] sm:$0xff] %v3124_v0  ;;  %1904 = vrot.lane.b32.xlu1 %v1824_v31, %s5186_s18  ;;  %vm9042_vm9 = vmmov %vm9034_vm6 }
 0x5a4   : > { %9039 = vst [vmem:[#allocation18_spill] sm:$0xff] %v6457_v6  ;;  %v1840_v43 = vpop.permute.xlu0 %1839  ;;  %3820 = vst [vmem:[#allocation3 + $0x118] sm:$0xf0] %v6457_v6 }
 0x5a5   : > { %3819 = vst [vmem:[#allocation3 + $0x648] sm:$0xf0] %v6460_v3  ;;  %v1912_v12 = vsel %vm1911_vm8, %v1831_v34, %v1840_v43  ;;  %v3187_v7 = vpop.permute.xlu1 %3186 }
 0x5a6   : > { %v3201_v32 = vsel %vm9040_vm12, %v6237_v30, %v3187_v7  ;;  %3775 = vrot.lane.b32.xlu0 %v3698_v57, %s5186_s18  ;;  %v1915_v26 = vsel %vm558_vm1, %v1912_v12, %v1849_v41  ;;  %v4070_v7 = vsel %vm3327_vm3, %v5875_v4, %v6099_v33  ;;  %vm9043_vm12 = vmmov %vm9034_vm6 }
 0x5a7   : > { %3213 = vst [vmem:[#allocation3 + $0x50] sm:$0xff] %v3201_v32  ;;  %3152 = vrot.lane.b32.xlu1 %v6057_v63, %s5179_s14 }
 0x5a8   : > { %v1861_v19 = vpop.permute.xlu0 %1860 }
 0x5a9   : > { %v6474_v50 = vsel %vm9034_vm6, %v1861_v19, %v6428_v13  ;;  %v6477_v0 = vsel %vm9041_vm14, %v1915_v26, %v1861_v19  ;;  %v3259_v34 = vpop.permute.xlu1 %3258  ;;  %vm9044_vm6 = vcmask 523264   ;;  %vm9045_vm14 = vcmask 654336  }
 0x5aa   : > { %1930 = vst [vmem:[#allocation3 + $0x220] sm:$0xff] %v6477_v0  ;;  %1931 = vst [vmem:[#allocation3 + $0x310] sm:$0xff] %v6474_v50  ;;  %v3273_v30 = vsel %vm9042_vm9, %v6248_v40, %v3259_v34  ;;  %1832 = vrot.lane.b32.xlu0 %v1823_v29, %s5178_s12  ;;  %v3023_v40 = vsel %vm8976_vm4, %v6121_v51, %v6187_v14 }
 0x5ab   : > { %3285 = vst [vmem:[#allocation3 + $0x130] sm:$0xff] %v3273_v30  ;;  %3224 = vrot.lane.b32.xlu1 %v6057_v63, %s5180_s15 }
 0x5ac   : > { %v6486_v57 = vpop.permute.xlu0 %1884 }
 0x5ad   : > { %v6488_v41 = vpop.permute.xlu1 %4108 }
 0x5ae   : > { %1850 = vrot.lane.b32.xlu0 %v1823_v29, %s5186_s18 }
 0x5af   : > { %3296 = vrot.lane.b32.xlu1 %v6057_v63, %s9002_s19  ;;  %v3069_v63 = vsel %vm9043_vm12, %v3023_v40, %v6166_v17  ;;  %vm9047_vm12 = vcmp.eq.s32.totalorder %v5275_v9, 15 }
 0x5b0   : > { %v6493_v43 = vpop.permute.xlu0 %1902  ;;  %v3072_v19 = vsel %vm9044_vm6, %v3069_v63, %v6193_v27  ;;  %v4069_v17 = vsel %vm9047_vm12, %v5837_v59, %v6104_v20  ;;  %vm9048_vm6 = vmmov %vm9042_vm9  ;;  %v1401_v59 = vadd.f32 %v6209_v5, %v5868_v2 }
 0x5b1   : > { %v4077_v12 = vpop.permute.xlu1 %4076  ;;  %v6516_v4 = vsel %vm9045_vm14, %v3072_v19, %v6181_v11  ;;  %v1422_v19 = vld [vmem:[%s8888_s4] sm:$0xff]  ;;  %vm9049_vm14 = vcmask 916480   ;;  %vm9051_vm12 = vmmov %vm9048_vm6 }
 0x5b2   : > { %1864 = vrot.lane.b32.xlu0 %v1823_v29, %s5176_s30  ;;  %9046 = vst [vmem:[#allocation19_spill] sm:$0xff] %v6516_v4 }
 0x5b3   : > { %4112 = vrot.lane.b32.xlu1 %v4070_v7, %s5176_s30 }
 0x5b4   : > { %v6504_v32 = vpop.permute.xlu0 %4130 }
 0x5b5   : > { %v6508_v26 = vpop.permute.xlu1 %4139 }
 0x5b6   : > { %1895 = vrot.lane.b32.xlu0 %v1824_v31, %s5177_s11 }
 0x5b7   : > { %4132 = vrot.lane.b32.xlu1 %v4070_v7, %s5178_s12 }
 0x5b8   : > { %v4086_v51 = vpop.permute.xlu0 %4085 }
 0x5b9   : > { %v4107_v33 = vpop.permute.xlu1 %4106  ;;  %v4157_v11 = vsel %vm1911_vm8, %v4077_v12, %v4086_v51  ;;  %v1411_v12 = vadd.f32 %v6213_v49, %v1401_v59 }
 0x5ba   : > { %v6520_v14 = vsel %vm9042_vm9, %v4107_v33, %v6488_v41  ;;  %3115 = vrot.lane.b32.xlu0 %v6516_v4, %s5177_s11  ;;  %vm9050_vm9 = vcmask 654336  }
 0x5bb   : > { %4176 = vst [vmem:[#allocation3 + $0x600] sm:$0xff] %v6520_v14  ;;  %4078 = vrot.lane.b32.xlu1 %v4069_v17, %s5178_s12  ;;  %4688 = vmatprep.subr.mxu1 %v6520_v14  ;;  %v1421_v40 = vadd.f32 %v6222_v56, %v1411_v12  ;;  %v1424_v56 = vld [vmem:[%s8889_s5] sm:$0xff] }
 0x5bc   : > { %v4095_v27 = vpop.permute.xlu0 %4094 }
 0x5bd   : > { %v4160_v29 = vsel %vm558_vm1, %v4157_v11, %v4095_v27  ;;  %v6533_v31 = vpop.permute.xlu1 %3113  ;;  %v1423_v49 = vmul.f32 %v1422_v19, %v1421_v40  ;;  %v8937_v27 = vrot.slane %v6516_v4, 4 }
 0x5be   : > { %v6536_v34 = vsel %vm9048_vm6, %v4160_v29, %v4107_v33  ;;  %3154 = vrot.lane.b32.xlu0 %v6137_v38, %s5179_s14  ;;  %vm9052_vm6 = vcmask 1043456  }
 0x5bf   : > { %4175 = vst [vmem:[#allocation3 + $0x3b8] sm:$0xff] %v6536_v34  ;;  %4087 = vrot.lane.b32.xlu1 %v4069_v17, %s5177_s11  ;;  %4689 = vmatpush1.msra.mxu1 %v6536_v34  ;;  %v1425_v29 = vadd.f32 %v1424_v56, %v1423_v49 }
 0x5c0   : > { %v6545_v20 = vpop.permute.xlu0 %4148 }
 0x5c1   : > { %v6547_v30 = vpop.permute.xlu1 %3190  ;;  %v6582_v19 = vmax.f32 %v1425_v29, 0.0 }
 0x5c2   : > { %3192 = vrot.lane.b32.xlu0 %v6516_v4, %s5178_s12 }
 0x5c3   : > { %4141 = vrot.lane.b32.xlu1 %v4070_v7, %s5177_s11  ;;  %9053 = vst [vmem:[#allocation20_spill] sm:$0xff] %v6582_v19 }
 0x5c4   : > { %v3112_v63 = vpop.permute.xlu0 %3111 }
 0x5c5   : > { %v3125_v2 = vsel %vm9049_vm14, %v3112_v63, %v6533_v31  ;;  %v6559_v5 = vpop.permute.xlu1 %3262  ;;  %v3143_v63 = vsel %vm9052_vm6, %v6297_v53, %v8937_v27  ;;  %vm9054_vm14 = vmmov %vm9051_vm12  ;;  %vm9060_vm6 = vcmask 523264  }
 0x5c6   : > { %3137 = vst [vmem:[#allocation3 + $0x4c0] sm:$0xff] %v3125_v2  ;;  %3226 = vrot.lane.b32.xlu0 %v6137_v38, %s5180_s15 }
 0x5c7   : > { %4096 = vrot.lane.b32.xlu1 %v4069_v17, %s5186_s18 }
 0x5c8   : > { %v3189_v51 = vpop.permute.xlu0 %3188 }
 0x5c9   : > { %v3202_v33 = vsel %vm9050_vm9, %v3189_v51, %v6547_v30  ;;  %v2636_v11 = vpop.permute.xlu1 %2635  ;;  %vm9056_vm9 = vmmov %vm9051_vm12 }
 0x5ca   : > { %3214 = vst [vmem:[#allocation3 + $0x158] sm:$0xff] %v3202_v33  ;;  %3264 = vrot.lane.b32.xlu0 %v6516_v4, %s5176_s30 }
 0x5cb   : > { %4150 = vrot.lane.b32.xlu1 %v4070_v7, %s5186_s18 }
 0x5cc   : > { %v3261_v59 = vpop.permute.xlu0 %3260 }
 0x5cd   : > { %v3274_v12 = vsel %vm9051_vm12, %v3261_v59, %v6559_v5  ;;  %v2654_v40 = vpop.permute.xlu1 %2653  ;;  %v9057_v59 = vsub.s32 2, %v5848_v60  ;;  %vm9059_vm12 = vcmask 785408  }
 0x5ce   : > { %3286 = vst [vmem:[#allocation3 + $0x398] sm:$0xff] %v3274_v12  ;;  %3298 = vrot.lane.b32.xlu0 %v6137_v38, %s9002_s19  ;;  %v9055_v38 = vsub.s32 1, %v5848_v60 }
 0x5cf   : > { %3156 = vrot.lane.b32.xlu1 %v3143_v63, %s5179_s14  ;;  %v1460_v12 = vrot.slane %v6582_v19, %v9057_v59 }
 0x5d0   : > { %v2645_v7 = vpop.permute.xlu0 %2644  ;;  %v1440_v33 = vrot.slane %v6582_v19, %v9055_v38 }
 0x5d1   : > { %v2715_v2 = vsel %vm1911_vm8, %v2636_v11, %v2645_v7  ;;  %v2668_v49 = vpop.permute.xlu1 %2667 }
 0x5d2   : > { %v2718_v51 = vsel %vm558_vm1, %v2715_v2, %v2654_v40  ;;  %4110 = vrot.lane.b32.xlu0 %v4069_v17, %s5176_s30  ;;  %v1499_v40 = vsub.s32 4, %v5848_v60  ;;  %v9058_v2 = vsub.s32 3, %v5848_v60 }
 0x5d3   : > { %v6588_v56 = vsel %vm9054_vm14, %v2718_v51, %v2668_v49  ;;  %3228 = vrot.lane.b32.xlu1 %v3143_v63, %s5180_s15  ;;  %v1539_v51 = vsub.s32 6, %v5848_v60  ;;  %vm9061_vm14 = vmmov %vm9056_vm9 }
 0x5d4   : > { %2734 = vst [vmem:[#allocation3 + $0x5d0] sm:$0xff] %v6588_v56  ;;  %v6592_v53 = vpop.permute.xlu0 %2669  ;;  %v1500_v38 = vrot.slane %v6582_v19, %v1499_v40 }
 0x5d5   : > { %v6599_v11 = vsel %vm9056_vm9, %v2668_v49, %v6592_v53  ;;  %v6601_v29 = vpop.permute.xlu1 %2698  ;;  %v1480_v49 = vrot.slane %v6582_v19, %v9058_v2  ;;  %v1540_v27 = vrot.slane %v6582_v19, %v1539_v51 }
 0x5d6   : > { %2735 = vst [vmem:[#allocation3 + $0x598] sm:$0xff] %v6599_v11  ;;  %1442 = vrot.lane.b32.xlu0 %v1440_v33, %s5187_s27  ;;  %v1519_v33 = vsub.s32 5, %v5848_v60  ;;  %s5191_s27 = smov 5  }
 0x5d7   : > { %3300 = vrot.lane.b32.xlu1 %v3143_v63, %s9002_s19 }
 0x5d8   : > { %v6605_v17 = vpop.permute.xlu0 %2689  ;;  %v1520_v4 = vrot.slane %v6582_v19, %v1519_v33 }
 0x5d9   : > { %v3353_v7 = vpop.permute.xlu1 %3352 }
 0x5da   : > { %1462 = vrot.lane.b32.xlu0 %v1460_v12, %s5188_s20  ;;  %v1559_v12 = vsub.s32 7, %v5848_v60  ;;  %s5192_s20 = smov 7   ;;  %v6692_v60 = vrot.slane %v6311_v52, 4 }
 0x5db   : > { %1482 = vrot.lane.b32.xlu1 %v1480_v49, %s5169_s21 }
 0x5dc   : > { %v6616_v63 = vpop.permute.xlu0 %2707  ;;  %v1560_v51 = vrot.slane %v6582_v19, %v1559_v12 }
 0x5dd   : > { %v6620_v59 = vpop.permute.xlu1 %3377 }
 0x5de   : > { %1502 = vrot.lane.b32.xlu0 %v1500_v38, %s5189_s22  ;;  %s5193_s22 = smov 121  }
 0x5df   : > { %1542 = vrot.lane.b32.xlu1 %v1540_v27, %s5190_s23 }
 0x5e0   : > { %v3151_v2 = vpop.permute.xlu0 %3150 }
 0x5e1   : > { %v3165_v49 = vsel %vm9059_vm12, %v6333_v24, %v3151_v2  ;;  %v6627_v16 = vpop.permute.xlu1 %3397  ;;  %vm9065_vm12 = vmmov %vm9056_vm9 }
 0x5e2   : > { %3177 = vst [vmem:[#allocation3 + $0x168] sm:$0xf0] %v3165_v49  ;;  %1522 = vrot.lane.b32.xlu0 %v1520_v4, %s5191_s27 }
 0x5e3   : > { %2405 = vrot.lane.b32.xlu1 %v6373_v37, %s5177_s11 }
 0x5e4   : > { %v3223_v40 = vpop.permute.xlu0 %3222 }
 0x5e5   : > { %v3237_v27 = vsel %vm9060_vm6, %v6340_v45, %v3223_v40  ;;  %v6634_v38 = vpop.permute.xlu1 %3406  ;;  %vm9067_vm6 = vmmov %vm9056_vm9 }
 0x5e6   : > { %3249 = vst [vmem:[#allocation3 + $0x80] sm:$0xf0] %v3237_v27  ;;  %1562 = vrot.lane.b32.xlu0 %v1560_v51, %s5192_s20 }
 0x5e7   : > { %2482 = vrot.lane.b32.xlu1 %v6373_v37, %s5178_s12 }
 0x5e8   : > { %v3295_v24 = vpop.permute.xlu0 %3294 }
 0x5e9   : > { %v3309_v4 = vsel %vm558_vm1, %v6346_v39, %v3295_v24  ;;  %v2282_v33 = vpop.permute.xlu1 %2281 }
 0x5ea   : > { %3321 = vst [vmem:[#allocation3 + $0x6f0] sm:$0xf0] %v3309_v4  ;;  %2797 = vrot.lane.b32.xlu0 %v6279_v36, %s5179_s14 }
 0x5eb   : > { %2554 = vrot.lane.b32.xlu1 %v6373_v37, %s5176_s30 }
 0x5ec   : > { %v3344_v45 = vpop.permute.xlu0 %3343 }
 0x5ed   : > { %v2300_v2 = vpop.permute.xlu1 %2299  ;;  %v3423_v39 = vsel %vm1911_vm8, %v3344_v45, %v3353_v7 }
 0x5ee   : > { %2869 = vrot.lane.b32.xlu0 %v6279_v36, %s5180_s15 }
 0x5ef   : > { %3907 = vrot.lane.b32.xlu1 %v6448_v1, %s5178_s12 }
 0x5f0   : > { %v3362_v12 = vpop.permute.xlu0 %3361 }
 0x5f1   : > { %v2314_v49 = vpop.permute.xlu1 %2313  ;;  %v3426_v37 = vsel %vm558_vm1, %v3423_v39, %v3362_v12 }
 0x5f2   : > { %2941 = vrot.lane.b32.xlu0 %v6279_v36, %s9002_s19 }
 0x5f3   : > { %1995 = vrot.lane.b32.xlu1 %v6474_v50, %s5179_s14 }
 0x5f4   : > { %v3376_v40 = vpop.permute.xlu0 %3375 }
 0x5f5   : > { %v6656_v51 = vsel %vm9061_vm14, %v3376_v40, %v6620_v59  ;;  %v6659_v27 = vsel %vm9056_vm9, %v3426_v37, %v3376_v40  ;;  %v6661_v24 = vpop.permute.xlu1 %2341  ;;  %v6679_v37 = vrot.slane %v6279_v36, 4  ;;  %vm9069_vm14 = vmmov %vm9067_vm6  ;;  %vm9070_vm9 = vcmask 1043456  }
 0x5f6   : > { %3442 = vst [vmem:[#allocation3 + $0x560] sm:$0xff] %v6659_v27  ;;  %3443 = vst [vmem:[#allocation3 + $0x1f0] sm:$0xff] %v6656_v51  ;;  %3505 = vrot.lane.b32.xlu0 %v6311_v52, %s5179_s14 }
 0x5f7   : > { %2067 = vrot.lane.b32.xlu1 %v6474_v50, %s5180_s15  ;;  %9064 = vst [vmem:[#allocation23_spill] sm:$0xff] %v6679_v37 }
 0x5f8   : > { %v6669_v7 = vpop.permute.xlu0 %3415 }
 0x5f9   : > { %9062 = vst [vmem:[#allocation21_spill] sm:$0xff] %v6669_v7  ;;  %v6671_v4 = vpop.permute.xlu1 %3740 }
 0x5fa   : > { %9063 = vst [vmem:[#allocation22_spill] sm:$0xff] %v6671_v4  ;;  %3830 = vrot.lane.b32.xlu0 %v6448_v1, %s5177_s11 }
 0x5fb   : > { %2139 = vrot.lane.b32.xlu1 %v6474_v50, %s9002_s19 }
 0x5fc   : > { %v2291_v45 = vpop.permute.xlu0 %2290 }
 0x5fd   : > { %v2358_v12 = vsel %vm1911_vm8, %v2282_v33, %v2291_v45  ;;  %v3707_v39 = vpop.permute.xlu1 %3706  ;;  %v2723_v45 = vsel %vm9069_vm14, %v6275_v10, %v6217_v58  ;;  %vm9075_vm14 = vcmask 654336  }
 0x5fe   : > { %v2361_v40 = vsel %vm558_vm1, %v2358_v12, %v2300_v2  ;;  %3503 = vrot.lane.b32.xlu0 %v6314_v62, %s5179_s14 }
 0x5ff   : > { %2761 = vrot.lane.b32.xlu1 %v6679_v37, %s5177_s11  ;;  %v6687_v9 = vsel %vm9065_vm12, %v2361_v40, %v2314_v49  ;;  %vm9072_vm12 = vcmask 523264  }
 0x600   : > { %v6689_v19 = vpop.permute.xlu0 %2315  ;;  %v8946_v33 = vrot.slane %v6687_v9, 4  ;;  %v2726_v40 = vsel %vm9072_vm12, %v2723_v45, %v6288_v44 }
 0x601   : > { %v6695_v36 = vpop.permute.xlu1 %3766  ;;  %v6699_v2 = vsel %vm9067_vm6, %v2314_v49, %v6689_v19  ;;  %vm9073_vm6 = vmmov %vm9070_vm9  ;;  %v6731_v44 = vsel %vm9075_vm14, %v2726_v40, %v6224_v61  ;;  %vm9080_vm14 = vcmask 523264  }
 0x602   : > { %9066 = vst [vmem:[#allocation24_spill] sm:$0xff] %v6695_v36  ;;  %9068 = vst [vmem:[#allocation25_spill] sm:$0xff] %v6699_v2  ;;  %3469 = vrot.lane.b32.xlu0 %v6692_v60, %s5177_s11  ;;  %v8945_v12 = vrot.slane %v6699_v2, 4  ;;  %v6711_v52 = vsel %vm9070_vm9, %v6360_v23, %v8946_v33  ;;  %vm9076_vm9 = vcmask 392192  }
 0x603   : > { %9071 = vst [vmem:[#allocation26_spill] sm:$0xff] %v6711_v52  ;;  %2795 = vrot.lane.b32.xlu1 %v6270_v48, %s5179_s14  ;;  %2396 = vst [vmem:[#allocation3 + $0x688] sm:$0xff] %v6711_v52 }
 0x604   : > { %v6718_v58 = vpop.permute.xlu0 %2332  ;;  %v6724_v10 = vsel %vm9073_vm6, %v6380_v15, %v8945_v12  ;;  %vm9078_vm12 = vmmov %vm9076_vm9 }
 0x605   : > { %9074 = vst [vmem:[#allocation27_spill] sm:$0xff] %v6724_v10  ;;  %v3739_v49 = vpop.permute.xlu1 %3738  ;;  %2397 = vst [vmem:[#allocation3 + $0x1c0] sm:$0xff] %v6724_v10  ;;  %v2366_v1 = vsel %vm9078_vm12, %v6365_v47, %v6300_v8 }
 0x606   : > { %4240 = vrot.lane.b32.xlu0 %v6520_v14, %s5179_s14  ;;  %v6735_v45 = vsel %vm9076_vm9, %v3739_v49, %v6671_v4  ;;  %v2369_v40 = vsel %vm9080_vm14, %v2366_v1, %v6385_v54  ;;  %vm9082_vm9 = vcmask 654336   ;;  %vm9087_vm14 = vmmov %vm9078_vm12 }
 0x607   : > { %9077 = vst [vmem:[#allocation28_spill] sm:$0xff] %v6735_v45  ;;  %2799 = vrot.lane.b32.xlu1 %v6731_v44, %s5179_s14  ;;  %v8952_v12 = vrot.slane %v6735_v45, 4  ;;  %v6764_v47 = vsel %vm9082_vm9, %v2369_v40, %v6316_v46  ;;  %vm9089_vm9 = vcmask 523264  }
 0x608   : > { %v6740_v33 = vpop.permute.xlu0 %2350 }
 0x609   : > { %v1842_v52 = vpop.permute.xlu1 %1841  ;;  %v6749_v61 = vsel %vm9073_vm6, %v6457_v6, %v8952_v12 }
 0x60a   : > { %9079 = vst [vmem:[#allocation29_spill] sm:$0xff] %v6749_v61  ;;  %2403 = vrot.lane.b32.xlu0 %v6353_v35, %s5177_s11  ;;  %3822 = vst [vmem:[#allocation3 + $0x698] sm:$0xff] %v6749_v61 }
 0x60b   : > { %2833 = vrot.lane.b32.xlu1 %v6679_v37, %s5178_s12 }
 0x60c   : > { %v6758_v10 = vpop.permute.xlu0 %3757 }
 0x60d   : > { %9081 = vst [vmem:[#allocation30_spill] sm:$0xff] %v6758_v10  ;;  %v6760_v8 = vpop.permute.xlu1 %1866 }
 0x60e   : > { %2407 = vrot.lane.b32.xlu0 %v6764_v47, %s5177_s11 }
 0x60f   : > { %2867 = vrot.lane.b32.xlu1 %v6270_v48, %s5180_s15 }
 0x610   : > { %v3716_v54 = vpop.permute.xlu0 %3715 }
 0x611   : > { %v6770_v1 = vpop.permute.xlu1 %1886  ;;  %v3783_v12 = vsel %vm1911_vm8, %v3707_v39, %v3716_v54 }
 0x612   : > { %9083 = vst [vmem:[#allocation31_spill] sm:$0xff] %v6770_v1  ;;  %2446 = vrot.lane.b32.xlu0 %v6380_v15, %s5179_s14 }
 0x613   : > { %2871 = vrot.lane.b32.xlu1 %v6731_v44, %s5180_s15 }
 0x614   : > { %v3725_v61 = vpop.permute.xlu0 %3724 }
 0x615   : > { %v3786_v46 = vsel %vm558_vm1, %v3783_v12, %v3725_v61  ;;  %v6778_v40 = vpop.permute.xlu1 %1904  ;;  %v3431_v61 = vsel %vm9087_vm14, %v6252_v22, %v6257_v55 }
 0x616   : > { %9084 = vst [vmem:[#allocation32_spill] sm:$0xff] %v6778_v40  ;;  %2480 = vrot.lane.b32.xlu0 %v6353_v35, %s5178_s12  ;;  %v6783_v36 = vsel %vm9078_vm12, %v3786_v46, %v3739_v49  ;;  %v9088_v46 = vld [vmem:[#allocation13_spill] sm:$0xff]  ;;  %vm9091_vm12 = vcmask 654336  }
 0x617   : > { %2905 = vrot.lane.b32.xlu1 %v6679_v37, %s5176_s30  ;;  %v8955_v4 = vrot.slane %v6783_v36, 4 }
 0x618   : > { %v6788_v10 = vpop.permute.xlu0 %3775 }
 0x619   : > { %9085 = vst [vmem:[#allocation33_spill] sm:$0xff] %v6788_v10  ;;  %v3153_v1 = vpop.permute.xlu1 %3152  ;;  %v6794_v39 = vsel %vm9073_vm6, %v6460_v3, %v8955_v4  ;;  %v3434_v4 = vsel %vm9089_vm9, %v3431_v61, %v9088_v46  ;;  %v9090_v10 = vld [vmem:[#allocation14_spill] sm:$0xff]  ;;  %vm9093_vm6 = vmmov %vm9087_vm14 }
 0x61a   : > { %9086 = vst [vmem:[#allocation34_spill] sm:$0xff] %v6794_v39  ;;  %2484 = vrot.lane.b32.xlu0 %v6764_v47, %s5178_s12  ;;  %3821 = vst [vmem:[#allocation3 + $0xb8] sm:$0xff] %v6794_v39  ;;  %v6812_v37 = vsel %vm9091_vm12, %v3434_v4, %v9090_v10  ;;  %v9095_v10 = vld [vmem:[#allocation15_spill] sm:$0xff]  ;;  %vm9097_vm12 = vcmask 523264  }
 0x61b   : > { %2939 = vrot.lane.b32.xlu1 %v6270_v48, %s9002_s19  ;;  %9092 = vst [vmem:[#allocation13_spill] sm:$0xff] %v6812_v37  ;;  %vm9094_vm14 = vmmov %vm9093_vm6 }
 0x61c   : > { %v1833_v12 = vpop.permute.xlu0 %1832  ;;  %vm9096_vm9 = vmmov %vm9093_vm6 }
 0x61d   : > { %v3225_v49 = vpop.permute.xlu1 %3224  ;;  %v1913_v40 = vsel %vm1911_vm8, %v1833_v12, %v1842_v52 }
 0x61e   : > { %2518 = vrot.lane.b32.xlu0 %v6380_v15, %s5180_s15 }
 0x61f   : > { %2943 = vrot.lane.b32.xlu1 %v6731_v44, %s9002_s19 }
 0x620   : > { %v1851_v54 = vpop.permute.xlu0 %1850 }
 0x621   : > { %v3297_v39 = vpop.permute.xlu1 %3296  ;;  %v1916_v7 = vsel %vm558_vm1, %v1913_v40, %v1851_v54 }
 0x622   : > { %2552 = vrot.lane.b32.xlu0 %v6353_v35, %s5176_s30 }
 0x623   : > { %3507 = vrot.lane.b32.xlu1 %v6812_v37, %s5179_s14 }
 0x624   : > { %v1865_v22 = vpop.permute.xlu0 %1864 }
 0x625   : > { %v6822_v55 = vsel %vm9093_vm6, %v1865_v22, %v6760_v8  ;;  %v6825_v61 = vsel %vm9094_vm14, %v1916_v7, %v1865_v22  ;;  %v6827_v4 = vpop.permute.xlu1 %4112  ;;  %v3791_v7 = vsel %vm9096_vm9, %v6414_v42, %v9095_v10  ;;  %vm9098_vm6 = vcmask 916480  }
 0x626   : > { %1932 = vst [vmem:[#allocation3 + $0x718] sm:$0xff] %v6825_v61  ;;  %1933 = vst [vmem:[#allocation3 + $0x2f0] sm:$0xff] %v6822_v55  ;;  %2556 = vrot.lane.b32.xlu0 %v6764_v47, %s5176_s30  ;;  %v3794_v40 = vsel %vm9097_vm12, %v3791_v7, %v6438_v25  ;;  %vm9099_vm14 = vcmask 654336   ;;  %vm9100_vm9 = vcmask 785408   ;;  %v6864_v10 = vrot.slane %v6474_v50, 4 }
 0x627   : > { %3541 = vrot.lane.b32.xlu1 %v6692_v60, %s5178_s12  ;;  %v6854_v42 = vsel %vm9099_vm14, %v3794_v40, %v6402_v18  ;;  %vm9101_vm12 = vmmov %vm9099_vm14  ;;  %vm9103_vm14 = vcmask 523264  }
 0x628   : > { %v6835_v35 = vpop.permute.xlu0 %1895 }
 0x629   : > { %v6837_v52 = vpop.permute.xlu1 %4132 }
 0x62a   : > { %2590 = vrot.lane.b32.xlu0 %v6380_v15, %s9002_s19 }
 0x62b   : > { %3871 = vrot.lane.b32.xlu1 %v6457_v6, %s5179_s14 }
 0x62c   : > { %v3116_v12 = vpop.permute.xlu0 %3115 }
 0x62d   : > { %v3126_v54 = vsel %vm9098_vm6, %v6533_v31, %v3116_v12  ;;  %v4079_v46 = vpop.permute.xlu1 %4078  ;;  %vm9102_vm6 = vcmask 392192  }
 0x62e   : > { %3138 = vst [vmem:[#allocation3 + $0x190] sm:$0xff] %v3126_v54  ;;  %3828 = vrot.lane.b32.xlu0 %v6451_v28, %s5177_s11  ;;  %v1921_v40 = vsel %vm9102_vm6, %v6428_v13, %v6486_v57 }
 0x62f   : > { %3832 = vrot.lane.b32.xlu1 %v6854_v42, %s5177_s11 }
 0x630   : > { %v3155_v15 = vpop.permute.xlu0 %3154 }
 0x631   : > { %v3166_v25 = vsel %vm9100_vm9, %v3153_v1, %v3155_v15  ;;  %v4088_v22 = vpop.permute.xlu1 %4087  ;;  %vm9104_vm9 = vmmov %vm9103_vm14 }
 0x632   : > { %3178 = vst [vmem:[#allocation3 + $0x518] sm:$0xff] %v3166_v25  ;;  %3909 = vrot.lane.b32.xlu0 %v6854_v42, %s5178_s12 }
 0x633   : > { %2803 = vrot.lane.b32.xlu1 %v6599_v11, %s5179_s14 }
 0x634   : > { %v3193_v31 = vpop.permute.xlu0 %3192 }
 0x635   : > { %v3203_v18 = vsel %vm9101_vm12, %v6547_v30, %v3193_v31  ;;  %v6868_v7 = vpop.permute.xlu1 %4141  ;;  %v1924_v30 = vsel %vm9104_vm9, %v1921_v40, %v6441_v21  ;;  %v6897_v21 = vrot.slane %v6812_v37, 4  ;;  %vm9106_vm9 = vmmov %vm9102_vm6 }
 0x636   : > { %3215 = vst [vmem:[#allocation3 + $0x7a8] sm:$0xff] %v3203_v18  ;;  %1959 = vrot.lane.b32.xlu0 %v6864_v10, %s5177_s11  ;;  %v6886_v25 = vsel %vm9101_vm12, %v1924_v30, %v6493_v43  ;;  %vm9107_vm12 = vmmov %vm9102_vm6 }
 0x637   : > { %2875 = vrot.lane.b32.xlu1 %v6599_v11, %s5180_s15 }
 0x638   : > { %v3227_v1 = vpop.permute.xlu0 %3226 }
 0x639   : > { %v3238_v50 = vsel %vm9103_vm14, %v3225_v49, %v3227_v1  ;;  %v4097_v12 = vpop.permute.xlu1 %4096  ;;  %vm9105_vm14 = vcmask 785408  }
 0x63a   : > { %3250 = vst [vmem:[#allocation3 + $0x5a0] sm:$0xff] %v3238_v50  ;;  %1993 = vrot.lane.b32.xlu0 %v6477_v0, %s5179_s14 }
 0x63b   : > { %2947 = vrot.lane.b32.xlu1 %v6599_v11, %s9002_s19 }
 0x63c   : > { %v3265_v54 = vpop.permute.xlu0 %3264 }
 0x63d   : > { %v3275_v13 = vsel %vm9102_vm6, %v6559_v5, %v3265_v54  ;;  %v6890_v57 = vpop.permute.xlu1 %4150  ;;  %v4158_v5 = vsel %vm1911_vm8, %v4079_v46, %v4088_v22  ;;  %v6915_v54 = vrot.slane %v6314_v62, 4  ;;  %v4166_v46 = vsel %vm9102_vm6, %v6488_v41, %v6504_v32 }
 0x63e   : > { %3287 = vst [vmem:[#allocation3 + $0x4a8] sm:$0xff] %v3275_v13  ;;  %1997 = vrot.lane.b32.xlu0 %v6886_v25, %s5179_s14  ;;  %v4161_v40 = vsel %vm558_vm1, %v4158_v5, %v4097_v12  ;;  %vm9119_vm6 = vcmask 785408  }
 0x63f   : > { %3511 = vrot.lane.b32.xlu1 %v6656_v51, %s5179_s14 }
 0x640   : > { %v3299_v49 = vpop.permute.xlu0 %3298 }
 0x641   : > { %v3310_v31 = vsel %vm558_vm1, %v3297_v39, %v3299_v49  ;;  %v3157_v43 = vpop.permute.xlu1 %3156 }
 0x642   : > { %3322 = vst [vmem:[#allocation3 + $0x88] sm:$0xff] %v3310_v31  ;;  %v3167_v18 = vsel %vm9105_vm14, %v3155_v15, %v3157_v43  ;;  %2031 = vrot.lane.b32.xlu0 %v6864_v10, %s5178_s12  ;;  %vm9108_vm14 = vcmask 523264  }
 0x643   : > { %3179 = vst [vmem:[#allocation3 + $0x3e8] sm:$0xff] %v3167_v18  ;;  %3471 = vrot.lane.b32.xlu1 %v6897_v21, %s5177_s11  ;;  %v6962_v18 = vrot.slane %v6764_v47, 4 }
 0x644   : > { %v4111_v50 = vpop.permute.xlu0 %4110 }
 0x645   : > { %v6909_v30 = vsel %vm9106_vm9, %v4111_v50, %v6827_v4  ;;  %v6912_v39 = vsel %vm9107_vm12, %v4161_v40, %v4111_v50  ;;  %v3229_v15 = vpop.permute.xlu1 %3228  ;;  %vm9110_vm9 = vmmov %vm9108_vm14  ;;  %vm9111_vm12 = vcmask 654336   ;;  %v6971_v40 = vrot.slane %v6270_v48, 4 }
 0x646   : > { %4177 = vst [vmem:[#allocation3 + $0x700] sm:$0xff] %v6912_v39  ;;  %4178 = vst [vmem:[#allocation3 + $0x3d0] sm:$0xff] %v6909_v30  ;;  %v3239_v22 = vsel %vm9108_vm14, %v3227_v1, %v3229_v15  ;;  %2065 = vrot.lane.b32.xlu0 %v6477_v0, %s5180_s15  ;;  %v4169_v62 = vsel %vm9110_vm9, %v4166_v46, %v6508_v26  ;;  %v6945_v26 = vrot.slane %v6520_v14, 4  ;;  %v6980_v15 = vrot.slane %v6731_v44, 4 }
 0x647   : > { %3251 = vst [vmem:[#allocation3 + $0x30] sm:$0xff] %v3239_v22  ;;  %3539 = vrot.lane.b32.xlu1 %v6915_v54, %s5178_s12  ;;  %v6933_v41 = vsel %vm9111_vm12, %v4169_v62, %v6545_v20  ;;  %vm9120_vm14 = vmmov %vm9119_vm6  ;;  %vm9122_vm12 = vcmask 916480  }
 0x648   : > { %v6927_v12 = vpop.permute.xlu0 %1442  ;;  %9112 = vst [vmem:[#allocation15_spill] sm:$0xff] %v6933_v41  ;;  %vm9121_vm9 = vmmov %vm9119_vm6 }
 0x649   : > { %9109 = vst [vmem:[#allocation14_spill] sm:$0xff] %v6927_v12  ;;  %v3301_v13 = vpop.permute.xlu1 %3300  ;;  %v7023_v12 = vrot.slane %v6477_v0, 4 }
 0x64a   : > { %v3311_v32 = vsel %vm558_vm1, %v3299_v49, %v3301_v13  ;;  %2069 = vrot.lane.b32.xlu0 %v6886_v25, %s5180_s15 }
 0x64b   : > { %3323 = vst [vmem:[#allocation3 + $0x740] sm:$0xff] %v3311_v32  ;;  %4242 = vrot.lane.b32.xlu1 %v6933_v41, %s5179_s14 }
 0x64c   : > { %v6940_v1 = vpop.permute.xlu0 %1462 }
 0x64d   : > { %9113 = vst [vmem:[#allocation35_spill] sm:$0xff] %v6940_v1  ;;  %v6942_v31 = vpop.permute.xlu1 %1482 }
 0x64e   : > { %9114 = vst [vmem:[#allocation36_spill] sm:$0xff] %v6942_v31  ;;  %2103 = vrot.lane.b32.xlu0 %v6864_v10, %s5176_s30 }
 0x64f   : > { %4276 = vrot.lane.b32.xlu1 %v6945_v26, %s5178_s12 }
 0x650   : > { %v6951_v20 = vpop.permute.xlu0 %1502 }
 0x651   : > { %9115 = vst [vmem:[#allocation37_spill] sm:$0xff] %v6951_v20  ;;  %v6953_v49 = vpop.permute.xlu1 %1542 }
 0x652   : > { %9116 = vst [vmem:[#allocation38_spill] sm:$0xff] %v6953_v49  ;;  %2137 = vrot.lane.b32.xlu0 %v6477_v0, %s9002_s19  ;;  %v7032_v49 = vrot.slane %v6886_v25, 4 }
 0x653   : > { %2444 = vrot.lane.b32.xlu1 %v6360_v23, %s5179_s14 }
 0x654   : > { %v6959_v43 = vpop.permute.xlu0 %1522 }
 0x655   : > { %9117 = vst [vmem:[#allocation39_spill] sm:$0xff] %v6959_v43  ;;  %v2406_v14 = vpop.permute.xlu1 %2405 }
 0x656   : > { %2141 = vrot.lane.b32.xlu0 %v6886_v25, %s9002_s19 }
 0x657   : > { %2448 = vrot.lane.b32.xlu1 %v6962_v18, %s5179_s14 }
 0x658   : > { %v6968_v5 = vpop.permute.xlu0 %1562 }
 0x659   : > { %9118 = vst [vmem:[#allocation40_spill] sm:$0xff] %v6968_v5  ;;  %v6973_v50 = vpop.permute.xlu1 %2482 }
 0x65a   : > { %2759 = vrot.lane.b32.xlu0 %v6971_v40, %s5177_s11 }
 0x65b   : > { %2516 = vrot.lane.b32.xlu1 %v6360_v23, %s5180_s15 }
 0x65c   : > { %v2798_v47 = vpop.permute.xlu0 %2797 }
 0x65d   : > { %v6982_v46 = vpop.permute.xlu1 %2554 }
 0x65e   : > { %2763 = vrot.lane.b32.xlu0 %v6980_v15, %s5177_s11 }
 0x65f   : > { %2520 = vrot.lane.b32.xlu1 %v6962_v18, %s5180_s15 }
 0x660   : > { %v2870_v48 = vpop.permute.xlu0 %2869 }
 0x661   : > { %v6988_v22 = vpop.permute.xlu1 %3907 }
 0x662   : > { %2831 = vrot.lane.b32.xlu0 %v6971_v40, %s5178_s12 }
 0x663   : > { %2588 = vrot.lane.b32.xlu1 %v6360_v23, %s9002_s19 }
 0x664   : > { %v6994_v62 = vpop.permute.xlu0 %2941 }
 0x665   : > { %v6996_v44 = vpop.permute.xlu1 %1995 }
 0x666   : > { %2835 = vrot.lane.b32.xlu0 %v6980_v15, %s5178_s12 }
 0x667   : > { %2592 = vrot.lane.b32.xlu1 %v6962_v18, %s9002_s19 }
 0x668   : > { %v7002_v13 = vpop.permute.xlu0 %3505 }
 0x669   : > { %v7004_v32 = vpop.permute.xlu1 %2067 }
 0x66a   : > { %2903 = vrot.lane.b32.xlu0 %v6971_v40, %s5176_s30 }
 0x66b   : > { %3836 = vrot.lane.b32.xlu1 %v6735_v45, %s5177_s11 }
 0x66c   : > { %v7010_v23 = vpop.permute.xlu0 %3830 }
 0x66d   : > { %v7012_v37 = vpop.permute.xlu1 %2139 }
 0x66e   : > { %2907 = vrot.lane.b32.xlu0 %v6980_v15, %s5176_s30 }
 0x66f   : > { %3913 = vrot.lane.b32.xlu1 %v6735_v45, %s5178_s12 }
 0x670   : > { %v3504_v6 = vpop.permute.xlu0 %3503 }
 0x671   : > { %v3521_v31 = vsel %vm9119_vm6, %v3504_v6, %v7002_v13  ;;  %v7020_v1 = vpop.permute.xlu1 %2761  ;;  %vm9123_vm6 = vmmov %vm9122_vm12 }
 0x672   : > { %3533 = vst [vmem:[#allocation3 + $0x430] sm:$0xff] %v3521_v31  ;;  %3467 = vrot.lane.b32.xlu0 %v6915_v54, %s5177_s11 }
 0x673   : > { %1957 = vrot.lane.b32.xlu1 %v7023_v12, %s5177_s11 }
 0x674   : > { %v7029_v5 = vpop.permute.xlu0 %3469 }
 0x675   : > { %v2796_v43 = vpop.permute.xlu1 %2795 }
 0x676   : > { %v2813_v6 = vsel %vm9120_vm14, %v2796_v43, %v2798_v47  ;;  %4204 = vrot.lane.b32.xlu0 %v6945_v26, %s5177_s11  ;;  %vm9124_vm14 = vcmask 523264  }
 0x677   : > { %2825 = vst [vmem:[#allocation3 + $0x4b0] sm:$0xff] %v2813_v6  ;;  %1961 = vrot.lane.b32.xlu1 %v7032_v49, %s5177_s11 }
 0x678   : > { %v7039_v0 = vpop.permute.xlu0 %4240 }
 0x679   : > { %v2800_v31 = vpop.permute.xlu1 %2799 }
 0x67a   : > { %v2814_v20 = vsel %vm9121_vm9, %v2798_v47, %v2800_v31  ;;  %3543 = vrot.lane.b32.xlu0 %v6897_v21, %s5178_s12  ;;  %vm9125_vm9 = vmmov %vm9124_vm14 }
 0x67b   : > { %2826 = vst [vmem:[#allocation3 + $0x178] sm:$0xff] %v2814_v20  ;;  %2029 = vrot.lane.b32.xlu1 %v7023_v12, %s5178_s12 }
 0x67c   : > { %v2404_v25 = vpop.permute.xlu0 %2403 }
 0x67d   : > { %v2421_v43 = vsel %vm9122_vm12, %v2404_v25, %v2406_v14  ;;  %v7047_v45 = vpop.permute.xlu1 %2833  ;;  %vm9126_vm12 = vcmask 654336  }
 0x67e   : > { %2433 = vst [vmem:[#allocation3 + $0x630] sm:$0xff] %v2421_v43  ;;  %4238 = vrot.lane.b32.xlu0 %v6536_v34, %s5179_s14 }
 0x67f   : > { %2033 = vrot.lane.b32.xlu1 %v7032_v49, %s5178_s12 }
 0x680   : > { %v2408_v47 = vpop.permute.xlu0 %2407 }
 0x681   : > { %v2422_v6 = vsel %vm9123_vm6, %v2406_v14, %v2408_v47  ;;  %v2868_v31 = vpop.permute.xlu1 %2867  ;;  %vm9127_vm6 = vmmov %vm9126_vm12 }
 0x682   : > { %2434 = vst [vmem:[#allocation3 + $0xf8] sm:$0xff] %v2422_v6  ;;  %v2885_v20 = vsel %vm9124_vm14, %v2868_v31, %v2870_v48  ;;  %2411 = vrot.lane.b32.xlu0 %v6699_v2, %s5177_s11  ;;  %v7075_v31 = vrot.slane %v6854_v42, 4  ;;  %vm9128_vm14 = vcmask 392192  }
 0x683   : > { %2897 = vst [vmem:[#allocation3 + $0x6a8] sm:$0xff] %v2885_v20  ;;  %2101 = vrot.lane.b32.xlu1 %v7023_v12, %s5176_s30 }
 0x684   : > { %v7059_v25 = vpop.permute.xlu0 %2446 }
 0x685   : > { %v2872_v43 = vpop.permute.xlu1 %2871 }
 0x686   : > { %v2886_v28 = vsel %vm9125_vm9, %v2870_v48, %v2872_v43  ;;  %2488 = vrot.lane.b32.xlu0 %v6699_v2, %s5178_s12  ;;  %vm9129_vm9 = vcmask 785408  }
 0x687   : > { %2898 = vst [vmem:[#allocation3 + $0x1a0] sm:$0xff] %v2886_v28  ;;  %2105 = vrot.lane.b32.xlu1 %v7032_v49, %s5176_s30  ;;  %v7078_v28 = vrot.slane %v6933_v41, 4  ;;  %v7091_v41 = vrot.slane %v6536_v34, 4 }
 0x688   : > { %v2481_v14 = vpop.permute.xlu0 %2480 }
 0x689   : > { %v2498_v47 = vsel %vm9126_vm12, %v2481_v14, %v6973_v50  ;;  %v7068_v6 = vpop.permute.xlu1 %2905  ;;  %vm9130_vm12 = vmmov %vm9128_vm14 }
 0x68a   : > { %2510 = vst [vmem:[#allocation3 + $0x388] sm:$0xff] %v2498_v47  ;;  %2560 = vrot.lane.b32.xlu0 %v6699_v2, %s5176_s30 }
 0x68b   : > { %3509 = vrot.lane.b32.xlu1 %v6659_v27, %s5179_s14 }
 0x68c   : > { %v2485_v48 = vpop.permute.xlu0 %2484 }
 0x68d   : > { %v2499_v20 = vsel %vm9127_vm6, %v6973_v50, %v2485_v48  ;;  %v2940_v43 = vpop.permute.xlu1 %2939  ;;  %vm9131_vm6 = vmmov %vm9130_vm12 }
 0x68e   : > { %2511 = vst [vmem:[#allocation3 + $0x2c0] sm:$0xff] %v2499_v20  ;;  %v2957_v14 = vsel %vm558_vm1, %v2940_v43, %v6994_v62  ;;  %3873 = vrot.lane.b32.xlu0 %v7075_v31, %s5179_s14 }
 0x68f   : > { %2969 = vst [vmem:[#allocation3 + $0x2c8] sm:$0xff] %v2957_v14  ;;  %4206 = vrot.lane.b32.xlu1 %v7078_v28, %s5177_s11 }
 0x690   : > { %v7088_v47 = vpop.permute.xlu0 %2518 }
 0x691   : > { %v2944_v2 = vpop.permute.xlu1 %2943 }
 0x692   : > { %v2958_v50 = vsel %vm558_vm1, %v6994_v62, %v2944_v2  ;;  %3869 = vrot.lane.b32.xlu0 %v6460_v3, %s5179_s14 }
 0x693   : > { %2970 = vst [vmem:[#allocation3 + $0xc8] sm:$0xff] %v2958_v50  ;;  %4202 = vrot.lane.b32.xlu1 %v7091_v41, %s5177_s11  ;;  %v2367_v50 = vsel %vm9131_vm6, %v6689_v19, %v6718_v58 }
 0x694   : > { %v2553_v48 = vpop.permute.xlu0 %2552 }
 0x695   : > { %v2570_v20 = vsel %vm9128_vm14, %v2553_v48, %v6982_v46  ;;  %v3508_v43 = vpop.permute.xlu1 %3507  ;;  %vm9132_vm14 = vcmask 523264  }
 0x696   : > { %2582 = vst [vmem:[#allocation3 + $0x410] sm:$0xff] %v2570_v20  ;;  %v3522_v34 = vsel %vm9129_vm9, %v7002_v13, %v3508_v43  ;;  %2001 = vrot.lane.b32.xlu0 %v6822_v55, %s5179_s14  ;;  %v2370_v48 = vsel %vm9132_vm14, %v2367_v50, %v6661_v24  ;;  %vm9133_vm9 = vcmask 654336  }
 0x697   : > { %3534 = vst [vmem:[#allocation3 + $0x420] sm:$0xff] %v3522_v34  ;;  %4246 = vrot.lane.b32.xlu1 %v6909_v30, %s5179_s14 }
 0x698   : > { %v2557_v2 = vpop.permute.xlu0 %2556 }
 0x699   : > { %v2571_v62 = vsel %vm9130_vm12, %v6982_v46, %v2557_v2  ;;  %v7109_v14 = vpop.permute.xlu1 %3541  ;;  %v7126_v46 = vsel %vm9133_vm9, %v2370_v48, %v6740_v33  ;;  %vm9134_vm12 = vmmov %vm9131_vm6  ;;  %vm9135_vm6 = vcmask 916480   ;;  %vm9137_vm9 = vcmask 523264  }
 0x69a   : > { %2583 = vst [vmem:[#allocation3 + $0x148] sm:$0xff] %v2571_v62  ;;  %2073 = vrot.lane.b32.xlu0 %v6822_v55, %s5180_s15  ;;  %v2724_v58 = vsel %vm9134_vm12, %v6592_v53, %v6605_v17  ;;  %vm9136_vm14 = vmmov %vm9135_vm6  ;;  %vm9138_vm12 = vcmask 654336  }
 0x69b   : > { %2409 = vrot.lane.b32.xlu1 %v6687_v9, %s5177_s11  ;;  %v2727_v34 = vsel %vm9137_vm9, %v2724_v58, %v6601_v29 }
 0x69c   : > { %v7118_v13 = vpop.permute.xlu0 %2590  ;;  %v7147_v53 = vsel %vm9138_vm12, %v2727_v34, %v6616_v63 }
 0x69d   : > { %v7122_v20 = vpop.permute.xlu1 %3871 }
 0x69e   : > { %2145 = vrot.lane.b32.xlu0 %v6822_v55, %s9002_s19 }
 0x69f   : > { %2413 = vrot.lane.b32.xlu1 %v7126_v46, %s5177_s11 }
 0x6a0   : > { %v3829_v19 = vpop.permute.xlu0 %3828 }
 0x6a1   : > { %v3846_v24 = vsel %vm9135_vm6, %v3829_v19, %v7010_v23  ;;  %v3833_v43 = vpop.permute.xlu1 %3832  ;;  %vm9139_vm6 = vmmov %vm9138_vm12  ;;  %vm9142_vm12 = vcmask 916480  }
 0x6a2   : > { %3858 = vst [vmem:[#allocation3 + $0x240] sm:$0xff] %v3846_v24  ;;  %v3847_v33 = vsel %vm9136_vm14, %v7010_v23, %v3833_v43  ;;  %2801 = vrot.lane.b32.xlu0 %v6588_v56, %s5179_s14  ;;  %vm9140_vm14 = vcmask 785408  }
 0x6a3   : > { %3859 = vst [vmem:[#allocation3 + $0x6e8] sm:$0xff] %v3847_v33  ;;  %2486 = vrot.lane.b32.xlu1 %v6687_v9, %s5178_s12  ;;  %vm9141_vm9 = vmmov %vm9140_vm14 }
 0x6a4   : > { %v3910_v2 = vpop.permute.xlu0 %3909 }
 0x6a5   : > { %v3924_v17 = vsel %vm9139_vm6, %v6988_v22, %v3910_v2  ;;  %v7151_v62 = vpop.permute.xlu1 %2803  ;;  %vm9143_vm6 = vcmask 392192  }
 0x6a6   : > { %3936 = vst [vmem:[#allocation3 + $0x488] sm:$0xff] %v3924_v17  ;;  %2805 = vrot.lane.b32.xlu0 %v7147_v53, %s5179_s14  ;;  %vm9149_vm4 = vmmov %vm9143_vm6 }
 0x6a7   : > { %2490 = vrot.lane.b32.xlu1 %v7126_v46, %s5178_s12 }
 0x6a8   : > { %v7157_v23 = vpop.permute.xlu0 %1959 }
 0x6a9   : > { %v7159_v29 = vpop.permute.xlu1 %2875 }
 0x6aa   : > { %2873 = vrot.lane.b32.xlu0 %v6588_v56, %s5180_s15 }
 0x6ab   : > { %2558 = vrot.lane.b32.xlu1 %v6687_v9, %s5176_s30 }
 0x6ac   : > { %v1994_v63 = vpop.permute.xlu0 %1993 }
 0x6ad   : > { %v2011_v50 = vsel %vm9140_vm14, %v1994_v63, %v6996_v44  ;;  %v7167_v48 = vpop.permute.xlu1 %2947  ;;  %vm9144_vm14 = vcmask 523264   ;;  %v9145_v63 = vld [vmem:[#allocation21_spill] sm:$0xff] }
 0x6ae   : > { %2023 = vst [vmem:[#allocation3 + $0x98] sm:$0xff] %v2011_v50  ;;  %2877 = vrot.lane.b32.xlu0 %v7147_v53, %s5180_s15 }
 0x6af   : > { %2562 = vrot.lane.b32.xlu1 %v7126_v46, %s5176_s30 }
 0x6b0   : > { %v1998_v19 = vpop.permute.xlu0 %1997 }
 0x6b1   : > { %v2012_v58 = vsel %vm9141_vm9, %v6996_v44, %v1998_v19  ;;  %v7175_v24 = vpop.permute.xlu1 %3511  ;;  %v3432_v44 = vsel %vm9143_vm6, %v6620_v59, %v6627_v16  ;;  %vm9146_vm9 = vcmask 654336  }
 0x6b2   : > { %2024 = vst [vmem:[#allocation3 + $0x2f8] sm:$0xff] %v2012_v58  ;;  %2945 = vrot.lane.b32.xlu0 %v6588_v56, %s9002_s19  ;;  %v3435_v2 = vsel %vm9144_vm14, %v3432_v44, %v6634_v38  ;;  %vm9150_vm6 = vmmov %vm9146_vm9 }
 0x6b3   : > { %3834 = vrot.lane.b32.xlu1 %v6783_v36, %s5177_s11  ;;  %v7196_v50 = vsel %vm9146_vm9, %v3435_v2, %v9145_v63 }
 0x6b4   : > { %v7181_v43 = vpop.permute.xlu0 %2031 }
 0x6b5   : > { %v3472_v33 = vpop.permute.xlu1 %3471 }
 0x6b6   : > { %v3486_v34 = vsel %vm9142_vm12, %v7029_v5, %v3472_v33  ;;  %2949 = vrot.lane.b32.xlu0 %v7147_v53, %s9002_s19  ;;  %vm9147_vm12 = vmmov %vm9144_vm14  ;;  %v9148_v33 = vld [vmem:[#allocation31_spill] sm:$0xff] }
 0x6b7   : > { %3498 = vst [vmem:[#allocation3 + $0x28] sm:$0xf0] %v3486_v34  ;;  %3911 = vrot.lane.b32.xlu1 %v6783_v36, %s5178_s12  ;;  %v1922_v16 = vsel %vm9149_vm4, %v6760_v8, %v9148_v33  ;;  %vm9151_vm14 = vmmov %vm9147_vm12  ;;  %vm9153_vm4 = vcmask 785408  }
 0x6b8   : > { %v2066_v17 = vpop.permute.xlu0 %2065  ;;  %v1925_v38 = vsel %vm9151_vm14, %v1922_v16, %v6835_v35  ;;  %vm9152_vm9 = vmmov %vm9147_vm12 }
 0x6b9   : > { %v2083_v19 = vsel %vm9147_vm12, %v2066_v17, %v7004_v32  ;;  %v3540_v58 = vpop.permute.xlu1 %3539  ;;  %v9154_v17 = vld [vmem:[#allocation32_spill] sm:$0xff]  ;;  %vm9155_vm12 = vmmov %vm9150_vm6 }
 0x6ba   : > { %2095 = vst [vmem:[#allocation3 + $0x610] sm:$0xff] %v2083_v19  ;;  %v3557_v59 = vsel %vm9150_vm6, %v3540_v58, %v7109_v14  ;;  %3513 = vrot.lane.b32.xlu0 %v7196_v50, %s5179_s14  ;;  %v7219_v63 = vsel %vm9155_vm12, %v1925_v38, %v9154_v17  ;;  %vm9157_vm6 = vcmask 1043456   ;;  %vm9158_vm14 = vmmov %vm9153_vm4  ;;  %vm9163_vm12 = vcmask 916480  }
 0x6bb   : > { %3569 = vst [vmem:[#allocation3 + $0x5c0] sm:$0xf0] %v3557_v59  ;;  %1999 = vrot.lane.b32.xlu1 %v6825_v61, %s5179_s14  ;;  %v9156_v59 = vld [vmem:[#allocation23_spill] sm:$0xff] }
 0x6bc   : > { %v2070_v34 = vpop.permute.xlu0 %2069 }
 0x6bd   : > { %v2084_v44 = vsel %vm9152_vm9, %v7004_v32, %v2070_v34  ;;  %v4243_v2 = vpop.permute.xlu1 %4242  ;;  %v2749_v32 = vrot.slane %v6599_v11, 4  ;;  %vm9159_vm9 = vmmov %vm9153_vm4 }
 0x6be   : > { %2096 = vst [vmem:[#allocation3 + $0x750] sm:$0xff] %v2084_v44  ;;  %v4257_v8 = vsel %vm9153_vm4, %v7039_v0, %v4243_v2  ;;  %4278 = vrot.lane.b32.xlu0 %v7078_v28, %s5178_s12  ;;  %vm9162_vm4 = vcmask 392192  }
 0x6bf   : > { %4269 = vst [vmem:[#allocation3 + $0x2d8] sm:$0xff] %v4257_v8  ;;  %2003 = vrot.lane.b32.xlu1 %v7219_v63, %s5179_s14  ;;  %v2750_v38 = vsel %vm9157_vm6, %v9156_v59, %v2749_v32  ;;  %vm9164_vm6 = vcmask 523264  }
 0x6c0   : > { %v7223_v35 = vpop.permute.xlu0 %2103 }
 0x6c1   : > { %v7225_v19 = vpop.permute.xlu1 %4276 }
 0x6c2   : > { %4274 = vrot.lane.b32.xlu0 %v7091_v41, %s5178_s12 }
 0x6c3   : > { %2071 = vrot.lane.b32.xlu1 %v6825_v61, %s5180_s15 }
 0x6c4   : > { %v2138_v58 = vpop.permute.xlu0 %2137 }
 0x6c5   : > { %v2155_v33 = vsel %vm558_vm1, %v2138_v58, %v7012_v37  ;;  %v2445_v16 = vpop.permute.xlu1 %2444 }
 0x6c6   : > { %2167 = vst [vmem:[#allocation3 + $0x408] sm:$0xff] %v2155_v33  ;;  %v2462_v34 = vsel %vm9158_vm14, %v2445_v16, %v7059_v25  ;;  %2767 = vrot.lane.b32.xlu0 %v2750_v38, %s5177_s11  ;;  %v9160_v33 = vld [vmem:[#allocation30_spill] sm:$0xff]  ;;  %vm9166_vm14 = vmmov %vm9164_vm6 }
 0x6c7   : > { %2474 = vst [vmem:[#allocation3 + $0x1b8] sm:$0xf0] %v2462_v34  ;;  %2075 = vrot.lane.b32.xlu1 %v7219_v63, %s5180_s15  ;;  %v9161_v16 = vld [vmem:[#allocation22_spill] sm:$0xff] }
 0x6c8   : > { %v2142_v44 = vpop.permute.xlu0 %2141  ;;  %v3792_v59 = vsel %vm9162_vm4, %v9161_v16, %v9160_v33  ;;  %vm9169_vm4 = vmmov %vm9163_vm12 }
 0x6c9   : > { %v2156_v2 = vsel %vm558_vm1, %v7012_v37, %v2142_v44  ;;  %v2449_v8 = vpop.permute.xlu1 %2448 }
 0x6ca   : > { %2168 = vst [vmem:[#allocation3 + $0x6c8] sm:$0xff] %v2156_v2  ;;  %v2463_v17 = vsel %vm9159_vm9, %v7059_v25, %v2449_v8  ;;  %2839 = vrot.lane.b32.xlu0 %v2750_v38, %s5178_s12  ;;  %v9165_v25 = vld [vmem:[#allocation24_spill] sm:$0xff]  ;;  %vm9168_vm9 = vcmask 654336  }
 0x6cb   : > { %2475 = vst [vmem:[#allocation3 + $0x10] sm:$0xf0] %v2463_v17  ;;  %2143 = vrot.lane.b32.xlu1 %v6825_v61, %s9002_s19  ;;  %v3795_v2 = vsel %vm9166_vm14, %v3792_v59, %v9165_v25  ;;  %v9167_v17 = vld [vmem:[#allocation33_spill] sm:$0xff]  ;;  %v9171_v59 = vld [vmem:[#allocation27_spill] sm:$0xff]  ;;  %vm9173_vm14 = vcmask 1043456  }
 0x6cc   : > { %v2760_v58 = vpop.permute.xlu0 %2759  ;;  %v7264_v33 = vsel %vm9168_vm9, %v3795_v2, %v9167_v17 }
 0x6cd   : > { %v2777_v34 = vsel %vm9163_vm12, %v2760_v58, %v7020_v1  ;;  %v2517_v37 = vpop.permute.xlu1 %2516  ;;  %vm9170_vm12 = vmmov %vm9164_vm6 }
 0x6ce   : > { %2789 = vst [vmem:[#allocation3 + $0x6c0] sm:$0xf0] %v2777_v34  ;;  %v2534_v44 = vsel %vm9164_vm6, %v2517_v37, %v7088_v47  ;;  %2911 = vrot.lane.b32.xlu0 %v2750_v38, %s5176_s30  ;;  %v3457_v34 = vrot.slane %v6656_v51, 4  ;;  %vm9172_vm6 = vmmov %vm9168_vm9 }
 0x6cf   : > { %2546 = vst [vmem:[#allocation3 + $0x228] sm:$0xf0] %v2534_v44  ;;  %2147 = vrot.lane.b32.xlu1 %v7219_v63, %s9002_s19  ;;  %vm9174_vm9 = vmmov %vm9172_vm6 }
 0x6d0   : > { %v2764_v8 = vpop.permute.xlu0 %2763 }
 0x6d1   : > { %v2778_v58 = vsel %vm9169_vm4, %v7020_v1, %v2764_v8  ;;  %v2521_v16 = vpop.permute.xlu1 %2520  ;;  %v7281_v1 = vsel %vm9173_vm14, %v6692_v60, %v3457_v34  ;;  %vm9175_vm4 = vcmask 392192   ;;  %vm9178_vm14 = vmmov %vm9174_vm9 }
 0x6d2   : > { %2790 = vst [vmem:[#allocation3 + $0x540] sm:$0xf0] %v2778_v58  ;;  %v2535_v38 = vsel %vm9170_vm12, %v7088_v47, %v2521_v16  ;;  %3838 = vrot.lane.b32.xlu0 %v7264_v33, %s5177_s11  ;;  %vm9176_vm12 = vmmov %vm9175_vm4 }
 0x6d3   : > { %2547 = vst [vmem:[#allocation3 + $0x530] sm:$0xf0] %v2535_v38  ;;  %2452 = vrot.lane.b32.xlu1 %v9171_v59, %s5179_s14 }
 0x6d4   : > { %v2832_v37 = vpop.permute.xlu0 %2831 }
 0x6d5   : > { %v2849_v44 = vsel %vm9172_vm6, %v2832_v37, %v7047_v45  ;;  %v2589_v25 = vpop.permute.xlu1 %2588  ;;  %vm9177_vm6 = vcmask 523264  }
 0x6d6   : > { %2861 = vst [vmem:[#allocation3 + $0x568] sm:$0xf0] %v2849_v44  ;;  %v2606_v47 = vsel %vm558_vm1, %v2589_v25, %v7118_v13  ;;  %3475 = vrot.lane.b32.xlu0 %v7281_v1, %s5177_s11 }
 0x6d7   : > { %2618 = vst [vmem:[#allocation3 + $0x3f0] sm:$0xf0] %v2606_v47  ;;  %2524 = vrot.lane.b32.xlu1 %v9171_v59, %s5180_s15 }
 0x6d8   : > { %v2836_v2 = vpop.permute.xlu0 %2835 }
 0x6d9   : > { %v2850_v8 = vsel %vm9174_vm9, %v7047_v45, %v2836_v2  ;;  %v2593_v17 = vpop.permute.xlu1 %2592  ;;  %v8986_v45 = vrot.slane %v6822_v55, 4  ;;  %vm9179_vm9 = vmmov %vm9175_vm4 }
 0x6da   : > { %2862 = vst [vmem:[#allocation3 + $0x5f0] sm:$0xf0] %v2850_v8  ;;  %v2607_v58 = vsel %vm558_vm1, %v7118_v13, %v2593_v17  ;;  %3547 = vrot.lane.b32.xlu0 %v7281_v1, %s5178_s12  ;;  %v4167_v13 = vsel %vm9176_vm12, %v6827_v4, %v6837_v52  ;;  %vm9181_vm12 = vcmask 916480   ;;  %v9183_v17 = vld [vmem:[#allocation29_spill] sm:$0xff] }
 0x6db   : > { %2619 = vst [vmem:[#allocation3 + $0x260] sm:$0xf0] %v2607_v58  ;;  %2596 = vrot.lane.b32.xlu1 %v9171_v59, %s9002_s19  ;;  %v4170_v59 = vsel %vm9177_vm6, %v4167_v13, %v6868_v7  ;;  %vm9182_vm6 = vmmov %vm9181_vm12  ;;  %v8983_v13 = vrot.slane %v6588_v56, 4 }
 0x6dc   : > { %v2904_v16 = vpop.permute.xlu0 %2903  ;;  %v7313_v25 = vsel %vm9178_vm14, %v4170_v59, %v6890_v57 }
 0x6dd   : > { %v2921_v38 = vsel %vm9175_vm4, %v2904_v16, %v7068_v6  ;;  %v7299_v37 = vpop.permute.xlu1 %3836  ;;  %vm9180_vm4 = vcmask 1043456   ;;  %v8987_v16 = vrot.slane %v6909_v30, 4 }
 0x6de   : > { %2933 = vst [vmem:[#allocation3 + $0x68] sm:$0xf0] %v2921_v38  ;;  %3915 = vrot.lane.b32.xlu0 %v7264_v33, %s5178_s12  ;;  %v1948_v4 = vsel %vm9180_vm4, %v6864_v10, %v8986_v45  ;;  %vm9184_vm14 = vmmov %vm9180_vm4  ;;  %vm9186_vm4 = vcmask 654336  }
 0x6df   : > { %4244 = vrot.lane.b32.xlu1 %v6912_v39, %s5179_s14 }
 0x6e0   : > { %v2908_v44 = vpop.permute.xlu0 %2907 }
 0x6e1   : > { %v2922_v47 = vsel %vm9179_vm9, %v7068_v6, %v2908_v44  ;;  %v7317_v2 = vpop.permute.xlu1 %3913  ;;  %v3455_v6 = vrot.slane %v6659_v27, 4  ;;  %vm9185_vm9 = vmmov %vm9182_vm6 }
 0x6e2   : > { %2934 = vst [vmem:[#allocation3 + $0x558] sm:$0xf0] %v2922_v47  ;;  %4248 = vrot.lane.b32.xlu0 %v7313_v25, %s5179_s14 }
 0x6e3   : > { %1965 = vrot.lane.b32.xlu1 %v1948_v4, %s5177_s11 }
 0x6e4   : > { %v3468_v52 = vpop.permute.xlu0 %3467 }
 0x6e5   : > { %v3485_v7 = vsel %vm9181_vm12, %v3468_v52, %v7029_v5  ;;  %v1958_v57 = vpop.permute.xlu1 %1957  ;;  %v7340_v5 = vsel %vm9184_vm14, %v6915_v54, %v3455_v6  ;;  %vm9187_vm12 = vmmov %vm9184_vm14 }
 0x6e6   : > { %3497 = vst [vmem:[#allocation3 + $0x608] sm:$0xf0] %v3485_v7  ;;  %v1975_v8 = vsel %vm9182_vm6, %v1958_v57, %v7157_v23  ;;  %3877 = vrot.lane.b32.xlu0 %v9183_v17, %s5179_s14  ;;  %v7355_v52 = vsel %vm9187_vm12, %v6945_v26, %v8987_v16  ;;  %vm9188_vm6 = vmmov %vm9186_vm4 }
 0x6e7   : > { %1987 = vst [vmem:[#allocation3 + $0x778] sm:$0xf0] %v1975_v8  ;;  %2037 = vrot.lane.b32.xlu1 %v1948_v4, %s5178_s12  ;;  %vm9189_vm14 = vmmov %vm9187_vm12 }
 0x6e8   : > { %v7334_v10 = vpop.permute.xlu0 %4204 }
 0x6e9   : > { %v1962_v58 = vpop.permute.xlu1 %1961 }
 0x6ea   : > { %v1976_v38 = vsel %vm9185_vm9, %v7157_v23, %v1962_v58  ;;  %3473 = vrot.lane.b32.xlu0 %v7340_v5, %s5177_s11  ;;  %v8982_v23 = vrot.slane %v7147_v53, 4  ;;  %vm9190_vm9 = vcmask 785408  }
 0x6eb   : > { %1988 = vst [vmem:[#allocation3 + $0x140] sm:$0xf0] %v1976_v38  ;;  %2109 = vrot.lane.b32.xlu1 %v1948_v4, %s5176_s30 }
 0x6ec   : > { %v3544_v59 = vpop.permute.xlu0 %3543 }
 0x6ed   : > { %v3558_v44 = vsel %vm9186_vm4, %v7109_v14, %v3544_v59  ;;  %v2030_v47 = vpop.permute.xlu1 %2029  ;;  %v2748_v14 = vsel %vm9189_vm14, %v6971_v40, %v8983_v13  ;;  %v2752_v40 = vsel %vm9187_vm12, %v6980_v15, %v8982_v23  ;;  %v8984_v59 = vrot.slane %v7126_v46, 4  ;;  %v9308_v23 = vld [vmem:[#allocation12_spill] sm:$0xff] }
 0x6ee   : > { %3570 = vst [vmem:[#allocation3 + $0x690] sm:$0xf0] %v3558_v44  ;;  %v2047_v7 = vsel %vm9188_vm6, %v2030_v47, %v7181_v43  ;;  %4210 = vrot.lane.b32.xlu0 %v7355_v52, %s5177_s11  ;;  %vm9191_vm6 = vcmask 392192   ;;  %v9193_v47 = vld [vmem:[#allocation26_spill] sm:$0xff]  ;;  %v9309_v13 = vrot.slane %v9308_v23, 4 }
 0x6ef   : > { %2059 = vst [vmem:[#allocation3 + $0x2e0] sm:$0xf0] %v2047_v7  ;;  %2765 = vrot.lane.b32.xlu1 %v2748_v14, %s5177_s11  ;;  %vm9192_vm14 = vmmov %vm9191_vm6 }
 0x6f0   : > { %v4239_v4 = vpop.permute.xlu0 %4238 }
 0x6f1   : > { %v4256_v57 = vsel %vm9190_vm9, %v4239_v4, %v7039_v0  ;;  %v2034_v8 = vpop.permute.xlu1 %2033  ;;  %vm9194_vm9 = vmmov %vm9187_vm12 }
 0x6f2   : > { %4268 = vst [vmem:[#allocation3 + $0x4f0] sm:$0xff] %v4256_v57  ;;  %v2048_v17 = vsel %vm9186_vm4, %v7181_v43, %v2034_v8  ;;  %3545 = vrot.lane.b32.xlu0 %v7340_v5, %s5178_s12  ;;  %v2441_v57 = vsel %vm9194_vm9, %v6962_v18, %v8984_v59  ;;  %vm9195_vm4 = vcmask 785408  }
 0x6f3   : > { %2060 = vst [vmem:[#allocation3 + $0x390] sm:$0xf0] %v2048_v17  ;;  %2769 = vrot.lane.b32.xlu1 %v2752_v40, %s5177_s11  ;;  %vm9196_vm12 = vmmov %vm9195_vm4 }
 0x6f4   : > { %v2412_v58 = vpop.permute.xlu0 %2411 }
 0x6f5   : > { %v2102_v38 = vpop.permute.xlu1 %2101 }
 0x6f6   : > { %v2119_v0 = vsel %vm9191_vm6, %v2102_v38, %v7223_v35  ;;  %4282 = vrot.lane.b32.xlu0 %v7355_v52, %s5178_s12  ;;  %vm9197_vm6 = vcmask 916480  }
 0x6f7   : > { %2131 = vst [vmem:[#allocation3 + $0x350] sm:$0xf0] %v2119_v0  ;;  %2837 = vrot.lane.b32.xlu1 %v2748_v14, %s5178_s12  ;;  %v8985_v0 = vrot.slane %v7196_v50, 4  ;;  %vm9199_vm9 = vmmov %vm9197_vm6 }
 0x6f8   : > { %v7383_v43 = vpop.permute.xlu0 %2488 }
 0x6f9   : > { %v2106_v44 = vpop.permute.xlu1 %2105 }
 0x6fa   : > { %v2120_v15 = vsel %vm9192_vm14, %v7223_v35, %v2106_v44  ;;  %2450 = vrot.lane.b32.xlu0 %v9193_v47, %s5179_s14  ;;  %vm9198_vm14 = vmmov %vm9195_vm4 }
 0x6fb   : > { %2132 = vst [vmem:[#allocation3 + $0x480] sm:$0xf0] %v2120_v15  ;;  %2841 = vrot.lane.b32.xlu1 %v2752_v40, %s5178_s12 }
 0x6fc   : > { %v7391_v7 = vpop.permute.xlu0 %2560 }
 0x6fd   : > { %v3510_v4 = vpop.permute.xlu1 %3509 }
 0x6fe   : > { %v3523_v8 = vsel %vm9195_vm4, %v3510_v4, %v7175_v24  ;;  %2454 = vrot.lane.b32.xlu0 %v2441_v57, %s5179_s14  ;;  %vm9200_vm4 = vcmask 1043456  }
 0x6ff   : > { %3535 = vst [vmem:[#allocation3 + $0x110] sm:$0xff] %v3523_v8  ;;  %2909 = vrot.lane.b32.xlu1 %v2748_v14, %s5176_s30  ;;  %v7418_v8 = vsel %vm9200_vm4, %v6897_v21, %v8985_v0 }
 0x700   : > { %v3874_v35 = vpop.permute.xlu0 %3873 }
 0x701   : > { %v3888_v17 = vsel %vm9196_vm12, %v7122_v20, %v3874_v35  ;;  %v4207_v38 = vpop.permute.xlu1 %4206  ;;  %vm9201_vm12 = vmmov %vm9197_vm6 }
 0x702   : > { %3900 = vst [vmem:[#allocation3 + $0x5e8] sm:$0xf0] %v3888_v17  ;;  %v4221_v44 = vsel %vm9197_vm6, %v7334_v10, %v4207_v38  ;;  %2522 = vrot.lane.b32.xlu0 %v9193_v47, %s5180_s15  ;;  %v8977_v17 = vrot.slane %v7264_v33, 4 }
 0x703   : > { %4233 = vst [vmem:[#allocation3 + $0x438] sm:$0xf0] %v4221_v44  ;;  %2913 = vrot.lane.b32.xlu1 %v2752_v40, %s5176_s30 }
 0x704   : > { %v3870_v18 = vpop.permute.xlu0 %3869 }
 0x705   : > { %v3887_v14 = vsel %vm9198_vm14, %v3870_v18, %v7122_v20  ;;  %v4203_v15 = vpop.permute.xlu1 %4202  ;;  %vm9203_vm14 = vmmov %vm9200_vm4 }
 0x706   : > { %3899 = vst [vmem:[#allocation3 + $0x2a8] sm:$0xf0] %v3887_v14  ;;  %v4220_v4 = vsel %vm9199_vm9, %v4203_v15, %v7334_v10  ;;  %2526 = vrot.lane.b32.xlu0 %v2441_v57, %s5180_s15  ;;  %v8978_v14 = vrot.slane %v7313_v25, 4  ;;  %vm9204_vm9 = vcmask 785408  }
 0x707   : > { %4232 = vst [vmem:[#allocation3 + $0x3f8] sm:$0xf0] %v4220_v4  ;;  %3477 = vrot.lane.b32.xlu1 %v7418_v8, %s5177_s11  ;;  %v9202_v4 = vld [vmem:[#allocation34_spill] sm:$0xff] }
 0x708   : > { %v7422_v40 = vpop.permute.xlu0 %2001 }
 0x709   : > { %v7424_v20 = vpop.permute.xlu1 %4246 }
 0x70a   : > { %2594 = vrot.lane.b32.xlu0 %v9193_v47, %s9002_s19  ;;  %v8981_v47 = vrot.slane %v6825_v61, 4 }
 0x70b   : > { %3549 = vrot.lane.b32.xlu1 %v7418_v8, %s5178_s12 }
 0x70c   : > { %v7430_v10 = vpop.permute.xlu0 %2073 }
 0x70d   : > { %v2410_v35 = vpop.permute.xlu1 %2409 }
 0x70e   : > { %v2423_v38 = vsel %vm9201_vm12, %v2410_v35, %v2412_v58  ;;  %2598 = vrot.lane.b32.xlu0 %v2441_v57, %s9002_s19  ;;  %v7448_v57 = vsel %vm9203_vm14, %v7075_v31, %v8977_v17  ;;  %v8980_v35 = vrot.slane %v7219_v63, 4  ;;  %vm9205_vm12 = vcmask 654336   ;;  %vm9207_vm14 = vmmov %vm9204_vm9 }
 0x70f   : > { %2435 = vst [vmem:[#allocation3 + $0x4c8] sm:$0xff] %v2423_v38  ;;  %4354 = vrot.lane.b32.xlu1 %v7355_v52, %s5176_s30 }
 0x710   : > { %v7437_v44 = vpop.permute.xlu0 %2145 }
 0x711   : > { %v2414_v18 = vpop.permute.xlu1 %2413 }
 0x712   : > { %v2424_v15 = vsel %vm9197_vm6, %v2412_v58, %v2414_v18  ;;  %3875 = vrot.lane.b32.xlu0 %v9202_v4, %s5179_s14  ;;  %v1946_v18 = vsel %vm9200_vm4, %v7023_v12, %v8981_v47  ;;  %vm9206_vm6 = vmmov %vm9200_vm4  ;;  %v9303_v47 = vld [vmem:[#allocation11_spill] sm:$0xff] }
 0x713   : > { %2436 = vst [vmem:[#allocation3 + $0x1c8] sm:$0xff] %v2424_v15  ;;  %3879 = vrot.lane.b32.xlu1 %v7448_v57, %s5179_s14  ;;  %v7466_v15 = vsel %vm9206_vm6, %v7078_v28, %v8978_v14 }
 0x714   : > { %v2802_v52 = vpop.permute.xlu0 %2801 }
 0x715   : > { %v2815_v38 = vsel %vm9204_vm9, %v2802_v52, %v7151_v62  ;;  %v2487_v58 = vpop.permute.xlu1 %2486  ;;  %v8979_v52 = vrot.slane %v6912_v39, 4  ;;  %vm9208_vm9 = vmmov %vm9200_vm4 }
 0x716   : > { %2827 = vst [vmem:[#allocation3 + $0x440] sm:$0xff] %v2815_v38  ;;  %v2500_v4 = vsel %vm9205_vm12, %v2487_v58, %v7383_v43  ;;  %1963 = vrot.lane.b32.xlu0 %v1946_v18, %s5177_s11  ;;  %v1950_v58 = vsel %vm9208_vm9, %v7032_v49, %v8980_v35  ;;  %vm9209_vm4 = vmmov %vm9205_vm12 }
 0x717   : > { %2512 = vst [vmem:[#allocation3 + $0x780] sm:$0xff] %v2500_v4  ;;  %4212 = vrot.lane.b32.xlu1 %v7466_v15, %s5177_s11  ;;  %vm9210_vm12 = vmmov %vm9206_vm6  ;;  %vm9211_vm6 = vcmask 523264  }
 0x718   : > { %v2806_v17 = vpop.permute.xlu0 %2805  ;;  %v7484_v4 = vsel %vm9210_vm12, %v7091_v41, %v8979_v52  ;;  %vm9213_vm9 = vmmov %vm9211_vm6  ;;  %vm9216_vm12 = vcmask 916480  }
 0x719   : > { %v2816_v12 = vsel %vm9207_vm14, %v7151_v62, %v2806_v17  ;;  %v2491_v38 = vpop.permute.xlu1 %2490  ;;  %vm9212_vm14 = vcmask 392192  }
 0x71a   : > { %2828 = vst [vmem:[#allocation3 + $0x160] sm:$0xff] %v2816_v12  ;;  %v2501_v14 = vsel %vm9209_vm4, %v7383_v43, %v2491_v38  ;;  %1967 = vrot.lane.b32.xlu0 %v1950_v58, %s5177_s11  ;;  %vm9214_vm4 = vmmov %vm9212_vm14 }
 0x71b   : > { %2513 = vst [vmem:[#allocation3 + $0x790] sm:$0xff] %v2501_v14  ;;  %4208 = vrot.lane.b32.xlu1 %v7484_v4, %s5177_s11 }
 0x71c   : > { %v2874_v62 = vpop.permute.xlu0 %2873 }
 0x71d   : > { %v2887_v49 = vsel %vm9211_vm6, %v2874_v62, %v7159_v29  ;;  %v2559_v17 = vpop.permute.xlu1 %2558  ;;  %vm9217_vm6 = vcmask 654336  }
 0x71e   : > { %2899 = vst [vmem:[#allocation3 + $0x5d8] sm:$0xff] %v2887_v49  ;;  %v2572_v43 = vsel %vm9212_vm14, %v2559_v17, %v7391_v7  ;;  %2035 = vrot.lane.b32.xlu0 %v1946_v18, %s5178_s12  ;;  %v9215_v49 = vld [vmem:[#allocation17_spill] sm:$0xff]  ;;  %vm9218_vm14 = vcmask 785408  }
 0x71f   : > { %2584 = vst [vmem:[#allocation3 + $0x4e0] sm:$0xff] %v2572_v43  ;;  %4284 = vrot.lane.b32.xlu1 %v7466_v15, %s5178_s12 }
 0x720   : > { %v2878_v12 = vpop.permute.xlu0 %2877 }
 0x721   : > { %v2888_v14 = vsel %vm9213_vm9, %v7159_v29, %v2878_v12  ;;  %v2563_v38 = vpop.permute.xlu1 %2562  ;;  %vm9219_vm9 = vmmov %vm9218_vm14 }
 0x722   : > { %2900 = vst [vmem:[#allocation3 + $0x768] sm:$0xff] %v2888_v14  ;;  %v2573_v62 = vsel %vm9214_vm4, %v7391_v7, %v2563_v38  ;;  %2039 = vrot.lane.b32.xlu0 %v1950_v58, %s5178_s12  ;;  %vm9220_vm4 = vmmov %vm9217_vm6 }
 0x723   : > { %2585 = vst [vmem:[#allocation3 + $0x1d0] sm:$0xff] %v2573_v62  ;;  %3905 = vrot.lane.b32.xlu1 %v9215_v49, %s5178_s12 }
 0x724   : > { %v2946_v17 = vpop.permute.xlu0 %2945 }
 0x725   : > { %v2959_v43 = vsel %vm558_vm1, %v2946_v17, %v7167_v48  ;;  %v3835_v52 = vpop.permute.xlu1 %3834  ;;  %v9222_v17 = vld [vmem:[#allocation28_spill] sm:$0xff] }
 0x726   : > { %2971 = vst [vmem:[#allocation3 + $0x4a0] sm:$0xff] %v2959_v43  ;;  %v3848_v29 = vsel %vm9216_vm12, %v3835_v52, %v7299_v37  ;;  %2107 = vrot.lane.b32.xlu0 %v1946_v18, %s5176_s30  ;;  %vm9221_vm12 = vmmov %vm9219_vm9  ;;  %v9223_v43 = vld [vmem:[#allocation16_spill] sm:$0xff] }
 0x727   : > { %3860 = vst [vmem:[#allocation3 + $0x358] sm:$0xff] %v3848_v29  ;;  %4348 = vrot.lane.b32.xlu1 %v6945_v26, %s5176_s30 }
 0x728   : > { %v2950_v7 = vpop.permute.xlu0 %2949 }
 0x729   : > { %v2960_v12 = vsel %vm558_vm1, %v7167_v48, %v2950_v7  ;;  %v3912_v14 = vpop.permute.xlu1 %3911 }
 0x72a   : > { %2972 = vst [vmem:[#allocation3 + $0x1a8] sm:$0xff] %v2960_v12  ;;  %v3925_v38 = vsel %vm9217_vm6, %v3912_v14, %v7317_v2  ;;  %2111 = vrot.lane.b32.xlu0 %v1950_v58, %s5176_s30  ;;  %vm9224_vm6 = vmmov %vm9220_vm4 }
 0x72b   : > { %3937 = vst [vmem:[#allocation3 + $0x478] sm:$0xff] %v3925_v38  ;;  %4346 = vrot.lane.b32.xlu1 %v7091_v41, %s5176_s30 }
 0x72c   : > { %v3514_v18 = vpop.permute.xlu0 %3513 }
 0x72d   : > { %v3524_v52 = vsel %vm9218_vm14, %v7175_v24, %v3514_v18  ;;  %v2000_v26 = vpop.permute.xlu1 %1999  ;;  %vm9225_vm14 = vcmask 523264  }
 0x72e   : > { %3536 = vst [vmem:[#allocation3 + $0x4f8] sm:$0xff] %v3524_v52  ;;  %v2013_v48 = vsel %vm9219_vm9, %v2000_v26, %v7422_v40  ;;  %4350 = vrot.lane.b32.xlu0 %v7078_v28, %s5176_s30  ;;  %vm9227_vm9 = vmmov %vm9225_vm14 }
 0x72f   : > { %2025 = vst [vmem:[#allocation3 + $0x200] sm:$0xff] %v2013_v48  ;;  %3987 = vrot.lane.b32.xlu1 %v7264_v33, %s5176_s30  ;;  %v9228_v48 = vld [vmem:[#allocation39_spill] sm:$0xff] }
 0x730   : > { %v4279_v58 = vpop.permute.xlu0 %4278 }
 0x731   : > { %v4293_v41 = vsel %vm9220_vm4, %v7225_v19, %v4279_v58  ;;  %v2004_v62 = vpop.permute.xlu1 %2003  ;;  %vm9231_vm4 = vcmask 916480  }
 0x732   : > { %4305 = vst [vmem:[#allocation3 + $0x348] sm:$0xf0] %v4293_v41  ;;  %v2014_v24 = vsel %vm9221_vm12, %v7422_v40, %v2004_v62  ;;  %3985 = vrot.lane.b32.xlu0 %v9222_v17, %s5176_s30  ;;  %v7543_v40 = vld [vmem:[%s8890_s6 + $0x8] sm:$0xff]  ;;  %v9229_v62 = vld [vmem:[#allocation38_spill] sm:$0xff]  ;;  %vm9234_vm12 = vmmov %vm9224_vm6 }
 0x733   : > { %2026 = vst [vmem:[#allocation3 + $0x2d0] sm:$0xff] %v2014_v24  ;;  %3979 = vrot.lane.b32.xlu1 %v9223_v43, %s5176_s30  ;;  %v1546_v24 = vmul.f32 %v9229_v62, %v7543_v40 }
 0x734   : > { %v4275_v28 = vpop.permute.xlu0 %4274 }
 0x735   : > { %v4292_v29 = vsel %vm9224_vm6, %v4275_v28, %v7225_v19  ;;  %v2072_v7 = vpop.permute.xlu1 %2071  ;;  %v9226_v19 = vld [vmem:[#allocation37_spill] sm:$0xff]  ;;  %vm9235_vm6 = vcmask 785408  }
 0x736   : > { %4304 = vst [vmem:[#allocation3 + $0x1e8] sm:$0xf0] %v4292_v29  ;;  %v2085_v12 = vsel %vm9225_vm14, %v2072_v7, %v7430_v10  ;;  %3983 = vrot.lane.b32.xlu0 %v6783_v36, %s5176_s30  ;;  %v1506_v38 = vmul.f32 %v9226_v19, %v7543_v40  ;;  %v9230_v7 = vld [vmem:[#allocation40_spill] sm:$0xff]  ;;  %vm9236_vm14 = vmmov %vm9235_vm6 }
 0x737   : > { %2097 = vst [vmem:[#allocation3 + $0x668] sm:$0xff] %v2085_v12  ;;  %3977 = vrot.lane.b32.xlu1 %v9215_v49, %s5176_s30  ;;  %v7557_v49 = vld [vmem:[%s8890_s6] sm:$0xff] }
 0x738   : > { %v7545_v14 = vpop.permute.xlu0 %2767  ;;  %v1525_v58 = vmul.f32 %v9228_v48, %v7557_v49  ;;  %v1565_v12 = vmul.f32 %v9230_v7, %v7557_v49 }
 0x739   : > { %v2076_v18 = vpop.permute.xlu1 %2075 }
 0x73a   : > { %v2086_v52 = vsel %vm9227_vm9, %v7430_v10, %v2076_v18  ;;  %3981 = vrot.lane.b32.xlu0 %v6854_v42, %s5176_s30  ;;  %vm9238_vm9 = vmmov %vm9231_vm4 }
 0x73b   : > { %2098 = vst [vmem:[#allocation3 + $0x3d8] sm:$0xff] %v2086_v52  ;;  %1511 = vrot.lane.b32.xlu1 %v1506_v38, %s5172_s26 }
 0x73c   : > { %v7559_v26 = vpop.permute.xlu0 %2839 }
 0x73d   : > { %v2144_v41 = vpop.permute.xlu1 %2143 }
 0x73e   : > { %v2157_v10 = vsel %vm558_vm1, %v2144_v41, %v7437_v44  ;;  %4280 = vrot.lane.b32.xlu0 %v7484_v4, %s5178_s12 }
 0x73f   : > { %2169 = vst [vmem:[#allocation3 + $0x618] sm:$0xff] %v2157_v10  ;;  %1529 = vrot.lane.b32.xlu1 %v1525_v58, %s5175_s29  ;;  %v9233_v10 = vld [vmem:[#allocation35_spill] sm:$0xff] }
 0x740   : > { %v7568_v42 = vpop.permute.xlu0 %2911 }
 0x741   : > { %v2148_v43 = vpop.permute.xlu1 %2147 }
 0x742   : > { %v2158_v28 = vsel %vm558_vm1, %v7437_v44, %v2148_v43  ;;  %4356 = vrot.lane.b32.xlu0 %v7466_v15, %s5176_s30  ;;  %v9232_v44 = vld [vmem:[#allocation14_spill] sm:$0xff] }
 0x743   : > { %2170 = vst [vmem:[#allocation3 + $0xb0] sm:$0xff] %v2158_v28  ;;  %1551 = vrot.lane.b32.xlu1 %v1546_v24, %s5174_s28  ;;  %v1445_v15 = vmul.f32 %v9232_v44, %v7557_v49  ;;  %v1465_v24 = vmul.f32 %v9233_v10, %v7557_v49 }
 0x744   : > { %v3839_v29 = vpop.permute.xlu0 %3838 }
 0x745   : > { %v3849_v38 = vsel %vm9231_vm4, %v7299_v37, %v3839_v29  ;;  %v7581_v18 = vpop.permute.xlu1 %2452  ;;  %v1446_v37 = vmul.f32 %v9232_v44, %v7543_v40 }
 0x746   : > { %3861 = vst [vmem:[#allocation3 + $0x1b0] sm:$0xff] %v3849_v38  ;;  %4352 = vrot.lane.b32.xlu0 %v7484_v4, %s5176_s30 }
 0x747   : > { %1569 = vrot.lane.b32.xlu1 %v1565_v12, %s5193_s22 }
 0x748   : > { %v7588_v52 = vpop.permute.xlu0 %3475 }
 0x749   : > { %v7590_v58 = vpop.permute.xlu1 %2524 }
 0x74a   : > { %1449 = vrot.lane.b32.xlu0 %v1445_v15, %s5171_s25 }
 0x74b   : > { %3619 = vrot.lane.b32.xlu1 %v7281_v1, %s5176_s30 }
 0x74c   : > { %v7597_v41 = vpop.permute.xlu0 %3547 }
 0x74d   : > { %v7599_v4 = vpop.permute.xlu1 %2596 }
 0x74e   : > { %1451 = vrot.lane.b32.xlu0 %v1446_v37, %s5171_s25 }
 0x74f   : > { %3617 = vrot.lane.b32.xlu1 %v7340_v5, %s5176_s30  ;;  %v1466_v5 = vmul.f32 %v9233_v10, %v7543_v40  ;;  %v5146_v10 = vld [vmem:[#allocation3 + $0x600] sm:$0xff] }
 0x750   : > { %v3916_v43 = vpop.permute.xlu0 %3915 }
 0x751   : > { %v3926_v28 = vsel %vm9234_vm12, %v7317_v2, %v3916_v43  ;;  %v4245_v1 = vpop.permute.xlu1 %4244  ;;  %v9237_v2 = vld [vmem:[#allocation36_spill] sm:$0xff] }
 0x752   : > { %3938 = vst [vmem:[#allocation3 + $0x628] sm:$0xff] %v3926_v28  ;;  %v4258_v29 = vsel %vm9235_vm6, %v4245_v1, %v7424_v20  ;;  %1469 = vrot.lane.b32.xlu0 %v1465_v24, %s5170_s24  ;;  %v1485_v15 = vmul.f32 %v9237_v2, %v7557_v49  ;;  %v1505_v1 = vmul.f32 %v9226_v19, %v7557_v49  ;;  %vm9239_vm6 = vmmov %vm9231_vm4 }
 0x753   : > { %4270 = vst [vmem:[#allocation3 + $0x300] sm:$0xff] %v4258_v29  ;;  %3615 = vrot.lane.b32.xlu1 %v6897_v21, %s5176_s30 }
 0x754   : > { %v4249_v12 = vpop.permute.xlu0 %4248 }
 0x755   : > { %v4259_v38 = vsel %vm9236_vm14, %v7424_v20, %v4249_v12  ;;  %v7617_v44 = vpop.permute.xlu1 %1965  ;;  %v1486_v20 = vmul.f32 %v9237_v2, %v7543_v40  ;;  %vm9240_vm14 = vmmov %vm9234_vm12 }
 0x756   : > { %4271 = vst [vmem:[#allocation3] sm:$0xff] %v4259_v38  ;;  %1471 = vrot.lane.b32.xlu0 %v1466_v5, %s5170_s24  ;;  %v1526_v38 = vmul.f32 %v9228_v48, %v7543_v40 }
 0x757   : > { %4392 = vrot.lane.b32.xlu1 %v7313_v25, %s9002_s19 }
 0x758   : > { %v7624_v37 = vpop.permute.xlu0 %3877 }
 0x759   : > { %v7626_v21 = vpop.permute.xlu1 %2037 }
 0x75a   : > { %1489 = vrot.lane.b32.xlu0 %v1485_v15, %s5182_s16 }
 0x75b   : > { %4384 = vrot.lane.b32.xlu1 %v5146_v10, %s9002_s19 }
 0x75c   : > { %v3474_v24 = vpop.permute.xlu0 %3473 }
 0x75d   : > { %v3487_v43 = vsel %vm9238_vm9, %v3474_v24, %v7588_v52  ;;  %v7634_v28 = vpop.permute.xlu1 %2109  ;;  %vm9241_vm9 = vcmask 785408  }
 0x75e   : > { %3499 = vst [vmem:[#allocation3 + $0x470] sm:$0xff] %v3487_v43  ;;  %1491 = vrot.lane.b32.xlu0 %v1486_v20, %s5182_s16  ;;  %v1545_v20 = vmul.f32 %v9229_v62, %v7557_v49 }
 0x760   : > { %v7639_v29 = vpop.permute.xlu0 %4210 }
 0x761   : > { %v2766_v5 = vpop.permute.xlu1 %2765 }
 0x762   : > { %v2779_v12 = vsel %vm9231_vm4, %v2766_v5, %v7545_v14  ;;  %1509 = vrot.lane.b32.xlu0 %v1505_v1, %s5172_s26  ;;  %vm9242_vm4 = vmmov %vm9234_vm12 }
 0x763   : > { %2791 = vst [vmem:[#allocation3 + $0x360] sm:$0xff] %v2779_v12 }
 0x764   : > { %v3546_v2 = vpop.permute.xlu0 %3545 }
 0x765   : > { %v3559_v15 = vsel %vm9234_vm12, %v3546_v2, %v7597_v41  ;;  %v2770_v10 = vpop.permute.xlu1 %2769  ;;  %vm9243_vm12 = vmmov %vm9241_vm9 }
 0x766   : > { %3571 = vst [vmem:[#allocation3 + $0x738] sm:$0xff] %v3559_v15  ;;  %v2780_v19 = vsel %vm9239_vm6, %v7545_v14, %v2770_v10  ;;  %1531 = vrot.lane.b32.xlu0 %v1526_v38, %s5175_s29  ;;  %vm9244_vm6 = vcmask 392192  }
 0x767   : > { %2792 = vst [vmem:[#allocation3 + $0xc0] sm:$0xff] %v2780_v19 }
 0x768   : > { %v7653_v24 = vpop.permute.xlu0 %4282 }
 0x769   : > { %v2838_v43 = vpop.permute.xlu1 %2837 }
 0x76a   : > { %v2851_v48 = vsel %vm9240_vm14, %v2838_v43, %v7559_v26  ;;  %1549 = vrot.lane.b32.xlu0 %v1545_v20, %s5174_s28  ;;  %vm9245_vm14 = vcmask 523264  }
 0x76b   : > { %2863 = vst [vmem:[#allocation3 + $0x2e8] sm:$0xff] %v2851_v48  ;;  %v5147_v48 = vld [vmem:[#allocation3 + $0x3d0] sm:$0xff] }
 0x76c   : > { %v2451_v1 = vpop.permute.xlu0 %2450 }
 0x76d   : > { %v2464_v5 = vsel %vm9241_vm9, %v2451_v1, %v7581_v18  ;;  %v2842_v14 = vpop.permute.xlu1 %2841  ;;  %vm9246_vm9 = vmmov %vm9244_vm6 }
 0x76e   : > { %2476 = vst [vmem:[#allocation3 + $0x288] sm:$0xff] %v2464_v5  ;;  %v2852_v12 = vsel %vm9242_vm4, %v7559_v26, %v2842_v14  ;;  %3621 = vrot.lane.b32.xlu0 %v7418_v8, %s5176_s30  ;;  %vm9247_vm4 = vmmov %vm9245_vm14  ;;  %v5148_v14 = vld [vmem:[#allocation3 + $0x700] sm:$0xff] }
 0x76f   : > { %2864 = vst [vmem:[#allocation3 + $0x638] sm:$0xff] %v2852_v12 }
 0x770   : > { %v2455_v62 = vpop.permute.xlu0 %2454 }
 0x771   : > { %v2465_v38 = vsel %vm9243_vm12, %v7581_v18, %v2455_v62  ;;  %v2910_v2 = vpop.permute.xlu1 %2909  ;;  %vm9248_vm12 = vcmask 916480  }
 0x772   : > { %2477 = vst [vmem:[#allocation3 + $0x660] sm:$0xff] %v2465_v38  ;;  %v2923_v15 = vsel %vm9244_vm6, %v2910_v2, %v7568_v42  ;;  %3613 = vrot.lane.b32.xlu0 %v6692_v60, %s5176_s30  ;;  %vm9249_vm6 = vcmask 654336  }
 0x773   : > { %2935 = vst [vmem:[#allocation3 + $0x198] sm:$0xff] %v2923_v15 }
 0x774   : > { %v2523_v10 = vpop.permute.xlu0 %2522 }
 0x775   : > { %v2536_v26 = vsel %vm9245_vm14, %v2523_v10, %v7590_v58  ;;  %v2914_v19 = vpop.permute.xlu1 %2913  ;;  %vm9250_vm14 = vcmask 785408  }
 0x776   : > { %2548 = vst [vmem:[#allocation3 + $0x18] sm:$0xff] %v2536_v26  ;;  %v2924_v8 = vsel %vm9246_vm9, %v7568_v42, %v2914_v19  ;;  %3611 = vrot.lane.b32.xlu0 %v6915_v54, %s5176_s30  ;;  %vm9251_vm9 = vmmov %vm9250_vm14 }
 0x777   : > { %2936 = vst [vmem:[#allocation3 + $0x4d0] sm:$0xff] %v2924_v8  ;;  %v5149_v8 = vld [vmem:[#allocation3 + $0x3b8] sm:$0xff] }
 0x778   : > { %v2527_v18 = vpop.permute.xlu0 %2526 }
 0x779   : > { %v2537_v20 = vsel %vm9247_vm4, %v7590_v58, %v2527_v18  ;;  %v3478_v43 = vpop.permute.xlu1 %3477  ;;  %vm9253_vm4 = vmmov %vm9248_vm12 }
 0x77a   : > { %2549 = vst [vmem:[#allocation3 + $0x270] sm:$0xff] %v2537_v20  ;;  %v3488_v60 = vsel %vm9248_vm12, %v7588_v52, %v3478_v43  ;;  %4390 = vrot.lane.b32.xlu0 %v5147_v48, %s9002_s19  ;;  %v1566_v52 = vmul.f32 %v9230_v7, %v7543_v40  ;;  %v9252_v7 = vld [vmem:[#allocation15_spill] sm:$0xff]  ;;  %vm9254_vm12 = vmmov %vm9253_vm4 }
 0x77b   : > { %3500 = vst [vmem:[#allocation3 + $0x2b8] sm:$0xff] %v3488_v60 }
 0x77c   : > { %v2595_v1 = vpop.permute.xlu0 %2594 }
 0x77d   : > { %v2608_v42 = vsel %vm558_vm1, %v2595_v1, %v7599_v4  ;;  %v3550_v5 = vpop.permute.xlu1 %3549 }
 0x77e   : > { %2620 = vst [vmem:[#allocation3 + $0xa0] sm:$0xff] %v2608_v42  ;;  %v3560_v54 = vsel %vm9249_vm6, %v7597_v41, %v3550_v5  ;;  %4388 = vrot.lane.b32.xlu0 %v5148_v14, %s9002_s19  ;;  %vm9255_vm6 = vmmov %vm9253_vm4 }
 0x77f   : > { %3572 = vst [vmem:[#allocation3 + $0x90] sm:$0xff] %v3560_v54 }
 0x780   : > { %v2599_v58 = vpop.permute.xlu0 %2598 }
 0x781   : > { %v2609_v12 = vsel %vm558_vm1, %v7599_v4, %v2599_v58  ;;  %v7690_v62 = vpop.permute.xlu1 %4354 }
 0x782   : > { %2621 = vst [vmem:[#allocation3 + $0x210] sm:$0xff] %v2609_v12  ;;  %1571 = vrot.lane.b32.xlu0 %v1566_v52, %s5193_s22 }
 0x784   : > { %v3876_v38 = vpop.permute.xlu0 %3875 }
 0x785   : > { %v3889_v41 = vsel %vm9250_vm14, %v3876_v38, %v7624_v37  ;;  %v3880_v2 = vpop.permute.xlu1 %3879  ;;  %vm9256_vm14 = vmmov %vm9253_vm4 }
 0x786   : > { %3901 = vst [vmem:[#allocation3 + $0x78] sm:$0xff] %v3889_v41  ;;  %v3890_v15 = vsel %vm9251_vm9, %v7624_v37, %v3880_v2  ;;  %4386 = vrot.lane.b32.xlu0 %v9252_v7, %s9002_s19  ;;  %vm9257_vm9 = vcmask 654336  }
 0x787   : > { %3902 = vst [vmem:[#allocation3 + $0x1f8] sm:$0xff] %v3890_v15 }
 0x788   : > { %v1964_v10 = vpop.permute.xlu0 %1963 }
 0x789   : > { %v1977_v4 = vsel %vm9253_vm4, %v1964_v10, %v7617_v44  ;;  %v4213_v26 = vpop.permute.xlu1 %4212  ;;  %vm9258_vm4 = vmmov %vm9257_vm9 }
 0x78a   : > { %1989 = vst [vmem:[#allocation3 + $0x188] sm:$0xff] %v1977_v4  ;;  %v4223_v19 = vsel %vm9254_vm12, %v7639_v29, %v4213_v26  ;;  %4382 = vrot.lane.b32.xlu0 %v5149_v8, %s9002_s19  ;;  %vm9259_vm12 = vmmov %vm9258_vm4 }
 0x78b   : > { %4235 = vst [vmem:[#allocation3 + $0x378] sm:$0xff] %v4223_v19 }
 0x78c   : > { %v1968_v18 = vpop.permute.xlu0 %1967 }
 0x78d   : > { %v1978_v37 = vsel %vm9255_vm6, %v7617_v44, %v1968_v18  ;;  %v4209_v20 = vpop.permute.xlu1 %4208  ;;  %vm9260_vm6 = vmmov %vm9258_vm4 }
 0x78e   : > { %1990 = vst [vmem:[#allocation3 + $0x180] sm:$0xff] %v1978_v37  ;;  %v4222_v43 = vsel %vm9256_vm14, %v4209_v20, %v7639_v29  ;;  %vm9261_vm14 = vcmask 392192  }
 0x78f   : > { %4234 = vst [vmem:[#allocation3 + $0x670] sm:$0xff] %v4222_v43 }
 0x790   : > { %v2036_v60 = vpop.permute.xlu0 %2035 }
 0x791   : > { %v2049_v48 = vsel %vm9257_vm9, %v2036_v60, %v7626_v21  ;;  %v4285_v1 = vpop.permute.xlu1 %4284  ;;  %vm9262_vm9 = vmmov %vm9261_vm14 }
 0x792   : > { %2061 = vst [vmem:[#allocation3 + $0x520] sm:$0xff] %v2049_v48  ;;  %v4295_v42 = vsel %vm9258_vm4, %v7653_v24, %v4285_v1  ;;  %vm9263_vm4 = vmmov %vm9262_vm9 }
 0x793   : > { %4307 = vst [vmem:[#allocation3 + $0x248] sm:$0xff] %v4295_v42 }
 0x794   : > { %v2040_v5 = vpop.permute.xlu0 %2039 }
 0x795   : > { %v2050_v44 = vsel %vm9259_vm12, %v7626_v21, %v2040_v5  ;;  %v3906_v54 = vpop.permute.xlu1 %3905  ;;  %vm9264_vm12 = vmmov %vm9263_vm4 }
 0x796   : > { %2062 = vst [vmem:[#allocation3 + $0x38] sm:$0xff] %v2050_v44  ;;  %v3923_v29 = vsel %vm9260_vm6, %v3906_v54, %v6988_v22  ;;  %vm9265_vm6 = vmmov %vm9263_vm4 }
 0x797   : > { %3935 = vst [vmem:[#allocation3 + $0x340] sm:$0xff] %v3923_v29 }
 0x798   : > { %v2108_v14 = vpop.permute.xlu0 %2107 }
 0x799   : > { %v2121_v52 = vsel %vm9261_vm14, %v2108_v14, %v7634_v28  ;;  %v4349_v58 = vpop.permute.xlu1 %4348  ;;  %vm9266_vm14 = vmmov %vm9263_vm4 }
 0x79a   : > { %2133 = vst [vmem:[#allocation3 + $0x5a8] sm:$0xff] %v2121_v52 }
 0x79c   : > { %v2112_v12 = vpop.permute.xlu0 %2111 }
 0x79d   : > { %v2122_v38 = vsel %vm9262_vm9, %v7634_v28, %v2112_v12  ;;  %v4347_v41 = vpop.permute.xlu1 %4346  ;;  %vm9267_vm9 = vmmov %vm9263_vm4 }
 0x79e   : > { %2134 = vst [vmem:[#allocation3 + $0x128] sm:$0xff] %v2122_v38  ;;  %v4364_v21 = vsel %vm9263_vm4, %v4347_v41, %v4349_v58 }
 0x79f   : > { %4376 = vst [vmem:[#allocation3 + $0x3e0] sm:$0xf0] %v4364_v21 }
 0x7a0   : > { %v4351_v2 = vpop.permute.xlu0 %4350 }
 0x7a1   : > { %v4365_v15 = vsel %vm9264_vm12, %v4349_v58, %v4351_v2  ;;  %v3988_v22 = vpop.permute.xlu1 %3987  ;;  %vm9268_vm12 = vcmask 654336  }
 0x7a2   : > { %4377 = vst [vmem:[#allocation3 + $0xe8] sm:$0xf0] %v4365_v15 }
 0x7a4   : > { %v3986_v10 = vpop.permute.xlu0 %3985 }
 0x7a5   : > { %v3998_v4 = vsel %vm9265_vm6, %v3986_v10, %v3988_v22  ;;  %v3980_v26 = vpop.permute.xlu1 %3979  ;;  %vm9269_vm6 = vmmov %vm9263_vm4 }
 0x7a6   : > { %4010 = vst [vmem:[#allocation3 + $0xd0] sm:$0xff] %v3998_v4  ;;  %v9272_v4 = vld [vmem:[#allocation10_spill] sm:$0xff] }
 0x7a8   : > { %v3984_v19 = vpop.permute.xlu0 %3983 }
 0x7a9   : > { %v3997_v8 = vsel %vm9266_vm14, %v3984_v19, %v3986_v10  ;;  %v3978_v18 = vpop.permute.xlu1 %3977  ;;  %vm9270_vm14 = vmmov %vm9263_vm4  ;;  %v9274_v19 = vld [vmem:[#allocation20_spill] sm:$0xff] }
 0x7aa   : > { %4009 = vst [vmem:[#allocation3 + $0x218] sm:$0xff] %v3997_v8  ;;  %v3995_v28 = vsel %vm9267_vm9, %v3978_v18, %v3980_v26  ;;  %vm9271_vm9 = vmmov %vm9263_vm4 }
 0x7ab   : > { %4007 = vst [vmem:[#allocation3 + $0x3b0] sm:$0xff] %v3995_v28 }
 0x7ac   : > { %v3982_v37 = vpop.permute.xlu0 %3981 }
 0x7ad   : > { %v3996_v20 = vsel %vm9263_vm4, %v3980_v26, %v3982_v37  ;;  %v1512_v43 = vpop.permute.xlu1 %1511  ;;  %v9273_v26 = vsub.s32 0, %v9272_v4 }
 0x7ae   : > { %4008 = vst [vmem:[#allocation3 + $0x588] sm:$0xff] %v3996_v20 }
 0x7af   : > { %v1432_v8 = vrot.slane %v9274_v19, %v9273_v26 }
 0x7b0   : > { %v4281_v60 = vpop.permute.xlu0 %4280 }
 0x7b1   : > { %v4294_v48 = vsel %vm9268_vm12, %v4281_v60, %v7653_v24  ;;  %v1530_v1 = vpop.permute.xlu1 %1529  ;;  %v1433_v18 = vmul.f32 %v1432_v8, %v7557_v49  ;;  %v1434_v60 = vmul.f32 %v1432_v8, %v7543_v40  ;;  %vm9275_vm12 = vmmov %vm9263_vm4 }
 0x7b2   : > { %4306 = vst [vmem:[#allocation3 + $0x658] sm:$0xff] %v4294_v48 }
 0x7b4   : > { %v4357_v42 = vpop.permute.xlu0 %4356 }
 0x7b5   : > { %v4367_v5 = vsel %vm9269_vm6, %v7690_v62, %v4357_v42  ;;  %v1552_v44 = vpop.permute.xlu1 %1551  ;;  %vm9276_vm6 = vmmov %vm9263_vm4 }
 0x7b6   : > { %4379 = vst [vmem:[#allocation3 + $0x678] sm:$0xff] %v4367_v5 }
 0x7b8   : > { %v4353_v54 = vpop.permute.xlu0 %4352 }
 0x7b9   : > { %v4366_v29 = vsel %vm9270_vm14, %v4353_v54, %v7690_v62  ;;  %v1570_v14 = vpop.permute.xlu1 %1569  ;;  %vm9281_vm14 = vcmask 23552  }
 0x7ba   : > { %4378 = vst [vmem:[#allocation3 + $0x368] sm:$0xff] %v4366_v29 }
 0x7bc   : > { %v1450_v52 = vpop.permute.xlu0 %1449 }
 0x7bd   : > { %v3620_v58 = vpop.permute.xlu1 %3619  ;;  %v1455_v37 = vadd.f32 %v1450_v52, %v1433_v18 }
 0x7c0   : > { %v1452_v12 = vpop.permute.xlu0 %1451 }
 0x7c1   : > { %v3618_v38 = vpop.permute.xlu1 %3617  ;;  %v1456_v54 = vadd.f32 %v1452_v12, %v1434_v60 }
 0x7c2   : > { %v3631_v24 = vsel %vm9271_vm9, %v3618_v38, %v3620_v58  ;;  %vm9282_vm9 = vmmov %vm9281_vm14 }
 0x7c3   : > { %3643 = vst [vmem:[#allocation3 + $0x330] sm:$0xff] %v3631_v24 }
 0x7c4   : > { %v1470_v41 = vpop.permute.xlu0 %1469 }
 0x7c5   : > { %v1475_v48 = vadd.f32 %v1470_v41, %v1455_v37  ;;  %v3616_v42 = vpop.permute.xlu1 %3615 }
 0x7c8   : > { %v1472_v21 = vpop.permute.xlu0 %1471 }
 0x7c9   : > { %v1476_v24 = vadd.f32 %v1472_v21, %v1456_v54 }
 0x7cc   : > { %v1490_v2 = vpop.permute.xlu0 %1489 }
 0x7cd   : > { %v1495_v29 = vadd.f32 %v1490_v2, %v1475_v48 }
 0x7d0   : > { %v1492_v15 = vpop.permute.xlu0 %1491 }
 0x7d1   : > { %v1496_v19 = vadd.f32 %v1492_v15, %v1476_v24 }
 0x7d4   : > { %v1510_v22 = vpop.permute.xlu0 %1509 }
 0x7d5   : > { %v1515_v4 = vadd.f32 %v1510_v22, %v1495_v29 }
 0x7d7   : > { %v1535_v52 = vadd.f32 %v1530_v1, %v1515_v4 }
 0x7d8   : > { %v1532_v10 = vpop.permute.xlu0 %1531 }
 0x7dc   : > { %v1550_v62 = vpop.permute.xlu0 %1549 }
 0x7dd   : > { %v1555_v40 = vadd.f32 %v1550_v62, %v1535_v52 }
 0x7df   : > { %v1575_v8 = vadd.f32 %v1570_v14, %v1555_v40 }
 0x7e0   : > { %v3622_v28 = vpop.permute.xlu0 %3621 }
 0x7e1   : > { %v3632_v20 = vsel %vm9263_vm4, %v3620_v58, %v3622_v28  ;;  %v4393_v58 = vpop.permute.xlu1 %4392  ;;  %v1516_v28 = vadd.f32 %v1512_v43, %v1496_v19  ;;  %v1578_v15 = vrot.slane %v1575_v8, 4  ;;  %vm9283_vm4 = vmmov %vm9282_vm9 }
 0x7e2   : > { %3644 = vst [vmem:[#allocation3 + $0x6a0] sm:$0xff] %v3632_v20 }
 0x7e3   : > { %v1536_v12 = vadd.f32 %v1532_v10, %v1516_v28 }
 0x7e4   : > { %v3614_v5 = vpop.permute.xlu0 %3613 }
 0x7e5   : > { %v3630_v38 = vsel %vm9275_vm12, %v3614_v5, %v3616_v42  ;;  %v1556_v21 = vadd.f32 %v1552_v44, %v1536_v12  ;;  %v4385_v48 = vpop.permute.xlu1 %4384  ;;  %v1580_v42 = vmax.f32 %v1575_v8, %v1578_v15  ;;  %vm9288_vm12 = vcmask 998400  }
 0x7e6   : > { %3642 = vst [vmem:[#allocation3 + $0x3a0] sm:$0xf0] %v3630_v38 }
 0x7e8   : > { %v3612_v26 = vpop.permute.xlu0 %3611 }
 0x7e9   : > { %v3629_v49 = vsel %vm9276_vm6, %v3612_v26, %v3614_v5  ;;  %vm9289_vm6 = vcmask 1014784  }
 0x7ea   : > { %3641 = vst [vmem:[#allocation3 + $0x6f8] sm:$0xf0] %v3629_v49 }
 0x7ec   : > { %v4391_v18 = vpop.permute.xlu0 %4390 }
 0x7ed   : > { %v4403_v41 = vsel %vm558_vm1, %v4391_v18, %v4393_v58 }
 0x7ee   : > { %4415 = vst [vmem:[#allocation3 + $0x570] sm:$0xff] %v4403_v41 }
 0x7f0   : > { %v4389_v2 = vpop.permute.xlu0 %4388 }
 0x7f1   : > { %v4402_v37 = vsel %vm558_vm1, %v4389_v2, %v4391_v18 }
 0x7f2   : > { %4414 = vst [vmem:[#allocation3 + $0x290] sm:$0xff] %v4402_v37 }
 0x7f4   : > { %v1572_v22 = vpop.permute.xlu0 %1571 }
 0x7f5   : > { %v1576_v20 = vadd.f32 %v1572_v22, %v1556_v21  ;;  %v9277_v22 = vld [vmem:[#allocation6_spill] sm:$0xff] }
 0x7f7   : > { %v1582_v60 = vrot.slane %v1576_v20, 4 }
 0x7f8   : > { %v4387_v1 = vpop.permute.xlu0 %4386 }
 0x7f9   : > { %v1584_v5 = vmax.f32 %v1576_v20, %v1582_v60  ;;  %v4401_v43 = vsel %vm558_vm1, %v4385_v48, %v4387_v1 }
 0x7fa   : > { %4413 = vst [vmem:[#allocation3 + $0x2b0] sm:$0xff] %v4401_v43 }
 0x7fb   : > { %v1585_v62 = vmax.f32 %v1580_v42, %v1584_v5 }
 0x7fc   : > { %v4383_v54 = vpop.permute.xlu0 %4382 }
 0x7fd   : > { %v1586_v10 = vsub.f32 %v1575_v8, %v1585_v62  ;;  %v1590_v29 = vrot.slane %v1585_v62, 4  ;;  %v1595_v14 = vsub.f32 %v1576_v20, %v1585_v62  ;;  %v4400_v38 = vsel %vm558_vm1, %v4383_v54, %v4385_v48 }
 0x7fe   : > { %4412 = vst [vmem:[#allocation3 + $0x640] sm:$0xff] %v4400_v38 }
 0x7ff   : > { %v1587_v44 = vmul.f32 1.442695, %v1586_v10  ;;  %v1592_v24 = vsub.f32 %v1575_v8, %v1590_v29  ;;  %v1598_v4 = vsub.f32 %v1576_v20, %v1590_v29  ;;  %v1596_v26 = vmul.f32 1.442695, %v1595_v14  ;;  %v9278_v20 = vld [vmem:[#allocation7_spill] sm:$0xff]  ;;  %v9279_v14 = vld [vmem:[#allocation8_spill] sm:$0xff] }
 0x801   : > { %5136 = vpow2.f32 %v1587_v44  ;;  %v1593_v19 = vmul.f32 1.442695, %v1592_v24  ;;  %v1599_v49 = vmul.f32 1.442695, %v1598_v4  ;;  %v9280_v44 = vld [vmem:[#allocation9_spill] sm:$0xff] }
 0x803   : > { %5138 = vpow2.f32 %v1593_v19 }
 0x804   : > { %5140 = vpow2.f32 %v1596_v26 }
 0x805   : > { %5142 = vpow2.f32 %v1599_v49 }
 0x80e   : > { %v5137_v52 = vpop.eup %5136 }
 0x80f   : > { %1614 = vperm.xlu1 %5134, %v5137_v52  }
 0x810   : > { %v5139_v58 = vpop.eup %5138 }
 0x811   : > { %v5141_v18 = vpop.eup %5140  ;;  %v1602_v28 = vrot.slane %v5139_v58, 4  ;;  %1620 = vperm.xlu0 %5133, %v5139_v58  }
 0x812   : > { %v5143_v40 = vpop.eup %5142 }
 0x813   : > { %v1604_v41 = vadd.f32 %v5137_v52, %v1602_v28  ;;  %1635 = vperm.xlu1 %5134, %v5141_v18   ;;  %v1607_v2 = vrot.slane %v5143_v40, 4 }
 0x815   : > { %v1605_v12 = vadd.f32 %v5141_v18, %v1604_v41  ;;  %1643 = vperm.xlu0 %5133, %v5143_v40  }
 0x817   : > { %v1609_v8 = vadd.f32 %v1607_v2, %v1605_v12 }
 0x819   : > { %5144 = vrcp.f32 %v1609_v8 }
 0x826   : > { %v5145_v37 = vpop.eup %5144 }
 0x827   : > { %1658 = vperm.xlu1 %5134, %v5145_v37  }
 0x88a   : > { %v1615_v48 = vpop.permute.xlu1 %1614 }
 0x88b   : > { %v1617_v43 = vmul.f32 %v1615_v48, %v9277_v22  ;;  %v1618_v62 = vmul.f32 %v1615_v48, %v9278_v20 }
 0x88c   : > { %v1621_v21 = vpop.permute.xlu0 %1620 }
 0x88d   : > { %v1623_v15 = vmul.f32 %v1621_v21, %v9277_v22  ;;  %v1624_v60 = vmul.f32 %v1621_v21, %v9278_v20 }
 0x88e   : > { %v1636_v54 = vpop.permute.xlu1 %1635 }
 0x88f   : > { %v1627_v1 = vrot.slane %v1623_v15, 4  ;;  %v1628_v42 = vrot.slane %v1624_v60, 4  ;;  %v1638_v4 = vmul.f32 %v1636_v54, %v9279_v14  ;;  %v1639_v26 = vmul.f32 %v1636_v54, %v9280_v44 }
 0x890   : > { %v1644_v5 = vpop.permute.xlu0 %1643 }
 0x891   : > { %v1631_v10 = vadd.f32 %v1627_v1, %v1617_v43  ;;  %v1632_v29 = vadd.f32 %v1628_v42, %v1618_v62  ;;  %v1646_v38 = vmul.f32 %v1644_v5, %v9279_v14  ;;  %v1647_v24 = vmul.f32 %v1644_v5, %v9280_v44  ;;  %v9290_v62 = vld [vmem:[#allocation4_spill] sm:$0xff] }
 0x893   : > { %v1640_v19 = vadd.f32 %v1638_v4, %v1631_v10  ;;  %v1641_v49 = vadd.f32 %v1639_v26, %v1632_v29  ;;  %v1650_v52 = vrot.slane %v1646_v38, 4  ;;  %v1651_v58 = vrot.slane %v1647_v24, 4 }
 0x895   : > { %v1654_v18 = vadd.f32 %v1650_v52, %v1640_v19  ;;  %v1655_v28 = vadd.f32 %v1651_v58, %v1641_v49  ;;  %v9295_v52 = vld [vmem:[#allocation5_spill] sm:$0xff] }
 0x8a2   : > { %v1659_v40 = vpop.permute.xlu1 %1658 }
 0x8a3   : > { %v1661_v41 = vmul.f32 %v1659_v40, %v1654_v18  ;;  %v1662_v12 = vmul.f32 %v1659_v40, %v1655_v28 }
 0x8a5   : > { %1675 = vrot.lane.b32.xlu1 %v1662_v12, %s5169_s21  ;;  %1673 = vrot.lane.b32.xlu0 %v1661_v41, %s5169_s21  ;;  %s9284_s21 = smov 77  }
 0x917   : > { %v1676_v2 = vpop.permute.xlu1 %1675  ;;  %v1674_v8 = vpop.permute.xlu0 %1673 }
 0x918   : > { %v7756_v37 = vsel %vm9281_vm14, %v1674_v8, %v1676_v2  ;;  %v7759_v21 = vsel %vm9282_vm9, 0.0, %v1674_v8  ;;  %v1694_v22 = vsel %vm9283_vm4, %v1676_v2, 0.0  ;;  %vm9291_vm14 = vmmov %vm9288_vm12  ;;  %vm9292_vm9 = vcmp.eq.s32.totalorder %v9290_v62, 1 }
 0x919   : > { %1719 = vrot.lane.b32.xlu0 %v7759_v21, %s5174_s28  ;;  %1721 = vrot.lane.b32.xlu1 %v7756_v37, %s5174_s28  ;;  %vm9293_vm4 = vmmov %vm9289_vm6 }
 0x91d   : > { %1723 = vrot.lane.b32.xlu0 %v1694_v22, %s5174_s28  ;;  %1761 = vrot.lane.b32.xlu1 %v7759_v21, %s5172_s26  ;;  %s9287_s28 = smov 45  }
 0x921   : > { %1763 = vrot.lane.b32.xlu0 %v7756_v37, %s5172_s26  ;;  %1765 = vrot.lane.b32.xlu1 %v1694_v22, %s5172_s26  ;;  %s9286_s26 = smov 13  }
 0x925   : > { %1803 = vrot.lane.b32.xlu0 %v7759_v21, %s5170_s24  ;;  %1805 = vrot.lane.b32.xlu1 %v7756_v37, %s5170_s24 }
 0x929   : > { %1807 = vrot.lane.b32.xlu0 %v1694_v22, %s5170_s24  ;;  %2185 = vrot.lane.b32.xlu1 %v7759_v21, %s5175_s29  ;;  %s9285_s24 = smov 109  }
 0x92d   : > { %2187 = vrot.lane.b32.xlu0 %v7756_v37, %s5175_s29  ;;  %2189 = vrot.lane.b32.xlu1 %v1694_v22, %s5175_s29 }
 0x931   : > { %2215 = vrot.lane.b32.xlu0 %v7759_v21, %s5171_s25  ;;  %2217 = vrot.lane.b32.xlu1 %v7756_v37, %s5171_s25 }
 0x935   : > { %2219 = vrot.lane.b32.xlu0 %v1694_v22, %s5171_s25  ;;  %2251 = vrot.lane.b32.xlu1 %v7759_v21, %s5182_s16 }
 0x939   : > { %2253 = vrot.lane.b32.xlu0 %v7756_v37, %s5182_s16  ;;  %2255 = vrot.lane.b32.xlu1 %v1694_v22, %s5182_s16 }
 0x93d   : > { %2979 = vrot.lane.b32.xlu0 %v7759_v21, %s9284_s21  ;;  %2988 = vrot.lane.b32.xlu1 %v7759_v21, %s9285_s24 }
 0x941   : > { %2997 = vrot.lane.b32.xlu0 %v7759_v21, %s9286_s26  ;;  %3014 = vrot.lane.b32.xlu1 %v7759_v21, %s9287_s28 }
 0x945   : > { %3016 = vrot.lane.b32.xlu0 %v7756_v37, %s9287_s28  ;;  %3018 = vrot.lane.b32.xlu1 %v1694_v22, %s9287_s28 }
 0x949   : > { %3036 = vrot.lane.b32.xlu0 %v7756_v37, %s9284_s21  ;;  %3045 = vrot.lane.b32.xlu1 %v7756_v37, %s9285_s24 }
 0x94d   : > { %3054 = vrot.lane.b32.xlu0 %v7756_v37, %s9286_s26 }
 0x98b   : > { %v1720_v15 = vpop.permute.xlu0 %1719  ;;  %v1722_v20 = vpop.permute.xlu1 %1721 }
 0x98c   : > { %v1729_v5 = vsel %vm9288_vm12, %v1720_v15, %v1722_v20  ;;  %vm9294_vm12 = vcmp.eq.s32.totalorder %v9290_v62, 2 }
 0x98d   : > { %v1741_v54 = vsel %vm1695_vm2, %v1729_v5, %v7759_v21 }
 0x98f   : > { %v1724_v60 = vpop.permute.xlu0 %1723  ;;  %v1762_v48 = vpop.permute.xlu1 %1761 }
 0x990   : > { %v1730_v14 = vsel %vm9291_vm14, %v1722_v20, %v1724_v60  ;;  %vm9300_vm14 = vcmask 1006592  }
 0x991   : > { %v1742_v58 = vsel %vm1696_vm0, %v1730_v14, %v7756_v37 }
 0x993   : > { %v1764_v1 = vpop.permute.xlu0 %1763  ;;  %v1766_v42 = vpop.permute.xlu1 %1765 }
 0x994   : > { %v1771_v43 = vsel %vm9289_vm6, %v1762_v48, %v1764_v1  ;;  %v1772_v4 = vsel %vm9293_vm4, %v1764_v1, %v1766_v42  ;;  %vm9297_vm6 = vcmp.eq.s32.totalorder %v9295_v52, 2  ;;  %vm9301_vm4 = vcmask 392192  }
 0x995   : > { %v4059_v38 = vsel %vm4049_vm13, %v1771_v43, %v1729_v5  ;;  %v1783_v24 = vsel %vm9292_vm9, %v1771_v43, %v1741_v54  ;;  %v4060_v40 = vsel %vm4050_vm10, %v1772_v4, %v1730_v14  ;;  %vm9296_vm13 = vcmp.eq.s32.totalorder %v9295_v52, 1 }
 0x996   : > { %v1784_v12 = vsel %vm9296_vm13, %v1772_v4, %v1742_v58  ;;  %vm9299_vm10 = vcmask 1022976   ;;  %vm9305_vm13 = vcmask 1043456  }
 0x997   : > { %v1804_v10 = vpop.permute.xlu0 %1803  ;;  %v1806_v29 = vpop.permute.xlu1 %1805 }
 0x998   : > { %v1813_v44 = vsel %vm686_vm7, %v1804_v10, %v1806_v29 }
 0x999   : > { %v2628_v26 = vsel %vm1695_vm2, %v1771_v43, %v1813_v44  ;;  %v7825_v19 = vsel %vm9294_vm12, %v1813_v44, %v1783_v24  ;;  %v7829_v49 = vsel %vm3683_vm15, %v1813_v44, %v4059_v38  ;;  %vm9302_vm12 = vcmask 367616  }
 0x99a   : > { %2646 = vrot.lane.b32.xlu1 %v2628_v26, %s5177_s11 }
 0x99b   : > { %v1808_v18 = vpop.permute.xlu0 %1807  ;;  %v2186_v28 = vpop.permute.xlu1 %2185 }
 0x99c   : > { %v1814_v41 = vsel %vm686_vm7, %v1806_v29, %v1808_v18  ;;  %vm9298_vm7 = vcmp.eq.s32.totalorder %v9290_v62, 15 }
 0x99d   : > { %v7842_v2 = vsel %vm9297_vm6, %v1814_v41, %v1784_v12  ;;  %v7846_v8 = vsel %vm3684_vm11, %v1814_v41, %v4060_v40  ;;  %v2629_v20 = vsel %vm1696_vm0, %v1772_v4, %v1814_v41  ;;  %v3336_v5 = vsel %vm9298_vm7, %v1813_v44, %v1771_v43  ;;  %vm9307_vm6 = vmmov %vm9300_vm14 }
 0x99e   : > { %2671 = vrot.lane.b32.xlu1 %v2628_v26, %s5176_s30  ;;  %v3337_v24 = vsel %vm3327_vm3, %v1814_v41, %v1772_v4  ;;  %vm9310_vm7 = vmmov %vm9305_vm13 }
 0x99f   : > { %v2188_v22 = vpop.permute.xlu0 %2187  ;;  %v2190_v15 = vpop.permute.xlu1 %2189 }
 0x9a0   : > { %v2195_v18 = vsel %vm9300_vm14, %v2186_v28, %v2188_v22  ;;  %vm9316_vm14 = vcmask 654336  }
 0x9a2   : > { %2691 = vrot.lane.b32.xlu1 %v2629_v20, %s5178_s12 }
 0x9a3   : > { %v2216_v60 = vpop.permute.xlu0 %2215  ;;  %v2218_v48 = vpop.permute.xlu1 %2217 }
 0x9a4   : > { %v2225_v38 = vsel %vm577_vm5, %v2216_v60, %v2218_v48 }
 0x9a5   : > { %v2237_v35 = vsel %vm1695_vm2, %v2195_v18, %v2225_v38  ;;  %vm9306_vm2 = vmmov %vm9299_vm10 }
 0x9a6   : > { %2709 = vrot.lane.b32.xlu1 %v2629_v20, %s5186_s18 }
 0x9a7   : > { %v2220_v1 = vpop.permute.xlu0 %2219  ;;  %v2252_v42 = vpop.permute.xlu1 %2251 }
 0x9aa   : > { %3345 = vrot.lane.b32.xlu1 %v3336_v5, %s5178_s12 }
 0x9ab   : > { %v2254_v54 = vpop.permute.xlu0 %2253  ;;  %v2256_v10 = vpop.permute.xlu1 %2255 }
 0x9ac   : > { %v2262_v58 = vsel %vm9299_vm10, %v2252_v42, %v2254_v54  ;;  %vm9315_vm10 = vcmask 523264  }
 0x9ad   : > { %v2274_v60 = vsel %vm9292_vm9, %v2262_v58, %v2237_v35  ;;  %v2263_v35 = vsel %vm9306_vm2, %v2254_v54, %v2256_v10  ;;  %vm9323_vm2 = vmmov %vm9310_vm7 }
 0x9ae   : > { %3363 = vrot.lane.b32.xlu1 %v3336_v5, %s5186_s18 }
 0x9af   : > { %v2980_v29 = vpop.permute.xlu0 %2979  ;;  %v2989_v14 = vpop.permute.xlu1 %2988 }
 0x9b0   : > { %v3061_v43 = vsel %vm1911_vm8, %v2980_v29, %v2989_v14  ;;  %v9304_v29 = vrot.slane %v9303_v47, 4 }
 0x9b2   : > { %3381 = vrot.lane.b32.xlu1 %v3337_v24, %s5176_s30 }
 0x9b3   : > { %v2998_v44 = vpop.permute.xlu0 %2997  ;;  %v3015_v40 = vpop.permute.xlu1 %3014 }
 0x9b4   : > { %v3064_v12 = vsel %vm558_vm1, %v3061_v43, %v2998_v44  ;;  %v2226_v43 = vsel %vm577_vm5, %v2218_v48, %v2220_v1  ;;  %vm9311_vm5 = vcmp.eq.s32.totalorder %v9295_v52, 1 }
 0x9b5   : > { %v3067_v4 = vsel %vm9301_vm4, %v3064_v12, %v3015_v40  ;;  %v2196_v12 = vsel %vm9307_vm6, %v2188_v22, %v2190_v15  ;;  %v3693_v22 = vsel %vm3683_vm15, %v2262_v58, %v2195_v18  ;;  %vm9313_vm15 = vmmov %vm9302_vm12 }
 0x9b6   : > { %2292 = vrot.lane.b32.xlu1 %v2274_v60, %s5177_s11  ;;  %v3086_v41 = vrot.slane %v3067_v4, 4  ;;  %v2238_v47 = vsel %vm1696_vm0, %v2196_v12, %v2226_v43  ;;  %vm9312_vm0 = vcmp.eq.s32.totalorder %v9290_v62, 15  ;;  %vm9324_vm6 = vmmov %vm9301_vm4 }
 0x9b7   : > { %v3017_v42 = vpop.permute.xlu0 %3016  ;;  %v2275_v48 = vsel %vm9311_vm5, %v2263_v35, %v2238_v47  ;;  %v3019_v15 = vpop.permute.xlu1 %3018  ;;  %vm9317_vm9 = vmmov %vm9312_vm0 }
 0x9b8   : > { %v3024_v28 = vsel %vm9302_vm12, %v3015_v40, %v3017_v42  ;;  %v7875_v14 = vsel %vm9305_vm13, %v9304_v29, %v3086_v41  ;;  %v3025_v1 = vsel %vm9313_vm15, %v3017_v42, %v3019_v15  ;;  %v4071_v58 = vsel %vm9317_vm9, %v7759_v21, %v7829_v49  ;;  %vm9319_vm12 = vmmov %vm9316_vm14 }
 0x9b9   : > { %3119 = vrot.lane.b32.xlu0 %v3024_v28, %s5177_s11  ;;  %v3088_v44 = vrot.slane %v3024_v28, 4  ;;  %v4072_v21 = vsel %vm3327_vm3, %v7756_v37, %v7846_v8  ;;  %vm9320_vm13 = vmmov %vm9301_vm4 }
 0x9ba   : > { %2317 = vrot.lane.b32.xlu1 %v2274_v60, %s5176_s30  ;;  %vm9326_vm5 = vmmov %vm9301_vm4 }
 0x9bb   : > { %v7885_v40 = vsel %vm9310_vm7, %v9309_v13, %v3088_v44  ;;  %v3694_v13 = vsel %vm3684_vm11, %v2263_v35, %v2196_v12  ;;  %vm9314_vm11 = vmmov %vm9301_vm4 }
 0x9bc   : > { %v3700_v23 = vsel %vm3327_vm3, %v2226_v43, %v3694_v13  ;;  %vm9318_vm3 = vcmask 916480   ;;  %vm9325_vm7 = vmmov %vm9301_vm4 }
 0x9bd   : > { %3196 = vrot.lane.b32.xlu0 %v3024_v28, %s5178_s12  ;;  %vm9329_vm15 = vmmov %vm9323_vm2 }
 0x9be   : > { %2334 = vrot.lane.b32.xlu1 %v2275_v48, %s5178_s12 }
 0x9c1   : > { %3268 = vrot.lane.b32.xlu0 %v3024_v28, %s5176_s30 }
 0x9c2   : > { %2352 = vrot.lane.b32.xlu1 %v2275_v48, %s5186_s18 }
 0x9c5   : > { %2637 = vrot.lane.b32.xlu0 %v2628_v26, %s5178_s12 }
 0x9c6   : > { %3117 = vrot.lane.b32.xlu1 %v3067_v4, %s5177_s11 }
 0x9c9   : > { %2655 = vrot.lane.b32.xlu0 %v2628_v26, %s5186_s18  ;;  %v3699_v26 = vsel %vm9312_vm0, %v2225_v38, %v3693_v22  ;;  %vm9327_vm0 = vmmov %vm9301_vm4 }
 0x9ca   : > { %3194 = vrot.lane.b32.xlu1 %v3067_v4, %s5178_s12  ;;  %vm9332_vm9 = vmmov %vm9327_vm0 }
 0x9cd   : > { %2673 = vrot.lane.b32.xlu0 %v2629_v20, %s5176_s30 }
 0x9ce   : > { %3266 = vrot.lane.b32.xlu1 %v3067_v4, %s5176_s30 }
 0x9d1   : > { %2700 = vrot.lane.b32.xlu0 %v2629_v20, %s5177_s11  ;;  %v3037_v20 = vpop.permute.xlu0 %3036 }
 0x9d2   : > { %3744 = vrot.lane.b32.xlu1 %v3700_v23, %s5176_s30  ;;  %v3070_v54 = vsel %vm9314_vm11, %v3025_v1, %v3037_v20  ;;  %vm9330_vm11 = vmmov %vm9327_vm0 }
 0x9d5   : > { %3354 = vrot.lane.b32.xlu0 %v3336_v5, %s5177_s11  ;;  %v3055_v10 = vpop.permute.xlu0 %3054 }
 0x9d6   : > { %3708 = vrot.lane.b32.xlu1 %v3699_v26, %s5178_s12 }
 0x9d9   : > { %3399 = vrot.lane.b32.xlu0 %v3337_v24, %s5178_s12 }
 0x9da   : > { %3768 = vrot.lane.b32.xlu1 %v3700_v23, %s5177_s11 }
 0x9dd   : > { %3408 = vrot.lane.b32.xlu0 %v3337_v24, %s5177_s11 }
 0x9de   : > { %3742 = vrot.lane.b32.xlu1 %v3699_v26, %s5176_s30 }
 0x9e1   : > { %3379 = vrot.lane.b32.xlu0 %v3336_v5, %s5176_s30  ;;  %v3046_v5 = vpop.permute.xlu1 %3045 }
 0x9e2   : > { %1834 = vrot.lane.b32.xlu1 %v7825_v19, %s5178_s12  ;;  %v3073_v38 = vsel %vm9315_vm10, %v3070_v54, %v3046_v5  ;;  %v9321_v54 = vld [vmem:[#allocation19_spill] sm:$0xff] }
 0x9e3   : > { %v9322_v5 = vrot.slane %v9321_v54, 4 }
 0x9e5   : > { %3417 = vrot.lane.b32.xlu0 %v3337_v24, %s5186_s18  ;;  %v3076_v24 = vsel %vm9316_vm14, %v3073_v38, %v3055_v10  ;;  %vm9331_vm14 = vmmov %vm9319_vm12 }
 0x9e6   : > { %1852 = vrot.lane.b32.xlu1 %v7825_v19, %s5186_s18 }
 0x9e9   : > { %2283 = vrot.lane.b32.xlu0 %v2274_v60, %s5178_s12 }
 0x9ea   : > { %1870 = vrot.lane.b32.xlu1 %v7842_v2, %s5176_s30 }
 0x9ed   : > { %2301 = vrot.lane.b32.xlu0 %v2274_v60, %s5186_s18 }
 0x9ee   : > { %1897 = vrot.lane.b32.xlu1 %v7842_v2, %s5177_s11 }
 0x9f1   : > { %2319 = vrot.lane.b32.xlu0 %v2275_v48, %s5176_s30 }
 0x9f2   : > { %3121 = vrot.lane.b32.xlu1 %v3076_v24, %s5177_s11 }
 0x9f5   : > { %2343 = vrot.lane.b32.xlu0 %v2275_v48, %s5177_s11  ;;  %v3144_v48 = vrot.slane %v3076_v24, 4 }
 0x9f6   : > { %3160 = vrot.lane.b32.xlu1 %v7885_v40, %s5179_s14 }
 0x9f7   : > { %v3145_v10 = vsel %vm9323_vm2, %v9322_v5, %v3144_v48 }
 0x9f9   : > { %3759 = vrot.lane.b32.xlu0 %v3700_v23, %s5178_s12 }
 0x9fa   : > { %3198 = vrot.lane.b32.xlu1 %v3076_v24, %s5178_s12 }
 0x9fd   : > { %3717 = vrot.lane.b32.xlu0 %v3699_v26, %s5177_s11 }
 0x9fe   : > { %3232 = vrot.lane.b32.xlu1 %v7885_v40, %s5180_s15 }
 0xa01   : > { %3726 = vrot.lane.b32.xlu0 %v3699_v26, %s5186_s18 }
 0xa02   : > { %3270 = vrot.lane.b32.xlu1 %v3076_v24, %s5176_s30 }
 0xa05   : > { %3777 = vrot.lane.b32.xlu0 %v3700_v23, %s5186_s18 }
 0xa06   : > { %3304 = vrot.lane.b32.xlu1 %v7885_v40, %s9002_s19 }
 0xa09   : > { %1843 = vrot.lane.b32.xlu0 %v7825_v19, %s5177_s11 }
 0xa0a   : > { %4114 = vrot.lane.b32.xlu1 %v4071_v58, %s5176_s30 }
 0xa0c   : > { %v2647_v18 = vpop.permute.xlu1 %2646 }
 0xa0d   : > { %1868 = vrot.lane.b32.xlu0 %v7825_v19, %s5176_s30 }
 0xa10   : > { %v2672_v60 = vpop.permute.xlu1 %2671 }
 0xa11   : > { %1888 = vrot.lane.b32.xlu0 %v7842_v2, %s5178_s12 }
 0xa14   : > { %v7959_v4 = vpop.permute.xlu1 %2691 }
 0xa15   : > { %1906 = vrot.lane.b32.xlu0 %v7842_v2, %s5186_s18 }
 0xa18   : > { %v7963_v41 = vpop.permute.xlu1 %2709 }
 0xa19   : > { %4116 = vrot.lane.b32.xlu0 %v4072_v21, %s5176_s30 }
 0xa1c   : > { %v3346_v62 = vpop.permute.xlu1 %3345 }
 0xa1d   : > { %4134 = vrot.lane.b32.xlu0 %v4072_v21, %s5178_s12 }
 0xa20   : > { %v3364_v19 = vpop.permute.xlu1 %3363 }
 0xa21   : > { %4080 = vrot.lane.b32.xlu0 %v4071_v58, %s5178_s12 }
 0xa24   : > { %v7972_v49 = vpop.permute.xlu1 %3381 }
 0xa25   : > { %4089 = vrot.lane.b32.xlu0 %v4071_v58, %s5177_s11 }
 0xa28   : > { %v7975_v2 = vpop.permute.xlu1 %2292 }
 0xa29   : > { %4143 = vrot.lane.b32.xlu0 %v4072_v21, %s5177_s11 }
 0xa2b   : > { %v7978_v42 = vpop.permute.xlu0 %3119 }
 0xa2c   : > { %v7980_v52 = vpop.permute.xlu1 %2317 }
 0xa2d   : > { %4098 = vrot.lane.b32.xlu0 %v4071_v58, %s5186_s18 }
 0xa2f   : > { %v7983_v37 = vpop.permute.xlu0 %3196 }
 0xa30   : > { %v7985_v8 = vpop.permute.xlu1 %2334 }
 0xa31   : > { %4152 = vrot.lane.b32.xlu0 %v4072_v21, %s5186_s18 }
 0xa33   : > { %v7988_v28 = vpop.permute.xlu0 %3268 }
 0xa34   : > { %v7990_v29 = vpop.permute.xlu1 %2352 }
 0xa35   : > { %3158 = vrot.lane.b32.xlu0 %v7875_v14, %s5179_s14 }
 0xa37   : > { %v2638_v43 = vpop.permute.xlu0 %2637 }
 0xa38   : > { %v3118_v44 = vpop.permute.xlu1 %3117  ;;  %v2716_v12 = vsel %vm1911_vm8, %v2638_v43, %v2647_v18 }
 0xa39   : > { %v3127_v35 = vsel %vm9318_vm3, %v3118_v44, %v7978_v42  ;;  %3230 = vrot.lane.b32.xlu0 %v7875_v14, %s5180_s15  ;;  %vm9333_vm3 = vmmov %vm9327_vm0 }
 0xa3a   : > { %3139 = vst [vmem:[#allocation3 + $0x608] sm:$0xf] %v3127_v35 }
 0xa3b   : > { %v2656_v47 = vpop.permute.xlu0 %2655 }
 0xa3c   : > { %v2719_v13 = vsel %vm558_vm1, %v2716_v12, %v2656_v47  ;;  %v3195_v23 = vpop.permute.xlu1 %3194 }
 0xa3d   : > { %v8001_v22 = vsel %vm9301_vm4, %v2719_v13, %v2672_v60  ;;  %v3204_v26 = vsel %vm9319_vm12, %v3195_v23, %v7983_v37  ;;  %3302 = vrot.lane.b32.xlu0 %v7875_v14, %s9002_s19  ;;  %vm9335_vm4 = vmmov %vm9323_vm2  ;;  %vm9336_vm12 = vcmask 916480  }
 0xa3e   : > { %2736 = vst [vmem:[#allocation3 + $0x760] sm:$0xf] %v8001_v22  ;;  %3216 = vst [vmem:[#allocation3 + $0x5c0] sm:$0xf] %v3204_v26 }
 0xa3f   : > { %v8008_v15 = vpop.permute.xlu0 %2673 }
 0xa40   : > { %v8012_v20 = vsel %vm9320_vm13, %v2672_v60, %v8008_v15  ;;  %v3267_v1 = vpop.permute.xlu1 %3266  ;;  %vm9339_vm13 = vmmov %vm9323_vm2 }
 0xa41   : > { %2737 = vst [vmem:[#allocation3 + $0x798] sm:$0xf] %v8012_v20  ;;  %v3276_v38 = vsel %vm9324_vm6, %v3267_v1, %v7988_v28  ;;  %3162 = vrot.lane.b32.xlu0 %v3145_v10, %s5179_s14  ;;  %vm9340_vm2 = vmmov %vm9331_vm14 }
 0xa42   : > { %3288 = vst [vmem:[#allocation3 + $0x6f8] sm:$0xf] %v3276_v38  ;;  %vm9341_vm6 = vmmov %vm9327_vm0 }
 0xa43   : > { %v8021_v24 = vpop.permute.xlu0 %2700 }
 0xa44   : > { %v8023_v58 = vpop.permute.xlu1 %3744 }
 0xa45   : > { %3234 = vrot.lane.b32.xlu0 %v3145_v10, %s5180_s15 }
 0xa47   : > { %v3355_v18 = vpop.permute.xlu0 %3354 }
 0xa48   : > { %v3709_v60 = vpop.permute.xlu1 %3708  ;;  %v3424_v35 = vsel %vm1911_vm8, %v3346_v62, %v3355_v18  ;;  %v9328_v62 = vrot.slane %v9222_v17, 4 }
 0xa49   : > { %3306 = vrot.lane.b32.xlu0 %v3145_v10, %s9002_s19  ;;  %v3427_v13 = vsel %vm558_vm1, %v3424_v35, %v3364_v19 }
 0xa4b   : > { %v3400_v21 = vpop.permute.xlu0 %3399 }
 0xa4c   : > { %v8027_v43 = vpop.permute.xlu1 %3768  ;;  %v3433_v17 = vsel %vm9330_vm11, %v7972_v49, %v3400_v21  ;;  %vm9346_vm11 = vmmov %vm9327_vm0 }
 0xa4d   : > { %2809 = vrot.lane.b32.xlu0 %v8012_v20, %s5179_s14 }
 0xa4f   : > { %v3409_v44 = vpop.permute.xlu0 %3408 }
 0xa50   : > { %v3743_v12 = vpop.permute.xlu1 %3742  ;;  %v3436_v38 = vsel %vm9315_vm10, %v3433_v17, %v3409_v44  ;;  %vm9347_vm10 = vmmov %vm9327_vm0 }
 0xa51   : > { %2881 = vrot.lane.b32.xlu0 %v8012_v20, %s5180_s15  ;;  %v3748_v47 = vsel %vm9325_vm7, %v3743_v12, %v8023_v58  ;;  %vm9342_vm7 = vmmov %vm9327_vm0 }
 0xa52   : > { %v3811_v48 = vrot.slane %v3748_v47, 4 }
 0xa53   : > { %v3380_v23 = vpop.permute.xlu0 %3379 }
 0xa54   : > { %v8039_v26 = vsel %vm9326_vm5, %v3380_v23, %v7972_v49  ;;  %v8042_v1 = vsel %vm9327_vm0, %v3427_v13, %v3380_v23  ;;  %v1835_v54 = vpop.permute.xlu1 %1834  ;;  %v8047_v5 = vsel %vm9329_vm15, %v9328_v62, %v3811_v48  ;;  %vm9344_vm5 = vmmov %vm9335_vm4 }
 0xa55   : > { %3444 = vst [vmem:[#allocation3 + $0x648] sm:$0xf] %v8042_v1  ;;  %3445 = vst [vmem:[#allocation3 + $0x118] sm:$0xf] %v8039_v26  ;;  %2953 = vrot.lane.b32.xlu0 %v8012_v20, %s9002_s19  ;;  %3517 = vrot.lane.b32.xlu1 %v8039_v26, %s5179_s14 }
 0xa56   : > { %4690 = vmatprep.subr.mxu1 %v8047_v5  ;;  %vm9345_vm15 = vmmov %vm9327_vm0 }
 0xa57   : > { %v3418_v19 = vpop.permute.xlu0 %3417 }
 0xa58   : > { %v1853_v10 = vpop.permute.xlu1 %1852  ;;  %v8061_v35 = vsel %vm9331_vm14, %v3436_v38, %v3418_v19  ;;  %vm9348_vm14 = vcmask 523264  }
 0xa59   : > { %3842 = vrot.lane.b32.xlu0 %v3748_v47, %s5177_s11 }
 0xa5b   : > { %v2284_v18 = vpop.permute.xlu0 %2283 }
 0xa5c   : > { %v8063_v48 = vpop.permute.xlu1 %1870  ;;  %v2359_v13 = vsel %vm1911_vm8, %v2284_v18, %v7975_v2  ;;  %v9334_v2 = vrot.slane %v6687_v9, 4 }
 0xa5d   : > { %3519 = vrot.lane.b32.xlu0 %v8061_v35, %s5179_s14 }
 0xa5f   : > { %v2302_v23 = vpop.permute.xlu0 %2301 }
 0xa60   : > { %v2362_v62 = vsel %vm558_vm1, %v2359_v13, %v2302_v23  ;;  %v8070_v59 = vpop.permute.xlu1 %1897  ;;  %v9337_v23 = vld [vmem:[#allocation25_spill] sm:$0xff] }
 0xa61   : > { %v8074_v49 = vsel %vm9332_vm9, %v2362_v62, %v7980_v52  ;;  %v9338_v62 = vrot.slane %v9337_v23, 4  ;;  %vm9349_vm9 = vmmov %vm9327_vm0 }
 0xa62   : > { %v2384_v21 = vrot.slane %v8074_v49, 4 }
 0xa63   : > { %v8077_v44 = vpop.permute.xlu0 %2319 }
 0xa64   : > { %v3122_v19 = vpop.permute.xlu1 %3121  ;;  %v2323_v17 = vsel %vm9333_vm3, %v7980_v52, %v8077_v44  ;;  %v8085_v38 = vsel %vm9335_vm4, %v9334_v2, %v2384_v21  ;;  %vm9350_vm3 = vmmov %vm9340_vm2 }
 0xa65   : > { %v3128_v18 = vsel %vm9336_vm12, %v7978_v42, %v3122_v19  ;;  %2417 = vrot.lane.b32.xlu1 %v2323_v17, %s5177_s11  ;;  %v2386_v13 = vrot.slane %v2323_v17, 4  ;;  %vm9351_vm4 = vmmov %vm9348_vm14 }
 0xa66   : > { %3140 = vst [vmem:[#allocation3 + $0x28] sm:$0xf] %v3128_v18  ;;  %vm9352_vm12 = vmmov %vm9340_vm2 }
 0xa67   : > { %v8093_v0 = vsel %vm9339_vm13, %v9338_v62, %v2386_v13  ;;  %v8095_v45 = vpop.permute.xlu0 %2343  ;;  %vm9353_vm13 = vmmov %vm9327_vm0 }
 0xa68   : > { %v8097_v52 = vpop.permute.xlu1 %3160 }
 0xa69   : > { %2494 = vrot.lane.b32.xlu1 %v2323_v17, %s5178_s12 }
 0xa6b   : > { %v8100_v9 = vpop.permute.xlu0 %3759 }
 0xa6c   : > { %v3199_v21 = vpop.permute.xlu1 %3198 }
 0xa6d   : > { %v3205_v42 = vsel %vm9340_vm2, %v7983_v37, %v3199_v21  ;;  %2566 = vrot.lane.b32.xlu1 %v2323_v17, %s5176_s30  ;;  %vm9355_vm2 = vcmask 785408  }
 0xa6e   : > { %3217 = vst [vmem:[#allocation3 + $0x690] sm:$0xf] %v3205_v42  ;;  %v9343_v42 = vrot.slane %v6783_v36, 4 }
 0xa6f   : > { %v3718_v19 = vpop.permute.xlu0 %3717 }
 0xa70   : > { %v8105_v2 = vpop.permute.xlu1 %3232  ;;  %v3784_v18 = vsel %vm1911_vm8, %v3709_v60, %v3718_v19  ;;  %v4453_v19 = vld [vmem:[#allocation3 + $0x698] sm:$0xff] }
 0xa71   : > { %3919 = vrot.lane.b32.xlu1 %v3748_v47, %s5178_s12 }
 0xa73   : > { %v3727_v13 = vpop.permute.xlu0 %3726 }
 0xa74   : > { %v3787_v23 = vsel %vm558_vm1, %v3784_v18, %v3727_v13  ;;  %v3271_v62 = vpop.permute.xlu1 %3270  ;;  %v4450_v13 = vld [vmem:[#allocation3 + $0x648] sm:$0xff] }
 0xa75   : > { %v8111_v16 = vsel %vm9341_vm6, %v3787_v23, %v3743_v12  ;;  %v3277_v37 = vsel %vm9342_vm7, %v7988_v28, %v3271_v62  ;;  %3991 = vrot.lane.b32.xlu1 %v3748_v47, %s5176_s30  ;;  %v4452_v12 = vld [vmem:[#allocation3 + $0xb8] sm:$0xff]  ;;  %v4449_v23 = vld [vmem:[#allocation3 + $0x1f0] sm:$0xff]  ;;  %v4448_v62 = vld [vmem:[#allocation3 + $0x560] sm:$0xff] }
 0xa76   : > { %v3809_v17 = vrot.slane %v8111_v16, 4  ;;  %3289 = vst [vmem:[#allocation3 + $0x3a0] sm:$0xf] %v3277_v37  ;;  %v4451_v28 = vld [vmem:[#allocation3 + $0x118] sm:$0xff]  ;;  %vm9356_vm6 = vmmov %vm9351_vm4 }
 0xa77   : > { %v8117_v21 = vpop.permute.xlu0 %3777  ;;  %vm9357_vm7 = vmmov %vm9350_vm3 }
 0xa78   : > { %v8122_v60 = vsel %vm9344_vm5, %v9343_v42, %v3809_v17  ;;  %v4447_v17 = vld [vmem:[#allocation3 + $0x550] sm:$0xff]  ;;  %vm9358_vm5 = vmmov %vm9351_vm4 }
 0xa79   : > { %4691 = vmatpush1.msra.mxu1 %v8122_v60 }
 0xa7a   : > { %4692 = vmatprep.subr.mxu1 %v4453_v19 }
 0xa7b   : > { %v1844_v18 = vpop.permute.xlu0 %1843  ;;  %4693 = vmatpush1.msra.mxu1 %v4452_v12  ;;  %v4443_v12 = vld [vmem:[#allocation3 + $0x450] sm:$0xff] }
 0xa7c   : > { %v1914_v47 = vsel %vm1911_vm8, %v1835_v54, %v1844_v18  ;;  %4694 = vmatprep.subr.mxu1 %v4451_v28  ;;  %v4446_v54 = vld [vmem:[#allocation3 + $0x268] sm:$0xff]  ;;  %v4442_v18 = vld [vmem:[#allocation3 + $0x538] sm:$0xff]  ;;  %v8142_v28 = vpop.permute.xlu1 %3304 }
 0xa7d   : > { %4695 = vmatpush1.msra.mxu1 %v4450_v13  ;;  %v1917_v36 = vsel %vm558_vm1, %v1914_v47, %v1853_v10  ;;  %v4441_v47 = vld [vmem:[#allocation3 + $0x798] sm:$0xff]  ;;  %v4440_v13 = vld [vmem:[#allocation3 + $0x760] sm:$0xff] }
 0xa7e   : > { %4696 = vmatprep.subr.mxu1 %v4449_v23 }
 0xa7f   : > { %v1869_v37 = vpop.permute.xlu0 %1868  ;;  %4697 = vmatpush1.msra.mxu1 %v4448_v62  ;;  %v4438_v62 = vld [vmem:[#allocation3 + $0x5d0] sm:$0xff] }
 0xa80   : > { %v8129_v42 = vsel %vm9327_vm0, %v1869_v37, %v8063_v48  ;;  %v8132_v19 = vsel %vm9345_vm15, %v1917_v36, %v1869_v37  ;;  %4698 = vmatprep.subr.mxu1 %v4447_v17  ;;  %v4436_v36 = vld [vmem:[#allocation3 + $0x6d0] sm:$0xff]  ;;  %v4115_v37 = vpop.permute.xlu1 %4114  ;;  %vm9360_vm15 = vmmov %vm9355_vm2 }
 0xa81   : > { %1934 = vst [vmem:[#allocation3 + $0x498] sm:$0xf] %v8132_v19  ;;  %1935 = vst [vmem:[#allocation3 + $0x5e0] sm:$0xf] %v8129_v42  ;;  %2007 = vrot.lane.b32.xlu1 %v8129_v42, %s5179_s14  ;;  %4699 = vmatpush1.msra.mxu1 %v4446_v54  ;;  %v2725_v54 = vsel %vm9346_vm11, %v8008_v15, %v7959_v4  ;;  %v4433_v4 = vld [vmem:[#allocation3 + $0x1c0] sm:$0xff] }
 0xa82   : > { %4700 = vmatprep.subr.mxu1 %v7885_v40  ;;  %v4439_v40 = vld [vmem:[#allocation3 + $0x598] sm:$0xff]  ;;  %vm9361_vm11 = vmmov %vm9351_vm4 }
 0xa83   : > { %v8139_v10 = vpop.permute.xlu0 %1888  ;;  %4701 = vmatpush1.msra.mxu1 %v7875_v14  ;;  %v4437_v14 = vld [vmem:[#allocation3 + $0x338] sm:$0xff] }
 0xa84   : > { %4702 = vmatprep.subr.mxu1 %v4443_v12 }
 0xa85   : > { %2079 = vrot.lane.b32.xlu1 %v8129_v42, %s5180_s15  ;;  %4703 = vmatpush1.msra.mxu1 %v4442_v18  ;;  %v2728_v18 = vsel %vm9348_vm14, %v2725_v54, %v8021_v24 }
 0xa86   : > { %4704 = vmatprep.subr.mxu1 %v4441_v47  ;;  %v4432_v47 = vld [vmem:[#allocation3 + $0x688] sm:$0xff]  ;;  %v8175_v24 = vsel %vm9350_vm3, %v2728_v18, %v7963_v41  ;;  %v4426_v18 = vld [vmem:[#allocation3 + $0x220] sm:$0xff] }
 0xa87   : > { %v8146_v23 = vpop.permute.xlu0 %1906  ;;  %4705 = vmatpush1.msra.mxu1 %v4440_v13  ;;  %v2368_v13 = vsel %vm9349_vm9, %v8077_v44, %v7985_v8  ;;  %v4429_v8 = vld [vmem:[#allocation3 + $0x2f0] sm:$0xff]  ;;  %vm9364_vm9 = vmmov %vm9351_vm4 }
 0xa88   : > { %4706 = vmatprep.subr.mxu1 %v4439_v40  ;;  %v2371_v40 = vsel %vm9351_vm4, %v2368_v13, %v8095_v45  ;;  %v4428_v45 = vld [vmem:[#allocation3 + $0x718] sm:$0xff]  ;;  %v4427_v44 = vld [vmem:[#allocation3 + $0x310] sm:$0xff]  ;;  %v4487_v13 = vld [vmem:[#allocation3 + $0x6e8] sm:$0xff] }
 0xa89   : > { %2151 = vrot.lane.b32.xlu1 %v8129_v42, %s9002_s19  ;;  %4707 = vmatpush1.msra.mxu1 %v4438_v62  ;;  %v4431_v62 = vld [vmem:[#allocation3 + $0x5e0] sm:$0xff]  ;;  %v8185_v41 = vsel %vm9352_vm12, %v2371_v40, %v7990_v29  ;;  %v4489_v29 = vld [vmem:[#allocation3 + $0x1b0] sm:$0xff]  ;;  %vm9366_vm12 = vmmov %vm9358_vm5 }
 0xa8a   : > { %4708 = vmatprep.subr.mxu1 %v4437_v14  ;;  %v4430_v14 = vld [vmem:[#allocation3 + $0x498] sm:$0xff]  ;;  %v4486_v40 = vld [vmem:[#allocation3 + $0x240] sm:$0xff] }
 0xa8b   : > { %v8150_v17 = vpop.permute.xlu0 %4116  ;;  %4709 = vmatpush1.msra.mxu1 %v4436_v36 }
 0xa8c   : > { %v8157_v12 = vsel %vm9347_vm10, %v4115_v37, %v8150_v17  ;;  %4710 = vmatprep.subr.mxu1 %v8093_v0 }
 0xa8d   : > { %4180 = vst [vmem:[#allocation3 + $0x140] sm:$0xf] %v8157_v12  ;;  %2807 = vrot.lane.b32.xlu1 %v8001_v22, %s5179_s14  ;;  %4252 = vrot.lane.b32.xlu0 %v8157_v12, %s5179_s14 }
 0xa8e   : > { %4711 = vmatpush1.msra.mxu1 %v8085_v38 }
 0xa8f   : > { %v8168_v15 = vpop.permute.xlu0 %4134  ;;  %4712 = vmatprep.subr.mxu1 %v4433_v4  ;;  %v4488_v4 = vld [vmem:[#allocation3 + $0x358] sm:$0xff] }
 0xa90   : > { %4713 = vmatpush1.msra.mxu1 %v4432_v47 }
 0xa91   : > { %2811 = vrot.lane.b32.xlu1 %v8175_v24, %s5179_s14  ;;  %2415 = vrot.lane.b32.xlu0 %v8074_v49, %s5177_s11 }
 0xa92   : > { %4714 = vmatprep.subr.mxu1 %v4431_v62 }
 0xa93   : > { %v4081_v36 = vpop.permute.xlu0 %4080  ;;  %4715 = vmatpush1.msra.mxu1 %v4430_v14 }
 0xa94   : > { %4716 = vmatprep.subr.mxu1 %v4429_v8 }
 0xa95   : > { %2879 = vrot.lane.b32.xlu1 %v8001_v22, %s5180_s15  ;;  %2419 = vrot.lane.b32.xlu0 %v8185_v41, %s5177_s11 }
 0xa96   : > { %4717 = vmatpush1.msra.mxu1 %v4428_v45 }
 0xa97   : > { %v4090_v54 = vpop.permute.xlu0 %4089  ;;  %4718 = vmatprep.subr.mxu1 %v4427_v44 }
 0xa98   : > { %4719 = vmatpush1.msra.mxu1 %v4426_v18  ;;  %v4159_v62 = vsel %vm1911_vm8, %v4081_v36, %v4090_v54  ;;  %vm9354_vm8 = vmmov %vm9327_vm0  ;;  %vm9359_vm0 = vcmask 1043456  }
 0xa99   : > { %2883 = vrot.lane.b32.xlu1 %v8175_v24, %s5180_s15  ;;  %2492 = vrot.lane.b32.xlu0 %v8074_v49, %s5178_s12  ;;  %vm9362_vm10 = vmmov %vm9359_vm0 }
 0xa9a   : > { %4720 = vmatprep.subr.mxu1 %v4489_v29  ;;  %vm9363_vm14 = vmmov %vm9354_vm8 }
 0xa9b   : > { %v8195_v47 = vpop.permute.xlu0 %4143  ;;  %4721 = vmatpush2.msra.mxu1 %v4488_v4  ;;  %vm9365_vm4 = vmmov %vm9354_vm8 }
 0xa9c   : > { %4722 = vmatprep.subr.mxu1 %v4487_v13 }
 0xa9d   : > { %2951 = vrot.lane.b32.xlu1 %v8001_v22, %s9002_s19  ;;  %2496 = vrot.lane.b32.xlu0 %v8185_v41, %s5178_s12 }
 0xa9e   : > { %4723 = vmatpush2.msra.mxu1 %v4486_v40  ;;  %v3463_v40 = vrot.slane %v8039_v26, 4 }
 0xa9f   : > { %v4099_v14 = vpop.permute.xlu0 %4098 }
 0xaa0   : > { %v4162_v8 = vsel %vm558_vm1, %v4159_v62, %v4099_v14  ;;  %v3464_v62 = vsel %vm9362_vm10, %v3457_v34, %v3463_v40  ;;  %v1923_v14 = vsel %vm9363_vm14, %v8063_v48, %v8139_v10  ;;  %v4168_v10 = vsel %vm9365_vm4, %v8150_v17, %v8168_v15  ;;  %vm9385_vm4 = vmmov %vm9366_vm12 }
 0xaa1   : > { %v8204_v45 = vsel %vm9353_vm13, %v4162_v8, %v4115_v37  ;;  %2955 = vrot.lane.b32.xlu1 %v8175_v24, %s9002_s19  ;;  %2564 = vrot.lane.b32.xlu0 %v8074_v49, %s5176_s30  ;;  %v3793_v37 = vsel %vm9354_vm8, %v8023_v58, %v8100_v9  ;;  %v2755_v9 = vrot.slane %v8012_v20, 4  ;;  %v1926_v51 = vsel %vm9364_vm9, %v1923_v14, %v8070_v59  ;;  %vm9367_vm13 = vmmov %vm9350_vm3 }
 0xaa2   : > { %4179 = vst [vmem:[#allocation3 + $0x778] sm:$0xf] %v8204_v45  ;;  %v3796_v49 = vsel %vm9356_vm6, %v3793_v37, %v8027_v43  ;;  %vm9368_vm8 = vmmov %vm9355_vm2  ;;  %v2753_v14 = vrot.slane %v8001_v22, 4  ;;  %v9379_v22 = vrot.slane %v7147_v53, 4  ;;  %vm9382_vm14 = vcmask 916480  }
 0xaa3   : > { %v4153_v44 = vpop.permute.xlu0 %4152  ;;  %v8230_v29 = vsel %vm9357_vm7, %v3796_v49, %v8117_v21  ;;  %v2756_v21 = vsel %vm9359_vm0, %v2749_v32, %v2755_v9  ;;  %vm9371_vm6 = vmmov %vm9359_vm0 }
 0xaa4   : > { %vm9373_vm7 = vmmov %vm9359_vm0 }
 0xaa5   : > { %3515 = vrot.lane.b32.xlu1 %v8042_v1, %s5179_s14  ;;  %2568 = vrot.lane.b32.xlu0 %v8185_v41, %s5176_s30  ;;  %vm9381_vm10 = vmmov %vm9368_vm8 }
 0xaa6   : > { %vm9383_vm9 = vmmov %vm9368_vm8 }
 0xaa7   : > { %v3159_v36 = vpop.permute.xlu0 %3158 }
 0xaa8   : > { %v8220_v54 = vsel %vm9355_vm2, %v3159_v36, %v8097_v52  ;;  %vm9369_vm2 = vmmov %vm9359_vm0 }
 0xaa9   : > { %4396 = vrot.lane.b32.xlu1 %v8157_v12, %s9002_s19  ;;  %3840 = vrot.lane.b32.xlu0 %v8111_v16, %s5177_s11 }
 0xaab   : > { %v3231_v18 = vpop.permute.xlu0 %3230 }
 0xaac   : > { %v8234_v58 = vsel %vm9358_vm5, %v3231_v18, %v8105_v2  ;;  %v4198_v18 = vrot.slane %v8157_v12, 4  ;;  %vm9375_vm5 = vmmov %vm9359_vm0 }
 0xaad   : > { %4324 = vrot.lane.b32.xlu1 %v8157_v12, %s5180_s15  ;;  %3921 = vrot.lane.b32.xlu0 %v8230_v29, %s5178_s12  ;;  %v9372_v12 = vrot.slane %v6822_v55, 4 }
 0xaaf   : > { %v3303_v4 = vpop.permute.xlu0 %3302 }
 0xab0   : > { %v3312_v43 = vsel %vm558_vm1, %v3303_v4, %v8142_v28  ;;  %v9370_v4 = vrot.slane %v6909_v30, 4  ;;  %v1953_v30 = vrot.slane %v8129_v42, 4 }
 0xab1   : > { %3324 = vst [vmem:[#allocation3 + $0x730] sm:$0xff] %v3312_v43  ;;  %2773 = vrot.lane.b32.xlu1 %v2756_v21, %s5177_s11  ;;  %3993 = vrot.lane.b32.xlu0 %v8230_v29, %s5176_s30 }
 0xab2   : > { %v8343_v43 = vsel %vm9371_vm6, %v9370_v4, %v4198_v18  ;;  %vm9392_vm6 = vmmov %vm9359_vm0 }
 0xab3   : > { %v3163_v20 = vpop.permute.xlu0 %3162 }
 0xab4   : > { %v8251_v13 = vsel %vm9360_vm15, %v8097_v52, %v3163_v20  ;;  %v9374_v20 = vrot.slane %v7196_v50, 4  ;;  %vm9378_vm15 = vmmov %vm9359_vm0 }
 0xab5   : > { %2845 = vrot.lane.b32.xlu1 %v2756_v21, %s5178_s12  ;;  %3989 = vrot.lane.b32.xlu0 %v8111_v16, %s5176_s30 }
 0xab7   : > { %v3235_v11 = vpop.permute.xlu0 %3234 }
 0xab8   : > { %v8259_v32 = vsel %vm9361_vm11, %v8105_v2, %v3235_v11  ;;  %v8280_v2 = vsel %vm9350_vm3, %v1926_v51, %v8146_v23  ;;  %v2442_v11 = vrot.slane %v8185_v41, 4  ;;  %v2757_v41 = vrot.slane %v8175_v24, 4  ;;  %vm9380_vm11 = vmmov %vm9359_vm0 }
 0xab9   : > { %2917 = vrot.lane.b32.xlu1 %v2756_v21, %s5176_s30  ;;  %3625 = vrot.lane.b32.xlu0 %v3464_v62, %s5176_s30  ;;  %v1954_v21 = vsel %vm9373_vm7, %v9372_v12, %v1953_v30  ;;  %v9377_v51 = vrot.slane %v6588_v56, 4  ;;  %vm9384_vm3 = vmmov %vm9382_vm14  ;;  %v1951_v30 = vrot.slane %v8132_v19, 4  ;;  %vm9393_vm7 = vcmask 392192  }
 0xabb   : > { %v3307_v52 = vpop.permute.xlu0 %3306 }
 0xabc   : > { %v3313_v8 = vsel %vm558_vm1, %v8142_v28, %v3307_v52  ;;  %v4171_v28 = vsel %vm9366_vm12, %v4168_v10, %v8195_v47  ;;  %v2754_v10 = vsel %vm9378_vm15, %v9377_v51, %v2753_v14  ;;  %vm9386_vm12 = vmmov %vm9367_vm13 }
 0xabd   : > { %3325 = vst [vmem:[#allocation3 + $0x58] sm:$0xff] %v3313_v8  ;;  %3481 = vrot.lane.b32.xlu1 %v3464_v62, %s5177_s11  ;;  %2005 = vrot.lane.b32.xlu0 %v8132_v19, %s5179_s14  ;;  %vm9396_vm15 = vmmov %vm9384_vm3 }
 0xabf   : > { %v8276_v34 = vpop.permute.xlu0 %2809 }
 0xac1   : > { %3844 = vrot.lane.b32.xlu1 %v8230_v29, %s5177_s11  ;;  %2009 = vrot.lane.b32.xlu0 %v8280_v2, %s5179_s14 }
 0xac3   : > { %v8286_v48 = vpop.permute.xlu0 %2881 }
 0xac5   : > { %3917 = vrot.lane.b32.xlu1 %v8111_v16, %s5178_s12  ;;  %2077 = vrot.lane.b32.xlu0 %v8132_v19, %s5180_s15  ;;  %v8305_v16 = vsel %vm9367_vm13, %v4171_v28, %v4153_v44  ;;  %v3461_v44 = vrot.slane %v8042_v1, 4  ;;  %v2758_v28 = vsel %vm9380_vm11, %v9379_v22, %v2757_v41  ;;  %vm9387_vm13 = vmmov %vm9385_vm4 }
 0xac7   : > { %v8292_v59 = vpop.permute.xlu0 %2953  ;;  %v8311_v36 = vpop.permute.xlu1 %3517  ;;  %v8331_v49 = vsel %vm9369_vm2, %v3455_v6, %v3461_v44  ;;  %v3465_v6 = vrot.slane %v8061_v35, 4  ;;  %vm9390_vm2 = vmmov %vm9386_vm12 }
 0xac8   : > { %vm9397_vm11 = vmmov %vm9390_vm2 }
 0xac9   : > { %3553 = vrot.lane.b32.xlu1 %v3464_v62, %s5178_s12  ;;  %2081 = vrot.lane.b32.xlu0 %v8280_v2, %s5180_s15  ;;  %v8369_v40 = vsel %vm9375_vm5, %v9374_v20, %v3465_v6  ;;  %v9376_v62 = vrot.slane %v7126_v46, 4  ;;  %vm9394_vm5 = vmmov %vm9393_vm7 }
 0xacb   : > { %v8302_v23 = vpop.permute.xlu0 %3842  ;;  %v2443_v52 = vsel %vm9359_vm0, %v9376_v62, %v2442_v11  ;;  %v9388_v11 = vrot.slane %v6825_v61, 4 }
 0xacd   : > { %4254 = vrot.lane.b32.xlu1 %v8305_v16, %s5179_s14  ;;  %2149 = vrot.lane.b32.xlu0 %v8132_v19, %s9002_s19 }
 0xacf   : > { %v3520_v37 = vpop.permute.xlu0 %3519 }
 0xad0   : > { %v3526_v17 = vsel %vm9368_vm8, %v8311_v36, %v3520_v37  ;;  %vm9389_vm8 = vmmov %vm9359_vm0 }
 0xad1   : > { %3538 = vst [vmem:[#allocation3 + $0x5e8] sm:$0xf] %v3526_v17  ;;  %3883 = vrot.lane.b32.xlu1 %v8047_v5, %s5179_s14  ;;  %2153 = vrot.lane.b32.xlu0 %v8280_v2, %s9002_s19  ;;  %v1952_v19 = vsel %vm9389_vm8, %v9388_v11, %v1951_v30  ;;  %vm9395_vm0 = vmmov %vm9383_vm9  ;;  %v4513_v11 = vld [vmem:[#allocation3 + $0x3e8] sm:$0xff] }
 0xad2   : > { %vm9408_vm8 = vmmov %vm9396_vm15 }
 0xad5   : > { %4394 = vrot.lane.b32.xlu1 %v8204_v45, %s9002_s19  ;;  %2458 = vrot.lane.b32.xlu0 %v8093_v0, %s5179_s14 }
 0xad7   : > { %v2418_v15 = vpop.permute.xlu1 %2417 }
 0xad8   : > { %v4521_v47 = vld [vmem:[#allocation3 + $0x5e8] sm:$0xff] }
 0xad9   : > { %4322 = vrot.lane.b32.xlu1 %v8204_v45, %s5180_s15  ;;  %2530 = vrot.lane.b32.xlu0 %v8093_v0, %s5180_s15 }
 0xada   : > { %4759 = vmatprep.subr.mxu0 %v4521_v47 }
 0xadb   : > { %v8334_v9 = vpop.permute.xlu1 %2494 }
 0xadd   : > { %3479 = vrot.lane.b32.xlu1 %v8331_v49, %s5177_s11  ;;  %2602 = vrot.lane.b32.xlu0 %v8093_v0, %s9002_s19 }
 0xadf   : > { %v8349_v27 = vpop.permute.xlu1 %2566 }
 0xae1   : > { %4250 = vrot.lane.b32.xlu0 %v8204_v45, %s5179_s14  ;;  %4288 = vrot.lane.b32.xlu1 %v8343_v43, %s5178_s12 }
 0xae3   : > { %v8357_v0 = vpop.permute.xlu1 %3919 }
 0xae5   : > { %4398 = vrot.lane.b32.xlu0 %v8305_v16, %s9002_s19  ;;  %4360 = vrot.lane.b32.xlu1 %v8343_v43, %s5176_s30 }
 0xae7   : > { %v8374_v42 = vpop.permute.xlu1 %3991 }
 0xae9   : > { %4326 = vrot.lane.b32.xlu0 %v8305_v16, %s5180_s15  ;;  %3551 = vrot.lane.b32.xlu1 %v8331_v49, %s5178_s12 }
 0xaed   : > { %1971 = vrot.lane.b32.xlu0 %v1954_v21, %s5177_s11  ;;  %3627 = vrot.lane.b32.xlu1 %v8369_v40, %s5176_s30 }
 0xaf1   : > { %2043 = vrot.lane.b32.xlu0 %v1954_v21, %s5178_s12  ;;  %2456 = vrot.lane.b32.xlu1 %v8085_v38, %s5179_s14 }
 0xaf3   : > { %v8380_v55 = vpop.permute.xlu1 %2007 }
 0xaf5   : > { %2115 = vrot.lane.b32.xlu0 %v1954_v21, %s5176_s30  ;;  %2460 = vrot.lane.b32.xlu1 %v2443_v52, %s5179_s14  ;;  %v1955_v21 = vrot.slane %v8280_v2, 4 }
 0xaf7   : > { %v8388_v8 = vpop.permute.xlu1 %2079 }
 0xaf9   : > { %2771 = vrot.lane.b32.xlu0 %v2754_v10, %s5177_s11  ;;  %2528 = vrot.lane.b32.xlu1 %v8085_v38, %s5180_s15 }
 0xafb   : > { %v8397_v46 = vpop.permute.xlu1 %2151 }
 0xafd   : > { %2775 = vrot.lane.b32.xlu0 %v2758_v28, %s5177_s11  ;;  %2532 = vrot.lane.b32.xlu1 %v2443_v52, %s5180_s15 }
 0xaff   : > { %v8404_v24 = vpop.permute.xlu0 %4252  ;;  %v2808_v56 = vpop.permute.xlu1 %2807 }
 0xb00   : > { %v2817_v37 = vsel %vm9381_vm10, %v2808_v56, %v8276_v34  ;;  %vm9399_vm10 = vmmov %vm9392_vm6 }
 0xb01   : > { %2829 = vst [vmem:[#allocation3 + $0x250] sm:$0xf] %v2817_v37  ;;  %2843 = vrot.lane.b32.xlu0 %v2754_v10, %s5178_s12  ;;  %2600 = vrot.lane.b32.xlu1 %v8085_v38, %s9002_s19 }
 0xb03   : > { %v2416_v17 = vpop.permute.xlu0 %2415  ;;  %v2812_v53 = vpop.permute.xlu1 %2811 }
 0xb04   : > { %v2425_v47 = vsel %vm9382_vm14, %v2416_v17, %v2418_v15  ;;  %v2818_v44 = vsel %vm9383_vm9, %v8276_v34, %v2812_v53  ;;  %v4200_v53 = vrot.slane %v8305_v16, 4  ;;  %v4518_v16 = vld [vmem:[#allocation3 + $0x110] sm:$0xff]  ;;  %vm9400_vm14 = vmmov %vm9394_vm5 }
 0xb05   : > { %2437 = vst [vmem:[#allocation3 + $0x6c0] sm:$0xf] %v2425_v47  ;;  %2830 = vst [vmem:[#allocation3 + $0x168] sm:$0xf] %v2818_v44  ;;  %2847 = vrot.lane.b32.xlu0 %v2758_v28, %s5178_s12  ;;  %2604 = vrot.lane.b32.xlu1 %v2443_v52, %s9002_s19  ;;  %v9398_v47 = vrot.slane %v7264_v33, 4 }
 0xb06   : > { %vm9402_vm9 = vmmov %vm9392_vm6 }
 0xb07   : > { %v2420_v18 = vpop.permute.xlu0 %2419  ;;  %v2880_v4 = vpop.permute.xlu1 %2879 }
 0xb08   : > { %v2426_v6 = vsel %vm9384_vm3, %v2418_v15, %v2420_v18  ;;  %v2889_v38 = vsel %vm9385_vm4, %v2880_v4, %v8286_v48  ;;  %vm9403_vm3 = vmmov %vm9394_vm5 }
 0xb09   : > { %2438 = vst [vmem:[#allocation3 + $0x540] sm:$0xf] %v2426_v6  ;;  %2901 = vst [vmem:[#allocation3 + $0x120] sm:$0xf] %v2889_v38  ;;  %2915 = vrot.lane.b32.xlu0 %v2754_v10, %s5176_s30  ;;  %3881 = vrot.lane.b32.xlu1 %v8122_v60, %s5179_s14  ;;  %v4517_v6 = vld [vmem:[#allocation3 + $0x420] sm:$0xff]  ;;  %v9401_v38 = vrot.slane %v7313_v25, 4 }
 0xb0a   : > { %vm9405_vm4 = vmmov %vm9392_vm6 }
 0xb0b   : > { %v2493_v34 = vpop.permute.xlu0 %2492  ;;  %v2884_v12 = vpop.permute.xlu1 %2883  ;;  %v8485_v30 = vsel %vm9402_vm9, %v9401_v38, %v4200_v53  ;;  %v4421_v38 = vld [vmem:[%s8891_s7 + $0x18] sm:$0x3f]  ;;  %vm9419_vm9 = vmmov %vm9403_vm3 }
 0xb0c   : > { %v2502_v20 = vsel %vm9386_vm12, %v2493_v34, %v8334_v9  ;;  %v2890_v15 = vsel %vm9387_vm13, %v8286_v48, %v2884_v12  ;;  %v9391_v48 = vrot.slane %v7219_v63, 4  ;;  %v4196_v34 = vrot.slane %v8204_v45, 4  ;;  %v4419_v12 = vld [vmem:[%s8891_s7 + $0x8] sm:$0x3f]  ;;  %vm9406_vm12 = vmmov %vm9395_vm0  ;;  %4823 = vmatprep.mubr.f32.mxu0 %v4421_v38 }
 0xb0d   : > { %2514 = vst [vmem:[#allocation3 + $0x568] sm:$0xf] %v2502_v20  ;;  %2902 = vst [vmem:[#allocation3 + $0x80] sm:$0xf] %v2890_v15  ;;  %2919 = vrot.lane.b32.xlu0 %v2758_v28, %s5176_s30  ;;  %1969 = vrot.lane.b32.xlu1 %v1952_v19, %s5177_s11 }
 0xb0e   : > { %v1956_v61 = vsel %vm9392_vm6, %v9391_v48, %v1955_v21  ;;  %v4516_v21 = vld [vmem:[#allocation3 + $0x430] sm:$0xff]  ;;  %4752 = vmatprep.mubr.f32.mxu1 %v4419_v12  ;;  %v5150_v48 = vld [vmem:[#allocation3 + $0x700] sm:$0xff]  ;;  %vm9407_vm13 = vmmov %vm9395_vm0 }
 0xb0f   : > { %v2497_v62 = vpop.permute.xlu0 %2496  ;;  %v2952_v52 = vpop.permute.xlu1 %2951  ;;  %vm9410_vm6 = vmmov %vm9397_vm11 }
 0xb10   : > { %v2503_v2 = vsel %vm9390_vm2, %v8334_v9, %v2497_v62  ;;  %v2961_v14 = vsel %vm558_vm1, %v2952_v52, %v8292_v59  ;;  %v4511_v52 = vld [vmem:[#allocation3 + $0x168] sm:$0xff]  ;;  %vm9409_vm2 = vcmask 523264  }
 0xb11   : > { %2515 = vst [vmem:[#allocation3 + $0x5f0] sm:$0xf] %v2503_v2  ;;  %2973 = vst [vmem:[#allocation3 + $0x298] sm:$0xf] %v2961_v14  ;;  %3483 = vrot.lane.b32.xlu0 %v8369_v40, %s5177_s11  ;;  %1973 = vrot.lane.b32.xlu1 %v1956_v61, %s5177_s11  ;;  %v4508_v14 = vld [vmem:[#allocation3 + $0x440] sm:$0xff] }
 0xb13   : > { %v2565_v41 = vpop.permute.xlu0 %2564  ;;  %v2956_v51 = vpop.permute.xlu1 %2955 }
 0xb14   : > { %v2574_v10 = vsel %vm9393_vm7, %v2565_v41, %v8349_v27  ;;  %v2962_v9 = vsel %vm558_vm1, %v8292_v59, %v2956_v51  ;;  %v4506_v41 = vld [vmem:[#allocation3 + $0x4b0] sm:$0xff]  ;;  %vm9411_vm7 = vmmov %vm9409_vm2 }
 0xb15   : > { %2586 = vst [vmem:[#allocation3 + $0x68] sm:$0xf] %v2574_v10  ;;  %2974 = vst [vmem:[#allocation3 + $0x6f0] sm:$0xf] %v2962_v9  ;;  %2041 = vrot.lane.b32.xlu1 %v1952_v19, %s5178_s12  ;;  %4216 = vrot.lane.b32.xlu0 %v8343_v43, %s5177_s11  ;;  %v3867_v43 = vrot.slane %v8230_v29, 4  ;;  %v5151_v9 = vld [vmem:[#allocation3 + $0x3d0] sm:$0xff] }
 0xb17   : > { %v2569_v63 = vpop.permute.xlu0 %2568  ;;  %v3516_v22 = vpop.permute.xlu1 %3515  ;;  %v8473_v29 = vsel %vm9399_vm10, %v9398_v47, %v3867_v43  ;;  %v5154_v47 = vld [vmem:[#allocation3 + $0x600] sm:$0xff] }
 0xb18   : > { %v2575_v28 = vsel %vm9394_vm5, %v8349_v27, %v2569_v63  ;;  %v3525_v56 = vsel %vm9395_vm0, %v3516_v22, %v8311_v36  ;;  %vm9412_vm5 = vmmov %vm9395_vm0 }
 0xb19   : > { %2587 = vst [vmem:[#allocation3 + $0x558] sm:$0xf] %v2575_v28  ;;  %3537 = vst [vmem:[#allocation3 + $0x2a8] sm:$0xf] %v3525_v56  ;;  %2045 = vrot.lane.b32.xlu1 %v1956_v61, %s5178_s12  ;;  %3555 = vrot.lane.b32.xlu0 %v8369_v40, %s5178_s12 }
 0xb1a   : > { %vm9413_vm0 = vmmov %vm9409_vm2 }
 0xb1b   : > { %v3841_v59 = vpop.permute.xlu0 %3840  ;;  %v8457_v37 = vpop.permute.xlu1 %4396  ;;  %vm9417_vm10 = vmmov %vm9413_vm0 }
 0xb1c   : > { %v3850_v17 = vsel %vm9396_vm15, %v3841_v59, %v8302_v23  ;;  %vm9415_vm15 = vmmov %vm9408_vm8 }
 0xb1d   : > { %3862 = vst [vmem:[#allocation3 + $0x3f8] sm:$0xf] %v3850_v17  ;;  %2113 = vrot.lane.b32.xlu1 %v1952_v19, %s5176_s30  ;;  %3623 = vrot.lane.b32.xlu0 %v8331_v49, %s5176_s30  ;;  %v4519_v49 = vld [vmem:[#allocation3 + $0x4f8] sm:$0xff]  ;;  %v9404_v19 = vrot.slane %v6912_v39, 4  ;;  %v4509_v39 = vld [vmem:[#allocation3 + $0x160] sm:$0xff] }
 0xb1f   : > { %v3922_v36 = vpop.permute.xlu0 %3921  ;;  %v8465_v27 = vpop.permute.xlu1 %4324  ;;  %v8504_v62 = vsel %vm9405_vm4, %v9404_v19, %v4196_v34 }
 0xb20   : > { %v3928_v40 = vsel %vm9397_vm11, %v8357_v0, %v3922_v36  ;;  %v4520_v44 = vld [vmem:[#allocation3 + $0x2a8] sm:$0xff]  ;;  %vm9416_vm11 = vmmov %vm9412_vm5 }
 0xb21   : > { %3940 = vst [vmem:[#allocation3 + $0x348] sm:$0xf] %v3928_v40  ;;  %2117 = vrot.lane.b32.xlu1 %v1956_v61, %s5176_s30  ;;  %3885 = vrot.lane.b32.xlu0 %v8473_v29, %s5179_s14 }
 0xb22   : > { %4760 = vmatpush1.msra.mxu0 %v4520_v44 }
 0xb23   : > { %4761 = vmatprep.subr.mxu0 %v4519_v49  ;;  %v3994_v18 = vpop.permute.xlu0 %3993  ;;  %v8478_v4 = vpop.permute.xlu1 %2773 }
 0xb24   : > { %v4000_v33 = vsel %vm9400_vm14, %v8374_v42, %v3994_v18  ;;  %4762 = vmatpush1.msra.mxu0 %v4518_v16  ;;  %v5155_v16 = vld [vmem:[#allocation3 + $0xb8] sm:$0xff]  ;;  %vm9418_vm14 = vmmov %vm9410_vm6 }
 0xb25   : > { %4012 = vst [vmem:[#allocation3 + $0xe8] sm:$0xf] %v4000_v33  ;;  %4763 = vmatprep.subr.mxu0 %v4517_v6  ;;  %4218 = vrot.lane.b32.xlu1 %v8485_v30, %s5177_s11 }
 0xb26   : > { %4029 = vrot.lane.b32.xlu0 %v8473_v29, %s9002_s19  ;;  %4764 = vmatpush1.msra.mxu0 %v4516_v21 }
 0xb27   : > { %4765 = vmatprep.subr.mxu0 %v8251_v13  ;;  %v3990_v20 = vpop.permute.xlu0 %3989  ;;  %v8496_v15 = vpop.permute.xlu1 %2845  ;;  %v4512_v13 = vld [vmem:[#allocation3 + $0x518] sm:$0xff] }
 0xb28   : > { %v3999_v45 = vsel %vm9403_vm3, %v3990_v20, %v8374_v42  ;;  %4766 = vmatpush1.msra.mxu0 %v8220_v54  ;;  %v4510_v54 = vld [vmem:[#allocation3 + $0x250] sm:$0xff]  ;;  %vm9420_vm3 = vmmov %vm9412_vm5 }
 0xb29   : > { %4011 = vst [vmem:[#allocation3 + $0x3e0] sm:$0xf] %v3999_v45  ;;  %4767 = vmatprep.subr.mxu0 %v4513_v11  ;;  %4214 = vrot.lane.b32.xlu1 %v8504_v62, %s5177_s11  ;;  %v9414_v45 = vld [vmem:[#allocation18_spill] sm:$0xff]  ;;  %vm9421_vm4 = vmmov %vm9420_vm3  ;;  %s367_s11 = scalar_lea.vmem %s8893_s9, %s5260_s17 }
 0xb2a   : > { %4320 = vrot.lane.b32.xlu0 %v7313_v25, %s5180_s15  ;;  %4768 = vmatpush1.msra.mxu0 %v4512_v13  ;;  %v4507_v25 = vld [vmem:[#allocation3 + $0x178] sm:$0xff] }
 0xb2b   : > { %4769 = vmatprep.subr.mxu0 %v4511_v52  ;;  %v8510_v42 = vpop.permute.xlu0 %3625  ;;  %v8512_v2 = vpop.permute.xlu1 %2917 }
 0xb2c   : > { %4770 = vmatpush1.msra.mxu0 %v4510_v54 }
 0xb2d   : > { %4771 = vmatprep.subr.mxu0 %v4509_v39  ;;  %4027 = vrot.lane.b32.xlu1 %v8047_v5, %s9002_s19 }
 0xb2e   : > { %4316 = vrot.lane.b32.xlu0 %v5150_v48, %s5180_s15  ;;  %4772 = vmatpush1.msra.mxu0 %v4508_v14 }
 0xb2f   : > { %4773 = vmatprep.subr.mxu0 %v4507_v25  ;;  %v2006_v61 = vpop.permute.xlu0 %2005  ;;  %v8517_v51 = vpop.permute.xlu1 %3481 }
 0xb30   : > { %v2015_v10 = vsel %vm9406_vm12, %v2006_v61, %v8380_v55  ;;  %4774 = vmatpush1.msra.mxu0 %v4506_v41  ;;  %vm9422_vm12 = vmmov %vm9408_vm8 }
 0xb31   : > { %2027 = vst [vmem:[#allocation3 + $0x1b8] sm:$0xf] %v2015_v10  ;;  %4318 = vrot.lane.b32.xlu1 %v5151_v9, %s5180_s15 }
 0xb32   : > { %4023 = vrot.lane.b32.xlu0 %v7448_v57, %s9002_s19 }
 0xb33   : > { %v2010_v63 = vpop.permute.xlu0 %2009  ;;  %v3845_v22 = vpop.permute.xlu1 %3844 }
 0xb34   : > { %v2016_v28 = vsel %vm9407_vm13, %v8380_v55, %v2010_v63  ;;  %v3851_v56 = vsel %vm9408_vm8, %v8302_v23, %v3845_v22  ;;  %v5152_v55 = vld [vmem:[#allocation3 + $0x698] sm:$0xff]  ;;  %vm9423_vm13 = vmmov %vm9413_vm0 }
 0xb35   : > { %2028 = vst [vmem:[#allocation3 + $0x10] sm:$0xf] %v2016_v28  ;;  %3863 = vst [vmem:[#allocation3 + $0x438] sm:$0xf] %v3851_v56  ;;  %4025 = vrot.lane.b32.xlu1 %v8122_v60, %s9002_s19  ;;  %v5153_v23 = vld [vmem:[#allocation3 + $0x3b8] sm:$0xff] }
 0xb36   : > { %4314 = vrot.lane.b32.xlu0 %v9252_v7, %s5180_s15 }
 0xb37   : > { %v2078_v59 = vpop.permute.xlu0 %2077  ;;  %v3918_v43 = vpop.permute.xlu1 %3917 }
 0xb38   : > { %v2087_v17 = vsel %vm9409_vm2, %v2078_v59, %v8388_v8  ;;  %v3927_v36 = vsel %vm9410_vm6, %v3918_v43, %v8357_v0  ;;  %v4503_v59 = vld [vmem:[#allocation3 + $0x660] sm:$0xff]  ;;  %vm9425_vm2 = vmmov %vm9413_vm0 }
 0xb39   : > { %2099 = vst [vmem:[#allocation3 + $0x228] sm:$0xf] %v2087_v17  ;;  %3939 = vst [vmem:[#allocation3 + $0x1e8] sm:$0xf] %v3927_v36  ;;  %4021 = vrot.lane.b32.xlu1 %v5152_v55, %s9002_s19  ;;  %v4502_v36 = vld [vmem:[#allocation3 + $0x288] sm:$0xff] }
 0xb3a   : > { %4310 = vrot.lane.b32.xlu0 %v5153_v23, %s5180_s15  ;;  %v9424_v23 = vld [vmem:[#allocation13_spill] sm:$0xff] }
 0xb3b   : > { %v2082_v53 = vpop.permute.xlu0 %2081  ;;  %v8538_v40 = vpop.permute.xlu1 %3553 }
 0xb3c   : > { %v2088_v7 = vsel %vm9411_vm7, %v8388_v8, %v2082_v53  ;;  %v4500_v53 = vld [vmem:[#allocation3 + $0x1b8] sm:$0xff]  ;;  %vm9426_vm7 = vmmov %vm9410_vm6 }
 0xb3d   : > { %2100 = vst [vmem:[#allocation3 + $0x530] sm:$0xf] %v2088_v7  ;;  %4312 = vrot.lane.b32.xlu1 %v5154_v47, %s5180_s15  ;;  %v4499_v7 = vld [vmem:[#allocation3 + $0x2d0] sm:$0xff] }
 0xb3e   : > { %3663 = vrot.lane.b32.xlu0 %v8061_v35, %s9002_s19 }
 0xb3f   : > { %v2150_v0 = vpop.permute.xlu0 %2149  ;;  %v4255_v44 = vpop.permute.xlu1 %4254 }
 0xb40   : > { %v2159_v49 = vsel %vm558_vm1, %v2150_v0, %v8397_v46  ;;  %v4261_v18 = vsel %vm9412_vm5, %v8404_v24, %v4255_v44  ;;  %v4498_v44 = vld [vmem:[#allocation3 + $0x200] sm:$0xff]  ;;  %vm9427_vm5 = vmmov %vm9419_vm9 }
 0xb41   : > { %2171 = vst [vmem:[#allocation3 + $0x3f0] sm:$0xf] %v2159_v49  ;;  %4273 = vst [vmem:[#allocation3 + $0x390] sm:$0xf] %v4261_v18  ;;  %4019 = vrot.lane.b32.xlu1 %v5155_v16, %s9002_s19 }
 0xb42   : > { %3957 = vrot.lane.b32.xlu0 %v8473_v29, %s5180_s15 }
 0xb43   : > { %v2154_v8 = vpop.permute.xlu0 %2153  ;;  %v8552_v33 = vpop.permute.xlu1 %3883 }
 0xb44   : > { %v2160_v6 = vsel %vm558_vm1, %v8397_v46, %v2154_v8  ;;  %v4496_v8 = vld [vmem:[#allocation3 + $0x98] sm:$0xff] }
 0xb45   : > { %2172 = vst [vmem:[#allocation3 + $0x260] sm:$0xf] %v2160_v6  ;;  %3661 = vrot.lane.b32.xlu1 %v8039_v26, %s9002_s19 }
 0xb46   : > { %4017 = vrot.lane.b32.xlu0 %v7075_v31, %s9002_s19 }
 0xb47   : > { %v2459_v34 = vpop.permute.xlu0 %2458  ;;  %v4395_v29 = vpop.permute.xlu1 %4394 }
 0xb48   : > { %v4404_v12 = vsel %vm558_vm1, %v4395_v29, %v8457_v37  ;;  %v5159_v29 = vld [vmem:[#allocation3 + $0x268] sm:$0xff] }
 0xb49   : > { %4416 = vst [vmem:[#allocation3 + $0x728] sm:$0xf] %v4404_v12  ;;  %3955 = vrot.lane.b32.xlu1 %v8047_v5, %s5180_s15 }
 0xb4a   : > { %3953 = vrot.lane.b32.xlu0 %v8122_v60, %s5180_s15  ;;  %v8585_v60 = vld [vmem:[#allocation3 + $0x1f0] sm:$0xff] }
 0xb4b   : > { %v8569_v46 = vpop.permute.xlu0 %2530  ;;  %v4323_v21 = vpop.permute.xlu1 %4322 }
 0xb4c   : > { %v4332_v20 = vsel %vm9413_vm0, %v4323_v21, %v8465_v27  ;;  %vm9428_vm0 = vmmov %vm9420_vm3 }
 0xb4d   : > { %4344 = vst [vmem:[#allocation3 + $0x350] sm:$0xf] %v4332_v20  ;;  %4015 = vrot.lane.b32.xlu1 %v9414_v45, %s9002_s19 }
 0xb4e   : > { %4290 = vrot.lane.b32.xlu0 %v8485_v30, %s5178_s12 }
 0xb4f   : > { %v8577_v11 = vpop.permute.xlu0 %2602  ;;  %v3480_v19 = vpop.permute.xlu1 %3479 }
 0xb50   : > { %v8581_v5 = vsel %vm9415_vm15, %v3480_v19, %v8517_v51  ;;  %vm9429_vm15 = vmmov %vm9427_vm5 }
 0xb51   : > { %3659 = vrot.lane.b32.xlu1 %v8042_v1, %s9002_s19 }
 0xb52   : > { %3655 = vrot.lane.b32.xlu0 %v8585_v60, %s9002_s19 }
 0xb53   : > { %v4251_v13 = vpop.permute.xlu0 %4250  ;;  %v8589_v52 = vpop.permute.xlu1 %4288 }
 0xb54   : > { %v4260_v54 = vsel %vm9416_vm11, %v4251_v13, %v8404_v24  ;;  %vm9430_vm11 = vmmov %vm9408_vm8 }
 0xb55   : > { %4272 = vst [vmem:[#allocation3 + $0x2e0] sm:$0xf] %v4260_v54  ;;  %4286 = vrot.lane.b32.xlu1 %v8504_v62, %s5178_s12  ;;  %s372_s12 = scalar_lea.vmem %s8894_s10, %s5260_s17 }
 0xb56   : > { %3949 = vrot.lane.b32.xlu0 %v5152_v55, %s5180_s15 }
 0xb57   : > { %v4399_v39 = vpop.permute.xlu0 %4398  ;;  %v8596_v14 = vpop.permute.xlu1 %4360 }
 0xb58   : > { %v4405_v48 = vsel %vm558_vm1, %v8457_v37, %v4399_v39 }
 0xb59   : > { %4417 = vst [vmem:[#allocation3 + $0x458] sm:$0xf] %v4405_v48  ;;  %4013 = vrot.lane.b32.xlu1 %v6460_v3, %s9002_s19  ;;  %v4483_v48 = vld [vmem:[#allocation3 + $0x2b8] sm:$0xff] }
 0xb5a   : > { %4362 = vrot.lane.b32.xlu0 %v8485_v30, %s5176_s30 }
 0xb5b   : > { %v4327_v24 = vpop.permute.xlu0 %4326  ;;  %v3552_v25 = vpop.permute.xlu1 %3551 }
 0xb5c   : > { %v4333_v61 = vsel %vm9417_vm10, %v8465_v27, %v4327_v24  ;;  %v8608_v41 = vsel %vm9418_vm14, %v3552_v25, %v8538_v40  ;;  %v5157_v27 = vld [vmem:[#allocation3 + $0x560] sm:$0xff]  ;;  %vm9431_vm10 = vmmov %vm9408_vm8 }
 0xb5d   : > { %4345 = vst [vmem:[#allocation3 + $0x480] sm:$0xf] %v4333_v61  ;;  %3657 = vrot.lane.b32.xlu1 %v7196_v50, %s9002_s19  ;;  %vm9432_vm14 = vmmov %vm9408_vm8  ;;  %v4482_v61 = vld [vmem:[#allocation3 + $0x470] sm:$0xff] }
 0xb5e   : > { %4358 = vrot.lane.b32.xlu0 %v8504_v62, %s5176_s30 }
 0xb5f   : > { %v8614_v37 = vpop.permute.xlu0 %1971  ;;  %v3628_v10 = vpop.permute.xlu1 %3627 }
 0xb60   : > { %v8618_v30 = vsel %vm9419_vm9, %v8510_v42, %v3628_v10  ;;  %vm9433_vm9 = vmmov %vm9410_vm6 }
 0xb61   : > { %3951 = vrot.lane.b32.xlu1 %v7448_v57, %s5180_s15  ;;  %v5158_v57 = vld [vmem:[#allocation3 + $0x550] sm:$0xff] }
 0xb62   : > { %3653 = vrot.lane.b32.xlu0 %v5157_v27, %s9002_s19 }
 0xb63   : > { %v8623_v9 = vpop.permute.xlu0 %2043  ;;  %v2457_v63 = vpop.permute.xlu1 %2456 }
 0xb64   : > { %v2466_v22 = vsel %vm9420_vm3, %v2457_v63, %v2459_v34  ;;  %v4479_v63 = vld [vmem:[#allocation3 + $0x190] sm:$0xff]  ;;  %vm9434_vm3 = vmmov %vm9410_vm6 }
 0xb65   : > { %3947 = vrot.lane.b32.xlu1 %v5155_v16, %s5180_s15  ;;  %v4497_v16 = vld [vmem:[#allocation3 + $0x2f8] sm:$0xff] }
 0xb66   : > { %3589 = vrot.lane.b32.xlu0 %v8039_v26, %s5180_s15 }
 0xb67   : > { %v8629_v62 = vpop.permute.xlu0 %2115  ;;  %v2461_v28 = vpop.permute.xlu1 %2460 }
 0xb68   : > { %v2467_v56 = vsel %vm9421_vm4, %v2459_v34, %v2461_v28  ;;  %v4478_v28 = vld [vmem:[#allocation3 + $0x4c0] sm:$0xff]  ;;  %vm9435_vm4 = vmmov %vm9434_vm3 }
 0xb69   : > { %3591 = vrot.lane.b32.xlu1 %v8061_v35, %s5180_s15  ;;  %4775 = vmatprep.subr.mxu0 %v2467_v56  ;;  %v4501_v35 = vld [vmem:[#allocation3 + $0x10] sm:$0xff] }
 0xb6a   : > { %3649 = vrot.lane.b32.xlu0 %v5158_v57, %s9002_s19  ;;  %4776 = vmatpush1.msra.mxu0 %v2466_v22 }
 0xb6b   : > { %v2772_v43 = vpop.permute.xlu0 %2771  ;;  %v2529_v17 = vpop.permute.xlu1 %2528  ;;  %4777 = vmatprep.subr.mxu0 %v4503_v59  ;;  %v4476_v59 = vld [vmem:[#allocation3 + $0x6b8] sm:$0xff] }
 0xb6c   : > { %v8637_v26 = vsel %vm9422_vm12, %v2772_v43, %v8478_v4  ;;  %v8641_v55 = vsel %vm9423_vm13, %v2529_v17, %v8569_v46  ;;  %4778 = vmatpush1.msra.mxu0 %v4502_v36  ;;  %vm9436_vm12 = vmmov %vm9427_vm5 }
 0xb6d   : > { %3651 = vrot.lane.b32.xlu1 %v9424_v23, %s9002_s19  ;;  %4779 = vmatprep.subr.mxu0 %v4501_v35  ;;  %vm9437_vm13 = vmmov %vm9427_vm5  ;;  %v4472_v35 = vld [vmem:[#allocation3 + $0x360] sm:$0xff] }
 0xb6e   : > { %3943 = vrot.lane.b32.xlu0 %v9414_v45, %s5180_s15  ;;  %4780 = vmatpush1.msra.mxu0 %v4500_v53 }
 0xb6f   : > { %v2776_v47 = vpop.permute.xlu0 %2775  ;;  %v2533_v0 = vpop.permute.xlu1 %2532  ;;  %4781 = vmatprep.subr.mxu0 %v4499_v7 }
 0xb70   : > { %v8649_v49 = vsel %vm9408_vm8, %v8478_v4, %v2776_v47  ;;  %v8653_v18 = vsel %vm9425_vm2, %v8569_v46, %v2533_v0  ;;  %4782 = vmatpush1.msra.mxu0 %v4498_v44  ;;  %v4470_v47 = vld [vmem:[#allocation3 + $0x6c0] sm:$0xff]  ;;  %vm9438_vm8 = vmmov %vm9428_vm0  ;;  %v4469_v44 = vld [vmem:[#allocation3 + $0x1c8] sm:$0xff] }
 0xb71   : > { %3945 = vrot.lane.b32.xlu1 %v7075_v31, %s5180_s15  ;;  %4783 = vmatprep.subr.mxu0 %v4497_v16  ;;  %vm9439_vm2 = vmmov %vm9427_vm5 }
 0xb72   : > { %3587 = vrot.lane.b32.xlu0 %v8042_v1, %s5180_s15  ;;  %4784 = vmatpush1.msra.mxu0 %v4496_v8  ;;  %v4466_v8 = vld [vmem:[#allocation3 + $0x630] sm:$0xff] }
 0xb73   : > { %v2844_v6 = vpop.permute.xlu0 %2843  ;;  %v2601_v38 = vpop.permute.xlu1 %2600 }
 0xb74   : > { %v8661_v4 = vsel %vm9410_vm6, %v2844_v6, %v8496_v15  ;;  %v8665_v34 = vsel %vm558_vm1, %v2601_v38, %v8577_v11  ;;  %vm9440_vm6 = vmmov %vm9431_vm10 }
 0xb75   : > { %3647 = vrot.lane.b32.xlu1 %v5159_v29, %s9002_s19 }
 0xb76   : > { %3941 = vrot.lane.b32.xlu0 %v6460_v3, %s5180_s15 }
 0xb77   : > { %v2848_v31 = vpop.permute.xlu0 %2847  ;;  %v2605_v12 = vpop.permute.xlu1 %2604 }
 0xb78   : > { %v8672_v1 = vsel %vm9426_vm7, %v8496_v15, %v2848_v31  ;;  %v8676_v46 = vsel %vm558_vm1, %v8577_v11, %v2605_v12  ;;  %vm9441_vm7 = vmmov %vm9440_vm6 }
 0xb79   : > { %3583 = vrot.lane.b32.xlu1 %v8585_v60, %s5180_s15  ;;  %v4672_v60 = vld [vmem:[%s8892_s8] sm:$0x3f] }
 0xb7a   : > { %3585 = vrot.lane.b32.xlu0 %v7196_v50, %s5180_s15 }
 0xb7b   : > { %v2916_v21 = vpop.permute.xlu0 %2915  ;;  %v3882_v20 = vpop.permute.xlu1 %3881 }
 0xb7c   : > { %v8684_v3 = vsel %vm9427_vm5, %v2916_v21, %v8512_v2  ;;  %v8688_v15 = vsel %vm9428_vm0, %v3882_v20, %v8552_v33  ;;  %v4461_v21 = vld [vmem:[#allocation3 + $0x140] sm:$0xff]  ;;  %v4460_v20 = vld [vmem:[#allocation3 + $0x778] sm:$0xff]  ;;  %vm9442_vm5 = vcmask 523264  }
 0xb7d   : > { %3581 = vrot.lane.b32.xlu1 %v5157_v27, %s5180_s15  ;;  %v4481_v27 = vld [vmem:[#allocation3 + $0x28] sm:$0xff]  ;;  %vm9443_vm0 = vmmov %vm9442_vm5 }
 0xb7e   : > { %3577 = vrot.lane.b32.xlu0 %v5158_v57, %s5180_s15  ;;  %v4477_v57 = vld [vmem:[#allocation3 + $0x788] sm:$0xff] }
 0xb7f   : > { %v2920_v45 = vpop.permute.xlu0 %2919  ;;  %v1970_v11 = vpop.permute.xlu1 %1969 }
 0xb80   : > { %v8694_v19 = vsel %vm9429_vm15, %v8512_v2, %v2920_v45  ;;  %v8698_v50 = vsel %vm9430_vm11, %v1970_v11, %v8614_v37  ;;  %v4493_v45 = vld [vmem:[#allocation3 + $0x378] sm:$0xff]  ;;  %v4459_v11 = vld [vmem:[#allocation3 + $0x3d0] sm:$0xff]  ;;  %vm9444_vm15 = vmmov %vm9443_vm0 }
 0xb81   : > { %3579 = vrot.lane.b32.xlu1 %v9424_v23, %s5180_s15  ;;  %v4471_v23 = vld [vmem:[#allocation3 + $0x540] sm:$0xff]  ;;  %vm9445_vm11 = vmmov %vm9443_vm0 }
 0xb82   : > { %3575 = vrot.lane.b32.xlu0 %v5159_v29, %s5180_s15  ;;  %v4462_v29 = vld [vmem:[#allocation3 + $0x188] sm:$0xff] }
 0xb83   : > { %v3484_v13 = vpop.permute.xlu0 %3483  ;;  %v1974_v54 = vpop.permute.xlu1 %1973 }
 0xb84   : > { %v3490_v39 = vsel %vm9431_vm10, %v8517_v51, %v3484_v13  ;;  %v1980_v2 = vsel %vm9432_vm14, %v8614_v37, %v1974_v54  ;;  %v4480_v51 = vld [vmem:[#allocation3 + $0x608] sm:$0xff]  ;;  %v4458_v54 = vld [vmem:[#allocation3 + $0x700] sm:$0xff]  ;;  %vm9446_vm10 = vmmov %vm9443_vm0 }
 0xb85   : > { %4675 = vperm.xlu1 %5134, %v4672_v60   ;;  %4724 = vmatprep.subr.mxu1 %v3490_v39  ;;  %v4492_v60 = vld [vmem:[#allocation3 + $0x670] sm:$0xff]  ;;  %v4491_v39 = vld [vmem:[#allocation3 + $0x438] sm:$0xff]  ;;  %vm9447_vm14 = vmmov %vm9443_vm0 }
 0xb86   : > { %4725 = vmatpush2.msra.mxu1 %v8581_v5 }
 0xb87   : > { %v4217_v24 = vpop.permute.xlu0 %4216  ;;  %v2042_v25 = vpop.permute.xlu1 %2041  ;;  %4726 = vmatprep.subr.mxu1 %v4483_v48 }
 0xb88   : > { %v8713_v10 = vsel %vm9433_vm9, %v2042_v25, %v8623_v9  ;;  %4727 = vmatpush2.msra.mxu1 %v4482_v61  ;;  %v4553_v25 = vld [vmem:[#allocation3 + $0x90] sm:$0xff]  ;;  %v4552_v61 = vld [vmem:[#allocation3 + $0x738] sm:$0xff]  ;;  %vm4678_vm9 = vcmask 687104  }
 0xb89   : > { %4728 = vmatprep.subr.mxu1 %v4481_v27 }
 0xb8a   : > { %4729 = vmatpush2.msra.mxu1 %v4480_v51  ;;  %v4583_v51 = vld [vmem:[#allocation3 + $0x30] sm:$0xff] }
 0xb8b   : > { %v3556_v37 = vpop.permute.xlu0 %3555  ;;  %v2046_v22 = vpop.permute.xlu1 %2045  ;;  %4730 = vmatprep.subr.mxu1 %v4479_v63  ;;  %v4551_v63 = vld [vmem:[#allocation3 + $0x690] sm:$0xff] }
 0xb8c   : > { %v8717_v5 = vsel %vm9434_vm3, %v8538_v40, %v3556_v37  ;;  %v8721_v56 = vsel %vm9435_vm4, %v8623_v9, %v2046_v22  ;;  %4731 = vmatpush2.msra.mxu1 %v4478_v28  ;;  %v4473_v9 = vld [vmem:[#allocation3 + $0xc0] sm:$0xff]  ;;  %vm9448_vm4 = vmmov %vm9434_vm3 }
 0xb8d   : > { %4732 = vmatprep.subr.mxu1 %v4477_v57  ;;  %v4582_v57 = vld [vmem:[#allocation3 + $0x5a0] sm:$0xff] }
 0xb8e   : > { %4733 = vmatpush2.msra.mxu1 %v4476_v59  ;;  %v4550_v59 = vld [vmem:[#allocation3 + $0x5c0] sm:$0xff] }
 0xb8f   : > { %v3624_v43 = vpop.permute.xlu0 %3623  ;;  %v2114_v17 = vpop.permute.xlu1 %2113  ;;  %4734 = vmatprep.subr.mxu1 %v8649_v49  ;;  %v4467_v49 = vld [vmem:[#allocation3 + $0xf8] sm:$0xff] }
 0xb90   : > { %v8726_v36 = vsel %vm9436_vm12, %v3624_v43, %v8510_v42  ;;  %v8730_v40 = vsel %vm9437_vm13, %v2114_v17, %v8629_v62  ;;  %4735 = vmatpush2.msra.mxu1 %v8637_v26  ;;  %v4468_v26 = vld [vmem:[#allocation3 + $0x4c8] sm:$0xff]  ;;  %v4548_v17 = vld [vmem:[#allocation3 + $0x158] sm:$0xff]  ;;  %vm9449_vm12 = vmmov %vm9439_vm2 }
 0xb91   : > { %4736 = vmatprep.subr.mxu1 %v4473_v9  ;;  %v4549_v43 = vld [vmem:[#allocation3 + $0x7a8] sm:$0xff]  ;;  %vm9450_vm13 = vmmov %vm9439_vm2 }
 0xb92   : > { %4737 = vmatpush2.msra.mxu1 %v4472_v35  ;;  %v4579_v35 = vld [vmem:[#allocation3 + $0x768] sm:$0xff] }
 0xb93   : > { %v3886_v53 = vpop.permute.xlu0 %3885  ;;  %v2118_v7 = vpop.permute.xlu1 %2117  ;;  %4738 = vmatprep.subr.mxu1 %v4471_v23  ;;  %v4547_v23 = vld [vmem:[#allocation3 + $0x50] sm:$0xff] }
 0xb94   : > { %v8735_v0 = vsel %vm9438_vm8, %v8552_v33, %v3886_v53  ;;  %v8739_v42 = vsel %vm9439_vm2, %v8629_v62, %v2118_v7  ;;  %4739 = vmatpush2.msra.mxu1 %v4470_v47  ;;  %v4463_v33 = vld [vmem:[#allocation3 + $0x180] sm:$0xff]  ;;  %v4578_v47 = vld [vmem:[#allocation3 + $0x5d8] sm:$0xff]  ;;  %vm9451_vm8 = vmmov %vm9443_vm0 }
 0xb95   : > { %4740 = vmatprep.subr.mxu1 %v4469_v44  ;;  %v4546_v44 = vld [vmem:[#allocation3 + $0x3c0] sm:$0xff]  ;;  %vm9452_vm2 = vmmov %vm9443_vm0 }
 0xb96   : > { %4741 = vmatpush2.msra.mxu1 %v4468_v26  ;;  %v4577_v26 = vld [vmem:[#allocation3 + $0x1a0] sm:$0xff] }
 0xb97   : > { %v4219_v16 = vpop.permute.xlu1 %4218  ;;  %4742 = vmatprep.subr.mxu1 %v4467_v49  ;;  %v4576_v49 = vld [vmem:[#allocation3 + $0x6a8] sm:$0xff] }
 0xb98   : > { %v4030_v6 = vpop.permute.xlu0 %4029  ;;  %v4225_v38 = vsel %vm9440_vm6, %v4217_v24, %v4219_v16  ;;  %4743 = vmatpush2.msra.mxu1 %v4466_v8  ;;  %v4543_v8 = vld [vmem:[#allocation3 + $0x638] sm:$0xff]  ;;  %vm9453_vm6 = vmmov %vm9443_vm0 }
 0xb99   : > { %4744 = vmatprep.subr.mxu1 %v1980_v2  ;;  %4785 = vmatprep.subr.mxu0 %v4225_v38 }
 0xb9a   : > { %4745 = vmatpush2.msra.mxu1 %v8698_v50  ;;  %v4418_v50 = vld [vmem:[%s8891_s7] sm:$0x3f] }
 0xb9b   : > { %v4215_v62 = vpop.permute.xlu1 %4214  ;;  %4746 = vmatprep.subr.mxu1 %v4463_v33  ;;  %v4542_v33 = vld [vmem:[#allocation3 + $0x2e8] sm:$0xff] }
 0xb9c   : > { %v4321_v31 = vpop.permute.xlu0 %4320  ;;  %v4224_v12 = vsel %vm9441_vm7, %v4215_v62, %v4217_v24  ;;  %4747 = vmatpush2.msra.mxu1 %v4462_v29  ;;  %v4490_v24 = vld [vmem:[#allocation3 + $0x3f8] sm:$0xff]  ;;  %v4573_v62 = vld [vmem:[#allocation3 + $0x270] sm:$0xff]  ;;  %vm9454_vm7 = vcmask 1043456  }
 0xb9d   : > { %4748 = vmatprep.subr.mxu1 %v4461_v21  ;;  %4786 = vmatpush1.msra.mxu0 %v4224_v12  ;;  %v4541_v29 = vld [vmem:[#allocation3 + $0x5f0] sm:$0xff] }
 0xb9e   : > { %4749 = vmatpush2.msra.mxu1 %v4460_v20  ;;  %4787 = vmatprep.subr.mxu0 %v4493_v45  ;;  %v4539_v21 = vld [vmem:[#allocation3 + $0x790] sm:$0xff] }
 0xb9f   : > { %v4028_v13 = vpop.permute.xlu1 %4027  ;;  %4750 = vmatprep.subr.mxu1 %v4459_v11  ;;  %4788 = vmatpush1.msra.mxu0 %v4492_v60  ;;  %v4538_v11 = vld [vmem:[#allocation3 + $0x780] sm:$0xff]  ;;  %v4569_v60 = vld [vmem:[#allocation3 + $0x3d8] sm:$0xff] }
 0xba0   : > { %v4317_v2 = vpop.permute.xlu0 %4316  ;;  %v8748_v48 = vsel %vm558_vm1, %v4028_v13, %v4030_v6  ;;  %4751 = vmatpush2.msra.mxu1 %v4458_v54  ;;  %4789 = vmatprep.subr.mxu0 %v4491_v39  ;;  %v4536_v54 = vld [vmem:[#allocation3 + $0x388] sm:$0xff] }
 0xba1   : > { %4753 = vmatmul.mubr.f32.vlgmr.msra.gmra.mxu1 %v4418_v50  ;;  %4790 = vmatpush1.msra.mxu0 %v4490_v24  ;;  %v4537_v50 = vld [vmem:[#allocation3 + $0x2c0] sm:$0xff]  ;;  %v4423_v24 = vld [vmem:[%s8891_s7 + $0x28] sm:$0x3f] }
 0xba2   : > { %4830 = vmatprep.subr.mxu1 %v8259_v32  ;;  %4791 = vmatprep.subr.mxu0 %v4553_v25  ;;  %v4581_v32 = vld [vmem:[#allocation3 + $0x80] sm:$0xff] }
 0xba3   : > { %v4319_v27 = vpop.permute.xlu1 %4318  ;;  %4831 = vmatpush1.msra.mxu1 %v8234_v58  ;;  %4792 = vmatpush2.msra.mxu0 %v4552_v61  ;;  %v4580_v58 = vld [vmem:[#allocation3 + $0x120] sm:$0xff] }
 0xba4   : > { %v4024_v37 = vpop.permute.xlu0 %4023  ;;  %v8753_v22 = vsel %vm9442_vm5, %v4317_v2, %v4319_v27  ;;  %v8756_v28 = vsel %vm9443_vm0, %v4319_v27, %v4321_v31  ;;  %4832 = vmatprep.subr.mxu1 %v4583_v51  ;;  %4793 = vmatprep.subr.mxu0 %v4551_v63  ;;  %v4540_v31 = vld [vmem:[#allocation3 + $0x568] sm:$0xff]  ;;  %v4567_v2 = vld [vmem:[#allocation3 + $0x750] sm:$0xff]  ;;  %v4533_v51 = vld [vmem:[#allocation3 + $0x38] sm:$0xff] }
 0xba5   : > { %4833 = vmatpush1.msra.mxu1 %v4582_v57  ;;  %4794 = vmatpush2.msra.mxu0 %v4550_v59  ;;  %v4566_v27 = vld [vmem:[#allocation3 + $0x610] sm:$0xff]  ;;  %v4532_v63 = vld [vmem:[#allocation3 + $0x520] sm:$0xff]  ;;  %vm9455_vm5 = vmmov %vm9443_vm0 }
 0xba6   : > { %4834 = vmatprep.subr.mxu1 %v4581_v32  ;;  %4795 = vmatprep.subr.mxu0 %v4549_v43  ;;  %v4531_v57 = vld [vmem:[#allocation3 + $0x390] sm:$0xff]  ;;  %v4530_v43 = vld [vmem:[#allocation3 + $0x2e0] sm:$0xff]  ;;  %vm9456_vm0 = vmmov %vm9454_vm7 }
 0xba7   : > { %v4026_v9 = vpop.permute.xlu1 %4025  ;;  %4835 = vmatpush1.msra.mxu1 %v4580_v58  ;;  %4796 = vmatpush2.msra.mxu0 %v4548_v17  ;;  %v4529_v58 = vld [vmem:[#allocation3] sm:$0xff] }
 0xba8   : > { %v4315_v53 = vpop.permute.xlu0 %4314  ;;  %v8759_v7 = vsel %vm558_vm1, %v4026_v9, %v4028_v13  ;;  %4836 = vmatprep.subr.mxu1 %v4579_v35  ;;  %4797 = vmatprep.subr.mxu0 %v4547_v23  ;;  %v4568_v13 = vld [vmem:[#allocation3 + $0x668] sm:$0xff]  ;;  %v4526_v23 = vld [vmem:[#allocation3 + $0x4f0] sm:$0xff] }
 0xba9   : > { %4837 = vmatpush1.msra.mxu1 %v4578_v47  ;;  %4798 = vmatpush2.msra.mxu0 %v4546_v44  ;;  %v4523_v44 = vld [vmem:[#allocation3 + $0x1f8] sm:$0xff] }
 0xbaa   : > { %4838 = vmatprep.subr.mxu1 %v4577_v26  ;;  %4799 = vmatprep.subr.mxu0 %v8672_v1  ;;  %v4572_v1 = vld [vmem:[#allocation3 + $0x18] sm:$0xff]  ;;  %v4420_v26 = vld [vmem:[%s8891_s7 + $0x10] sm:$0x3f] }
 0xbab   : > { %v4022_v16 = vpop.permute.xlu1 %4021  ;;  %4839 = vmatpush1.msra.mxu1 %v4576_v49  ;;  %4800 = vmatpush2.msra.mxu0 %v8661_v4  ;;  %v4571_v4 = vld [vmem:[#allocation3 + $0x530] sm:$0xff] }
 0xbac   : > { %v4311_v6 = vpop.permute.xlu0 %4310  ;;  %v8764_v38 = vsel %vm558_vm1, %v4022_v16, %v4024_v37  ;;  %4840 = vmatprep.subr.mxu1 %v8653_v18  ;;  %4801 = vmatprep.subr.mxu0 %v4543_v8  ;;  %v4522_v8 = vld [vmem:[#allocation3 + $0x78] sm:$0xff] }
 0xbad   : > { %4841 = vmatpush1.msra.mxu1 %v8641_v55  ;;  %4802 = vmatpush2.msra.mxu0 %v4542_v33  ;;  %v4570_v55 = vld [vmem:[#allocation3 + $0x228] sm:$0xff] }
 0xbae   : > { %4842 = vmatprep.subr.mxu1 %v4573_v62  ;;  %4803 = vmatprep.subr.mxu0 %v4541_v29  ;;  %v4648_v62 = vld [vmem:[#allocation3 + $0x4a0] sm:$0xff] }
 0xbaf   : > { %v4313_v12 = vpop.permute.xlu1 %4312  ;;  %4843 = vmatpush1.msra.mxu1 %v4572_v1  ;;  %4804 = vmatpush2.msra.mxu0 %v4540_v31  ;;  %v4647_v31 = vld [vmem:[#allocation3 + $0xc8] sm:$0xff] }
 0xbb0   : > { %v3664_v20 = vpop.permute.xlu0 %3663  ;;  %v8769_v45 = vsel %vm9444_vm15, %v4311_v6, %v4313_v12  ;;  %v8772_v18 = vsel %vm9445_vm11, %v4313_v12, %v4315_v53  ;;  %4844 = vmatprep.subr.mxu1 %v4571_v4  ;;  %4805 = vmatprep.subr.mxu0 %v4539_v21  ;;  %v4425_v6 = vld [vmem:[%s8891_s7 + $0x38] sm:$0x3f]  ;;  %vm9457_vm15 = vmmov %vm9452_vm2 }
 0xbb1   : > { %4845 = vmatpush1.msra.mxu1 %v4570_v55  ;;  %4806 = vmatpush2.msra.mxu0 %v4538_v11  ;;  %v4646_v12 = vld [vmem:[#allocation3 + $0x2c8] sm:$0xff]  ;;  %v4643_v55 = vld [vmem:[#allocation3 + $0x210] sm:$0xff]  ;;  %v4642_v11 = vld [vmem:[#allocation3 + $0xa0] sm:$0xff] }
 0xbb2   : > { %4846 = vmatprep.subr.mxu1 %v4569_v60  ;;  %4807 = vmatprep.subr.mxu0 %v4537_v50  ;;  %v4563_v60 = vld [vmem:[#allocation3 + $0x248] sm:$0xff]  ;;  %v4641_v50 = vld [vmem:[#allocation3 + $0x260] sm:$0xff]  ;;  %vm9458_vm11 = vmmov %vm9452_vm2 }
 0xbb3   : > { %v4020_v39 = vpop.permute.xlu1 %4019  ;;  %4847 = vmatpush1.msra.mxu1 %v4568_v13  ;;  %4808 = vmatpush2.msra.mxu0 %v4536_v54  ;;  %v4562_v13 = vld [vmem:[#allocation3 + $0x658] sm:$0xff] }
 0xbb4   : > { %v3958_v25 = vpop.permute.xlu0 %3957  ;;  %v8778_v61 = vsel %vm558_vm1, %v4020_v39, %v4022_v16  ;;  %4848 = vmatprep.subr.mxu1 %v4567_v2  ;;  %4809 = vmatprep.subr.mxu0 %v8721_v56  ;;  %v4528_v56 = vld [vmem:[#allocation3 + $0x300] sm:$0xff]  ;;  %v4561_v39 = vld [vmem:[#allocation3 + $0x348] sm:$0xff] }
 0xbb5   : > { %4849 = vmatpush1.msra.mxu1 %v4566_v27  ;;  %4810 = vmatpush2.msra.mxu0 %v8713_v10  ;;  %v4527_v10 = vld [vmem:[#allocation3 + $0x2d8] sm:$0xff] }
 0xbb6   : > { %4811 = vmatprep.subr.mxu0 %v4533_v51  ;;  %4894 = vmatprep.mubr.f32.mxu1 %v4423_v24  ;;  %v4638_v27 = vld [vmem:[#allocation3 + $0x618] sm:$0xff]  ;;  %v4559_v51 = vld [vmem:[#allocation3 + $0x628] sm:$0xff] }
 0xbb7   : > { %v3662_v37 = vpop.permute.xlu1 %3661  ;;  %4812 = vmatpush2.msra.mxu0 %v4532_v63  ;;  %v4637_v63 = vld [vmem:[#allocation3 + $0x6c8] sm:$0xff] }
 0xbb8   : > { %v4018_v59 = vpop.permute.xlu0 %4017  ;;  %v3670_v32 = vsel %vm558_vm1, %v3662_v37, %v3664_v20  ;;  %4813 = vmatprep.subr.mxu0 %v4531_v57 }
 0xbb9   : > { %3682 = vst [vmem:[#allocation3 + $0x468] sm:$0xf] %v3670_v32  ;;  %4814 = vmatpush2.msra.mxu0 %v4530_v43  ;;  %v4557_v32 = vld [vmem:[#allocation3 + $0x488] sm:$0xff] }
 0xbba   : > { %4815 = vmatprep.subr.mxu0 %v4529_v58 }
 0xbbb   : > { %v3956_v17 = vpop.permute.xlu1 %3955  ;;  %4816 = vmatpush2.msra.mxu0 %v4528_v56  ;;  %v4556_v56 = vld [vmem:[#allocation3 + $0x340] sm:$0xff] }
 0xbbc   : > { %v3954_v9 = vpop.permute.xlu0 %3953  ;;  %v8784_v35 = vsel %vm9446_vm10, %v3956_v17, %v3958_v25  ;;  %4817 = vmatprep.subr.mxu0 %v4527_v10  ;;  %v4633_v10 = vld [vmem:[#allocation3 + $0x678] sm:$0xff] }
 0xbbd   : > { %v8787_v53 = vsel %vm9447_vm14, %v3954_v9, %v3956_v17  ;;  %4818 = vmatpush2.msra.mxu0 %v4526_v23  ;;  %v4632_v23 = vld [vmem:[#allocation3 + $0x368] sm:$0xff] }
 0xbbe   : > { %4819 = vmatprep.subr.mxu0 %v8735_v0 }
 0xbbf   : > { %v4016_v47 = vpop.permute.xlu1 %4015  ;;  %4820 = vmatpush2.msra.mxu0 %v8688_v15  ;;  %v4649_v15 = vld [vmem:[#allocation3 + $0x1a8] sm:$0xff] }
 0xbc0   : > { %v4291_v49 = vpop.permute.xlu0 %4290  ;;  %v4032_v16 = vsel %vm558_vm1, %v4016_v47, %v4018_v59  ;;  %4821 = vmatprep.subr.mxu0 %v4523_v44  ;;  %v4636_v59 = vld [vmem:[#allocation3 + $0x408] sm:$0xff] }
 0xbc1   : > { %v4297_v0 = vsel %vm9434_vm3, %v8589_v52, %v4291_v49  ;;  %4044 = vst [vmem:[#allocation3 + $0x468] sm:$0xf0] %v4032_v16  ;;  %4822 = vmatpush2.msra.mxu0 %v4522_v8  ;;  %v4616_v49 = vld [vmem:[#allocation3 + $0x428] sm:$0xff]  ;;  %vm4978_vm3 = vcmask 1040384  }
 0xbc2   : > { %4850 = vmatprep.subr.mxu1 %v4297_v0  ;;  %4824 = vmatmul.mubr.f32.vlgmr.msra.gmra.mxu0 %v4420_v26  ;;  %v4613_v0 = vld [vmem:[#allocation3 + $0x4d0] sm:$0xff] }
 0xbc3   : > { %v3660_v33 = vpop.permute.xlu1 %3659  ;;  %4901 = vmatprep.subr.mxu0 %v4649_v15  ;;  %5092 = vmatprep.mubr.msk.f32.mxu0 %vm4678_vm9, %v4425_v6  ;;  %v4628_v6 = vld [vmem:[#allocation3 + $0x218] sm:$0xff] }
 0xbc4   : > { %v8800_v29 = vpop.permute.xlu0 %3655  ;;  %v3669_v1 = vsel %vm558_vm1, %v3660_v33, %v3662_v37  ;;  %4902 = vmatpush1.msra.mxu0 %v4648_v62  ;;  %v4558_v37 = vld [vmem:[#allocation3 + $0x478] sm:$0xff]  ;;  %v4627_v62 = vld [vmem:[#allocation3 + $0x588] sm:$0xff] }
 0xbc5   : > { %3681 = vst [vmem:[#allocation3 + $0x4d8] sm:$0xf] %v3669_v1  ;;  %4903 = vmatprep.subr.mxu0 %v4647_v31  ;;  %v4626_v1 = vld [vmem:[#allocation3 + $0x3b0] sm:$0xff]  ;;  %v4610_v31 = vld [vmem:[#allocation3 + $0x68] sm:$0xff] }
 0xbc6   : > { %4904 = vmatpush1.msra.mxu0 %v4646_v12 }
 0xbc7   : > { %v4287_v4 = vpop.permute.xlu1 %4286  ;;  %4905 = vmatprep.subr.mxu0 %v8676_v46  ;;  %v4640_v46 = vld [vmem:[#allocation3 + $0x3f0] sm:$0xff] }
 0xbc8   : > { %v8804_v21 = vpop.permute.xlu0 %3949  ;;  %v4296_v20 = vsel %vm9448_vm4, %v4287_v4, %v8589_v52  ;;  %4906 = vmatpush1.msra.mxu0 %v8665_v34  ;;  %v4639_v52 = vld [vmem:[#allocation3 + $0xb0] sm:$0xff]  ;;  %v4560_v34 = vld [vmem:[#allocation3 + $0x1e8] sm:$0xff]  ;;  %vm4979_vm4 = vcmask 1044484  }
 0xbc9   : > { %4907 = vmatprep.subr.mxu0 %v4643_v55  ;;  %4851 = vmatpush1.msra.mxu1 %v4296_v20  ;;  %v4623_v20 = vld [vmem:[#allocation3 + $0x6a0] sm:$0xff] }
 0xbca   : > { %4908 = vmatpush1.msra.mxu0 %v4642_v11  ;;  %4852 = vmatprep.subr.mxu1 %v4563_v60  ;;  %v4608_v55 = vld [vmem:[#allocation3 + $0x4e0] sm:$0xff]  ;;  %v4622_v11 = vld [vmem:[#allocation3 + $0x330] sm:$0xff]  ;;  %v4607_v60 = vld [vmem:[#allocation3 + $0x148] sm:$0xff] }
 0xbcb   : > { %v4014_v54 = vpop.permute.xlu1 %4013  ;;  %4909 = vmatprep.subr.mxu0 %v4641_v50  ;;  %4853 = vmatpush1.msra.mxu1 %v4562_v13  ;;  %v4621_v50 = vld [vmem:[#allocation3 + $0x3a0] sm:$0xff]  ;;  %v4606_v13 = vld [vmem:[#allocation3 + $0x410] sm:$0xff] }
 0xbcc   : > { %v4363_v2 = vpop.permute.xlu0 %4362  ;;  %v4031_v24 = vsel %vm558_vm1, %v4014_v54, %v4016_v47  ;;  %4910 = vmatpush1.msra.mxu0 %v4640_v46  ;;  %4854 = vmatprep.subr.mxu1 %v4561_v39  ;;  %v4617_v47 = vld [vmem:[#allocation3 + $0x130] sm:$0xff]  ;;  %v4620_v54 = vld [vmem:[#allocation3 + $0x6f8] sm:$0xff] }
 0xbcd   : > { %v4369_v25 = vsel %vm9449_vm12, %v8596_v14, %v4363_v2  ;;  %4043 = vst [vmem:[#allocation3 + $0x4d8] sm:$0xf0] %v4031_v24  ;;  %4911 = vmatprep.subr.mxu0 %v4639_v52  ;;  %4855 = vmatpush1.msra.mxu1 %v4560_v34  ;;  %v4618_v2 = vld [vmem:[#allocation3 + $0x398] sm:$0xff]  ;;  %v4603_v24 = vld [vmem:[#allocation3 + $0x128] sm:$0xff]  ;;  %vm4980_vm12 = vmor %vm4978_vm3, %vm4979_vm4 }
 0xbce   : > { %4912 = vmatpush1.msra.mxu0 %v4638_v27  ;;  %4856 = vmatprep.subr.mxu1 %v4559_v51  ;;  %v4671_v52 = vld [vmem:[#allocation3 + $0x458] sm:$0xf]  ;;  %v4602_v34 = vld [vmem:[#allocation3 + $0x5a8] sm:$0xff]  ;;  %v4601_v51 = vld [vmem:[#allocation3 + $0x480] sm:$0xff] }
 0xbcf   : > { %v3658_v57 = vpop.permute.xlu1 %3657  ;;  %4913 = vmatprep.subr.mxu0 %v4637_v63  ;;  %4857 = vmatpush1.msra.mxu1 %v4558_v37  ;;  %v4670_v27 = vld [vmem:[#allocation3 + $0x728] sm:$0xf] }
 0xbd0   : > { %v4359_v43 = vpop.permute.xlu0 %4358  ;;  %v8814_v58 = vsel %vm558_vm1, %v8800_v29, %v3658_v57  ;;  %4914 = vmatpush1.msra.mxu0 %v4636_v59  ;;  %4858 = vmatprep.subr.mxu1 %v4557_v32  ;;  %v4668_v59 = vld [vmem:[#allocation3 + $0x290] sm:$0xff] }
 0xbd1   : > { %v4368_v17 = vsel %vm9450_vm13, %v4359_v43, %v8596_v14  ;;  %4915 = vmatprep.subr.mxu0 %v4369_v25  ;;  %4859 = vmatpush1.msra.mxu1 %v4556_v56  ;;  %v4631_v14 = vld [vmem:[#allocation3 + $0xe8] sm:$0xff]  ;;  %v4667_v32 = vld [vmem:[#allocation3 + $0x2b0] sm:$0xff]  ;;  %v4666_v56 = vld [vmem:[#allocation3 + $0x640] sm:$0xff] }
 0xbd2   : > { %4916 = vmatpush1.msra.mxu0 %v4368_v17  ;;  %4860 = vmatprep.subr.mxu1 %v8717_v5  ;;  %v4630_v5 = vld [vmem:[#allocation3 + $0x3e0] sm:$0xff] }
 0xbd3   : > { %v3952_v9 = vpop.permute.xlu1 %3951  ;;  %4917 = vmatprep.subr.mxu0 %v4633_v10  ;;  %4861 = vmatpush1.msra.mxu1 %v8608_v41  ;;  %v4629_v41 = vld [vmem:[#allocation3 + $0xd0] sm:$0xff] }
 0xbd4   : > { %v3654_v44 = vpop.permute.xlu0 %3653  ;;  %v8822_v26 = vsel %vm9451_vm8, %v8804_v21, %v3952_v9  ;;  %4918 = vmatpush1.msra.mxu0 %v4632_v23  ;;  %4862 = vmatprep.subr.mxu1 %v4617_v47 }
 0xbd5   : > { %v8826_v16 = vsel %vm558_vm1, %v3654_v44, %v8800_v29  ;;  %4919 = vmatprep.subr.mxu0 %v4631_v14  ;;  %4863 = vmatpush2.msra.mxu1 %v4616_v49  ;;  %v4612_v29 = vld [vmem:[#allocation3 + $0x198] sm:$0xff]  ;;  %v4654_v44 = vld [vmem:[#allocation3 + $0x730] sm:$0xff] }
 0xbd6   : > { %4920 = vmatpush1.msra.mxu0 %v4630_v5  ;;  %4864 = vmatprep.subr.mxu1 %v8694_v19  ;;  %v4611_v19 = vld [vmem:[#allocation3 + $0x558] sm:$0xff]  ;;  %v4422_v49 = vld [vmem:[%s8891_s7 + $0x20] sm:$0x3f]  ;;  %v4652_v5 = vld [vmem:[#allocation3 + $0x88] sm:$0xff] }
 0xbd7   : > { %v3948_v8 = vpop.permute.xlu1 %3947  ;;  %4921 = vmatprep.subr.mxu0 %v4629_v41  ;;  %4865 = vmatpush2.msra.mxu1 %v8684_v3  ;;  %v4609_v3 = vld [vmem:[#allocation3 + $0x1d0] sm:$0xff] }
 0xbd8   : > { %v3590_v15 = vpop.permute.xlu0 %3589  ;;  %v8832_v33 = vsel %vm9452_vm2, %v3948_v8, %v8804_v21  ;;  %4922 = vmatpush1.msra.mxu0 %v4628_v6  ;;  %4866 = vmatprep.subr.mxu1 %v4613_v0  ;;  %v4651_v41 = vld [vmem:[#allocation3 + $0x6f0] sm:$0xff]  ;;  %v4424_v8 = vld [vmem:[%s8891_s7 + $0x30] sm:$0x3f]  ;;  %v4650_v6 = vld [vmem:[#allocation3 + $0x298] sm:$0xff] }
 0xbd9   : > { %4923 = vmatprep.subr.mxu0 %v4627_v62  ;;  %4867 = vmatpush2.msra.mxu1 %v4612_v29 }
 0xbda   : > { %4924 = vmatpush1.msra.mxu0 %v4626_v1  ;;  %4868 = vmatprep.subr.mxu1 %v4611_v19 }
 0xbdb   : > { %v3592_v12 = vpop.permute.xlu1 %3591  ;;  %4925 = vmatprep.subr.mxu0 %v8618_v30  ;;  %4869 = vmatpush2.msra.mxu1 %v4610_v31 }
 0xbdc   : > { %v3650_v4 = vpop.permute.xlu0 %3649  ;;  %v3598_v21 = vsel %vm9453_vm6, %v3590_v15, %v3592_v12  ;;  %4926 = vmatpush1.msra.mxu0 %v8726_v36  ;;  %4870 = vmatprep.subr.mxu1 %v4609_v3  ;;  %v4619_v36 = vld [vmem:[#allocation3 + $0x4a8] sm:$0xff] }
 0xbdd   : > { %3610 = vst [vmem:[#allocation3 + $0x230] sm:$0xf] %v3598_v21  ;;  %4927 = vmatprep.subr.mxu0 %v4623_v20  ;;  %4871 = vmatpush2.msra.mxu1 %v4608_v55 }
 0xbde   : > { %4928 = vmatpush1.msra.mxu0 %v4622_v11  ;;  %4872 = vmatprep.subr.mxu1 %v4607_v60 }
 0xbdf   : > { %v3652_v30 = vpop.permute.xlu1 %3651  ;;  %4929 = vmatprep.subr.mxu0 %v4621_v50  ;;  %4873 = vmatpush2.msra.mxu1 %v4606_v13 }
 0xbe0   : > { %v3944_v46 = vpop.permute.xlu0 %3943  ;;  %v8838_v39 = vsel %vm558_vm1, %v3650_v4, %v3652_v30  ;;  %4930 = vmatpush1.msra.mxu0 %v4620_v54  ;;  %4874 = vmatprep.subr.mxu1 %v8739_v42  ;;  %v4669_v42 = vld [vmem:[#allocation3 + $0x570] sm:$0xff] }
 0xbe1   : > { %4931 = vmatprep.subr.mxu0 %v4619_v36  ;;  %4875 = vmatpush2.msra.mxu1 %v8730_v40  ;;  %v4600_v40 = vld [vmem:[#allocation3 + $0x350] sm:$0xff] }
 0xbe2   : > { %4932 = vmatpush1.msra.mxu0 %v4618_v2  ;;  %4876 = vmatprep.subr.mxu1 %v4603_v24 }
 0xbe3   : > { %v3946_v25 = vpop.permute.xlu1 %3945  ;;  %5090 = vmatprep.subr.msk.mxu0 %vm9454_vm7, %v4671_v52  ;;  %4877 = vmatpush2.msra.mxu1 %v4602_v34 }
 0xbe4   : > { %v3588_v63 = vpop.permute.xlu0 %3587  ;;  %v3960_v37 = vsel %vm9455_vm5, %v3944_v46, %v3946_v25  ;;  %5091 = vmatpush2.msk.msra.mxu0 %vm9456_vm0, %v4670_v27  ;;  %4878 = vmatprep.subr.mxu1 %v4601_v51 }
 0xbe5   : > { %v3597_v57 = vsel %vm9457_vm15, %v3588_v63, %v3590_v15  ;;  %3972 = vst [vmem:[#allocation3 + $0x230] sm:$0xf0] %v3960_v37  ;;  %4945 = vmatprep.subr.mxu0 %v4669_v42  ;;  %4879 = vmatpush2.msra.mxu1 %v4600_v40 }
 0xbe6   : > { %3609 = vst [vmem:[#allocation3 + $0x4b8] sm:$0xf] %v3597_v57  ;;  %4946 = vmatpush2.msra.mxu0 %v4668_v59  ;;  %4880 = vmatprep.subr.mxu1 %v8756_v28 }
 0xbe7   : > { %v3648_v43 = vpop.permute.xlu1 %3647  ;;  %4947 = vmatprep.subr.mxu0 %v4667_v32  ;;  %4881 = vmatpush2.msra.mxu1 %v8753_v22 }
 0xbe8   : > { %v3942_v17 = vpop.permute.xlu0 %3941  ;;  %v3665_v10 = vsel %vm558_vm1, %v3648_v43, %v3650_v4  ;;  %4948 = vmatpush2.msra.mxu0 %v4666_v56  ;;  %4882 = vmatprep.subr.mxu1 %v8772_v18  ;;  %v4661_v18 = vld [vmem:[#allocation3 + $0x468] sm:$0xff]  ;;  %vm9459_vm1 = vmmov %vm9452_vm2 }
 0xbe9   : > { %v3959_v9 = vsel %vm9458_vm11, %v3942_v17, %v3944_v46  ;;  %4949 = vmatprep.subr.mxu0 %v8748_v48  ;;  %4883 = vmatpush2.msra.mxu1 %v8769_v45  ;;  %vm9460_vm10 = vmmov %vm9459_vm1 }
 0xbea   : > { %3971 = vst [vmem:[#allocation3 + $0x4b8] sm:$0xf0] %v3959_v9  ;;  %4950 = vmatpush2.msra.mxu0 %v8759_v7  ;;  %4884 = vmatprep.subr.mxu1 %v8784_v35  ;;  %v4660_v7 = vld [vmem:[#allocation3 + $0x4d8] sm:$0xff]  ;;  %vm9461_vm14 = vmmov %vm9459_vm1 }
 0xbeb   : > { %v3584_v28 = vpop.permute.xlu1 %3583  ;;  %4951 = vmatprep.subr.mxu0 %v8764_v38  ;;  %4885 = vmatpush2.msra.mxu1 %v8787_v53  ;;  %v4655_v53 = vld [vmem:[#allocation3 + $0x58] sm:$0xff]  ;;  %vm9462_vm9 = vmmov %vm9459_vm1 }
 0xbec   : > { %v3586_v22 = vpop.permute.xlu0 %3585  ;;  %4952 = vmatpush2.msra.mxu0 %v8778_v61  ;;  %4886 = vmatprep.subr.mxu1 %v8822_v26  ;;  %v4591_v23 = vld [vmem:[#allocation3 + $0x230] sm:$0xff] }
 0xbed   : > { %v3596_v48 = vsel %vm9459_vm1, %v3584_v28, %v3586_v22  ;;  %4953 = vmatprep.subr.mxu0 %v4661_v18  ;;  %4887 = vmatpush2.msra.mxu1 %v8832_v33 }
 0xbee   : > { %4954 = vmatpush2.msra.mxu0 %v4660_v7  ;;  %4888 = vmatprep.subr.mxu1 %v4591_v23 }
 0xbef   : > { %v3582_v45 = vpop.permute.xlu1 %3581  ;;  %4955 = vmatprep.subr.mxu0 %v8814_v58  ;;  %v4653_v58 = vld [vmem:[#allocation3 + $0x740] sm:$0xff] }
 0xbf0   : > { %v3578_v38 = vpop.permute.xlu0 %3577  ;;  %v3595_v35 = vsel %vm9460_vm10, %v3582_v45, %v3584_v28  ;;  %4956 = vmatpush2.msra.mxu0 %v8826_v16 }
 0xbf1   : > { %v4590_v61 = vld [vmem:[#allocation3 + $0x4b8] sm:$0xff]  ;;  %4957 = vmatprep.subr.mxu0 %v8838_v39 }
 0xbf2   : > { %4889 = vmatpush2.msra.mxu1 %v4590_v61  ;;  %4958 = vmatpush2.msra.mxu0 %v3665_v10 }
 0xbf3   : > { %v3580_v47 = vpop.permute.xlu1 %3579  ;;  %4890 = vmatprep.subr.mxu1 %v3596_v48  ;;  %4959 = vmatprep.subr.mxu0 %v4655_v53 }
 0xbf4   : > { %v3576_v26 = vpop.permute.xlu0 %3575  ;;  %v3594_v14 = vsel %vm9461_vm14, %v3578_v38, %v3580_v47  ;;  %4891 = vmatpush2.msra.mxu1 %v3595_v35  ;;  %4960 = vmatpush2.msra.mxu0 %v4654_v44 }
 0xbf5   : > { %v3593_v16 = vsel %vm9462_vm9, %v3576_v26, %v3578_v38  ;;  %4961 = vmatprep.subr.mxu0 %v4653_v58  ;;  %4892 = vmatprep.subr.mxu1 %v3594_v14 }
 0xbf6   : > { %4962 = vmatpush2.msra.mxu0 %v4652_v5  ;;  %4893 = vmatpush2.msra.mxu1 %v3593_v16 }
 0xbf7   : > { %4963 = vmatprep.subr.mxu0 %v4651_v41  ;;  %4895 = vmatmul.mubr.f32.vlgmr.msra.gmra.mxu1 %v4422_v49 }
 0xbf8   : > { %4964 = vmatpush2.msra.mxu0 %v4650_v6 }
 0xbf9   : > { %4966 = vmatmul.mubr.f32.vlgmr.msra.gmra.mxu0 %v4424_v8 }
 0xc00   : > { %v4676_v33 = vpop.permute.xlu1 %4675 }
 0xc61   : > { %v4754_v0 = vpop.f32.mrf.mxu1 }
 0xc62   : > { %v4755_v29 = vadd.f32 %v4754_v0, %v4676_v33 }
 0xc63   : > { %v4756_v62 = vpop.f32.mrf.mxu1 }
 0xc64   : > { %v4757_v19 = vadd.f32 %v4756_v62, %v4676_v33 }
 0xc82   : > { %v4825_v15 = vpop.f32.mrf.mxu0 }
 0xc83   : > { %v4826_v31 = vadd.f32 %v4825_v15, %v4755_v29 }
 0xc84   : > { %v4827_v1 = vpop.f32.mrf.mxu0 }
 0xc85   : > { %v4828_v3 = vadd.f32 %v4827_v1, %v4757_v19 }
 0xcb7   : > { %v4896_v12 = vpop.f32.mrf.mxu1 }
 0xcb8   : > { %v4897_v4 = vadd.f32 %v4896_v12, %v4826_v31 }
 0xcb9   : > { %v4967_v21 = vpop.f32.mrf.mxu0  ;;  %v4898_v20 = vpop.f32.mrf.mxu1 }
 0xcba   : > { %v4899_v55 = vadd.f32 %v4898_v20, %v4828_v3  ;;  %v4968_v60 = vadd.f32 %v4967_v21, %v4897_v4 }
 0xcbb   : > { %v4969_v11 = vpop.f32.mrf.mxu0 }
 0xcbc   : > { %v4970_v50 = vadd.f32 %v4969_v11, %v4899_v55 }
 0xcbe   : > { %v4974_v13 = vcombine.low %v4968_v60, %v4970_v50  ;;  %v4977_v30 = vcombine.high %v4968_v60, %v4970_v50 }
 0xcc0   : > { %4976 = vst [vmem:[%s367_s11] sm:$0x77] %v4974_v13  ;;  %v5093_v54 = vrot.slane %v4974_v13, 11  ;;  %v4983_v46 = vrot.slane %v4977_v30, 7 }
 0xcc2   : > { %v4984_v39 = vsel %vm4980_vm12, %v5093_v54, %v4983_v46 }
 0xcc3   : > { %4986 = vst [vmem:[%s372_s12] sm:$0x77] %v4984_v39 }
 0xcc4 PF: > { %s21_s13 = sadd.s32 1, %s5166_s13  }
 0xcc5   : > { %p18_p4 = scmp.ge.s32.totalorder %s21_s13, 4  }
 0xcc7   :  { %20 = sbr.rel (!%p18_p4) target bundleno = 1 (0x1), region = 98 }

</bundles_post_ra>
